<compile_context>
chip_gen: v5e
topology: v5e:2x2
jax: 0.10.0
libtpu: 0.0.40
codegen_flags: <defaults>
</compile_context>

<pallas_src>
import jax
import jax.numpy as jnp
from jax import lax
from jax.experimental import pallas as pl
from jax.experimental.pallas import tpu as pltpu


# ---------------------------------------------------------------------------
# K1: fused down_l (1x1x1 conv) + Point_Reinforcement, one grid step per batch.
#     x slab is (Cl, S) with S = D*H*W on the lane axis -> lane-dense output.
# ---------------------------------------------------------------------------
def _down_l_pr_kernel(x_ref, wdl_ref, wa_ref, wc_ref, o_ref):
    x = x_ref[0]                                                         # (Cl, S)
    low = jnp.dot(wdl_ref[...], x, preferred_element_type=jnp.float32)   # (Co, S)
    # sigmoid(conv_atten(avg_pool3d(low))): the global mean commutes with the
    # 1x1x1 conv, so apply Wa first and reduce over lanes (exact in real math).
    atten = jax.nn.sigmoid(
        jnp.mean(jnp.dot(wa_ref[...], low, preferred_element_type=jnp.float32),
                 axis=1, keepdims=True))                                 # (Co, 1)
    # x + x*atten, then the final 1x1x1 conv.
    o_ref[0] = jnp.dot(wc_ref[...], low * (1.0 + atten),
                       preferred_element_type=jnp.float32)               # (Co, S)


def down_l_point_reinforcement(x_f, wdl, wa, wc):
    # TODO(synk): the whole per-batch voxel slab lives in VMEM; production-sized
    # volumes need an S-tiled two-pass (pool, then gate) pipeline.
    N, Cl, S = x_f.shape
    Co = wdl.shape[0]
    return pl.pallas_call(
        _down_l_pr_kernel,
        out_shape=jax.ShapeDtypeStruct((N, Co, S), jnp.float32),
        grid=(N,),
        in_specs=[
            pl.BlockSpec((1, Cl, S), lambda n: (n, 0, 0)),
            pl.BlockSpec((Co, Cl), lambda n: (0, 0)),
            pl.BlockSpec((Co, Co), lambda n: (0, 0)),
            pl.BlockSpec((Co, Co), lambda n: (0, 0)),
        ],
        out_specs=pl.BlockSpec((1, Co, S), lambda n: (n, 0, 0)),
        compiler_params=pltpu.CompilerParams(dimension_semantics=("parallel",)),
    )(x_f, wdl, wa, wc)


# ---------------------------------------------------------------------------
# K2: fused down_h (1x1x1 conv) + trilinear upsample (align_corners=True).
#     The separable interpolation is one Kronecker matrix uT = (M_D x M_H x M_W)^T,
#     so the whole stage is two lane-dense matmuls per batch.
# ---------------------------------------------------------------------------
def _down_h_up_kernel(y_ref, wdh_ref, uT_ref, o_ref):
    hfe = jnp.dot(wdh_ref[...], y_ref[0], preferred_element_type=jnp.float32)  # (Co, V)
    o_ref[0] = jnp.dot(hfe, uT_ref[...], preferred_element_type=jnp.float32)   # (Co, S)


def down_h_upsample(y_f, wdh, u_t):
    # TODO(synk): the dense Kronecker matrix scales as O(S*V); for large volumes
    # switch back to per-axis tiled interpolation matmuls.
    N, Ch, V = y_f.shape
    Co = wdh.shape[0]
    S = u_t.shape[1]
    return pl.pallas_call(
        _down_h_up_kernel,
        out_shape=jax.ShapeDtypeStruct((N, Co, S), jnp.float32),
        grid=(N,),
        in_specs=[
            pl.BlockSpec((1, Ch, V), lambda n: (n, 0, 0)),
            pl.BlockSpec((Co, Ch), lambda n: (0, 0)),
            pl.BlockSpec((V, S), lambda n: (0, 0)),
        ],
        out_specs=pl.BlockSpec((1, Co, S), lambda n: (n, 0, 0)),
        compiler_params=pltpu.CompilerParams(dimension_semantics=("parallel",)),
    )(y_f, wdh, u_t)


# ---------------------------------------------------------------------------
# Host-side (trace-time) constant / weight preprocessing.
# ---------------------------------------------------------------------------
def _interp_matrix(out_size, in_size):
    # 1-D linear interpolation matrix, align_corners=True (rows: out, cols: in).
    if in_size == 1:
        return jnp.ones((out_size, 1), jnp.float32)
    if out_size == 1:
        src = jnp.zeros((1,), jnp.float32)
    else:
        src = jnp.arange(out_size, dtype=jnp.float32) * ((in_size - 1) / (out_size - 1))
    i0 = jnp.clip(jnp.floor(src), 0.0, in_size - 1.0)
    i1 = jnp.minimum(i0 + 1.0, in_size - 1.0)
    t = src - i0
    cols = jnp.arange(in_size, dtype=jnp.float32)[None, :]
    return ((cols == i0[:, None]).astype(jnp.float32) * (1.0 - t)[:, None]
            + (cols == i1[:, None]).astype(jnp.float32) * t[:, None])


def _hw_shift_matrices(H, W):
    # T_all[:, t*HW:(t+1)*HW] maps in-plane index i -> shifted index for the
    # 3x3 tap t = (oh, ow); columns falling outside the plane are all-zero
    # (implements the conv's zero padding in H/W).
    HW = H * W
    hh = jnp.arange(HW) // W
    ww = jnp.arange(HW) % W
    rows = jnp.arange(HW)[:, None]
    blocks = []
    for oh in (-1, 0, 1):
        for ow in (-1, 0, 1):
            hs, ws = hh + oh, ww + ow
            valid = (hs >= 0) & (hs < H) & (ws >= 0) & (ws < W)
            src = jnp.clip(hs, 0, H - 1) * W + jnp.clip(ws, 0, W - 1)
            blocks.append(((rows == src[None, :]) & valid[None, :]).astype(jnp.float32))
    return jnp.concatenate(blocks, axis=1)                               # (HW, 9*HW)


def _flow_conv_matrices(wf, Co, D):
    # Per-output-depth-slice weight matrices that fold the kd (depth) taps:
    #   C[d_out, t=(kh,kw), o, c*D + d_in] = wf[o, c, d_in - d_out + 1, kh, kw]
    # and 0 when |d_in - d_out| > 1 (which also implements depth zero padding).
    do = jnp.arange(D)
    di = jnp.arange(D)
    kd = di[None, :] - do[:, None] + 1                                   # (Dout, Din)
    valid = (kd >= 0) & (kd <= 2)
    w_g = wf[:, :, jnp.clip(kd, 0, 2), :, :]                             # (3, 2Co, Dout, Din, 3, 3)
    w_g = jnp.where(valid[None, None, :, :, None, None], w_g, 0.0)
    w_g = jnp.transpose(w_g, (2, 4, 5, 0, 1, 3))                         # (Dout, kh, kw, o, c, Din)
    c_all = w_g.reshape(D, 9, 3, wf.shape[1] * D)
    return c_all[..., :Co * D], c_all[..., Co * D:]                      # hfe part, low part


# ---------------------------------------------------------------------------
# K3: fused flow_make (3x3x3 conv) + flow_warp (grid_sample on the original y).
#     Grid = (batch, output depth slice); flow / vgrid never touch HBM.
# ---------------------------------------------------------------------------
def flow_make_and_warp(xh, xl, y_f, t_all, c_h, c_l, dims):
    D, H, W, Dy, Hy, Wy = dims
    N, CoD, HW = xh.shape
    Ch, V = y_f.shape[1], y_f.shape[2]

    def kernel(xh_ref, xl_ref, y_ref, t_ref, ch_ref, cl_ref, o_ref):
        xh_b = xh_ref[0]                                                 # (Co*D, HW)
        xl_b = xl_ref[0]

        # ---- flow_make: 3x3x3 conv (padding=1) for this output depth slice ----
        flow_d = jnp.zeros((3, HW), jnp.float32)
        for t in range(9):
            t_hw = t_ref[:, t * HW:(t + 1) * HW]                         # (HW, HW) shift matrix
            yh_t = jnp.dot(xh_b, t_hw, preferred_element_type=jnp.float32)
            yl_t = jnp.dot(xl_b, t_hw, preferred_element_type=jnp.float32)
            flow_d = flow_d + jnp.dot(ch_ref[0, t], yh_t,
                                      preferred_element_type=jnp.float32)
            flow_d = flow_d + jnp.dot(cl_ref[0, t], yl_t,
                                      preferred_element_type=jnp.float32)

        # Split the 3 flow components with one-hot selector matmuls (cheap and
        # avoids relying on sub-tile row slicing support).
        comp = lax.broadcasted_iota(jnp.int32, (1, 3), 1)
        fx = jnp.dot(jnp.where(comp == 0, 1.0, 0.0), flow_d,
                     preferred_element_type=jnp.float32)                 # (1, HW)
        fy = jnp.dot(jnp.where(comp == 1, 1.0, 0.0), flow_d,
                     preferred_element_type=jnp.float32)
        fz = jnp.dot(jnp.where(comp == 2, 1.0, 0.0), flow_d,
                     preferred_element_type=jnp.float32)

        # ---- flow_warp: vgrid + trilinear grid_sample (zeros padding,
        #      align_corners=False).  Normalization is exactly the PyTorch
        #      reference: vgrid = (pixel_grid + flow) / (W, H, D). ----
        d_f = pl.program_id(1).astype(jnp.float32)
        hw_pos = lax.broadcasted_iota(jnp.int32, (1, HW), 1).astype(jnp.float32)
        h_i = jnp.floor((hw_pos + 0.5) * (1.0 / W))
        w_i = hw_pos - h_i * W
        gx = (w_i + fx) * (1.0 / W)
        gy = (h_i + fy) * (1.0 / H)
        gz = (d_f + fz) * (1.0 / D)
        ix = (gx + 1.0) * (0.5 * Wy) - 0.5
        iy = (gy + 1.0) * (0.5 * Hy) - 0.5
        iz = (gz + 1.0) * (0.5 * Dy) - 0.5
        ix0, iy0, iz0 = jnp.floor(ix), jnp.floor(iy), jnp.floor(iz)
        tx, ty, tz = ix - ix0, iy - iy0, iz - iz0

        # One-hot trilinear gather matrix wg (V, HW): out = y_flat @ wg.
        # TODO(synk): scales as O(V*HW); for large source volumes switch to a
        # DMA / dynamic-gather based sampler.
        v_rows = lax.broadcasted_iota(jnp.int32, (V, HW), 0).astype(jnp.float32)
        wg = jnp.zeros((V, HW), jnp.float32)
        for oz in (0, 1):
            for oy in (0, 1):
                for ox in (0, 1):
                    cx, cy, cz = ix0 + ox, iy0 + oy, iz0 + oz
                    wx = tx if ox else (1.0 - tx)
                    wy = ty if oy else (1.0 - ty)
                    wz = tz if oz else (1.0 - tz)
                    valid = ((cx >= 0.0) & (cx <= Wy - 1.0) &
                             (cy >= 0.0) & (cy <= Hy - 1.0) &
                             (cz >= 0.0) & (cz <= Dy - 1.0))
                    wt = wx * wy * wz * valid.astype(jnp.float32)        # (1, HW)
                    vidx = ((jnp.clip(cz, 0.0, Dy - 1.0) * Hy
                             + jnp.clip(cy, 0.0, Hy - 1.0)) * Wy
                            + jnp.clip(cx, 0.0, Wy - 1.0))               # (1, HW)
                    wg = wg + jnp.where(v_rows == vidx, wt, 0.0)

        o_ref[0, 0] = jnp.dot(y_ref[0], wg, preferred_element_type=jnp.float32)  # (Ch, HW)

    return pl.pallas_call(
        kernel,
        out_shape=jax.ShapeDtypeStruct((N, D, Ch, HW), jnp.float32),
        grid=(N, D),
        in_specs=[
            pl.BlockSpec((1, CoD, HW), lambda n, d: (n, 0, 0)),
            pl.BlockSpec((1, CoD, HW), lambda n, d: (n, 0, 0)),
            pl.BlockSpec((1, Ch, V), lambda n, d: (n, 0, 0)),
            pl.BlockSpec((HW, 9 * HW), lambda n, d: (0, 0)),
            pl.BlockSpec((1, 9, 3, CoD), lambda n, d: (d, 0, 0, 0)),
            pl.BlockSpec((1, 9, 3, CoD), lambda n, d: (d, 0, 0, 0)),
        ],
        out_specs=pl.BlockSpec((1, 1, Ch, HW), lambda n, d: (n, d, 0, 0)),
        compiler_params=pltpu.CompilerParams(
            dimension_semantics=("parallel", "parallel")),
    )(xh, xl, y_f, t_all, c_h, c_l)


# ---------------------------------------------------------------------------
# Parameters (deterministic init; Conv3d kernels, no biases).
# ---------------------------------------------------------------------------
def init_params(key, inplane_h, inplane_l, outplane):
    ks = jax.random.split(key, 5)
    s = 0.1
    return {
        "down_h": s * jax.random.normal(ks[0], (outplane, inplane_h), jnp.float32),
        "down_l": s * jax.random.normal(ks[1], (outplane, inplane_l), jnp.float32),
        "flow_make": s * jax.random.normal(ks[2], (3, 2 * outplane, 3, 3, 3), jnp.float32),
        "att_conv_atten": s * jax.random.normal(ks[3], (inplane_l, inplane_l), jnp.float32),
        "att_conv": s * jax.random.normal(ks[4], (inplane_l, inplane_l), jnp.float32),
    }


# ---------------------------------------------------------------------------
# AlignedModule.forward
# ---------------------------------------------------------------------------
def aligned_module_forward(params, x, y):
    # x: (N, inplane_l, D, H, W)   -- low_feature
    # y: (N, inplane_h, Dy, Hy, Wy) -- h_feature (the original y is the warp source)
    N, Cl, D, H, W = x.shape
    _, Ch, Dy, Hy, Wy = y.shape
    Co = params["down_l"].shape[0]
    S, HW, V = D * H * W, H * W, Dy * Hy * Wy

    # Channels-first flattened layouts (pure reshapes, no copies / transposes).
    x_f = x.reshape(N, Cl, S).astype(jnp.float32)
    y_f = y.reshape(N, Ch, V).astype(jnp.float32)

    # K1: down_l + Point_Reinforcement (fused).
    low = down_l_point_reinforcement(
        x_f, params["down_l"], params["att_conv_atten"], params["att_conv"])    # (N, Co, S)

    # K2: down_h + trilinear upsample (align_corners=True) as one Kronecker matmul.
    u_t = jnp.kron(_interp_matrix(D, Dy),
                   jnp.kron(_interp_matrix(H, Hy), _interp_matrix(W, Wy))).T    # (V, S)
    hfe = down_h_upsample(y_f, params["down_h"], u_t)                           # (N, Co, S)

    # K3: flow_make (3x3x3 conv, padding=1) + flow_warp on the ORIGINAL y.
    t_all = _hw_shift_matrices(H, W)                                            # (HW, 9*HW)
    c_h, c_l = _flow_conv_matrices(params["flow_make"], Co, D)                  # (D, 9, 3, Co*D)
    out = flow_make_and_warp(hfe.reshape(N, Co * D, HW),
                             low.reshape(N, Co * D, HW),
                             y_f, t_all, c_h, c_l,
                             (D, H, W, Dy, Hy, Wy))                             # (N, D, Ch, HW)

    # Tiny final layout fix back to NCDHW.
    return jnp.transpose(out, (0, 2, 1, 3)).reshape(N, Ch, D, H, W)


if __name__ == "__main__":
    # NOTE: the PyTorch module feeds the outplane-channel tensor into
    # Point_Reinforcement(in_chan=inplane_l), so it only runs when
    # outplane == inplane_l; we mirror that constraint here.
    inplane_l, inplane_h, outplane = 4, 6, 4
    N, D, H, W = 2, 8, 16, 16
    Dy, Hy, Wy = 4, 8, 8

    key = jax.random.PRNGKey(0)
    kx, ky, kp = jax.random.split(key, 3)
    x = jax.random.normal(kx, (N, inplane_l, D, H, W), jnp.float32)     # low_feature (NCDHW)
    y = jax.random.normal(ky, (N, inplane_h, Dy, Hy, Wy), jnp.float32)  # h_feature (NCDHW)
    params = init_params(kp, inplane_h, inplane_l, outplane)

    fwd = jax.jit(aligned_module_forward)
    out = jax.block_until_ready(fwd(params, x, y))
    assert out.shape == (N, inplane_h, D, H, W), out.shape
    assert out.dtype == jnp.float32
    print("KERNEL_OK")
</pallas_src>

<mosaic_0001>
module attributes {stable_mosaic.version = 11 : i64} {
  func.func @_down_h_up_kernel(%arg0: i32, %arg1: memref<1x6x256xf32, #tpu.memory_space<vmem>>, %arg2: memref<4x6xf32, #tpu.memory_space<vmem>>, %arg3: memref<256x2048xf32, #tpu.memory_space<vmem>>, %arg4: memref<1x4x2048xf32, #tpu.memory_space<vmem>>) attributes {dimension_semantics = [#tpu.dimension_semantics<parallel>], iteration_bounds = array<i64: 2>, scalar_prefetch = 0 : i64, scratch_operands = 0 : i64, tpu.core_type = #tpu.core_type<tc>, window_params = [{transform_indices = @transform_0, window_bounds = array<i64: 1, 6, 256>}, {pipeline_mode = #tpu.pipeline_mode<synchronous>, transform_indices = @transform_1, window_bounds = array<i64: 4, 6>}, {pipeline_mode = #tpu.pipeline_mode<synchronous>, transform_indices = @transform_2, window_bounds = array<i64: 256, 2048>}, {transform_indices = @transform_3, window_bounds = array<i64: 1, 4, 2048>}]} {
    %c0 = arith.constant 0 : index
    %c0_0 = arith.constant 0 : index
    %0 = vector.load %arg2[%c0, %c0_0] : memref<4x6xf32, #tpu.memory_space<vmem>>, vector<4x6xf32>
    %c0_1 = arith.constant 0 : index
    %c0_2 = arith.constant 0 : index
    %c0_3 = arith.constant 0 : index
    %1 = vector.load %arg1[%c0_1, %c0_2, %c0_3] : memref<1x6x256xf32, #tpu.memory_space<vmem>>, vector<1x6x256xf32>
    %2 = vector.shape_cast %1 : vector<1x6x256xf32> to vector<6x256xf32>
    %cst = arith.constant dense<0.000000e+00> : vector<4x256xf32>
    %3 = tpu.matmul %0, %2, %cst {dimension_numbers = #tpu.dot_dimension_numbers<[1], [0], [0], [1], [0, 0, 1, 1], [], []>} : vector<4x6xf32>, vector<6x256xf32>, vector<4x256xf32> -> vector<4x256xf32>
    %c0_4 = arith.constant 0 : index
    %c0_5 = arith.constant 0 : index
    %4 = vector.load %arg3[%c0_4, %c0_5] : memref<256x2048xf32, #tpu.memory_space<vmem>>, vector<256x2048xf32>
    %cst_6 = arith.constant dense<0.000000e+00> : vector<4x2048xf32>
    %5 = tpu.matmul %3, %4, %cst_6 {dimension_numbers = #tpu.dot_dimension_numbers<[1], [0], [0], [1], [0, 0, 1, 1], [], []>} : vector<4x256xf32>, vector<256x2048xf32>, vector<4x2048xf32> -> vector<4x2048xf32>
    %c0_7 = arith.constant 0 : index
    %c0_8 = arith.constant 0 : index
    %c0_9 = arith.constant 0 : index
    %6 = vector.load %arg4[%c0_7, %c0_8, %c0_9] : memref<1x4x2048xf32, #tpu.memory_space<vmem>>, vector<1x4x2048xf32>
    %7 = vector.shape_cast %6 : vector<1x4x2048xf32> to vector<4x2048xf32>
    %8 = vector.shape_cast %5 : vector<4x2048xf32> to vector<1x4x2048xf32>
    tpu.vector_store %arg4[%c0_7, %c0_8, %c0_9], %8 {strides = array<i32>} : memref<1x4x2048xf32, #tpu.memory_space<vmem>>, vector<1x4x2048xf32>,
    return
  }
  func.func @transform_0(%arg0: i32) -> (i32, i32, i32) {
    %c0_i32 = arith.constant 0 : i32
    %c0_i32_0 = arith.constant 0 : i32
    %c0_i32_1 = arith.constant 0 : i32
    return %arg0, %c0_i32, %c0_i32_0 : i32, i32, i32
  }
  func.func @transform_1(%arg0: i32) -> (i32, i32) {
    %c0_i32 = arith.constant 0 : i32
    %c0_i32_0 = arith.constant 0 : i32
    %c0_i32_1 = arith.constant 0 : i32
    return %c0_i32, %c0_i32_0 : i32, i32
  }
  func.func @transform_2(%arg0: i32) -> (i32, i32) {
    %c0_i32 = arith.constant 0 : i32
    %c0_i32_0 = arith.constant 0 : i32
    %c0_i32_1 = arith.constant 0 : i32
    return %c0_i32, %c0_i32_0 : i32, i32
  }
  func.func @transform_3(%arg0: i32) -> (i32, i32, i32) {
    %c0_i32 = arith.constant 0 : i32
    %c0_i32_0 = arith.constant 0 : i32
    %c0_i32_1 = arith.constant 0 : i32
    return %arg0, %c0_i32, %c0_i32_0 : i32, i32, i32
  }
}

module attributes {stable_mosaic.version = 11 : i64} {
  func.func @_down_l_pr_kernel(%arg0: i32, %arg1: memref<1x4x2048xf32, #tpu.memory_space<vmem>>, %arg2: memref<4x4xf32, #tpu.memory_space<vmem>>, %arg3: memref<4x4xf32, #tpu.memory_space<vmem>>, %arg4: memref<4x4xf32, #tpu.memory_space<vmem>>, %arg5: memref<1x4x2048xf32, #tpu.memory_space<vmem>>) attributes {dimension_semantics = [#tpu.dimension_semantics<parallel>], iteration_bounds = array<i64: 2>, scalar_prefetch = 0 : i64, scratch_operands = 0 : i64, tpu.core_type = #tpu.core_type<tc>, window_params = [{transform_indices = @transform_0, window_bounds = array<i64: 1, 4, 2048>}, {pipeline_mode = #tpu.pipeline_mode<synchronous>, transform_indices = @transform_1, window_bounds = array<i64: 4, 4>}, {pipeline_mode = #tpu.pipeline_mode<synchronous>, transform_indices = @transform_2, window_bounds = array<i64: 4, 4>}, {pipeline_mode = #tpu.pipeline_mode<synchronous>, transform_indices = @transform_3, window_bounds = array<i64: 4, 4>}, {transform_indices = @transform_4, window_bounds = array<i64: 1, 4, 2048>}]} {
    %c0 = arith.constant 0 : index
    %c0_0 = arith.constant 0 : index
    %c0_1 = arith.constant 0 : index
    %0 = vector.load %arg1[%c0, %c0_0, %c0_1] : memref<1x4x2048xf32, #tpu.memory_space<vmem>>, vector<1x4x2048xf32>
    %1 = vector.shape_cast %0 : vector<1x4x2048xf32> to vector<4x2048xf32>
    %c0_2 = arith.constant 0 : index
    %c0_3 = arith.constant 0 : index
    %2 = vector.load %arg2[%c0_2, %c0_3] : memref<4x4xf32, #tpu.memory_space<vmem>>, vector<4x4xf32>
    %cst = arith.constant dense<0.000000e+00> : vector<4x2048xf32>
    %3 = tpu.matmul %2, %1, %cst {dimension_numbers = #tpu.dot_dimension_numbers<[1], [0], [0], [1], [0, 0, 1, 1], [], []>} : vector<4x4xf32>, vector<4x2048xf32>, vector<4x2048xf32> -> vector<4x2048xf32>
    %c0_4 = arith.constant 0 : index
    %c0_5 = arith.constant 0 : index
    %4 = vector.load %arg3[%c0_4, %c0_5] : memref<4x4xf32, #tpu.memory_space<vmem>>, vector<4x4xf32>
    %cst_6 = arith.constant dense<0.000000e+00> : vector<4x2048xf32>
    %5 = tpu.matmul %4, %3, %cst_6 {dimension_numbers = #tpu.dot_dimension_numbers<[1], [0], [0], [1], [0, 0, 1, 1], [], []>} : vector<4x4xf32>, vector<4x2048xf32>, vector<4x2048xf32> -> vector<4x2048xf32>
    %cst_7 = arith.constant dense<0.000000e+00> : vector<4xf32>
    %6 = vector.multi_reduction <add>, %5, %cst_7 [1] : vector<4x2048xf32> to vector<4xf32>
    %7 = vector.shape_cast %6 : vector<4xf32> to vector<4x1xf32>
    %cst_8 = arith.constant 2.048000e+03 : f32
    %8 = vector.broadcast %cst_8 : f32 to vector<4x1xf32>
    %9 = arith.divf %7, %8 : vector<4x1xf32>
    %10 = arith.negf %9 : vector<4x1xf32>
    %11 = math.exp %10 : vector<4x1xf32>
    %cst_9 = arith.constant 1.000000e+00 : f32
    %12 = vector.broadcast %cst_9 : f32 to vector<4x1xf32>
    %13 = arith.addf %12, %11 : vector<4x1xf32>
    %14 = arith.divf %12, %13 : vector<4x1xf32>
    %c0_10 = arith.constant 0 : index
    %c0_11 = arith.constant 0 : index
    %15 = vector.load %arg4[%c0_10, %c0_11] : memref<4x4xf32, #tpu.memory_space<vmem>>, vector<4x4xf32>
    %cst_12 = arith.constant 1.000000e+00 : f32
    %16 = vector.broadcast %cst_12 : f32 to vector<4x1xf32>
    %17 = arith.addf %16, %14 : vector<4x1xf32>
    %18 = vector.broadcast %17 : vector<4x1xf32> to vector<4x2048xf32>
    %19 = arith.mulf %3, %18 : vector<4x2048xf32>
    %cst_13 = arith.constant dense<0.000000e+00> : vector<4x2048xf32>
    %20 = tpu.matmul %15, %19, %cst_13 {dimension_numbers = #tpu.dot_dimension_numbers<[1], [0], [0], [1], [0, 0, 1, 1], [], []>} : vector<4x4xf32>, vector<4x2048xf32>, vector<4x2048xf32> -> vector<4x2048xf32>
    %c0_14 = arith.constant 0 : index
    %c0_15 = arith.constant 0 : index
    %c0_16 = arith.constant 0 : index
    %21 = vector.load %arg5[%c0_14, %c0_15, %c0_16] : memref<1x4x2048xf32, #tpu.memory_space<vmem>>, vector<1x4x2048xf32>
    %22 = vector.shape_cast %21 : vector<1x4x2048xf32> to vector<4x2048xf32>
    %23 = vector.shape_cast %20 : vector<4x2048xf32> to vector<1x4x2048xf32>
    tpu.vector_store %arg5[%c0_14, %c0_15, %c0_16], %23 {strides = array<i32>} : memref<1x4x2048xf32, #tpu.memory_space<vmem>>, vector<1x4x2048xf32>,
    return
  }
  func.func @transform_0(%arg0: i32) -> (i32, i32, i32) {
    %c0_i32 = arith.constant 0 : i32
    %c0_i32_0 = arith.constant 0 : i32
    %c0_i32_1 = arith.constant 0 : i32
    return %arg0, %c0_i32, %c0_i32_0 : i32, i32, i32
  }
  func.func @transform_1(%arg0: i32) -> (i32, i32) {
    %c0_i32 = arith.constant 0 : i32
    %c0_i32_0 = arith.constant 0 : i32
    %c0_i32_1 = arith.constant 0 : i32
    return %c0_i32, %c0_i32_0 : i32, i32
  }
  func.func @transform_2(%arg0: i32) -> (i32, i32) {
    %c0_i32 = arith.constant 0 : i32
    %c0_i32_0 = arith.constant 0 : i32
    %c0_i32_1 = arith.constant 0 : i32
    return %c0_i32, %c0_i32_0 : i32, i32
  }
  func.func @transform_3(%arg0: i32) -> (i32, i32) {
    %c0_i32 = arith.constant 0 : i32
    %c0_i32_0 = arith.constant 0 : i32
    %c0_i32_1 = arith.constant 0 : i32
    return %c0_i32, %c0_i32_0 : i32, i32
  }
  func.func @transform_4(%arg0: i32) -> (i32, i32, i32) {
    %c0_i32 = arith.constant 0 : i32
    %c0_i32_0 = arith.constant 0 : i32
    %c0_i32_1 = arith.constant 0 : i32
    return %arg0, %c0_i32, %c0_i32_0 : i32, i32, i32
  }
}

module attributes {stable_mosaic.version = 11 : i64} {
  func.func @kernel(%arg0: i32, %arg1: i32, %arg2: memref<1x32x256xf32, #tpu.memory_space<vmem>>, %arg3: memref<1x32x256xf32, #tpu.memory_space<vmem>>, %arg4: memref<1x6x256xf32, #tpu.memory_space<vmem>>, %arg5: memref<256x2304xf32, #tpu.memory_space<vmem>>, %arg6: memref<1x9x3x32xf32, #tpu.memory_space<vmem>>, %arg7: memref<1x9x3x32xf32, #tpu.memory_space<vmem>>, %arg8: memref<1x1x6x256xf32, #tpu.memory_space<vmem>>) attributes {dimension_semantics = [#tpu.dimension_semantics<parallel>, #tpu.dimension_semantics<parallel>], iteration_bounds = array<i64: 2, 8>, scalar_prefetch = 0 : i64, scratch_operands = 0 : i64, tpu.core_type = #tpu.core_type<tc>, window_params = [{transform_indices = @transform_0, window_bounds = array<i64: 1, 32, 256>}, {transform_indices = @transform_1, window_bounds = array<i64: 1, 32, 256>}, {transform_indices = @transform_2, window_bounds = array<i64: 1, 6, 256>}, {pipeline_mode = #tpu.pipeline_mode<synchronous>, transform_indices = @transform_3, window_bounds = array<i64: 256, 2304>}, {transform_indices = @transform_4, window_bounds = array<i64: 1, 9, 3, 32>}, {transform_indices = @transform_5, window_bounds = array<i64: 1, 9, 3, 32>}, {transform_indices = @transform_6, window_bounds = array<i64: 1, 1, 6, 256>}]} {
    %c0 = arith.constant 0 : index
    %c0_0 = arith.constant 0 : index
    %c0_1 = arith.constant 0 : index
    %0 = vector.load %arg2[%c0, %c0_0, %c0_1] : memref<1x32x256xf32, #tpu.memory_space<vmem>>, vector<1x32x256xf32>
    %1 = vector.shape_cast %0 : vector<1x32x256xf32> to vector<32x256xf32>
    %c0_2 = arith.constant 0 : index
    %c0_3 = arith.constant 0 : index
    %c0_4 = arith.constant 0 : index
    %2 = vector.load %arg3[%c0_2, %c0_3, %c0_4] : memref<1x32x256xf32, #tpu.memory_space<vmem>>, vector<1x32x256xf32>
    %3 = vector.shape_cast %2 : vector<1x32x256xf32> to vector<32x256xf32>
    %cst = arith.constant 0.000000e+00 : f32
    %4 = vector.broadcast %cst : f32 to vector<3x256xf32>
    %c0_5 = arith.constant 0 : index
    %c0_6 = arith.constant 0 : index
    %5 = vector.load %arg5[%c0_5, %c0_6] : memref<256x2304xf32, #tpu.memory_space<vmem>>, vector<256x256xf32>
    %cst_7 = arith.constant dense<0.000000e+00> : vector<32x256xf32>
    %6 = tpu.matmul %1, %5, %cst_7 {dimension_numbers = #tpu.dot_dimension_numbers<[1], [0], [0], [1], [0, 0, 1, 1], [], []>} : vector<32x256xf32>, vector<256x256xf32>, vector<32x256xf32> -> vector<32x256xf32>
    %cst_8 = arith.constant dense<0.000000e+00> : vector<32x256xf32>
    %7 = tpu.matmul %3, %5, %cst_8 {dimension_numbers = #tpu.dot_dimension_numbers<[1], [0], [0], [1], [0, 0, 1, 1], [], []>} : vector<32x256xf32>, vector<256x256xf32>, vector<32x256xf32> -> vector<32x256xf32>
    %c0_9 = arith.constant 0 : index
    %c0_10 = arith.constant 0 : index
    %c0_11 = arith.constant 0 : index
    %c0_12 = arith.constant 0 : index
    %8 = vector.load %arg6[%c0_9, %c0_10, %c0_11, %c0_12] : memref<1x9x3x32xf32, #tpu.memory_space<vmem>>, vector<1x1x3x32xf32>
    %9 = vector.shape_cast %8 : vector<1x1x3x32xf32> to vector<3x32xf32>
    %cst_13 = arith.constant dense<0.000000e+00> : vector<3x256xf32>
    %10 = tpu.matmul %9, %6, %cst_13 {dimension_numbers = #tpu.dot_dimension_numbers<[1], [0], [0], [1], [0, 0, 1, 1], [], []>} : vector<3x32xf32>, vector<32x256xf32>, vector<3x256xf32> -> vector<3x256xf32>
    %11 = arith.addf %4, %10 : vector<3x256xf32>
    %c0_14 = arith.constant 0 : index
    %c0_15 = arith.constant 0 : index
    %c0_16 = arith.constant 0 : index
    %c0_17 = arith.constant 0 : index
    %12 = vector.load %arg7[%c0_14, %c0_15, %c0_16, %c0_17] : memref<1x9x3x32xf32, #tpu.memory_space<vmem>>, vector<1x1x3x32xf32>
    %13 = vector.shape_cast %12 : vector<1x1x3x32xf32> to vector<3x32xf32>
    %cst_18 = arith.constant dense<0.000000e+00> : vector<3x256xf32>
    %14 = tpu.matmul %13, %7, %cst_18 {dimension_numbers = #tpu.dot_dimension_numbers<[1], [0], [0], [1], [0, 0, 1, 1], [], []>} : vector<3x32xf32>, vector<32x256xf32>, vector<3x256xf32> -> vector<3x256xf32>
    %15 = arith.addf %11, %14 : vector<3x256xf32>
    %c0_19 = arith.constant 0 : index
    %c256 = arith.constant 256 : index
    %16 = vector.load %arg5[%c0_19, %c256] : memref<256x2304xf32, #tpu.memory_space<vmem>>, vector<256x256xf32>
    %cst_20 = arith.constant dense<0.000000e+00> : vector<32x256xf32>
    %17 = tpu.matmul %1, %16, %cst_20 {dimension_numbers = #tpu.dot_dimension_numbers<[1], [0], [0], [1], [0, 0, 1, 1], [], []>} : vector<32x256xf32>, vector<256x256xf32>, vector<32x256xf32> -> vector<32x256xf32>
    %cst_21 = arith.constant dense<0.000000e+00> : vector<32x256xf32>
    %18 = tpu.matmul %3, %16, %cst_21 {dimension_numbers = #tpu.dot_dimension_numbers<[1], [0], [0], [1], [0, 0, 1, 1], [], []>} : vector<32x256xf32>, vector<256x256xf32>, vector<32x256xf32> -> vector<32x256xf32>
    %c0_22 = arith.constant 0 : index
    %c1 = arith.constant 1 : index
    %c0_23 = arith.constant 0 : index
    %c0_24 = arith.constant 0 : index
    %19 = vector.load %arg6[%c0_22, %c1, %c0_23, %c0_24] : memref<1x9x3x32xf32, #tpu.memory_space<vmem>>, vector<1x1x3x32xf32>
    %20 = vector.shape_cast %19 : vector<1x1x3x32xf32> to vector<3x32xf32>
    %cst_25 = arith.constant dense<0.000000e+00> : vector<3x256xf32>
    %21 = tpu.matmul %20, %17, %cst_25 {dimension_numbers = #tpu.dot_dimension_numbers<[1], [0], [0], [1], [0, 0, 1, 1], [], []>} : vector<3x32xf32>, vector<32x256xf32>, vector<3x256xf32> -> vector<3x256xf32>
    %22 = arith.addf %15, %21 : vector<3x256xf32>
    %c0_26 = arith.constant 0 : index
    %c1_27 = arith.constant 1 : index
    %c0_28 = arith.constant 0 : index
    %c0_29 = arith.constant 0 : index
    %23 = vector.load %arg7[%c0_26, %c1_27, %c0_28, %c0_29] : memref<1x9x3x32xf32, #tpu.memory_space<vmem>>, vector<1x1x3x32xf32>
    %24 = vector.shape_cast %23 : vector<1x1x3x32xf32> to vector<3x32xf32>
    %cst_30 = arith.constant dense<0.000000e+00> : vector<3x256xf32>
    %25 = tpu.matmul %24, %18, %cst_30 {dimension_numbers = #tpu.dot_dimension_numbers<[1], [0], [0], [1], [0, 0, 1, 1], [], []>} : vector<3x32xf32>, vector<32x256xf32>, vector<3x256xf32> -> vector<3x256xf32>
    %26 = arith.addf %22, %25 : vector<3x256xf32>
    %c0_31 = arith.constant 0 : index
    %c512 = arith.constant 512 : index
    %27 = vector.load %arg5[%c0_31, %c512] : memref<256x2304xf32, #tpu.memory_space<vmem>>, vector<256x256xf32>
    %cst_32 = arith.constant dense<0.000000e+00> : vector<32x256xf32>
    %28 = tpu.matmul %1, %27, %cst_32 {dimension_numbers = #tpu.dot_dimension_numbers<[1], [0], [0], [1], [0, 0, 1, 1], [], []>} : vector<32x256xf32>, vector<256x256xf32>, vector<32x256xf32> -> vector<32x256xf32>
    %cst_33 = arith.constant dense<0.000000e+00> : vector<32x256xf32>
    %29 = tpu.matmul %3, %27, %cst_33 {dimension_numbers = #tpu.dot_dimension_numbers<[1], [0], [0], [1], [0, 0, 1, 1], [], []>} : vector<32x256xf32>, vector<256x256xf32>, vector<32x256xf32> -> vector<32x256xf32>
    %c0_34 = arith.constant 0 : index
    %c2 = arith.constant 2 : index
    %c0_35 = arith.constant 0 : index
    %c0_36 = arith.constant 0 : index
    %30 = vector.load %arg6[%c0_34, %c2, %c0_35, %c0_36] : memref<1x9x3x32xf32, #tpu.memory_space<vmem>>, vector<1x1x3x32xf32>
    %31 = vector.shape_cast %30 : vector<1x1x3x32xf32> to vector<3x32xf32>
    %cst_37 = arith.constant dense<0.000000e+00> : vector<3x256xf32>
    %32 = tpu.matmul %31, %28, %cst_37 {dimension_numbers = #tpu.dot_dimension_numbers<[1], [0], [0], [1], [0, 0, 1, 1], [], []>} : vector<3x32xf32>, vector<32x256xf32>, vector<3x256xf32> -> vector<3x256xf32>
    %33 = arith.addf %26, %32 : vector<3x256xf32>
    %c0_38 = arith.constant 0 : index
    %c2_39 = arith.constant 2 : index
    %c0_40 = arith.constant 0 : index
    %c0_41 = arith.constant 0 : index
    %34 = vector.load %arg7[%c0_38, %c2_39, %c0_40, %c0_41] : memref<1x9x3x32xf32, #tpu.memory_space<vmem>>, vector<1x1x3x32xf32>
    %35 = vector.shape_cast %34 : vector<1x1x3x32xf32> to vector<3x32xf32>
    %cst_42 = arith.constant dense<0.000000e+00> : vector<3x256xf32>
    %36 = tpu.matmul %35, %29, %cst_42 {dimension_numbers = #tpu.dot_dimension_numbers<[1], [0], [0], [1], [0, 0, 1, 1], [], []>} : vector<3x32xf32>, vector<32x256xf32>, vector<3x256xf32> -> vector<3x256xf32>
    %37 = arith.addf %33, %36 : vector<3x256xf32>
    %c0_43 = arith.constant 0 : index
    %c768 = arith.constant 768 : index
    %38 = vector.load %arg5[%c0_43, %c768] : memref<256x2304xf32, #tpu.memory_space<vmem>>, vector<256x256xf32>
    %cst_44 = arith.constant dense<0.000000e+00> : vector<32x256xf32>
    %39 = tpu.matmul %1, %38, %cst_44 {dimension_numbers = #tpu.dot_dimension_numbers<[1], [0], [0], [1], [0, 0, 1, 1], [], []>} : vector<32x256xf32>, vector<256x256xf32>, vector<32x256xf32> -> vector<32x256xf32>
    %cst_45 = arith.constant dense<0.000000e+00> : vector<32x256xf32>
    %40 = tpu.matmul %3, %38, %cst_45 {dimension_numbers = #tpu.dot_dimension_numbers<[1], [0], [0], [1], [0, 0, 1, 1], [], []>} : vector<32x256xf32>, vector<256x256xf32>, vector<32x256xf32> -> vector<32x256xf32>
    %c0_46 = arith.constant 0 : index
    %c3 = arith.constant 3 : index
    %c0_47 = arith.constant 0 : index
    %c0_48 = arith.constant 0 : index
    %41 = vector.load %arg6[%c0_46, %c3, %c0_47, %c0_48] : memref<1x9x3x32xf32, #tpu.memory_space<vmem>>, vector<1x1x3x32xf32>
    %42 = vector.shape_cast %41 : vector<1x1x3x32xf32> to vector<3x32xf32>
    %cst_49 = arith.constant dense<0.000000e+00> : vector<3x256xf32>
    %43 = tpu.matmul %42, %39, %cst_49 {dimension_numbers = #tpu.dot_dimension_numbers<[1], [0], [0], [1], [0, 0, 1, 1], [], []>} : vector<3x32xf32>, vector<32x256xf32>, vector<3x256xf32> -> vector<3x256xf32>
    %44 = arith.addf %37, %43 : vector<3x256xf32>
    %c0_50 = arith.constant 0 : index
    %c3_51 = arith.constant 3 : index
    %c0_52 = arith.constant 0 : index
    %c0_53 = arith.constant 0 : index
    %45 = vector.load %arg7[%c0_50, %c3_51, %c0_52, %c0_53] : memref<1x9x3x32xf32, #tpu.memory_space<vmem>>, vector<1x1x3x32xf32>
    %46 = vector.shape_cast %45 : vector<1x1x3x32xf32> to vector<3x32xf32>
    %cst_54 = arith.constant dense<0.000000e+00> : vector<3x256xf32>
    %47 = tpu.matmul %46, %40, %cst_54 {dimension_numbers = #tpu.dot_dimension_numbers<[1], [0], [0], [1], [0, 0, 1, 1], [], []>} : vector<3x32xf32>, vector<32x256xf32>, vector<3x256xf32> -> vector<3x256xf32>
    %48 = arith.addf %44, %47 : vector<3x256xf32>
    %c0_55 = arith.constant 0 : index
    %c1024 = arith.constant 1024 : index
    %49 = vector.load %arg5[%c0_55, %c1024] : memref<256x2304xf32, #tpu.memory_space<vmem>>, vector<256x256xf32>
    %cst_56 = arith.constant dense<0.000000e+00> : vector<32x256xf32>
    %50 = tpu.matmul %1, %49, %cst_56 {dimension_numbers = #tpu.dot_dimension_numbers<[1], [0], [0], [1], [0, 0, 1, 1], [], []>} : vector<32x256xf32>, vector<256x256xf32>, vector<32x256xf32> -> vector<32x256xf32>
    %cst_57 = arith.constant dense<0.000000e+00> : vector<32x256xf32>
    %51 = tpu.matmul %3, %49, %cst_57 {dimension_numbers = #tpu.dot_dimension_numbers<[1], [0], [0], [1], [0, 0, 1, 1], [], []>} : vector<32x256xf32>, vector<256x256xf32>, vector<32x256xf32> -> vector<32x256xf32>
    %c0_58 = arith.constant 0 : index
    %c4 = arith.constant 4 : index
    %c0_59 = arith.constant 0 : index
    %c0_60 = arith.constant 0 : index
    %52 = vector.load %arg6[%c0_58, %c4, %c0_59, %c0_60] : memref<1x9x3x32xf32, #tpu.memory_space<vmem>>, vector<1x1x3x32xf32>
    %53 = vector.shape_cast %52 : vector<1x1x3x32xf32> to vector<3x32xf32>
    %cst_61 = arith.constant dense<0.000000e+00> : vector<3x256xf32>
    %54 = tpu.matmul %53, %50, %cst_61 {dimension_numbers = #tpu.dot_dimension_numbers<[1], [0], [0], [1], [0, 0, 1, 1], [], []>} : vector<3x32xf32>, vector<32x256xf32>, vector<3x256xf32> -> vector<3x256xf32>
    %55 = arith.addf %48, %54 : vector<3x256xf32>
    %c0_62 = arith.constant 0 : index
    %c4_63 = arith.constant 4 : index
    %c0_64 = arith.constant 0 : index
    %c0_65 = arith.constant 0 : index
    %56 = vector.load %arg7[%c0_62, %c4_63, %c0_64, %c0_65] : memref<1x9x3x32xf32, #tpu.memory_space<vmem>>, vector<1x1x3x32xf32>
    %57 = vector.shape_cast %56 : vector<1x1x3x32xf32> to vector<3x32xf32>
    %cst_66 = arith.constant dense<0.000000e+00> : vector<3x256xf32>
    %58 = tpu.matmul %57, %51, %cst_66 {dimension_numbers = #tpu.dot_dimension_numbers<[1], [0], [0], [1], [0, 0, 1, 1], [], []>} : vector<3x32xf32>, vector<32x256xf32>, vector<3x256xf32> -> vector<3x256xf32>
    %59 = arith.addf %55, %58 : vector<3x256xf32>
    %c0_67 = arith.constant 0 : index
    %c1280 = arith.constant 1280 : index
    %60 = vector.load %arg5[%c0_67, %c1280] : memref<256x2304xf32, #tpu.memory_space<vmem>>, vector<256x256xf32>
    %cst_68 = arith.constant dense<0.000000e+00> : vector<32x256xf32>
    %61 = tpu.matmul %1, %60, %cst_68 {dimension_numbers = #tpu.dot_dimension_numbers<[1], [0], [0], [1], [0, 0, 1, 1], [], []>} : vector<32x256xf32>, vector<256x256xf32>, vector<32x256xf32> -> vector<32x256xf32>
    %cst_69 = arith.constant dense<0.000000e+00> : vector<32x256xf32>
    %62 = tpu.matmul %3, %60, %cst_69 {dimension_numbers = #tpu.dot_dimension_numbers<[1], [0], [0], [1], [0, 0, 1, 1], [], []>} : vector<32x256xf32>, vector<256x256xf32>, vector<32x256xf32> -> vector<32x256xf32>
    %c0_70 = arith.constant 0 : index
    %c5 = arith.constant 5 : index
    %c0_71 = arith.constant 0 : index
    %c0_72 = arith.constant 0 : index
    %63 = vector.load %arg6[%c0_70, %c5, %c0_71, %c0_72] : memref<1x9x3x32xf32, #tpu.memory_space<vmem>>, vector<1x1x3x32xf32>
    %64 = vector.shape_cast %63 : vector<1x1x3x32xf32> to vector<3x32xf32>
    %cst_73 = arith.constant dense<0.000000e+00> : vector<3x256xf32>
    %65 = tpu.matmul %64, %61, %cst_73 {dimension_numbers = #tpu.dot_dimension_numbers<[1], [0], [0], [1], [0, 0, 1, 1], [], []>} : vector<3x32xf32>, vector<32x256xf32>, vector<3x256xf32> -> vector<3x256xf32>
    %66 = arith.addf %59, %65 : vector<3x256xf32>
    %c0_74 = arith.constant 0 : index
    %c5_75 = arith.constant 5 : index
    %c0_76 = arith.constant 0 : index
    %c0_77 = arith.constant 0 : index
    %67 = vector.load %arg7[%c0_74, %c5_75, %c0_76, %c0_77] : memref<1x9x3x32xf32, #tpu.memory_space<vmem>>, vector<1x1x3x32xf32>
    %68 = vector.shape_cast %67 : vector<1x1x3x32xf32> to vector<3x32xf32>
    %cst_78 = arith.constant dense<0.000000e+00> : vector<3x256xf32>
    %69 = tpu.matmul %68, %62, %cst_78 {dimension_numbers = #tpu.dot_dimension_numbers<[1], [0], [0], [1], [0, 0, 1, 1], [], []>} : vector<3x32xf32>, vector<32x256xf32>, vector<3x256xf32> -> vector<3x256xf32>
    %70 = arith.addf %66, %69 : vector<3x256xf32>
    %c0_79 = arith.constant 0 : index
    %c1536 = arith.constant 1536 : index
    %71 = vector.load %arg5[%c0_79, %c1536] : memref<256x2304xf32, #tpu.memory_space<vmem>>, vector<256x256xf32>
    %cst_80 = arith.constant dense<0.000000e+00> : vector<32x256xf32>
    %72 = tpu.matmul %1, %71, %cst_80 {dimension_numbers = #tpu.dot_dimension_numbers<[1], [0], [0], [1], [0, 0, 1, 1], [], []>} : vector<32x256xf32>, vector<256x256xf32>, vector<32x256xf32> -> vector<32x256xf32>
    %cst_81 = arith.constant dense<0.000000e+00> : vector<32x256xf32>
    %73 = tpu.matmul %3, %71, %cst_81 {dimension_numbers = #tpu.dot_dimension_numbers<[1], [0], [0], [1], [0, 0, 1, 1], [], []>} : vector<32x256xf32>, vector<256x256xf32>, vector<32x256xf32> -> vector<32x256xf32>
    %c0_82 = arith.constant 0 : index
    %c6 = arith.constant 6 : index
    %c0_83 = arith.constant 0 : index
    %c0_84 = arith.constant 0 : index
    %74 = vector.load %arg6[%c0_82, %c6, %c0_83, %c0_84] : memref<1x9x3x32xf32, #tpu.memory_space<vmem>>, vector<1x1x3x32xf32>
    %75 = vector.shape_cast %74 : vector<1x1x3x32xf32> to vector<3x32xf32>
    %cst_85 = arith.constant dense<0.000000e+00> : vector<3x256xf32>
    %76 = tpu.matmul %75, %72, %cst_85 {dimension_numbers = #tpu.dot_dimension_numbers<[1], [0], [0], [1], [0, 0, 1, 1], [], []>} : vector<3x32xf32>, vector<32x256xf32>, vector<3x256xf32> -> vector<3x256xf32>
    %77 = arith.addf %70, %76 : vector<3x256xf32>
    %c0_86 = arith.constant 0 : index
    %c6_87 = arith.constant 6 : index
    %c0_88 = arith.constant 0 : index
    %c0_89 = arith.constant 0 : index
    %78 = vector.load %arg7[%c0_86, %c6_87, %c0_88, %c0_89] : memref<1x9x3x32xf32, #tpu.memory_space<vmem>>, vector<1x1x3x32xf32>
    %79 = vector.shape_cast %78 : vector<1x1x3x32xf32> to vector<3x32xf32>
    %cst_90 = arith.constant dense<0.000000e+00> : vector<3x256xf32>
    %80 = tpu.matmul %79, %73, %cst_90 {dimension_numbers = #tpu.dot_dimension_numbers<[1], [0], [0], [1], [0, 0, 1, 1], [], []>} : vector<3x32xf32>, vector<32x256xf32>, vector<3x256xf32> -> vector<3x256xf32>
    %81 = arith.addf %77, %80 : vector<3x256xf32>
    %c0_91 = arith.constant 0 : index
    %c1792 = arith.constant 1792 : index
    %82 = vector.load %arg5[%c0_91, %c1792] : memref<256x2304xf32, #tpu.memory_space<vmem>>, vector<256x256xf32>
    %cst_92 = arith.constant dense<0.000000e+00> : vector<32x256xf32>
    %83 = tpu.matmul %1, %82, %cst_92 {dimension_numbers = #tpu.dot_dimension_numbers<[1], [0], [0], [1], [0, 0, 1, 1], [], []>} : vector<32x256xf32>, vector<256x256xf32>, vector<32x256xf32> -> vector<32x256xf32>
    %cst_93 = arith.constant dense<0.000000e+00> : vector<32x256xf32>
    %84 = tpu.matmul %3, %82, %cst_93 {dimension_numbers = #tpu.dot_dimension_numbers<[1], [0], [0], [1], [0, 0, 1, 1], [], []>} : vector<32x256xf32>, vector<256x256xf32>, vector<32x256xf32> -> vector<32x256xf32>
    %c0_94 = arith.constant 0 : index
    %c7 = arith.constant 7 : index
    %c0_95 = arith.constant 0 : index
    %c0_96 = arith.constant 0 : index
    %85 = vector.load %arg6[%c0_94, %c7, %c0_95, %c0_96] : memref<1x9x3x32xf32, #tpu.memory_space<vmem>>, vector<1x1x3x32xf32>
    %86 = vector.shape_cast %85 : vector<1x1x3x32xf32> to vector<3x32xf32>
    %cst_97 = arith.constant dense<0.000000e+00> : vector<3x256xf32>
    %87 = tpu.matmul %86, %83, %cst_97 {dimension_numbers = #tpu.dot_dimension_numbers<[1], [0], [0], [1], [0, 0, 1, 1], [], []>} : vector<3x32xf32>, vector<32x256xf32>, vector<3x256xf32> -> vector<3x256xf32>
    %88 = arith.addf %81, %87 : vector<3x256xf32>
    %c0_98 = arith.constant 0 : index
    %c7_99 = arith.constant 7 : index
    %c0_100 = arith.constant 0 : index
    %c0_101 = arith.constant 0 : index
    %89 = vector.load %arg7[%c0_98, %c7_99, %c0_100, %c0_101] : memref<1x9x3x32xf32, #tpu.memory_space<vmem>>, vector<1x1x3x32xf32>
    %90 = vector.shape_cast %89 : vector<1x1x3x32xf32> to vector<3x32xf32>
    %cst_102 = arith.constant dense<0.000000e+00> : vector<3x256xf32>
    %91 = tpu.matmul %90, %84, %cst_102 {dimension_numbers = #tpu.dot_dimension_numbers<[1], [0], [0], [1], [0, 0, 1, 1], [], []>} : vector<3x32xf32>, vector<32x256xf32>, vector<3x256xf32> -> vector<3x256xf32>
    %92 = arith.addf %88, %91 : vector<3x256xf32>
    %c0_103 = arith.constant 0 : index
    %c2048 = arith.constant 2048 : index
    %93 = vector.load %arg5[%c0_103, %c2048] : memref<256x2304xf32, #tpu.memory_space<vmem>>, vector<256x256xf32>
    %cst_104 = arith.constant dense<0.000000e+00> : vector<32x256xf32>
    %94 = tpu.matmul %1, %93, %cst_104 {dimension_numbers = #tpu.dot_dimension_numbers<[1], [0], [0], [1], [0, 0, 1, 1], [], []>} : vector<32x256xf32>, vector<256x256xf32>, vector<32x256xf32> -> vector<32x256xf32>
    %cst_105 = arith.constant dense<0.000000e+00> : vector<32x256xf32>
    %95 = tpu.matmul %3, %93, %cst_105 {dimension_numbers = #tpu.dot_dimension_numbers<[1], [0], [0], [1], [0, 0, 1, 1], [], []>} : vector<32x256xf32>, vector<256x256xf32>, vector<32x256xf32> -> vector<32x256xf32>
    %c0_106 = arith.constant 0 : index
    %c8 = arith.constant 8 : index
    %c0_107 = arith.constant 0 : index
    %c0_108 = arith.constant 0 : index
    %96 = vector.load %arg6[%c0_106, %c8, %c0_107, %c0_108] : memref<1x9x3x32xf32, #tpu.memory_space<vmem>>, vector<1x1x3x32xf32>
    %97 = vector.shape_cast %96 : vector<1x1x3x32xf32> to vector<3x32xf32>
    %cst_109 = arith.constant dense<0.000000e+00> : vector<3x256xf32>
    %98 = tpu.matmul %97, %94, %cst_109 {dimension_numbers = #tpu.dot_dimension_numbers<[1], [0], [0], [1], [0, 0, 1, 1], [], []>} : vector<3x32xf32>, vector<32x256xf32>, vector<3x256xf32> -> vector<3x256xf32>
    %99 = arith.addf %92, %98 : vector<3x256xf32>
    %c0_110 = arith.constant 0 : index
    %c8_111 = arith.constant 8 : index
    %c0_112 = arith.constant 0 : index
    %c0_113 = arith.constant 0 : index
    %100 = vector.load %arg7[%c0_110, %c8_111, %c0_112, %c0_113] : memref<1x9x3x32xf32, #tpu.memory_space<vmem>>, vector<1x1x3x32xf32>
    %101 = vector.shape_cast %100 : vector<1x1x3x32xf32> to vector<3x32xf32>
    %cst_114 = arith.constant dense<0.000000e+00> : vector<3x256xf32>
    %102 = tpu.matmul %101, %95, %cst_114 {dimension_numbers = #tpu.dot_dimension_numbers<[1], [0], [0], [1], [0, 0, 1, 1], [], []>} : vector<3x32xf32>, vector<32x256xf32>, vector<3x256xf32> -> vector<3x256xf32>
    %103 = arith.addf %99, %102 : vector<3x256xf32>
    %104 = tpu.iota {dimensions = array<i32: 1>} : vector<1x3xi32>
    %c0_i32 = arith.constant 0 : i32
    %105 = vector.broadcast %c0_i32 : i32 to vector<1x3xi32>
    %106 = arith.cmpi eq, %104, %105 : vector<1x3xi32>
    %cst_115 = arith.constant 1.000000e+00 : f32
    %cst_116 = arith.constant 0.000000e+00 : f32
    %107 = vector.broadcast %cst_115 : f32 to vector<1x3xf32>
    %108 = vector.broadcast %cst_116 : f32 to vector<1x3xf32>
    %109 = arith.select %106, %107, %108 : vector<1x3xi1>, vector<1x3xf32>
    %cst_117 = arith.constant dense<0.000000e+00> : vector<1x256xf32>
    %110 = tpu.matmul %109, %103, %cst_117 {dimension_numbers = #tpu.dot_dimension_numbers<[1], [0], [0], [1], [0, 0, 1, 1], [], []>} : vector<1x3xf32>, vector<3x256xf32>, vector<1x256xf32> -> vector<1x256xf32>
    %c1_i32 = arith.constant 1 : i32
    %111 = vector.broadcast %c1_i32 : i32 to vector<1x3xi32>
    %112 = arith.cmpi eq, %104, %111 : vector<1x3xi32>
    %cst_118 = arith.constant 1.000000e+00 : f32
    %cst_119 = arith.constant 0.000000e+00 : f32
    %113 = vector.broadcast %cst_118 : f32 to vector<1x3xf32>
    %114 = vector.broadcast %cst_119 : f32 to vector<1x3xf32>
    %115 = arith.select %112, %113, %114 : vector<1x3xi1>, vector<1x3xf32>
    %cst_120 = arith.constant dense<0.000000e+00> : vector<1x256xf32>
    %116 = tpu.matmul %115, %103, %cst_120 {dimension_numbers = #tpu.dot_dimension_numbers<[1], [0], [0], [1], [0, 0, 1, 1], [], []>} : vector<1x3xf32>, vector<3x256xf32>, vector<1x256xf32> -> vector<1x256xf32>
    %c2_i32 = arith.constant 2 : i32
    %117 = vector.broadcast %c2_i32 : i32 to vector<1x3xi32>
    %118 = arith.cmpi eq, %104, %117 : vector<1x3xi32>
    %cst_121 = arith.constant 1.000000e+00 : f32
    %cst_122 = arith.constant 0.000000e+00 : f32
    %119 = vector.broadcast %cst_121 : f32 to vector<1x3xf32>
    %120 = vector.broadcast %cst_122 : f32 to vector<1x3xf32>
    %121 = arith.select %118, %119, %120 : vector<1x3xi1>, vector<1x3xf32>
    %cst_123 = arith.constant dense<0.000000e+00> : vector<1x256xf32>
    %122 = tpu.matmul %121, %103, %cst_123 {dimension_numbers = #tpu.dot_dimension_numbers<[1], [0], [0], [1], [0, 0, 1, 1], [], []>} : vector<1x3xf32>, vector<3x256xf32>, vector<1x256xf32> -> vector<1x256xf32>
    %123 = arith.sitofp %arg1 : i32 to f32
    %124 = tpu.iota {dimensions = array<i32: 1>} : vector<1x256xi32>
    %125 = arith.sitofp %124 : vector<1x256xi32> to vector<1x256xf32>
    %cst_124 = arith.constant 5.000000e-01 : f32
    %126 = vector.broadcast %cst_124 : f32 to vector<1x256xf32>
    %127 = arith.addf %125, %126 : vector<1x256xf32>
    %cst_125 = arith.constant 6.250000e-02 : f32
    %128 = vector.broadcast %cst_125 : f32 to vector<1x256xf32>
    %129 = arith.mulf %127, %128 : vector<1x256xf32>
    %130 = math.floor %129 : vector<1x256xf32>
    %cst_126 = arith.constant 1.600000e+01 : f32
    %131 = vector.broadcast %cst_126 : f32 to vector<1x256xf32>
    %132 = arith.mulf %130, %131 : vector<1x256xf32>
    %133 = arith.subf %125, %132 : vector<1x256xf32>
    %134 = arith.addf %133, %110 : vector<1x256xf32>
    %cst_127 = arith.constant 6.250000e-02 : f32
    %135 = vector.broadcast %cst_127 : f32 to vector<1x256xf32>
    %136 = arith.mulf %134, %135 : vector<1x256xf32>
    %137 = arith.addf %130, %116 : vector<1x256xf32>
    %cst_128 = arith.constant 6.250000e-02 : f32
    %138 = vector.broadcast %cst_128 : f32 to vector<1x256xf32>
    %139 = arith.mulf %137, %138 : vector<1x256xf32>
    %140 = vector.broadcast %123 : f32 to vector<1x256xf32>
    %141 = arith.addf %140, %122 : vector<1x256xf32>
    %cst_129 = arith.constant 1.250000e-01 : f32
    %142 = vector.broadcast %cst_129 : f32 to vector<1x256xf32>
    %143 = arith.mulf %141, %142 : vector<1x256xf32>
    %cst_130 = arith.constant 1.000000e+00 : f32
    %144 = vector.broadcast %cst_130 : f32 to vector<1x256xf32>
    %145 = arith.addf %136, %144 : vector<1x256xf32>
    %cst_131 = arith.constant 4.000000e+00 : f32
    %146 = vector.broadcast %cst_131 : f32 to vector<1x256xf32>
    %147 = arith.mulf %145, %146 : vector<1x256xf32>
    %cst_132 = arith.constant 5.000000e-01 : f32
    %148 = vector.broadcast %cst_132 : f32 to vector<1x256xf32>
    %149 = arith.subf %147, %148 : vector<1x256xf32>
    %cst_133 = arith.constant 1.000000e+00 : f32
    %150 = vector.broadcast %cst_133 : f32 to vector<1x256xf32>
    %151 = arith.addf %139, %150 : vector<1x256xf32>
    %cst_134 = arith.constant 4.000000e+00 : f32
    %152 = vector.broadcast %cst_134 : f32 to vector<1x256xf32>
    %153 = arith.mulf %151, %152 : vector<1x256xf32>
    %cst_135 = arith.constant 5.000000e-01 : f32
    %154 = vector.broadcast %cst_135 : f32 to vector<1x256xf32>
    %155 = arith.subf %153, %154 : vector<1x256xf32>
    %cst_136 = arith.constant 1.000000e+00 : f32
    %156 = vector.broadcast %cst_136 : f32 to vector<1x256xf32>
    %157 = arith.addf %143, %156 : vector<1x256xf32>
    %cst_137 = arith.constant 2.000000e+00 : f32
    %158 = vector.broadcast %cst_137 : f32 to vector<1x256xf32>
    %159 = arith.mulf %157, %158 : vector<1x256xf32>
    %cst_138 = arith.constant 5.000000e-01 : f32
    %160 = vector.broadcast %cst_138 : f32 to vector<1x256xf32>
    %161 = arith.subf %159, %160 : vector<1x256xf32>
    %162 = math.floor %149 : vector<1x256xf32>
    %163 = math.floor %155 : vector<1x256xf32>
    %164 = math.floor %161 : vector<1x256xf32>
    %165 = arith.subf %149, %162 : vector<1x256xf32>
    %166 = arith.subf %155, %163 : vector<1x256xf32>
    %167 = arith.subf %161, %164 : vector<1x256xf32>
    %168 = tpu.iota {dimensions = array<i32: 0>} : vector<256x256xi32>
    %169 = arith.sitofp %168 : vector<256x256xi32> to vector<256x256xf32>
    %cst_139 = arith.constant 0.000000e+00 : f32
    %170 = vector.broadcast %cst_139 : f32 to vector<256x256xf32>
    %cst_140 = arith.constant 0.000000e+00 : f32
    %171 = vector.broadcast %cst_140 : f32 to vector<1x256xf32>
    %172 = arith.addf %162, %171 : vector<1x256xf32>
    %cst_141 = arith.constant 0.000000e+00 : f32
    %173 = vector.broadcast %cst_141 : f32 to vector<1x256xf32>
    %174 = arith.addf %163, %173 : vector<1x256xf32>
    %cst_142 = arith.constant 0.000000e+00 : f32
    %175 = vector.broadcast %cst_142 : f32 to vector<1x256xf32>
    %176 = arith.addf %164, %175 : vector<1x256xf32>
    %cst_143 = arith.constant 1.000000e+00 : f32
    %177 = vector.broadcast %cst_143 : f32 to vector<1x256xf32>
    %178 = arith.subf %177, %165 : vector<1x256xf32>
    %cst_144 = arith.constant 1.000000e+00 : f32
    %179 = vector.broadcast %cst_144 : f32 to vector<1x256xf32>
    %180 = arith.subf %179, %166 : vector<1x256xf32>
    %cst_145 = arith.constant 1.000000e+00 : f32
    %181 = vector.broadcast %cst_145 : f32 to vector<1x256xf32>
    %182 = arith.subf %181, %167 : vector<1x256xf32>
    %cst_146 = arith.constant 0.000000e+00 : f32
    %183 = vector.broadcast %cst_146 : f32 to vector<1x256xf32>
    %184 = arith.cmpf oge, %172, %183 : vector<1x256xf32>
    %cst_147 = arith.constant 7.000000e+00 : f32
    %185 = vector.broadcast %cst_147 : f32 to vector<1x256xf32>
    %186 = arith.cmpf ole, %172, %185 : vector<1x256xf32>
    %187 = arith.andi %184, %186 : vector<1x256xi1>
    %cst_148 = arith.constant 0.000000e+00 : f32
    %188 = vector.broadcast %cst_148 : f32 to vector<1x256xf32>
    %189 = arith.cmpf oge, %174, %188 : vector<1x256xf32>
    %190 = arith.andi %187, %189 : vector<1x256xi1>
    %cst_149 = arith.constant 7.000000e+00 : f32
    %191 = vector.broadcast %cst_149 : f32 to vector<1x256xf32>
    %192 = arith.cmpf ole, %174, %191 : vector<1x256xf32>
    %193 = arith.andi %190, %192 : vector<1x256xi1>
    %cst_150 = arith.constant 0.000000e+00 : f32
    %194 = vector.broadcast %cst_150 : f32 to vector<1x256xf32>
    %195 = arith.cmpf oge, %176, %194 : vector<1x256xf32>
    %196 = arith.andi %193, %195 : vector<1x256xi1>
    %cst_151 = arith.constant 3.000000e+00 : f32
    %197 = vector.broadcast %cst_151 : f32 to vector<1x256xf32>
    %198 = arith.cmpf ole, %176, %197 : vector<1x256xf32>
    %199 = arith.andi %196, %198 : vector<1x256xi1>
    %200 = arith.mulf %178, %180 : vector<1x256xf32>
    %201 = arith.mulf %200, %182 : vector<1x256xf32>
    %202 = arith.extui %199 : vector<1x256xi1> to vector<1x256xi32>
    %203 = arith.sitofp %202 : vector<1x256xi32> to vector<1x256xf32>
    %204 = arith.mulf %201, %203 : vector<1x256xf32>
    %cst_152 = arith.constant 0.000000e+00 : f32
    %cst_153 = arith.constant 3.000000e+00 : f32
    %205 = vector.broadcast %cst_152 : f32 to vector<1x256xf32>
    %206 = arith.maximumf %205, %176 : vector<1x256xf32>
    %207 = vector.broadcast %cst_153 : f32 to vector<1x256xf32>
    %208 = arith.minimumf %207, %206 : vector<1x256xf32>
    %cst_154 = arith.constant 8.000000e+00 : f32
    %209 = vector.broadcast %cst_154 : f32 to vector<1x256xf32>
    %210 = arith.mulf %208, %209 : vector<1x256xf32>
    %cst_155 = arith.constant 0.000000e+00 : f32
    %cst_156 = arith.constant 7.000000e+00 : f32
    %211 = vector.broadcast %cst_155 : f32 to vector<1x256xf32>
    %212 = arith.maximumf %211, %174 : vector<1x256xf32>
    %213 = vector.broadcast %cst_156 : f32 to vector<1x256xf32>
    %214 = arith.minimumf %213, %212 : vector<1x256xf32>
    %215 = arith.addf %210, %214 : vector<1x256xf32>
    %cst_157 = arith.constant 8.000000e+00 : f32
    %216 = vector.broadcast %cst_157 : f32 to vector<1x256xf32>
    %217 = arith.mulf %215, %216 : vector<1x256xf32>
    %cst_158 = arith.constant 0.000000e+00 : f32
    %cst_159 = arith.constant 7.000000e+00 : f32
    %218 = vector.broadcast %cst_158 : f32 to vector<1x256xf32>
    %219 = arith.maximumf %218, %172 : vector<1x256xf32>
    %220 = vector.broadcast %cst_159 : f32 to vector<1x256xf32>
    %221 = arith.minimumf %220, %219 : vector<1x256xf32>
    %222 = arith.addf %217, %221 : vector<1x256xf32>
    %223 = vector.broadcast %222 : vector<1x256xf32> to vector<256x256xf32>
    %224 = arith.cmpf oeq, %169, %223 : vector<256x256xf32>
    %cst_160 = arith.constant 0.000000e+00 : f32
    %225 = vector.shape_cast %204 : vector<1x256xf32> to vector<1x256xf32>
    %226 = vector.broadcast %225 : vector<1x256xf32> to vector<256x256xf32>
    %227 = vector.broadcast %cst_160 : f32 to vector<256x256xf32>
    %228 = arith.select %224, %226, %227 : vector<256x256xi1>, vector<256x256xf32>
    %229 = arith.addf %170, %228 : vector<256x256xf32>
    %cst_161 = arith.constant 1.000000e+00 : f32
    %230 = vector.broadcast %cst_161 : f32 to vector<1x256xf32>
    %231 = arith.addf %162, %230 : vector<1x256xf32>
    %cst_162 = arith.constant 0.000000e+00 : f32
    %232 = vector.broadcast %cst_162 : f32 to vector<1x256xf32>
    %233 = arith.addf %163, %232 : vector<1x256xf32>
    %cst_163 = arith.constant 0.000000e+00 : f32
    %234 = vector.broadcast %cst_163 : f32 to vector<1x256xf32>
    %235 = arith.addf %164, %234 : vector<1x256xf32>
    %cst_164 = arith.constant 1.000000e+00 : f32
    %236 = vector.broadcast %cst_164 : f32 to vector<1x256xf32>
    %237 = arith.subf %236, %166 : vector<1x256xf32>
    %cst_165 = arith.constant 1.000000e+00 : f32
    %238 = vector.broadcast %cst_165 : f32 to vector<1x256xf32>
    %239 = arith.subf %238, %167 : vector<1x256xf32>
    %cst_166 = arith.constant 0.000000e+00 : f32
    %240 = vector.broadcast %cst_166 : f32 to vector<1x256xf32>
    %241 = arith.cmpf oge, %231, %240 : vector<1x256xf32>
    %cst_167 = arith.constant 7.000000e+00 : f32
    %242 = vector.broadcast %cst_167 : f32 to vector<1x256xf32>
    %243 = arith.cmpf ole, %231, %242 : vector<1x256xf32>
    %244 = arith.andi %241, %243 : vector<1x256xi1>
    %cst_168 = arith.constant 0.000000e+00 : f32
    %245 = vector.broadcast %cst_168 : f32 to vector<1x256xf32>
    %246 = arith.cmpf oge, %233, %245 : vector<1x256xf32>
    %247 = arith.andi %244, %246 : vector<1x256xi1>
    %cst_169 = arith.constant 7.000000e+00 : f32
    %248 = vector.broadcast %cst_169 : f32 to vector<1x256xf32>
    %249 = arith.cmpf ole, %233, %248 : vector<1x256xf32>
    %250 = arith.andi %247, %249 : vector<1x256xi1>
    %cst_170 = arith.constant 0.000000e+00 : f32
    %251 = vector.broadcast %cst_170 : f32 to vector<1x256xf32>
    %252 = arith.cmpf oge, %235, %251 : vector<1x256xf32>
    %253 = arith.andi %250, %252 : vector<1x256xi1>
    %cst_171 = arith.constant 3.000000e+00 : f32
    %254 = vector.broadcast %cst_171 : f32 to vector<1x256xf32>
    %255 = arith.cmpf ole, %235, %254 : vector<1x256xf32>
    %256 = arith.andi %253, %255 : vector<1x256xi1>
    %257 = arith.mulf %165, %237 : vector<1x256xf32>
    %258 = arith.mulf %257, %239 : vector<1x256xf32>
    %259 = arith.extui %256 : vector<1x256xi1> to vector<1x256xi32>
    %260 = arith.sitofp %259 : vector<1x256xi32> to vector<1x256xf32>
    %261 = arith.mulf %258, %260 : vector<1x256xf32>
    %cst_172 = arith.constant 0.000000e+00 : f32
    %cst_173 = arith.constant 3.000000e+00 : f32
    %262 = vector.broadcast %cst_172 : f32 to vector<1x256xf32>
    %263 = arith.maximumf %262, %235 : vector<1x256xf32>
    %264 = vector.broadcast %cst_173 : f32 to vector<1x256xf32>
    %265 = arith.minimumf %264, %263 : vector<1x256xf32>
    %cst_174 = arith.constant 8.000000e+00 : f32
    %266 = vector.broadcast %cst_174 : f32 to vector<1x256xf32>
    %267 = arith.mulf %265, %266 : vector<1x256xf32>
    %cst_175 = arith.constant 0.000000e+00 : f32
    %cst_176 = arith.constant 7.000000e+00 : f32
    %268 = vector.broadcast %cst_175 : f32 to vector<1x256xf32>
    %269 = arith.maximumf %268, %233 : vector<1x256xf32>
    %270 = vector.broadcast %cst_176 : f32 to vector<1x256xf32>
    %271 = arith.minimumf %270, %269 : vector<1x256xf32>
    %272 = arith.addf %267, %271 : vector<1x256xf32>
    %cst_177 = arith.constant 8.000000e+00 : f32
    %273 = vector.broadcast %cst_177 : f32 to vector<1x256xf32>
    %274 = arith.mulf %272, %273 : vector<1x256xf32>
    %cst_178 = arith.constant 0.000000e+00 : f32
    %cst_179 = arith.constant 7.000000e+00 : f32
    %275 = vector.broadcast %cst_178 : f32 to vector<1x256xf32>
    %276 = arith.maximumf %275, %231 : vector<1x256xf32>
    %277 = vector.broadcast %cst_179 : f32 to vector<1x256xf32>
    %278 = arith.minimumf %277, %276 : vector<1x256xf32>
    %279 = arith.addf %274, %278 : vector<1x256xf32>
    %280 = vector.broadcast %279 : vector<1x256xf32> to vector<256x256xf32>
    %281 = arith.cmpf oeq, %169, %280 : vector<256x256xf32>
    %cst_180 = arith.constant 0.000000e+00 : f32
    %282 = vector.shape_cast %261 : vector<1x256xf32> to vector<1x256xf32>
    %283 = vector.broadcast %282 : vector<1x256xf32> to vector<256x256xf32>
    %284 = vector.broadcast %cst_180 : f32 to vector<256x256xf32>
    %285 = arith.select %281, %283, %284 : vector<256x256xi1>, vector<256x256xf32>
    %286 = arith.addf %229, %285 : vector<256x256xf32>
    %cst_181 = arith.constant 0.000000e+00 : f32
    %287 = vector.broadcast %cst_181 : f32 to vector<1x256xf32>
    %288 = arith.addf %162, %287 : vector<1x256xf32>
    %cst_182 = arith.constant 1.000000e+00 : f32
    %289 = vector.broadcast %cst_182 : f32 to vector<1x256xf32>
    %290 = arith.addf %163, %289 : vector<1x256xf32>
    %cst_183 = arith.constant 0.000000e+00 : f32
    %291 = vector.broadcast %cst_183 : f32 to vector<1x256xf32>
    %292 = arith.addf %164, %291 : vector<1x256xf32>
    %cst_184 = arith.constant 1.000000e+00 : f32
    %293 = vector.broadcast %cst_184 : f32 to vector<1x256xf32>
    %294 = arith.subf %293, %165 : vector<1x256xf32>
    %cst_185 = arith.constant 1.000000e+00 : f32
    %295 = vector.broadcast %cst_185 : f32 to vector<1x256xf32>
    %296 = arith.subf %295, %167 : vector<1x256xf32>
    %cst_186 = arith.constant 0.000000e+00 : f32
    %297 = vector.broadcast %cst_186 : f32 to vector<1x256xf32>
    %298 = arith.cmpf oge, %288, %297 : vector<1x256xf32>
    %cst_187 = arith.constant 7.000000e+00 : f32
    %299 = vector.broadcast %cst_187 : f32 to vector<1x256xf32>
    %300 = arith.cmpf ole, %288, %299 : vector<1x256xf32>
    %301 = arith.andi %298, %300 : vector<1x256xi1>
    %cst_188 = arith.constant 0.000000e+00 : f32
    %302 = vector.broadcast %cst_188 : f32 to vector<1x256xf32>
    %303 = arith.cmpf oge, %290, %302 : vector<1x256xf32>
    %304 = arith.andi %301, %303 : vector<1x256xi1>
    %cst_189 = arith.constant 7.000000e+00 : f32
    %305 = vector.broadcast %cst_189 : f32 to vector<1x256xf32>
    %306 = arith.cmpf ole, %290, %305 : vector<1x256xf32>
    %307 = arith.andi %304, %306 : vector<1x256xi1>
    %cst_190 = arith.constant 0.000000e+00 : f32
    %308 = vector.broadcast %cst_190 : f32 to vector<1x256xf32>
    %309 = arith.cmpf oge, %292, %308 : vector<1x256xf32>
    %310 = arith.andi %307, %309 : vector<1x256xi1>
    %cst_191 = arith.constant 3.000000e+00 : f32
    %311 = vector.broadcast %cst_191 : f32 to vector<1x256xf32>
    %312 = arith.cmpf ole, %292, %311 : vector<1x256xf32>
    %313 = arith.andi %310, %312 : vector<1x256xi1>
    %314 = arith.mulf %294, %166 : vector<1x256xf32>
    %315 = arith.mulf %314, %296 : vector<1x256xf32>
    %316 = arith.extui %313 : vector<1x256xi1> to vector<1x256xi32>
    %317 = arith.sitofp %316 : vector<1x256xi32> to vector<1x256xf32>
    %318 = arith.mulf %315, %317 : vector<1x256xf32>
    %cst_192 = arith.constant 0.000000e+00 : f32
    %cst_193 = arith.constant 3.000000e+00 : f32
    %319 = vector.broadcast %cst_192 : f32 to vector<1x256xf32>
    %320 = arith.maximumf %319, %292 : vector<1x256xf32>
    %321 = vector.broadcast %cst_193 : f32 to vector<1x256xf32>
    %322 = arith.minimumf %321, %320 : vector<1x256xf32>
    %cst_194 = arith.constant 8.000000e+00 : f32
    %323 = vector.broadcast %cst_194 : f32 to vector<1x256xf32>
    %324 = arith.mulf %322, %323 : vector<1x256xf32>
    %cst_195 = arith.constant 0.000000e+00 : f32
    %cst_196 = arith.constant 7.000000e+00 : f32
    %325 = vector.broadcast %cst_195 : f32 to vector<1x256xf32>
    %326 = arith.maximumf %325, %290 : vector<1x256xf32>
    %327 = vector.broadcast %cst_196 : f32 to vector<1x256xf32>
    %328 = arith.minimumf %327, %326 : vector<1x256xf32>
    %329 = arith.addf %324, %328 : vector<1x256xf32>
    %cst_197 = arith.constant 8.000000e+00 : f32
    %330 = vector.broadcast %cst_197 : f32 to vector<1x256xf32>
    %331 = arith.mulf %329, %330 : vector<1x256xf32>
    %cst_198 = arith.constant 0.000000e+00 : f32
    %cst_199 = arith.constant 7.000000e+00 : f32
    %332 = vector.broadcast %cst_198 : f32 to vector<1x256xf32>
    %333 = arith.maximumf %332, %288 : vector<1x256xf32>
    %334 = vector.broadcast %cst_199 : f32 to vector<1x256xf32>
    %335 = arith.minimumf %334, %333 : vector<1x256xf32>
    %336 = arith.addf %331, %335 : vector<1x256xf32>
    %337 = vector.broadcast %336 : vector<1x256xf32> to vector<256x256xf32>
    %338 = arith.cmpf oeq, %169, %337 : vector<256x256xf32>
    %cst_200 = arith.constant 0.000000e+00 : f32
    %339 = vector.shape_cast %318 : vector<1x256xf32> to vector<1x256xf32>
    %340 = vector.broadcast %339 : vector<1x256xf32> to vector<256x256xf32>
    %341 = vector.broadcast %cst_200 : f32 to vector<256x256xf32>
    %342 = arith.select %338, %340, %341 : vector<256x256xi1>, vector<256x256xf32>
    %343 = arith.addf %286, %342 : vector<256x256xf32>
    %cst_201 = arith.constant 1.000000e+00 : f32
    %344 = vector.broadcast %cst_201 : f32 to vector<1x256xf32>
    %345 = arith.addf %162, %344 : vector<1x256xf32>
    %cst_202 = arith.constant 1.000000e+00 : f32
    %346 = vector.broadcast %cst_202 : f32 to vector<1x256xf32>
    %347 = arith.addf %163, %346 : vector<1x256xf32>
    %cst_203 = arith.constant 0.000000e+00 : f32
    %348 = vector.broadcast %cst_203 : f32 to vector<1x256xf32>
    %349 = arith.addf %164, %348 : vector<1x256xf32>
    %cst_204 = arith.constant 1.000000e+00 : f32
    %350 = vector.broadcast %cst_204 : f32 to vector<1x256xf32>
    %351 = arith.subf %350, %167 : vector<1x256xf32>
    %cst_205 = arith.constant 0.000000e+00 : f32
    %352 = vector.broadcast %cst_205 : f32 to vector<1x256xf32>
    %353 = arith.cmpf oge, %345, %352 : vector<1x256xf32>
    %cst_206 = arith.constant 7.000000e+00 : f32
    %354 = vector.broadcast %cst_206 : f32 to vector<1x256xf32>
    %355 = arith.cmpf ole, %345, %354 : vector<1x256xf32>
    %356 = arith.andi %353, %355 : vector<1x256xi1>
    %cst_207 = arith.constant 0.000000e+00 : f32
    %357 = vector.broadcast %cst_207 : f32 to vector<1x256xf32>
    %358 = arith.cmpf oge, %347, %357 : vector<1x256xf32>
    %359 = arith.andi %356, %358 : vector<1x256xi1>
    %cst_208 = arith.constant 7.000000e+00 : f32
    %360 = vector.broadcast %cst_208 : f32 to vector<1x256xf32>
    %361 = arith.cmpf ole, %347, %360 : vector<1x256xf32>
    %362 = arith.andi %359, %361 : vector<1x256xi1>
    %cst_209 = arith.constant 0.000000e+00 : f32
    %363 = vector.broadcast %cst_209 : f32 to vector<1x256xf32>
    %364 = arith.cmpf oge, %349, %363 : vector<1x256xf32>
    %365 = arith.andi %362, %364 : vector<1x256xi1>
    %cst_210 = arith.constant 3.000000e+00 : f32
    %366 = vector.broadcast %cst_210 : f32 to vector<1x256xf32>
    %367 = arith.cmpf ole, %349, %366 : vector<1x256xf32>
    %368 = arith.andi %365, %367 : vector<1x256xi1>
    %369 = arith.mulf %165, %166 : vector<1x256xf32>
    %370 = arith.mulf %369, %351 : vector<1x256xf32>
    %371 = arith.extui %368 : vector<1x256xi1> to vector<1x256xi32>
    %372 = arith.sitofp %371 : vector<1x256xi32> to vector<1x256xf32>
    %373 = arith.mulf %370, %372 : vector<1x256xf32>
    %cst_211 = arith.constant 0.000000e+00 : f32
    %cst_212 = arith.constant 3.000000e+00 : f32
    %374 = vector.broadcast %cst_211 : f32 to vector<1x256xf32>
    %375 = arith.maximumf %374, %349 : vector<1x256xf32>
    %376 = vector.broadcast %cst_212 : f32 to vector<1x256xf32>
    %377 = arith.minimumf %376, %375 : vector<1x256xf32>
    %cst_213 = arith.constant 8.000000e+00 : f32
    %378 = vector.broadcast %cst_213 : f32 to vector<1x256xf32>
    %379 = arith.mulf %377, %378 : vector<1x256xf32>
    %cst_214 = arith.constant 0.000000e+00 : f32
    %cst_215 = arith.constant 7.000000e+00 : f32
    %380 = vector.broadcast %cst_214 : f32 to vector<1x256xf32>
    %381 = arith.maximumf %380, %347 : vector<1x256xf32>
    %382 = vector.broadcast %cst_215 : f32 to vector<1x256xf32>
    %383 = arith.minimumf %382, %381 : vector<1x256xf32>
    %384 = arith.addf %379, %383 : vector<1x256xf32>
    %cst_216 = arith.constant 8.000000e+00 : f32
    %385 = vector.broadcast %cst_216 : f32 to vector<1x256xf32>
    %386 = arith.mulf %384, %385 : vector<1x256xf32>
    %cst_217 = arith.constant 0.000000e+00 : f32
    %cst_218 = arith.constant 7.000000e+00 : f32
    %387 = vector.broadcast %cst_217 : f32 to vector<1x256xf32>
    %388 = arith.maximumf %387, %345 : vector<1x256xf32>
    %389 = vector.broadcast %cst_218 : f32 to vector<1x256xf32>
    %390 = arith.minimumf %389, %388 : vector<1x256xf32>
    %391 = arith.addf %386, %390 : vector<1x256xf32>
    %392 = vector.broadcast %391 : vector<1x256xf32> to vector<256x256xf32>
    %393 = arith.cmpf oeq, %169, %392 : vector<256x256xf32>
    %cst_219 = arith.constant 0.000000e+00 : f32
    %394 = vector.shape_cast %373 : vector<1x256xf32> to vector<1x256xf32>
    %395 = vector.broadcast %394 : vector<1x256xf32> to vector<256x256xf32>
    %396 = vector.broadcast %cst_219 : f32 to vector<256x256xf32>
    %397 = arith.select %393, %395, %396 : vector<256x256xi1>, vector<256x256xf32>
    %398 = arith.addf %343, %397 : vector<256x256xf32>
    %cst_220 = arith.constant 0.000000e+00 : f32
    %399 = vector.broadcast %cst_220 : f32 to vector<1x256xf32>
    %400 = arith.addf %162, %399 : vector<1x256xf32>
    %cst_221 = arith.constant 0.000000e+00 : f32
    %401 = vector.broadcast %cst_221 : f32 to vector<1x256xf32>
    %402 = arith.addf %163, %401 : vector<1x256xf32>
    %cst_222 = arith.constant 1.000000e+00 : f32
    %403 = vector.broadcast %cst_222 : f32 to vector<1x256xf32>
    %404 = arith.addf %164, %403 : vector<1x256xf32>
    %cst_223 = arith.constant 1.000000e+00 : f32
    %405 = vector.broadcast %cst_223 : f32 to vector<1x256xf32>
    %406 = arith.subf %405, %165 : vector<1x256xf32>
    %cst_224 = arith.constant 1.000000e+00 : f32
    %407 = vector.broadcast %cst_224 : f32 to vector<1x256xf32>
    %408 = arith.subf %407, %166 : vector<1x256xf32>
    %cst_225 = arith.constant 0.000000e+00 : f32
    %409 = vector.broadcast %cst_225 : f32 to vector<1x256xf32>
    %410 = arith.cmpf oge, %400, %409 : vector<1x256xf32>
    %cst_226 = arith.constant 7.000000e+00 : f32
    %411 = vector.broadcast %cst_226 : f32 to vector<1x256xf32>
    %412 = arith.cmpf ole, %400, %411 : vector<1x256xf32>
    %413 = arith.andi %410, %412 : vector<1x256xi1>
    %cst_227 = arith.constant 0.000000e+00 : f32
    %414 = vector.broadcast %cst_227 : f32 to vector<1x256xf32>
    %415 = arith.cmpf oge, %402, %414 : vector<1x256xf32>
    %416 = arith.andi %413, %415 : vector<1x256xi1>
    %cst_228 = arith.constant 7.000000e+00 : f32
    %417 = vector.broadcast %cst_228 : f32 to vector<1x256xf32>
    %418 = arith.cmpf ole, %402, %417 : vector<1x256xf32>
    %419 = arith.andi %416, %418 : vector<1x256xi1>
    %cst_229 = arith.constant 0.000000e+00 : f32
    %420 = vector.broadcast %cst_229 : f32 to vector<1x256xf32>
    %421 = arith.cmpf oge, %404, %420 : vector<1x256xf32>
    %422 = arith.andi %419, %421 : vector<1x256xi1>
    %cst_230 = arith.constant 3.000000e+00 : f32
    %423 = vector.broadcast %cst_230 : f32 to vector<1x256xf32>
    %424 = arith.cmpf ole, %404, %423 : vector<1x256xf32>
    %425 = arith.andi %422, %424 : vector<1x256xi1>
    %426 = arith.mulf %406, %408 : vector<1x256xf32>
    %427 = arith.mulf %426, %167 : vector<1x256xf32>
    %428 = arith.extui %425 : vector<1x256xi1> to vector<1x256xi32>
    %429 = arith.sitofp %428 : vector<1x256xi32> to vector<1x256xf32>
    %430 = arith.mulf %427, %429 : vector<1x256xf32>
    %cst_231 = arith.constant 0.000000e+00 : f32
    %cst_232 = arith.constant 3.000000e+00 : f32
    %431 = vector.broadcast %cst_231 : f32 to vector<1x256xf32>
    %432 = arith.maximumf %431, %404 : vector<1x256xf32>
    %433 = vector.broadcast %cst_232 : f32 to vector<1x256xf32>
    %434 = arith.minimumf %433, %432 : vector<1x256xf32>
    %cst_233 = arith.constant 8.000000e+00 : f32
    %435 = vector.broadcast %cst_233 : f32 to vector<1x256xf32>
    %436 = arith.mulf %434, %435 : vector<1x256xf32>
    %cst_234 = arith.constant 0.000000e+00 : f32
    %cst_235 = arith.constant 7.000000e+00 : f32
    %437 = vector.broadcast %cst_234 : f32 to vector<1x256xf32>
    %438 = arith.maximumf %437, %402 : vector<1x256xf32>
    %439 = vector.broadcast %cst_235 : f32 to vector<1x256xf32>
    %440 = arith.minimumf %439, %438 : vector<1x256xf32>
    %441 = arith.addf %436, %440 : vector<1x256xf32>
    %cst_236 = arith.constant 8.000000e+00 : f32
    %442 = vector.broadcast %cst_236 : f32 to vector<1x256xf32>
    %443 = arith.mulf %441, %442 : vector<1x256xf32>
    %cst_237 = arith.constant 0.000000e+00 : f32
    %cst_238 = arith.constant 7.000000e+00 : f32
    %444 = vector.broadcast %cst_237 : f32 to vector<1x256xf32>
    %445 = arith.maximumf %444, %400 : vector<1x256xf32>
    %446 = vector.broadcast %cst_238 : f32 to vector<1x256xf32>
    %447 = arith.minimumf %446, %445 : vector<1x256xf32>
    %448 = arith.addf %443, %447 : vector<1x256xf32>
    %449 = vector.broadcast %448 : vector<1x256xf32> to vector<256x256xf32>
    %450 = arith.cmpf oeq, %169, %449 : vector<256x256xf32>
    %cst_239 = arith.constant 0.000000e+00 : f32
    %451 = vector.shape_cast %430 : vector<1x256xf32> to vector<1x256xf32>
    %452 = vector.broadcast %451 : vector<1x256xf32> to vector<256x256xf32>
    %453 = vector.broadcast %cst_239 : f32 to vector<256x256xf32>
    %454 = arith.select %450, %452, %453 : vector<256x256xi1>, vector<256x256xf32>
    %455 = arith.addf %398, %454 : vector<256x256xf32>
    %cst_240 = arith.constant 1.000000e+00 : f32
    %456 = vector.broadcast %cst_240 : f32 to vector<1x256xf32>
    %457 = arith.addf %162, %456 : vector<1x256xf32>
    %cst_241 = arith.constant 0.000000e+00 : f32
    %458 = vector.broadcast %cst_241 : f32 to vector<1x256xf32>
    %459 = arith.addf %163, %458 : vector<1x256xf32>
    %cst_242 = arith.constant 1.000000e+00 : f32
    %460 = vector.broadcast %cst_242 : f32 to vector<1x256xf32>
    %461 = arith.addf %164, %460 : vector<1x256xf32>
    %cst_243 = arith.constant 1.000000e+00 : f32
    %462 = vector.broadcast %cst_243 : f32 to vector<1x256xf32>
    %463 = arith.subf %462, %166 : vector<1x256xf32>
    %cst_244 = arith.constant 0.000000e+00 : f32
    %464 = vector.broadcast %cst_244 : f32 to vector<1x256xf32>
    %465 = arith.cmpf oge, %457, %464 : vector<1x256xf32>
    %cst_245 = arith.constant 7.000000e+00 : f32
    %466 = vector.broadcast %cst_245 : f32 to vector<1x256xf32>
    %467 = arith.cmpf ole, %457, %466 : vector<1x256xf32>
    %468 = arith.andi %465, %467 : vector<1x256xi1>
    %cst_246 = arith.constant 0.000000e+00 : f32
    %469 = vector.broadcast %cst_246 : f32 to vector<1x256xf32>
    %470 = arith.cmpf oge, %459, %469 : vector<1x256xf32>
    %471 = arith.andi %468, %470 : vector<1x256xi1>
    %cst_247 = arith.constant 7.000000e+00 : f32
    %472 = vector.broadcast %cst_247 : f32 to vector<1x256xf32>
    %473 = arith.cmpf ole, %459, %472 : vector<1x256xf32>
    %474 = arith.andi %471, %473 : vector<1x256xi1>
    %cst_248 = arith.constant 0.000000e+00 : f32
    %475 = vector.broadcast %cst_248 : f32 to vector<1x256xf32>
    %476 = arith.cmpf oge, %461, %475 : vector<1x256xf32>
    %477 = arith.andi %474, %476 : vector<1x256xi1>
    %cst_249 = arith.constant 3.000000e+00 : f32
    %478 = vector.broadcast %cst_249 : f32 to vector<1x256xf32>
    %479 = arith.cmpf ole, %461, %478 : vector<1x256xf32>
    %480 = arith.andi %477, %479 : vector<1x256xi1>
    %481 = arith.mulf %165, %463 : vector<1x256xf32>
    %482 = arith.mulf %481, %167 : vector<1x256xf32>
    %483 = arith.extui %480 : vector<1x256xi1> to vector<1x256xi32>
    %484 = arith.sitofp %483 : vector<1x256xi32> to vector<1x256xf32>
    %485 = arith.mulf %482, %484 : vector<1x256xf32>
    %cst_250 = arith.constant 0.000000e+00 : f32
    %cst_251 = arith.constant 3.000000e+00 : f32
    %486 = vector.broadcast %cst_250 : f32 to vector<1x256xf32>
    %487 = arith.maximumf %486, %461 : vector<1x256xf32>
    %488 = vector.broadcast %cst_251 : f32 to vector<1x256xf32>
    %489 = arith.minimumf %488, %487 : vector<1x256xf32>
    %cst_252 = arith.constant 8.000000e+00 : f32
    %490 = vector.broadcast %cst_252 : f32 to vector<1x256xf32>
    %491 = arith.mulf %489, %490 : vector<1x256xf32>
    %cst_253 = arith.constant 0.000000e+00 : f32
    %cst_254 = arith.constant 7.000000e+00 : f32
    %492 = vector.broadcast %cst_253 : f32 to vector<1x256xf32>
    %493 = arith.maximumf %492, %459 : vector<1x256xf32>
    %494 = vector.broadcast %cst_254 : f32 to vector<1x256xf32>
    %495 = arith.minimumf %494, %493 : vector<1x256xf32>
    %496 = arith.addf %491, %495 : vector<1x256xf32>
    %cst_255 = arith.constant 8.000000e+00 : f32
    %497 = vector.broadcast %cst_255 : f32 to vector<1x256xf32>
    %498 = arith.mulf %496, %497 : vector<1x256xf32>
    %cst_256 = arith.constant 0.000000e+00 : f32
    %cst_257 = arith.constant 7.000000e+00 : f32
    %499 = vector.broadcast %cst_256 : f32 to vector<1x256xf32>
    %500 = arith.maximumf %499, %457 : vector<1x256xf32>
    %501 = vector.broadcast %cst_257 : f32 to vector<1x256xf32>
    %502 = arith.minimumf %501, %500 : vector<1x256xf32>
    %503 = arith.addf %498, %502 : vector<1x256xf32>
    %504 = vector.broadcast %503 : vector<1x256xf32> to vector<256x256xf32>
    %505 = arith.cmpf oeq, %169, %504 : vector<256x256xf32>
    %cst_258 = arith.constant 0.000000e+00 : f32
    %506 = vector.shape_cast %485 : vector<1x256xf32> to vector<1x256xf32>
    %507 = vector.broadcast %506 : vector<1x256xf32> to vector<256x256xf32>
    %508 = vector.broadcast %cst_258 : f32 to vector<256x256xf32>
    %509 = arith.select %505, %507, %508 : vector<256x256xi1>, vector<256x256xf32>
    %510 = arith.addf %455, %509 : vector<256x256xf32>
    %cst_259 = arith.constant 0.000000e+00 : f32
    %511 = vector.broadcast %cst_259 : f32 to vector<1x256xf32>
    %512 = arith.addf %162, %511 : vector<1x256xf32>
    %cst_260 = arith.constant 1.000000e+00 : f32
    %513 = vector.broadcast %cst_260 : f32 to vector<1x256xf32>
    %514 = arith.addf %163, %513 : vector<1x256xf32>
    %cst_261 = arith.constant 1.000000e+00 : f32
    %515 = vector.broadcast %cst_261 : f32 to vector<1x256xf32>
    %516 = arith.addf %164, %515 : vector<1x256xf32>
    %cst_262 = arith.constant 1.000000e+00 : f32
    %517 = vector.broadcast %cst_262 : f32 to vector<1x256xf32>
    %518 = arith.subf %517, %165 : vector<1x256xf32>
    %cst_263 = arith.constant 0.000000e+00 : f32
    %519 = vector.broadcast %cst_263 : f32 to vector<1x256xf32>
    %520 = arith.cmpf oge, %512, %519 : vector<1x256xf32>
    %cst_264 = arith.constant 7.000000e+00 : f32
    %521 = vector.broadcast %cst_264 : f32 to vector<1x256xf32>
    %522 = arith.cmpf ole, %512, %521 : vector<1x256xf32>
    %523 = arith.andi %520, %522 : vector<1x256xi1>
    %cst_265 = arith.constant 0.000000e+00 : f32
    %524 = vector.broadcast %cst_265 : f32 to vector<1x256xf32>
    %525 = arith.cmpf oge, %514, %524 : vector<1x256xf32>
    %526 = arith.andi %523, %525 : vector<1x256xi1>
    %cst_266 = arith.constant 7.000000e+00 : f32
    %527 = vector.broadcast %cst_266 : f32 to vector<1x256xf32>
    %528 = arith.cmpf ole, %514, %527 : vector<1x256xf32>
    %529 = arith.andi %526, %528 : vector<1x256xi1>
    %cst_267 = arith.constant 0.000000e+00 : f32
    %530 = vector.broadcast %cst_267 : f32 to vector<1x256xf32>
    %531 = arith.cmpf oge, %516, %530 : vector<1x256xf32>
    %532 = arith.andi %529, %531 : vector<1x256xi1>
    %cst_268 = arith.constant 3.000000e+00 : f32
    %533 = vector.broadcast %cst_268 : f32 to vector<1x256xf32>
    %534 = arith.cmpf ole, %516, %533 : vector<1x256xf32>
    %535 = arith.andi %532, %534 : vector<1x256xi1>
    %536 = arith.mulf %518, %166 : vector<1x256xf32>
    %537 = arith.mulf %536, %167 : vector<1x256xf32>
    %538 = arith.extui %535 : vector<1x256xi1> to vector<1x256xi32>
    %539 = arith.sitofp %538 : vector<1x256xi32> to vector<1x256xf32>
    %540 = arith.mulf %537, %539 : vector<1x256xf32>
    %cst_269 = arith.constant 0.000000e+00 : f32
    %cst_270 = arith.constant 3.000000e+00 : f32
    %541 = vector.broadcast %cst_269 : f32 to vector<1x256xf32>
    %542 = arith.maximumf %541, %516 : vector<1x256xf32>
    %543 = vector.broadcast %cst_270 : f32 to vector<1x256xf32>
    %544 = arith.minimumf %543, %542 : vector<1x256xf32>
    %cst_271 = arith.constant 8.000000e+00 : f32
    %545 = vector.broadcast %cst_271 : f32 to vector<1x256xf32>
    %546 = arith.mulf %544, %545 : vector<1x256xf32>
    %cst_272 = arith.constant 0.000000e+00 : f32
    %cst_273 = arith.constant 7.000000e+00 : f32
    %547 = vector.broadcast %cst_272 : f32 to vector<1x256xf32>
    %548 = arith.maximumf %547, %514 : vector<1x256xf32>
    %549 = vector.broadcast %cst_273 : f32 to vector<1x256xf32>
    %550 = arith.minimumf %549, %548 : vector<1x256xf32>
    %551 = arith.addf %546, %550 : vector<1x256xf32>
    %cst_274 = arith.constant 8.000000e+00 : f32
    %552 = vector.broadcast %cst_274 : f32 to vector<1x256xf32>
    %553 = arith.mulf %551, %552 : vector<1x256xf32>
    %cst_275 = arith.constant 0.000000e+00 : f32
    %cst_276 = arith.constant 7.000000e+00 : f32
    %554 = vector.broadcast %cst_275 : f32 to vector<1x256xf32>
    %555 = arith.maximumf %554, %512 : vector<1x256xf32>
    %556 = vector.broadcast %cst_276 : f32 to vector<1x256xf32>
    %557 = arith.minimumf %556, %555 : vector<1x256xf32>
    %558 = arith.addf %553, %557 : vector<1x256xf32>
    %559 = vector.broadcast %558 : vector<1x256xf32> to vector<256x256xf32>
    %560 = arith.cmpf oeq, %169, %559 : vector<256x256xf32>
    %cst_277 = arith.constant 0.000000e+00 : f32
    %561 = vector.shape_cast %540 : vector<1x256xf32> to vector<1x256xf32>
    %562 = vector.broadcast %561 : vector<1x256xf32> to vector<256x256xf32>
    %563 = vector.broadcast %cst_277 : f32 to vector<256x256xf32>
    %564 = arith.select %560, %562, %563 : vector<256x256xi1>, vector<256x256xf32>
    %565 = arith.addf %510, %564 : vector<256x256xf32>
    %cst_278 = arith.constant 1.000000e+00 : f32
    %566 = vector.broadcast %cst_278 : f32 to vector<1x256xf32>
    %567 = arith.addf %162, %566 : vector<1x256xf32>
    %cst_279 = arith.constant 1.000000e+00 : f32
    %568 = vector.broadcast %cst_279 : f32 to vector<1x256xf32>
    %569 = arith.addf %163, %568 : vector<1x256xf32>
    %cst_280 = arith.constant 1.000000e+00 : f32
    %570 = vector.broadcast %cst_280 : f32 to vector<1x256xf32>
    %571 = arith.addf %164, %570 : vector<1x256xf32>
    %cst_281 = arith.constant 0.000000e+00 : f32
    %572 = vector.broadcast %cst_281 : f32 to vector<1x256xf32>
    %573 = arith.cmpf oge, %567, %572 : vector<1x256xf32>
    %cst_282 = arith.constant 7.000000e+00 : f32
    %574 = vector.broadcast %cst_282 : f32 to vector<1x256xf32>
    %575 = arith.cmpf ole, %567, %574 : vector<1x256xf32>
    %576 = arith.andi %573, %575 : vector<1x256xi1>
    %cst_283 = arith.constant 0.000000e+00 : f32
    %577 = vector.broadcast %cst_283 : f32 to vector<1x256xf32>
    %578 = arith.cmpf oge, %569, %577 : vector<1x256xf32>
    %579 = arith.andi %576, %578 : vector<1x256xi1>
    %cst_284 = arith.constant 7.000000e+00 : f32
    %580 = vector.broadcast %cst_284 : f32 to vector<1x256xf32>
    %581 = arith.cmpf ole, %569, %580 : vector<1x256xf32>
    %582 = arith.andi %579, %581 : vector<1x256xi1>
    %cst_285 = arith.constant 0.000000e+00 : f32
    %583 = vector.broadcast %cst_285 : f32 to vector<1x256xf32>
    %584 = arith.cmpf oge, %571, %583 : vector<1x256xf32>
    %585 = arith.andi %582, %584 : vector<1x256xi1>
    %cst_286 = arith.constant 3.000000e+00 : f32
    %586 = vector.broadcast %cst_286 : f32 to vector<1x256xf32>
    %587 = arith.cmpf ole, %571, %586 : vector<1x256xf32>
    %588 = arith.andi %585, %587 : vector<1x256xi1>
    %589 = arith.mulf %165, %166 : vector<1x256xf32>
    %590 = arith.mulf %589, %167 : vector<1x256xf32>
    %591 = arith.extui %588 : vector<1x256xi1> to vector<1x256xi32>
    %592 = arith.sitofp %591 : vector<1x256xi32> to vector<1x256xf32>
    %593 = arith.mulf %590, %592 : vector<1x256xf32>
    %cst_287 = arith.constant 0.000000e+00 : f32
    %cst_288 = arith.constant 3.000000e+00 : f32
    %594 = vector.broadcast %cst_287 : f32 to vector<1x256xf32>
    %595 = arith.maximumf %594, %571 : vector<1x256xf32>
    %596 = vector.broadcast %cst_288 : f32 to vector<1x256xf32>
    %597 = arith.minimumf %596, %595 : vector<1x256xf32>
    %cst_289 = arith.constant 8.000000e+00 : f32
    %598 = vector.broadcast %cst_289 : f32 to vector<1x256xf32>
    %599 = arith.mulf %597, %598 : vector<1x256xf32>
    %cst_290 = arith.constant 0.000000e+00 : f32
    %cst_291 = arith.constant 7.000000e+00 : f32
    %600 = vector.broadcast %cst_290 : f32 to vector<1x256xf32>
    %601 = arith.maximumf %600, %569 : vector<1x256xf32>
    %602 = vector.broadcast %cst_291 : f32 to vector<1x256xf32>
    %603 = arith.minimumf %602, %601 : vector<1x256xf32>
    %604 = arith.addf %599, %603 : vector<1x256xf32>
    %cst_292 = arith.constant 8.000000e+00 : f32
    %605 = vector.broadcast %cst_292 : f32 to vector<1x256xf32>
    %606 = arith.mulf %604, %605 : vector<1x256xf32>
    %cst_293 = arith.constant 0.000000e+00 : f32
    %cst_294 = arith.constant 7.000000e+00 : f32
    %607 = vector.broadcast %cst_293 : f32 to vector<1x256xf32>
    %608 = arith.maximumf %607, %567 : vector<1x256xf32>
    %609 = vector.broadcast %cst_294 : f32 to vector<1x256xf32>
    %610 = arith.minimumf %609, %608 : vector<1x256xf32>
    %611 = arith.addf %606, %610 : vector<1x256xf32>
    %612 = vector.broadcast %611 : vector<1x256xf32> to vector<256x256xf32>
    %613 = arith.cmpf oeq, %169, %612 : vector<256x256xf32>
    %cst_295 = arith.constant 0.000000e+00 : f32
    %614 = vector.shape_cast %593 : vector<1x256xf32> to vector<1x256xf32>
    %615 = vector.broadcast %614 : vector<1x256xf32> to vector<256x256xf32>
    %616 = vector.broadcast %cst_295 : f32 to vector<256x256xf32>
    %617 = arith.select %613, %615, %616 : vector<256x256xi1>, vector<256x256xf32>
    %618 = arith.addf %565, %617 : vector<256x256xf32>
    %c0_296 = arith.constant 0 : index
    %c0_297 = arith.constant 0 : index
    %c0_298 = arith.constant 0 : index
    %619 = vector.load %arg4[%c0_296, %c0_297, %c0_298] : memref<1x6x256xf32, #tpu.memory_space<vmem>>, vector<1x6x256xf32>
    %620 = vector.shape_cast %619 : vector<1x6x256xf32> to vector<6x256xf32>
    %cst_299 = arith.constant dense<0.000000e+00> : vector<6x256xf32>
    %621 = tpu.matmul %620, %618, %cst_299 {dimension_numbers = #tpu.dot_dimension_numbers<[1], [0], [0], [1], [0, 0, 1, 1], [], []>} : vector<6x256xf32>, vector<256x256xf32>, vector<6x256xf32> -> vector<6x256xf32>
    %c0_300 = arith.constant 0 : index
    %c0_301 = arith.constant 0 : index
    %c0_302 = arith.constant 0 : index
    %c0_303 = arith.constant 0 : index
    %622 = vector.load %arg8[%c0_300, %c0_301, %c0_302, %c0_303] : memref<1x1x6x256xf32, #tpu.memory_space<vmem>>, vector<1x1x6x256xf32>
    %623 = vector.shape_cast %622 : vector<1x1x6x256xf32> to vector<6x256xf32>
    %624 = vector.shape_cast %621 : vector<6x256xf32> to vector<1x1x6x256xf32>
    tpu.vector_store %arg8[%c0_300, %c0_301, %c0_302, %c0_303], %624 {strides = array<i32>} : memref<1x1x6x256xf32, #tpu.memory_space<vmem>>, vector<1x1x6x256xf32>,
    return
  }
  func.func @transform_0(%arg0: i32, %arg1: i32) -> (i32, i32, i32) {
    %c0_i32 = arith.constant 0 : i32
    %c0_i32_0 = arith.constant 0 : i32
    %c0_i32_1 = arith.constant 0 : i32
    return %arg0, %c0_i32, %c0_i32_0 : i32, i32, i32
  }
  func.func @transform_1(%arg0: i32, %arg1: i32) -> (i32, i32, i32) {
    %c0_i32 = arith.constant 0 : i32
    %c0_i32_0 = arith.constant 0 : i32
    %c0_i32_1 = arith.constant 0 : i32
    return %arg0, %c0_i32, %c0_i32_0 : i32, i32, i32
  }
  func.func @transform_2(%arg0: i32, %arg1: i32) -> (i32, i32, i32) {
    %c0_i32 = arith.constant 0 : i32
    %c0_i32_0 = arith.constant 0 : i32
    %c0_i32_1 = arith.constant 0 : i32
    return %arg0, %c0_i32, %c0_i32_0 : i32, i32, i32
  }
  func.func @transform_3(%arg0: i32, %arg1: i32) -> (i32, i32) {
    %c0_i32 = arith.constant 0 : i32
    %c0_i32_0 = arith.constant 0 : i32
    %c0_i32_1 = arith.constant 0 : i32
    return %c0_i32, %c0_i32_0 : i32, i32
  }
  func.func @transform_4(%arg0: i32, %arg1: i32) -> (i32, i32, i32, i32) {
    %c0_i32 = arith.constant 0 : i32
    %c0_i32_0 = arith.constant 0 : i32
    %c0_i32_1 = arith.constant 0 : i32
    %c0_i32_2 = arith.constant 0 : i32
    return %arg1, %c0_i32, %c0_i32_0, %c0_i32_1 : i32, i32, i32, i32
  }
  func.func @transform_5(%arg0: i32, %arg1: i32) -> (i32, i32, i32, i32) {
    %c0_i32 = arith.constant 0 : i32
    %c0_i32_0 = arith.constant 0 : i32
    %c0_i32_1 = arith.constant 0 : i32
    %c0_i32_2 = arith.constant 0 : i32
    return %arg1, %c0_i32, %c0_i32_0, %c0_i32_1 : i32, i32, i32, i32
  }
  func.func @transform_6(%arg0: i32, %arg1: i32) -> (i32, i32, i32, i32) {
    %c0_i32 = arith.constant 0 : i32
    %c0_i32_0 = arith.constant 0 : i32
    %c0_i32_1 = arith.constant 0 : i32
    return %arg0, %arg1, %c0_i32, %c0_i32_0 : i32, i32, i32, i32
  }
}

</mosaic_0001>

<bundles_post_ra>
// kernel: aligned_module_forward.4
= control target key start
LH: loop header
LB: loop body
LE: loop exit
PB: predicated region body
PF: predicated region fallthrough
CT: control target
= control target key end

     0   :  { %s1534_s12 = smov 0   ;;  %s3148_s0 = inlined_call_operand.vmem [shape: f32[2,6,256], index: 0, kind: input, shape index: {}]   ;;  %s3149_s1 = inlined_call_operand.vmem [shape: f32[4,6], index: 1, kind: input, shape index: {}]   ;;  %s3150_s2 = inlined_call_operand.vmem [shape: f32[256,2048], index: 2, kind: input, shape index: {}]   ;;  %s3151_s3 = inlined_call_operand.vmem [shape: f32[2,4,2048], index: 3, kind: output, shape index: {}]  }
   0x1 LB: > { %s1481_s13 = sadd.s32 4294967295, %s1512_s12   ;;  %p1485_p0 = scmp.ge.s32.totalorder %s1512_s12, 1  ;;  %s1512_s12 = sphi %s1534_s12, %s13_s12  }
   0x2   : > { %p137_p1 = scmp.lt.s32.totalorder %s1512_s12, 3 }
   0x4   : > { %p138_p2 = pnand %p1485_p0, %p137_p1 }
   0x5   : > { %p161_p3 = scmp.lt.s32.totalorder (!%p138_p2), %s1481_s13, 1 }
   0x6   : > { %141 = sbr.rel (%p138_p2) target bundleno = 486 (0x1e6), region = 32 }
   0xb   : > { %v465_v0 = vld [vmem:[%s3150_s2 + $0x780] sm:$0xff]  ;;  %s3153_s13 = smov (!%p161_p3, %s1481_s13), 1  ;;  %vm178_vm0 = vcmask 1045504   ;;  %vm174_vm1 = vcmask 48128   ;;  %v466_v7 = vld [vmem:[%s3150_s2 + $0x788] sm:$0xff]  ;;  %v467_v63 = vld [vmem:[%s3150_s2 + $0x790] sm:$0xff] }
   0xc   : > { %737 = vmatpush.msra.mxu2 %v465_v0  ;;  %v721_v1 = vld [vmem:[%s3150_s2 + $0xf80] sm:$0xff]  ;;  %s1496_s26 = sshll.u32 %s3153_s13, 4  ;;  %v722_v10 = vld [vmem:[%s3150_s2 + $0xf88] sm:$0xff]  ;;  %v723_v0 = vld [vmem:[%s3150_s2 + $0xf90] sm:$0xff]  ;;  %s1497_s14 = sshll.u32 %s3153_s13, 6  ;;  %vm1401_vm2 = vcmask 1043456  }
   0xd   : > { %757 = vmatpush.msra.mxu3 %v721_v1  ;;  %v449_v2 = vld [vmem:[%s3150_s2 + $0x700] sm:$0xff]  ;;  %s165_s29 = scalar_lea.vmem %s3148_s0, %s1496_s26  ;;  %v450_v13 = vld [vmem:[%s3150_s2 + $0x708] sm:$0xff]  ;;  %s2713_s28 = scalar_lea.vmem %s3151_s3, %s1497_s14 }
   0xe   : > { %v705_v3 = vld [vmem:[%s3150_s2 + $0xf00] sm:$0xff]  ;;  %738 = vmatpush.msra.mxu2 %v449_v2  ;;  %v173_v9 = vld [vmem:[%s165_s29 + $0x8] sm:$0x3f] }
   0xf   : > { %v433_v4 = vld [vmem:[%s3150_s2 + $0x680] sm:$0xff]  ;;  %758 = vmatpush.msra.mxu3 %v705_v3  ;;  %1492 = vmatpush.msk.msra.mxu1 %vm178_vm0, %v173_v9  ;;  %v706_v14 = vld [vmem:[%s3150_s2 + $0xf08] sm:$0xff]  ;;  %v451_v3 = vld [vmem:[%s3150_s2 + $0x710] sm:$0xff] }
  0x10   : > { %v689_v5 = vld [vmem:[%s3150_s2 + $0xe80] sm:$0xff]  ;;  %739 = vmatpush.msra.mxu2 %v433_v4  ;;  %v434_v17 = vld [vmem:[%s3150_s2 + $0x688] sm:$0xff]  ;;  %v707_v4 = vld [vmem:[%s3150_s2 + $0xf10] sm:$0xff] }
  0x11   : > { %v171_v6 = vld [vmem:[%s3149_s1] sm:$0xf]  ;;  %759 = vmatpush.msra.mxu3 %v689_v5  ;;  %797 = vmatpush.msrb.mxu1 %v722_v10  ;;  %v690_v18 = vld [vmem:[%s3150_s2 + $0xe88] sm:$0xff]  ;;  %v435_v9 = vld [vmem:[%s3150_s2 + $0x690] sm:$0xff] }
  0x12   : > { %v172_v8 = vld [vmem:[%s165_s29] sm:$0x3f]  ;;  %1493 = vmatmul.msk.f32.vlgmr.msra.gmra.mxu1 %vm174_vm1, %v171_v6  ;;  %v418_v21 = vld [vmem:[%s3150_s2 + $0x608] sm:$0xff]  ;;  %v691_v10 = vld [vmem:[%s3150_s2 + $0xe90] sm:$0xff] }
  0x13   : > { %1490 = vmatpush.msk.msra.mxu0 %vm178_vm0, %v172_v8  ;;  %v417_v11 = vld [vmem:[%s3150_s2 + $0x600] sm:$0xff]  ;;  %798 = vmatpush.msrb.mxu1 %v706_v14  ;;  %v674_v22 = vld [vmem:[%s3150_s2 + $0xe08] sm:$0xff]  ;;  %v724_v8 = vld [vmem:[%s3150_s2 + $0xf98] sm:$0xff] }
  0x14   : > { %v673_v12 = vld [vmem:[%s3150_s2 + $0xe00] sm:$0xff]  ;;  %1491 = vmatmul.msk.f32.vlgmr.msra.gmra.mxu0 %vm174_vm1, %v171_v6  ;;  %740 = vmatpush.msra.mxu2 %v417_v11  ;;  %v402_v25 = vld [vmem:[%s3150_s2 + $0x588] sm:$0xff]  ;;  %v452_v11 = vld [vmem:[%s3150_s2 + $0x718] sm:$0xff] }
  0x15   : > { %777 = vmatpush.msrb.mxu0 %v466_v7  ;;  %v401_v15 = vld [vmem:[%s3150_s2 + $0x580] sm:$0xff]  ;;  %760 = vmatpush.msra.mxu3 %v673_v12  ;;  %v658_v26 = vld [vmem:[%s3150_s2 + $0xd88] sm:$0xff]  ;;  %v468_v7 = vld [vmem:[%s3150_s2 + $0x798] sm:$0xff] }
  0x16   : > { %v657_v16 = vld [vmem:[%s3150_s2 + $0xd80] sm:$0xff]  ;;  %741 = vmatpush.msra.mxu2 %v401_v15  ;;  %799 = vmatpush.msrb.mxu1 %v690_v18  ;;  %v386_v29 = vld [vmem:[%s3150_s2 + $0x508] sm:$0xff]  ;;  %v708_v12 = vld [vmem:[%s3150_s2 + $0xf18] sm:$0xff] }
  0x17   : > { %778 = vmatpush.msrb.mxu0 %v450_v13  ;;  %v385_v19 = vld [vmem:[%s3150_s2 + $0x500] sm:$0xff]  ;;  %761 = vmatpush.msra.mxu3 %v657_v16  ;;  %v642_v30 = vld [vmem:[%s3150_s2 + $0xd08] sm:$0xff]  ;;  %v419_v13 = vld [vmem:[%s3150_s2 + $0x610] sm:$0xff] }
  0x18   : > { %v641_v20 = vld [vmem:[%s3150_s2 + $0xd00] sm:$0xff]  ;;  %742 = vmatpush.msra.mxu2 %v385_v19  ;;  %800 = vmatpush.msrb.mxu1 %v674_v22  ;;  %v370_v33 = vld [vmem:[%s3150_s2 + $0x488] sm:$0xff]  ;;  %v675_v14 = vld [vmem:[%s3150_s2 + $0xe10] sm:$0xff] }
  0x19   : > { %779 = vmatpush.msrb.mxu0 %v434_v17  ;;  %v369_v23 = vld [vmem:[%s3150_s2 + $0x480] sm:$0xff]  ;;  %762 = vmatpush.msra.mxu3 %v641_v20  ;;  %v626_v34 = vld [vmem:[%s3150_s2 + $0xc88] sm:$0xff]  ;;  %v436_v15 = vld [vmem:[%s3150_s2 + $0x698] sm:$0xff] }
  0x1a   : > { %v625_v24 = vld [vmem:[%s3150_s2 + $0xc80] sm:$0xff]  ;;  %743 = vmatpush.msra.mxu2 %v369_v23  ;;  %801 = vmatpush.msrb.mxu1 %v658_v26  ;;  %v354_v37 = vld [vmem:[%s3150_s2 + $0x408] sm:$0xff]  ;;  %v692_v16 = vld [vmem:[%s3150_s2 + $0xe98] sm:$0xff] }
  0x1b   : > { %780 = vmatpush.msrb.mxu0 %v418_v21  ;;  %v353_v27 = vld [vmem:[%s3150_s2 + $0x400] sm:$0xff]  ;;  %763 = vmatpush.msra.mxu3 %v625_v24  ;;  %v610_v38 = vld [vmem:[%s3150_s2 + $0xc08] sm:$0xff]  ;;  %v403_v17 = vld [vmem:[%s3150_s2 + $0x590] sm:$0xff] }
  0x1c   : > { %v609_v28 = vld [vmem:[%s3150_s2 + $0xc00] sm:$0xff]  ;;  %744 = vmatpush.msra.mxu2 %v353_v27  ;;  %802 = vmatpush.msrb.mxu1 %v642_v30  ;;  %v338_v41 = vld [vmem:[%s3150_s2 + $0x388] sm:$0xff]  ;;  %v659_v18 = vld [vmem:[%s3150_s2 + $0xd90] sm:$0xff] }
  0x1d   : > { %781 = vmatpush.msrb.mxu0 %v402_v25  ;;  %v337_v31 = vld [vmem:[%s3150_s2 + $0x380] sm:$0xff]  ;;  %764 = vmatpush.msra.mxu3 %v609_v28  ;;  %v594_v42 = vld [vmem:[%s3150_s2 + $0xb88] sm:$0xff]  ;;  %v420_v19 = vld [vmem:[%s3150_s2 + $0x618] sm:$0xff] }
  0x1e   : > { %v593_v32 = vld [vmem:[%s3150_s2 + $0xb80] sm:$0xff]  ;;  %745 = vmatpush.msra.mxu2 %v337_v31  ;;  %803 = vmatpush.msrb.mxu1 %v626_v34  ;;  %v322_v45 = vld [vmem:[%s3150_s2 + $0x308] sm:$0xff]  ;;  %v676_v20 = vld [vmem:[%s3150_s2 + $0xe18] sm:$0xff] }
  0x1f   : > { %782 = vmatpush.msrb.mxu0 %v386_v29  ;;  %v321_v35 = vld [vmem:[%s3150_s2 + $0x300] sm:$0xff]  ;;  %765 = vmatpush.msra.mxu3 %v593_v32  ;;  %v578_v46 = vld [vmem:[%s3150_s2 + $0xb08] sm:$0xff]  ;;  %v387_v21 = vld [vmem:[%s3150_s2 + $0x510] sm:$0xff] }
  0x20   : > { %v577_v36 = vld [vmem:[%s3150_s2 + $0xb00] sm:$0xff]  ;;  %746 = vmatpush.msra.mxu2 %v321_v35  ;;  %804 = vmatpush.msrb.mxu1 %v610_v38  ;;  %v306_v49 = vld [vmem:[%s3150_s2 + $0x288] sm:$0xff]  ;;  %v643_v22 = vld [vmem:[%s3150_s2 + $0xd10] sm:$0xff] }
  0x21   : > { %783 = vmatpush.msrb.mxu0 %v370_v33  ;;  %v305_v39 = vld [vmem:[%s3150_s2 + $0x280] sm:$0xff]  ;;  %766 = vmatpush.msra.mxu3 %v577_v36  ;;  %v562_v50 = vld [vmem:[%s3150_s2 + $0xa88] sm:$0xff]  ;;  %v404_v23 = vld [vmem:[%s3150_s2 + $0x598] sm:$0xff] }
  0x22   : > { %v561_v40 = vld [vmem:[%s3150_s2 + $0xa80] sm:$0xff]  ;;  %747 = vmatpush.msra.mxu2 %v305_v39  ;;  %805 = vmatpush.msrb.mxu1 %v594_v42  ;;  %v290_v53 = vld [vmem:[%s3150_s2 + $0x208] sm:$0xff]  ;;  %v660_v24 = vld [vmem:[%s3150_s2 + $0xd98] sm:$0xff] }
  0x23   : > { %784 = vmatpush.msrb.mxu0 %v354_v37  ;;  %v289_v43 = vld [vmem:[%s3150_s2 + $0x200] sm:$0xff]  ;;  %767 = vmatpush.msra.mxu3 %v561_v40  ;;  %v546_v54 = vld [vmem:[%s3150_s2 + $0xa08] sm:$0xff]  ;;  %v371_v25 = vld [vmem:[%s3150_s2 + $0x490] sm:$0xff] }
  0x24   : > { %v545_v44 = vld [vmem:[%s3150_s2 + $0xa00] sm:$0xff]  ;;  %748 = vmatpush.msra.mxu2 %v289_v43  ;;  %806 = vmatpush.msrb.mxu1 %v578_v46  ;;  %v274_v57 = vld [vmem:[%s3150_s2 + $0x188] sm:$0xff]  ;;  %v627_v26 = vld [vmem:[%s3150_s2 + $0xc90] sm:$0xff] }
  0x25   : > { %785 = vmatpush.msrb.mxu0 %v338_v41  ;;  %v273_v47 = vld [vmem:[%s3150_s2 + $0x180] sm:$0xff]  ;;  %768 = vmatpush.msra.mxu3 %v545_v44  ;;  %v530_v58 = vld [vmem:[%s3150_s2 + $0x988] sm:$0xff]  ;;  %v388_v27 = vld [vmem:[%s3150_s2 + $0x518] sm:$0xff] }
  0x26   : > { %v529_v48 = vld [vmem:[%s3150_s2 + $0x980] sm:$0xff]  ;;  %749 = vmatpush.msra.mxu2 %v273_v47  ;;  %807 = vmatpush.msrb.mxu1 %v562_v50  ;;  %v258_v61 = vld [vmem:[%s3150_s2 + $0x108] sm:$0xff]  ;;  %v644_v28 = vld [vmem:[%s3150_s2 + $0xd18] sm:$0xff] }
  0x27   : > { %786 = vmatpush.msrb.mxu0 %v322_v45  ;;  %v257_v51 = vld [vmem:[%s3150_s2 + $0x100] sm:$0xff]  ;;  %769 = vmatpush.msra.mxu3 %v529_v48  ;;  %v514_v62 = vld [vmem:[%s3150_s2 + $0x908] sm:$0xff]  ;;  %v355_v29 = vld [vmem:[%s3150_s2 + $0x410] sm:$0xff] }
  0x28   : > { %v513_v52 = vld [vmem:[%s3150_s2 + $0x900] sm:$0xff]  ;;  %750 = vmatpush.msra.mxu2 %v257_v51  ;;  %808 = vmatpush.msrb.mxu1 %v546_v54  ;;  %v242_v1 = vld [vmem:[%s3150_s2 + $0x88] sm:$0xff]  ;;  %v611_v30 = vld [vmem:[%s3150_s2 + $0xc10] sm:$0xff] }
  0x29   : > { %787 = vmatpush.msrb.mxu0 %v306_v49  ;;  %v241_v55 = vld [vmem:[%s3150_s2 + $0x80] sm:$0xff]  ;;  %770 = vmatpush.msra.mxu3 %v513_v52  ;;  %v498_v2 = vld [vmem:[%s3150_s2 + $0x888] sm:$0xff]  ;;  %v372_v31 = vld [vmem:[%s3150_s2 + $0x498] sm:$0xff] }
  0x2a   : > { %v497_v56 = vld [vmem:[%s3150_s2 + $0x880] sm:$0xff]  ;;  %751 = vmatpush.msra.mxu2 %v241_v55  ;;  %809 = vmatpush.msrb.mxu1 %v530_v58  ;;  %v226_v5 = vld [vmem:[%s3150_s2 + $0x8] sm:$0xff]  ;;  %v628_v32 = vld [vmem:[%s3150_s2 + $0xc98] sm:$0xff] }
  0x2b   : > { %788 = vmatpush.msrb.mxu0 %v290_v53  ;;  %v225_v59 = vld [vmem:[%s3150_s2] sm:$0xff]  ;;  %771 = vmatpush.msra.mxu3 %v497_v56  ;;  %v482_v6 = vld [vmem:[%s3150_s2 + $0x808] sm:$0xff]  ;;  %v339_v33 = vld [vmem:[%s3150_s2 + $0x390] sm:$0xff] }
  0x2c   : > { %v481_v60 = vld [vmem:[%s3150_s2 + $0x800] sm:$0xff]  ;;  %752 = vmatpush.msra.mxu2 %v225_v59  ;;  %810 = vmatpush.msrb.mxu1 %v514_v62  ;;  %v595_v34 = vld [vmem:[%s3150_s2 + $0xb90] sm:$0xff]  ;;  %v356_v35 = vld [vmem:[%s3150_s2 + $0x418] sm:$0xff] }
  0x2d   : > { %789 = vmatpush.msrb.mxu0 %v274_v57  ;;  %772 = vmatpush.msra.mxu3 %v481_v60  ;;  %v612_v36 = vld [vmem:[%s3150_s2 + $0xc18] sm:$0xff]  ;;  %v323_v37 = vld [vmem:[%s3150_s2 + $0x310] sm:$0xff] }
  0x2e   : > { %817 = vmatpush.msrb.mxu2 %v467_v63  ;;  %811 = vmatpush.msrb.mxu1 %v498_v2  ;;  %v579_v38 = vld [vmem:[%s3150_s2 + $0xb10] sm:$0xff]  ;;  %v340_v39 = vld [vmem:[%s3150_s2 + $0x398] sm:$0xff] }
  0x2f   : > { %790 = vmatpush.msrb.mxu0 %v258_v61  ;;  %837 = vmatpush.msrb.mxu3 %v723_v0  ;;  %v596_v40 = vld [vmem:[%s3150_s2 + $0xb98] sm:$0xff]  ;;  %v307_v41 = vld [vmem:[%s3150_s2 + $0x290] sm:$0xff] }
  0x30   : > { %818 = vmatpush.msrb.mxu2 %v451_v3  ;;  %812 = vmatpush.msrb.mxu1 %v482_v6  ;;  %v563_v42 = vld [vmem:[%s3150_s2 + $0xa90] sm:$0xff]  ;;  %v324_v43 = vld [vmem:[%s3150_s2 + $0x318] sm:$0xff]  ;;  %v725_v6 = vld [vmem:[%s3150_s2 + $0xfa0] sm:$0xff] }
  0x31   : > { %791 = vmatpush.msrb.mxu0 %v242_v1  ;;  %838 = vmatpush.msrb.mxu3 %v707_v4  ;;  %v580_v44 = vld [vmem:[%s3150_s2 + $0xb18] sm:$0xff]  ;;  %v291_v45 = vld [vmem:[%s3150_s2 + $0x210] sm:$0xff] }
  0x32   : > { %877 = vmatpush.msra.mxu1 %v724_v8  ;;  %819 = vmatpush.msrb.mxu2 %v435_v9  ;;  %v547_v46 = vld [vmem:[%s3150_s2 + $0xa10] sm:$0xff]  ;;  %v308_v47 = vld [vmem:[%s3150_s2 + $0x298] sm:$0xff]  ;;  %v726_v8 = vld [vmem:[%s3150_s2 + $0xfa8] sm:$0xff] }
  0x33   : > { %792 = vmatpush.msrb.mxu0 %v226_v5  ;;  %839 = vmatpush.msrb.mxu3 %v691_v10  ;;  %v564_v48 = vld [vmem:[%s3150_s2 + $0xa98] sm:$0xff]  ;;  %v275_v49 = vld [vmem:[%s3150_s2 + $0x190] sm:$0xff]  ;;  %v469_v5 = vld [vmem:[%s3150_s2 + $0x7a0] sm:$0xff] }
  0x34   : > { %878 = vmatpush.msra.mxu1 %v708_v12  ;;  %820 = vmatpush.msrb.mxu2 %v419_v13  ;;  %v531_v50 = vld [vmem:[%s3150_s2 + $0x990] sm:$0xff]  ;;  %v292_v51 = vld [vmem:[%s3150_s2 + $0x218] sm:$0xff]  ;;  %v453_v9 = vld [vmem:[%s3150_s2 + $0x720] sm:$0xff] }
  0x35   : > { %857 = vmatpush.msra.mxu0 %v468_v7  ;;  %840 = vmatpush.msrb.mxu3 %v675_v14  ;;  %v548_v52 = vld [vmem:[%s3150_s2 + $0xa18] sm:$0xff]  ;;  %v259_v53 = vld [vmem:[%s3150_s2 + $0x110] sm:$0xff]  ;;  %v470_v7 = vld [vmem:[%s3150_s2 + $0x7a8] sm:$0xff] }
  0x36   : > { %879 = vmatpush.msra.mxu1 %v692_v16  ;;  %821 = vmatpush.msrb.mxu2 %v403_v17  ;;  %v515_v54 = vld [vmem:[%s3150_s2 + $0x910] sm:$0xff]  ;;  %v276_v55 = vld [vmem:[%s3150_s2 + $0x198] sm:$0xff]  ;;  %v709_v10 = vld [vmem:[%s3150_s2 + $0xf20] sm:$0xff] }
  0x37   : > { %858 = vmatpush.msra.mxu0 %v452_v11  ;;  %841 = vmatpush.msrb.mxu3 %v659_v18  ;;  %v532_v56 = vld [vmem:[%s3150_s2 + $0x998] sm:$0xff]  ;;  %v243_v57 = vld [vmem:[%s3150_s2 + $0x90] sm:$0xff]  ;;  %v454_v11 = vld [vmem:[%s3150_s2 + $0x728] sm:$0xff] }
  0x38   : > { %880 = vmatpush.msra.mxu1 %v676_v20  ;;  %822 = vmatpush.msrb.mxu2 %v387_v21  ;;  %v499_v58 = vld [vmem:[%s3150_s2 + $0x890] sm:$0xff]  ;;  %v260_v59 = vld [vmem:[%s3150_s2 + $0x118] sm:$0xff]  ;;  %v710_v12 = vld [vmem:[%s3150_s2 + $0xf28] sm:$0xff] }
  0x39   : > { %859 = vmatpush.msra.mxu0 %v436_v15  ;;  %842 = vmatpush.msrb.mxu3 %v643_v22  ;;  %v516_v60 = vld [vmem:[%s3150_s2 + $0x918] sm:$0xff]  ;;  %v227_v63 = vld [vmem:[%s3150_s2 + $0x10] sm:$0xff]  ;;  %v437_v13 = vld [vmem:[%s3150_s2 + $0x6a0] sm:$0xff] }
  0x3a   : > { %881 = vmatpush.msra.mxu1 %v660_v24  ;;  %823 = vmatpush.msrb.mxu2 %v371_v25  ;;  %v244_v61 = vld [vmem:[%s3150_s2 + $0x98] sm:$0xff]  ;;  %v483_v0 = vld [vmem:[%s3150_s2 + $0x810] sm:$0xff]  ;;  %v693_v14 = vld [vmem:[%s3150_s2 + $0xea0] sm:$0xff] }
  0x3b   : > { %860 = vmatpush.msra.mxu0 %v420_v19  ;;  %843 = vmatpush.msrb.mxu3 %v627_v26  ;;  %v500_v62 = vld [vmem:[%s3150_s2 + $0x898] sm:$0xff]  ;;  %v438_v15 = vld [vmem:[%s3150_s2 + $0x6a8] sm:$0xff]  ;;  %v421_v17 = vld [vmem:[%s3150_s2 + $0x620] sm:$0xff] }
  0x3c   : > { %882 = vmatpush.msra.mxu1 %v644_v28  ;;  %824 = vmatpush.msrb.mxu2 %v355_v29  ;;  %v228_v1 = vld [vmem:[%s3150_s2 + $0x18] sm:$0xff]  ;;  %v694_v16 = vld [vmem:[%s3150_s2 + $0xea8] sm:$0xff]  ;;  %v677_v18 = vld [vmem:[%s3150_s2 + $0xe20] sm:$0xff] }
  0x3d   : > { %861 = vmatpush.msra.mxu0 %v404_v23  ;;  %844 = vmatpush.msrb.mxu3 %v611_v30  ;;  %v484_v2 = vld [vmem:[%s3150_s2 + $0x818] sm:$0xff]  ;;  %v422_v19 = vld [vmem:[%s3150_s2 + $0x628] sm:$0xff]  ;;  %v405_v21 = vld [vmem:[%s3150_s2 + $0x5a0] sm:$0xff] }
  0x3e   : > { %883 = vmatpush.msra.mxu1 %v628_v32  ;;  %825 = vmatpush.msrb.mxu2 %v339_v33  ;;  %v678_v20 = vld [vmem:[%s3150_s2 + $0xe28] sm:$0xff]  ;;  %v661_v22 = vld [vmem:[%s3150_s2 + $0xda0] sm:$0xff] }
  0x3f   : > { %862 = vmatpush.msra.mxu0 %v388_v27  ;;  %845 = vmatpush.msrb.mxu3 %v595_v34  ;;  %v406_v23 = vld [vmem:[%s3150_s2 + $0x5a8] sm:$0xff]  ;;  %v389_v25 = vld [vmem:[%s3150_s2 + $0x520] sm:$0xff] }
  0x40   : > { %884 = vmatpush.msra.mxu1 %v612_v36  ;;  %826 = vmatpush.msrb.mxu2 %v323_v37  ;;  %v662_v24 = vld [vmem:[%s3150_s2 + $0xda8] sm:$0xff]  ;;  %v645_v26 = vld [vmem:[%s3150_s2 + $0xd20] sm:$0xff] }
  0x41   : > { %863 = vmatpush.msra.mxu0 %v372_v31  ;;  %846 = vmatpush.msrb.mxu3 %v579_v38  ;;  %v390_v27 = vld [vmem:[%s3150_s2 + $0x528] sm:$0xff]  ;;  %v373_v29 = vld [vmem:[%s3150_s2 + $0x4a0] sm:$0xff] }
  0x42   : > { %885 = vmatpush.msra.mxu1 %v596_v40  ;;  %827 = vmatpush.msrb.mxu2 %v307_v41  ;;  %v646_v28 = vld [vmem:[%s3150_s2 + $0xd28] sm:$0xff]  ;;  %v629_v30 = vld [vmem:[%s3150_s2 + $0xca0] sm:$0xff] }
  0x43   : > { %864 = vmatpush.msra.mxu0 %v356_v35  ;;  %847 = vmatpush.msrb.mxu3 %v563_v42  ;;  %v374_v31 = vld [vmem:[%s3150_s2 + $0x4a8] sm:$0xff]  ;;  %v357_v33 = vld [vmem:[%s3150_s2 + $0x420] sm:$0xff] }
  0x44   : > { %886 = vmatpush.msra.mxu1 %v580_v44  ;;  %828 = vmatpush.msrb.mxu2 %v291_v45  ;;  %v630_v32 = vld [vmem:[%s3150_s2 + $0xca8] sm:$0xff]  ;;  %v613_v34 = vld [vmem:[%s3150_s2 + $0xc20] sm:$0xff] }
  0x45   : > { %865 = vmatpush.msra.mxu0 %v340_v39  ;;  %848 = vmatpush.msrb.mxu3 %v547_v46  ;;  %v358_v35 = vld [vmem:[%s3150_s2 + $0x428] sm:$0xff]  ;;  %v341_v37 = vld [vmem:[%s3150_s2 + $0x3a0] sm:$0xff] }
  0x46   : > { %887 = vmatpush.msra.mxu1 %v564_v48  ;;  %829 = vmatpush.msrb.mxu2 %v275_v49  ;;  %v614_v36 = vld [vmem:[%s3150_s2 + $0xc28] sm:$0xff]  ;;  %v597_v38 = vld [vmem:[%s3150_s2 + $0xba0] sm:$0xff] }
  0x47   : > { %866 = vmatpush.msra.mxu0 %v324_v43  ;;  %849 = vmatpush.msrb.mxu3 %v531_v50  ;;  %v342_v39 = vld [vmem:[%s3150_s2 + $0x3a8] sm:$0xff]  ;;  %v325_v41 = vld [vmem:[%s3150_s2 + $0x320] sm:$0xff] }
  0x48   : > { %888 = vmatpush.msra.mxu1 %v548_v52  ;;  %830 = vmatpush.msrb.mxu2 %v259_v53  ;;  %v598_v40 = vld [vmem:[%s3150_s2 + $0xba8] sm:$0xff]  ;;  %v581_v42 = vld [vmem:[%s3150_s2 + $0xb20] sm:$0xff] }
  0x49   : > { %867 = vmatpush.msra.mxu0 %v308_v47  ;;  %850 = vmatpush.msrb.mxu3 %v515_v54  ;;  %v326_v43 = vld [vmem:[%s3150_s2 + $0x328] sm:$0xff]  ;;  %v309_v45 = vld [vmem:[%s3150_s2 + $0x2a0] sm:$0xff] }
  0x4a   : > { %889 = vmatpush.msra.mxu1 %v532_v56  ;;  %831 = vmatpush.msrb.mxu2 %v243_v57  ;;  %v582_v44 = vld [vmem:[%s3150_s2 + $0xb28] sm:$0xff]  ;;  %v565_v46 = vld [vmem:[%s3150_s2 + $0xaa0] sm:$0xff] }
  0x4b   : > { %868 = vmatpush.msra.mxu0 %v292_v51  ;;  %851 = vmatpush.msrb.mxu3 %v499_v58  ;;  %v310_v47 = vld [vmem:[%s3150_s2 + $0x2a8] sm:$0xff]  ;;  %v293_v49 = vld [vmem:[%s3150_s2 + $0x220] sm:$0xff] }
  0x4c   : > { %890 = vmatpush.msra.mxu1 %v516_v60  ;;  %832 = vmatpush.msrb.mxu2 %v227_v63  ;;  %v566_v48 = vld [vmem:[%s3150_s2 + $0xaa8] sm:$0xff]  ;;  %v549_v50 = vld [vmem:[%s3150_s2 + $0xa20] sm:$0xff] }
  0x4d   : > { %869 = vmatpush.msra.mxu0 %v276_v55  ;;  %852 = vmatpush.msrb.mxu3 %v483_v0  ;;  %v294_v51 = vld [vmem:[%s3150_s2 + $0x228] sm:$0xff]  ;;  %v277_v53 = vld [vmem:[%s3150_s2 + $0x1a0] sm:$0xff] }
  0x4e   : > { %891 = vmatpush.msra.mxu1 %v500_v62  ;;  %v550_v52 = vld [vmem:[%s3150_s2 + $0xa28] sm:$0xff]  ;;  %v533_v54 = vld [vmem:[%s3150_s2 + $0x9a0] sm:$0xff] }
  0x4f   : > { %870 = vmatpush.msra.mxu0 %v260_v59  ;;  %v278_v55 = vld [vmem:[%s3150_s2 + $0x1a8] sm:$0xff]  ;;  %v261_v57 = vld [vmem:[%s3150_s2 + $0x120] sm:$0xff] }
  0x50   : > { %892 = vmatpush.msra.mxu1 %v484_v2  ;;  %v534_v56 = vld [vmem:[%s3150_s2 + $0x9a8] sm:$0xff]  ;;  %v517_v58 = vld [vmem:[%s3150_s2 + $0x920] sm:$0xff] }
  0x51   : > { %871 = vmatpush.msra.mxu0 %v244_v61  ;;  %v262_v59 = vld [vmem:[%s3150_s2 + $0x128] sm:$0xff]  ;;  %v245_v61 = vld [vmem:[%s3150_s2 + $0xa0] sm:$0xff] }
  0x52   : > { %v518_v60 = vld [vmem:[%s3150_s2 + $0x928] sm:$0xff]  ;;  %v501_v62 = vld [vmem:[%s3150_s2 + $0x8a0] sm:$0xff] }
  0x53   : > { %872 = vmatpush.msra.mxu0 %v228_v1  ;;  %v246_v63 = vld [vmem:[%s3150_s2 + $0xa8] sm:$0xff]  ;;  %v229_v1 = vld [vmem:[%s3150_s2 + $0x20] sm:$0xff] }
  0x54   : > { %v502_v0 = vld [vmem:[%s3150_s2 + $0x8a8] sm:$0xff]  ;;  %v485_v2 = vld [vmem:[%s3150_s2 + $0x820] sm:$0xff] }
  0x8f   : > { %v1937_v4 = vpop.f32.mrf.mxu1 }
  0x90   : > { %773 = vmatmul.f32.vlgmr.msra.gmra.mxu3 %v1937_v4  ;;  %813 = vmatmul.f32.vlgmr.msrb.gmra.mxu1 %v1937_v4 }
  0x91   : > { %v1935_v3 = vpop.f32.mrf.mxu0  ;;  %917 = vmatpush.msra.mxu3 %v725_v6  ;;  %957 = vmatpush.msrb.mxu1 %v726_v8  ;;  %v486_v6 = vld [vmem:[%s3150_s2 + $0x828] sm:$0xff]  ;;  %v727_v8 = vld [vmem:[%s3150_s2 + $0xfb0] sm:$0xff] }
  0x92   : > { %753 = vmatmul.f32.vlgmr.msra.gmra.mxu2 %v1935_v3  ;;  %793 = vmatmul.f32.vlgmr.msrb.gmra.mxu0 %v1935_v3 }
  0x93   : > { %897 = vmatpush.msra.mxu2 %v469_v5  ;;  %937 = vmatpush.msrb.mxu0 %v470_v7  ;;  %v230_v5 = vld [vmem:[%s3150_s2 + $0x28] sm:$0xff]  ;;  %v471_v7 = vld [vmem:[%s3150_s2 + $0x7b0] sm:$0xff] }
  0x94   : > { %918 = vmatpush.msra.mxu3 %v709_v10  ;;  %958 = vmatpush.msrb.mxu1 %v710_v12  ;;  %v728_v10 = vld [vmem:[%s3150_s2 + $0xfb8] sm:$0xff]  ;;  %v711_v12 = vld [vmem:[%s3150_s2 + $0xf30] sm:$0xff] }
  0x95   : > { %898 = vmatpush.msra.mxu2 %v453_v9  ;;  %938 = vmatpush.msrb.mxu0 %v454_v11  ;;  %v472_v9 = vld [vmem:[%s3150_s2 + $0x7b8] sm:$0xff]  ;;  %v455_v11 = vld [vmem:[%s3150_s2 + $0x730] sm:$0xff] }
  0x96   : > { %919 = vmatpush.msra.mxu3 %v693_v14  ;;  %959 = vmatpush.msrb.mxu1 %v694_v16  ;;  %v712_v14 = vld [vmem:[%s3150_s2 + $0xf38] sm:$0xff]  ;;  %v695_v16 = vld [vmem:[%s3150_s2 + $0xeb0] sm:$0xff] }
  0x97   : > { %899 = vmatpush.msra.mxu2 %v437_v13  ;;  %939 = vmatpush.msrb.mxu0 %v438_v15  ;;  %v456_v13 = vld [vmem:[%s3150_s2 + $0x738] sm:$0xff]  ;;  %v439_v15 = vld [vmem:[%s3150_s2 + $0x6b0] sm:$0xff] }
  0x98   : > { %920 = vmatpush.msra.mxu3 %v677_v18  ;;  %960 = vmatpush.msrb.mxu1 %v678_v20  ;;  %v696_v18 = vld [vmem:[%s3150_s2 + $0xeb8] sm:$0xff]  ;;  %v679_v20 = vld [vmem:[%s3150_s2 + $0xe30] sm:$0xff] }
  0x99   : > { %900 = vmatpush.msra.mxu2 %v421_v17  ;;  %940 = vmatpush.msrb.mxu0 %v422_v19  ;;  %v440_v17 = vld [vmem:[%s3150_s2 + $0x6b8] sm:$0xff]  ;;  %v423_v19 = vld [vmem:[%s3150_s2 + $0x630] sm:$0xff] }
  0x9a   : > { %833 = vmatmul.f32.vlgmr.msrb.gmra.mxu2 %v1935_v3  ;;  %853 = vmatmul.f32.vlgmr.msrb.gmra.mxu3 %v1937_v4 }
  0x9b   : > { %873 = vmatmul.f32.vlgmr.msra.gmra.mxu0 %v1935_v3  ;;  %893 = vmatmul.f32.vlgmr.msra.gmra.mxu1 %v1937_v4 }
  0x9c   : > { %901 = vmatpush.msra.mxu2 %v405_v21  ;;  %921 = vmatpush.msra.mxu3 %v661_v22  ;;  %v424_v21 = vld [vmem:[%s3150_s2 + $0x638] sm:$0xff] }
  0x9d   : > { %941 = vmatpush.msrb.mxu0 %v406_v23  ;;  %961 = vmatpush.msrb.mxu1 %v662_v24  ;;  %v680_v22 = vld [vmem:[%s3150_s2 + $0xe38] sm:$0xff]  ;;  %v407_v23 = vld [vmem:[%s3150_s2 + $0x5b0] sm:$0xff] }
  0x9e   : > { %902 = vmatpush.msra.mxu2 %v389_v25  ;;  %922 = vmatpush.msra.mxu3 %v645_v26  ;;  %v663_v24 = vld [vmem:[%s3150_s2 + $0xdb0] sm:$0xff]  ;;  %v408_v25 = vld [vmem:[%s3150_s2 + $0x5b8] sm:$0xff] }
  0x9f   : > { %942 = vmatpush.msrb.mxu0 %v390_v27  ;;  %962 = vmatpush.msrb.mxu1 %v646_v28  ;;  %v664_v26 = vld [vmem:[%s3150_s2 + $0xdb8] sm:$0xff]  ;;  %v391_v27 = vld [vmem:[%s3150_s2 + $0x530] sm:$0xff] }
  0xa0   : > { %903 = vmatpush.msra.mxu2 %v373_v29  ;;  %923 = vmatpush.msra.mxu3 %v629_v30  ;;  %v647_v28 = vld [vmem:[%s3150_s2 + $0xd30] sm:$0xff]  ;;  %v392_v29 = vld [vmem:[%s3150_s2 + $0x538] sm:$0xff] }
  0xa1   : > { %943 = vmatpush.msrb.mxu0 %v374_v31  ;;  %963 = vmatpush.msrb.mxu1 %v630_v32  ;;  %v648_v30 = vld [vmem:[%s3150_s2 + $0xd38] sm:$0xff]  ;;  %v375_v31 = vld [vmem:[%s3150_s2 + $0x4b0] sm:$0xff] }
  0xa2   : > { %904 = vmatpush.msra.mxu2 %v357_v33  ;;  %924 = vmatpush.msra.mxu3 %v613_v34  ;;  %v631_v32 = vld [vmem:[%s3150_s2 + $0xcb0] sm:$0xff]  ;;  %v376_v33 = vld [vmem:[%s3150_s2 + $0x4b8] sm:$0xff] }
  0xa3   : > { %944 = vmatpush.msrb.mxu0 %v358_v35  ;;  %964 = vmatpush.msrb.mxu1 %v614_v36  ;;  %v632_v34 = vld [vmem:[%s3150_s2 + $0xcb8] sm:$0xff]  ;;  %v359_v35 = vld [vmem:[%s3150_s2 + $0x430] sm:$0xff] }
  0xa4   : > { %905 = vmatpush.msra.mxu2 %v341_v37  ;;  %925 = vmatpush.msra.mxu3 %v597_v38  ;;  %v615_v36 = vld [vmem:[%s3150_s2 + $0xc30] sm:$0xff]  ;;  %v360_v37 = vld [vmem:[%s3150_s2 + $0x438] sm:$0xff] }
  0xa5   : > { %945 = vmatpush.msrb.mxu0 %v342_v39  ;;  %965 = vmatpush.msrb.mxu1 %v598_v40  ;;  %v616_v38 = vld [vmem:[%s3150_s2 + $0xc38] sm:$0xff]  ;;  %v343_v39 = vld [vmem:[%s3150_s2 + $0x3b0] sm:$0xff] }
  0xa6   : > { %906 = vmatpush.msra.mxu2 %v325_v41  ;;  %926 = vmatpush.msra.mxu3 %v581_v42  ;;  %v599_v40 = vld [vmem:[%s3150_s2 + $0xbb0] sm:$0xff]  ;;  %v344_v41 = vld [vmem:[%s3150_s2 + $0x3b8] sm:$0xff] }
  0xa7   : > { %946 = vmatpush.msrb.mxu0 %v326_v43  ;;  %966 = vmatpush.msrb.mxu1 %v582_v44  ;;  %v600_v42 = vld [vmem:[%s3150_s2 + $0xbb8] sm:$0xff]  ;;  %v327_v43 = vld [vmem:[%s3150_s2 + $0x330] sm:$0xff] }
  0xa8   : > { %907 = vmatpush.msra.mxu2 %v309_v45  ;;  %927 = vmatpush.msra.mxu3 %v565_v46  ;;  %v583_v44 = vld [vmem:[%s3150_s2 + $0xb30] sm:$0xff]  ;;  %v328_v45 = vld [vmem:[%s3150_s2 + $0x338] sm:$0xff] }
  0xa9   : > { %947 = vmatpush.msrb.mxu0 %v310_v47  ;;  %967 = vmatpush.msrb.mxu1 %v566_v48  ;;  %v584_v46 = vld [vmem:[%s3150_s2 + $0xb38] sm:$0xff]  ;;  %v311_v47 = vld [vmem:[%s3150_s2 + $0x2b0] sm:$0xff] }
  0xaa   : > { %908 = vmatpush.msra.mxu2 %v293_v49  ;;  %928 = vmatpush.msra.mxu3 %v549_v50  ;;  %v567_v48 = vld [vmem:[%s3150_s2 + $0xab0] sm:$0xff]  ;;  %v312_v49 = vld [vmem:[%s3150_s2 + $0x2b8] sm:$0xff] }
  0xab   : > { %948 = vmatpush.msrb.mxu0 %v294_v51  ;;  %968 = vmatpush.msrb.mxu1 %v550_v52  ;;  %v568_v50 = vld [vmem:[%s3150_s2 + $0xab8] sm:$0xff]  ;;  %v295_v51 = vld [vmem:[%s3150_s2 + $0x230] sm:$0xff] }
  0xac   : > { %909 = vmatpush.msra.mxu2 %v277_v53  ;;  %929 = vmatpush.msra.mxu3 %v533_v54  ;;  %v551_v52 = vld [vmem:[%s3150_s2 + $0xa30] sm:$0xff]  ;;  %v296_v53 = vld [vmem:[%s3150_s2 + $0x238] sm:$0xff] }
  0xad   : > { %949 = vmatpush.msrb.mxu0 %v278_v55  ;;  %969 = vmatpush.msrb.mxu1 %v534_v56  ;;  %v552_v54 = vld [vmem:[%s3150_s2 + $0xa38] sm:$0xff]  ;;  %v279_v55 = vld [vmem:[%s3150_s2 + $0x1b0] sm:$0xff] }
  0xae   : > { %910 = vmatpush.msra.mxu2 %v261_v57  ;;  %930 = vmatpush.msra.mxu3 %v517_v58  ;;  %v535_v56 = vld [vmem:[%s3150_s2 + $0x9b0] sm:$0xff]  ;;  %v280_v57 = vld [vmem:[%s3150_s2 + $0x1b8] sm:$0xff] }
  0xaf   : > { %950 = vmatpush.msrb.mxu0 %v262_v59  ;;  %970 = vmatpush.msrb.mxu1 %v518_v60  ;;  %v536_v58 = vld [vmem:[%s3150_s2 + $0x9b8] sm:$0xff]  ;;  %v263_v59 = vld [vmem:[%s3150_s2 + $0x130] sm:$0xff] }
  0xb0   : > { %911 = vmatpush.msra.mxu2 %v245_v61  ;;  %931 = vmatpush.msra.mxu3 %v501_v62  ;;  %v519_v60 = vld [vmem:[%s3150_s2 + $0x930] sm:$0xff]  ;;  %v264_v61 = vld [vmem:[%s3150_s2 + $0x138] sm:$0xff] }
  0xb1   : > { %951 = vmatpush.msrb.mxu0 %v246_v63  ;;  %971 = vmatpush.msrb.mxu1 %v502_v0  ;;  %v520_v62 = vld [vmem:[%s3150_s2 + $0x938] sm:$0xff]  ;;  %v247_v63 = vld [vmem:[%s3150_s2 + $0xb0] sm:$0xff] }
  0xb2   : > { %912 = vmatpush.msra.mxu2 %v229_v1  ;;  %932 = vmatpush.msra.mxu3 %v485_v2  ;;  %v503_v0 = vld [vmem:[%s3150_s2 + $0x8b0] sm:$0xff]  ;;  %v248_v1 = vld [vmem:[%s3150_s2 + $0xb8] sm:$0xff] }
  0xb3   : > { %952 = vmatpush.msrb.mxu0 %v230_v5  ;;  %972 = vmatpush.msrb.mxu1 %v486_v6  ;;  %v504_v2 = vld [vmem:[%s3150_s2 + $0x8b8] sm:$0xff]  ;;  %v231_v5 = vld [vmem:[%s3150_s2 + $0x30] sm:$0xff] }
  0xb4   : > { %913 = vmatmul.f32.vlgmr.msra.gmra.mxu2 %v1935_v3  ;;  %933 = vmatmul.f32.vlgmr.msra.gmra.mxu3 %v1937_v4  ;;  %v487_v6 = vld [vmem:[%s3150_s2 + $0x830] sm:$0xff] }
  0xb5   : > { %953 = vmatmul.f32.vlgmr.msrb.gmra.mxu0 %v1935_v3  ;;  %973 = vmatmul.f32.vlgmr.msrb.gmra.mxu1 %v1937_v4 }
  0xb6   : > { %977 = vmatpush.msrb.mxu2 %v471_v7  ;;  %997 = vmatpush.msrb.mxu3 %v727_v8  ;;  %v232_v7 = vld [vmem:[%s3150_s2 + $0x38] sm:$0xff] }
  0xb7   : > { %1017 = vmatpush.msra.mxu0 %v472_v9  ;;  %1037 = vmatpush.msra.mxu1 %v728_v10  ;;  %v488_v8 = vld [vmem:[%s3150_s2 + $0x838] sm:$0xff]  ;;  %v473_v9 = vld [vmem:[%s3150_s2 + $0x7c0] sm:$0xff] }
  0xb8   : > { %978 = vmatpush.msrb.mxu2 %v455_v11  ;;  %998 = vmatpush.msrb.mxu3 %v711_v12  ;;  %v729_v10 = vld [vmem:[%s3150_s2 + $0xfc0] sm:$0xff]  ;;  %v474_v11 = vld [vmem:[%s3150_s2 + $0x7c8] sm:$0xff] }
  0xb9   : > { %1018 = vmatpush.msra.mxu0 %v456_v13  ;;  %1038 = vmatpush.msra.mxu1 %v712_v14  ;;  %v730_v12 = vld [vmem:[%s3150_s2 + $0xfc8] sm:$0xff]  ;;  %v457_v13 = vld [vmem:[%s3150_s2 + $0x740] sm:$0xff] }
  0xba   : > { %979 = vmatpush.msrb.mxu2 %v439_v15  ;;  %999 = vmatpush.msrb.mxu3 %v695_v16  ;;  %v713_v14 = vld [vmem:[%s3150_s2 + $0xf40] sm:$0xff]  ;;  %v458_v15 = vld [vmem:[%s3150_s2 + $0x748] sm:$0xff] }
  0xbb   : > { %1019 = vmatpush.msra.mxu0 %v440_v17  ;;  %1039 = vmatpush.msra.mxu1 %v696_v18  ;;  %v714_v16 = vld [vmem:[%s3150_s2 + $0xf48] sm:$0xff]  ;;  %v441_v17 = vld [vmem:[%s3150_s2 + $0x6c0] sm:$0xff] }
  0xbc   : > { %980 = vmatpush.msrb.mxu2 %v423_v19  ;;  %1000 = vmatpush.msrb.mxu3 %v679_v20  ;;  %v697_v18 = vld [vmem:[%s3150_s2 + $0xec0] sm:$0xff]  ;;  %v442_v19 = vld [vmem:[%s3150_s2 + $0x6c8] sm:$0xff] }
  0xbd   : > { %1020 = vmatpush.msra.mxu0 %v424_v21  ;;  %1040 = vmatpush.msra.mxu1 %v680_v22  ;;  %v698_v20 = vld [vmem:[%s3150_s2 + $0xec8] sm:$0xff]  ;;  %v425_v21 = vld [vmem:[%s3150_s2 + $0x640] sm:$0xff] }
  0xbe   : > { %981 = vmatpush.msrb.mxu2 %v407_v23  ;;  %1001 = vmatpush.msrb.mxu3 %v663_v24  ;;  %v681_v22 = vld [vmem:[%s3150_s2 + $0xe40] sm:$0xff]  ;;  %v426_v23 = vld [vmem:[%s3150_s2 + $0x648] sm:$0xff] }
  0xbf   : > { %1021 = vmatpush.msra.mxu0 %v408_v25  ;;  %1041 = vmatpush.msra.mxu1 %v664_v26  ;;  %v682_v24 = vld [vmem:[%s3150_s2 + $0xe48] sm:$0xff]  ;;  %v409_v25 = vld [vmem:[%s3150_s2 + $0x5c0] sm:$0xff] }
  0xc0   : > { %982 = vmatpush.msrb.mxu2 %v391_v27  ;;  %1002 = vmatpush.msrb.mxu3 %v647_v28  ;;  %v665_v26 = vld [vmem:[%s3150_s2 + $0xdc0] sm:$0xff]  ;;  %v410_v27 = vld [vmem:[%s3150_s2 + $0x5c8] sm:$0xff] }
  0xc1   : > { %1022 = vmatpush.msra.mxu0 %v392_v29  ;;  %1042 = vmatpush.msra.mxu1 %v648_v30  ;;  %v666_v28 = vld [vmem:[%s3150_s2 + $0xdc8] sm:$0xff]  ;;  %v393_v29 = vld [vmem:[%s3150_s2 + $0x540] sm:$0xff] }
  0xc2   : > { %983 = vmatpush.msrb.mxu2 %v375_v31  ;;  %1003 = vmatpush.msrb.mxu3 %v631_v32  ;;  %v649_v30 = vld [vmem:[%s3150_s2 + $0xd40] sm:$0xff]  ;;  %v394_v31 = vld [vmem:[%s3150_s2 + $0x548] sm:$0xff] }
  0xc3   : > { %1023 = vmatpush.msra.mxu0 %v376_v33  ;;  %1043 = vmatpush.msra.mxu1 %v632_v34  ;;  %v650_v32 = vld [vmem:[%s3150_s2 + $0xd48] sm:$0xff]  ;;  %v377_v33 = vld [vmem:[%s3150_s2 + $0x4c0] sm:$0xff] }
  0xc4   : > { %984 = vmatpush.msrb.mxu2 %v359_v35  ;;  %1004 = vmatpush.msrb.mxu3 %v615_v36  ;;  %v633_v34 = vld [vmem:[%s3150_s2 + $0xcc0] sm:$0xff]  ;;  %v378_v35 = vld [vmem:[%s3150_s2 + $0x4c8] sm:$0xff] }
  0xc5   : > { %1024 = vmatpush.msra.mxu0 %v360_v37  ;;  %1044 = vmatpush.msra.mxu1 %v616_v38  ;;  %v634_v36 = vld [vmem:[%s3150_s2 + $0xcc8] sm:$0xff]  ;;  %v361_v37 = vld [vmem:[%s3150_s2 + $0x440] sm:$0xff] }
  0xc6   : > { %985 = vmatpush.msrb.mxu2 %v343_v39  ;;  %1005 = vmatpush.msrb.mxu3 %v599_v40  ;;  %v617_v38 = vld [vmem:[%s3150_s2 + $0xc40] sm:$0xff]  ;;  %v362_v39 = vld [vmem:[%s3150_s2 + $0x448] sm:$0xff] }
  0xc7   : > { %1025 = vmatpush.msra.mxu0 %v344_v41  ;;  %1045 = vmatpush.msra.mxu1 %v600_v42  ;;  %v618_v40 = vld [vmem:[%s3150_s2 + $0xc48] sm:$0xff]  ;;  %v345_v41 = vld [vmem:[%s3150_s2 + $0x3c0] sm:$0xff] }
  0xc8   : > { %986 = vmatpush.msrb.mxu2 %v327_v43  ;;  %1006 = vmatpush.msrb.mxu3 %v583_v44  ;;  %v601_v42 = vld [vmem:[%s3150_s2 + $0xbc0] sm:$0xff]  ;;  %v346_v43 = vld [vmem:[%s3150_s2 + $0x3c8] sm:$0xff] }
  0xc9   : > { %1026 = vmatpush.msra.mxu0 %v328_v45  ;;  %1046 = vmatpush.msra.mxu1 %v584_v46  ;;  %v602_v44 = vld [vmem:[%s3150_s2 + $0xbc8] sm:$0xff]  ;;  %v329_v45 = vld [vmem:[%s3150_s2 + $0x340] sm:$0xff] }
  0xca   : > { %987 = vmatpush.msrb.mxu2 %v311_v47  ;;  %1007 = vmatpush.msrb.mxu3 %v567_v48  ;;  %v585_v46 = vld [vmem:[%s3150_s2 + $0xb40] sm:$0xff]  ;;  %v330_v47 = vld [vmem:[%s3150_s2 + $0x348] sm:$0xff] }
  0xcb   : > { %1027 = vmatpush.msra.mxu0 %v312_v49  ;;  %1047 = vmatpush.msra.mxu1 %v568_v50  ;;  %v586_v48 = vld [vmem:[%s3150_s2 + $0xb48] sm:$0xff]  ;;  %v313_v49 = vld [vmem:[%s3150_s2 + $0x2c0] sm:$0xff] }
  0xcc   : > { %988 = vmatpush.msrb.mxu2 %v295_v51  ;;  %1008 = vmatpush.msrb.mxu3 %v551_v52  ;;  %v569_v50 = vld [vmem:[%s3150_s2 + $0xac0] sm:$0xff]  ;;  %v314_v51 = vld [vmem:[%s3150_s2 + $0x2c8] sm:$0xff] }
  0xcd   : > { %1028 = vmatpush.msra.mxu0 %v296_v53  ;;  %1048 = vmatpush.msra.mxu1 %v552_v54  ;;  %v570_v52 = vld [vmem:[%s3150_s2 + $0xac8] sm:$0xff]  ;;  %v297_v53 = vld [vmem:[%s3150_s2 + $0x240] sm:$0xff] }
  0xce   : > { %989 = vmatpush.msrb.mxu2 %v279_v55  ;;  %1009 = vmatpush.msrb.mxu3 %v535_v56  ;;  %v553_v54 = vld [vmem:[%s3150_s2 + $0xa40] sm:$0xff]  ;;  %v298_v55 = vld [vmem:[%s3150_s2 + $0x248] sm:$0xff] }
  0xcf   : > { %1029 = vmatpush.msra.mxu0 %v280_v57  ;;  %1049 = vmatpush.msra.mxu1 %v536_v58  ;;  %v554_v56 = vld [vmem:[%s3150_s2 + $0xa48] sm:$0xff]  ;;  %v281_v57 = vld [vmem:[%s3150_s2 + $0x1c0] sm:$0xff] }
  0xd0   : > { %990 = vmatpush.msrb.mxu2 %v263_v59  ;;  %1010 = vmatpush.msrb.mxu3 %v519_v60  ;;  %v537_v58 = vld [vmem:[%s3150_s2 + $0x9c0] sm:$0xff]  ;;  %v282_v59 = vld [vmem:[%s3150_s2 + $0x1c8] sm:$0xff] }
  0xd1   : > { %1030 = vmatpush.msra.mxu0 %v264_v61  ;;  %1050 = vmatpush.msra.mxu1 %v520_v62  ;;  %v538_v60 = vld [vmem:[%s3150_s2 + $0x9c8] sm:$0xff]  ;;  %v265_v61 = vld [vmem:[%s3150_s2 + $0x140] sm:$0xff] }
  0xd2   : > { %991 = vmatpush.msrb.mxu2 %v247_v63  ;;  %1011 = vmatpush.msrb.mxu3 %v503_v0  ;;  %v521_v62 = vld [vmem:[%s3150_s2 + $0x940] sm:$0xff]  ;;  %v266_v63 = vld [vmem:[%s3150_s2 + $0x148] sm:$0xff] }
  0xd3   : > { %1031 = vmatpush.msra.mxu0 %v248_v1  ;;  %1051 = vmatpush.msra.mxu1 %v504_v2  ;;  %v522_v0 = vld [vmem:[%s3150_s2 + $0x948] sm:$0xff]  ;;  %v249_v1 = vld [vmem:[%s3150_s2 + $0xc0] sm:$0xff] }
  0xd4   : > { %992 = vmatpush.msrb.mxu2 %v231_v5  ;;  %1012 = vmatpush.msrb.mxu3 %v487_v6  ;;  %v505_v2 = vld [vmem:[%s3150_s2 + $0x8c0] sm:$0xff]  ;;  %v250_v5 = vld [vmem:[%s3150_s2 + $0xc8] sm:$0xff] }
  0xd5   : > { %1032 = vmatpush.msra.mxu0 %v232_v7  ;;  %1052 = vmatpush.msra.mxu1 %v488_v8  ;;  %v506_v6 = vld [vmem:[%s3150_s2 + $0x8c8] sm:$0xff]  ;;  %v233_v7 = vld [vmem:[%s3150_s2 + $0x40] sm:$0xff] }
  0xd6   : > { %993 = vmatmul.f32.vlgmr.msrb.gmra.mxu2 %v1935_v3  ;;  %1013 = vmatmul.f32.vlgmr.msrb.gmra.mxu3 %v1937_v4  ;;  %v489_v8 = vld [vmem:[%s3150_s2 + $0x840] sm:$0xff] }
  0xd7   : > { %1033 = vmatmul.f32.vlgmr.msra.gmra.mxu0 %v1935_v3  ;;  %1053 = vmatmul.f32.vlgmr.msra.gmra.mxu1 %v1937_v4 }
  0xd8   : > { %1057 = vmatpush.msra.mxu2 %v473_v9  ;;  %1077 = vmatpush.msra.mxu3 %v729_v10  ;;  %v234_v9 = vld [vmem:[%s3150_s2 + $0x48] sm:$0xff] }
  0xd9   : > { %1097 = vmatpush.msrb.mxu0 %v474_v11  ;;  %1117 = vmatpush.msrb.mxu1 %v730_v12  ;;  %v490_v10 = vld [vmem:[%s3150_s2 + $0x848] sm:$0xff]  ;;  %v475_v11 = vld [vmem:[%s3150_s2 + $0x7d0] sm:$0xff] }
  0xda   : > { %1058 = vmatpush.msra.mxu2 %v457_v13  ;;  %1078 = vmatpush.msra.mxu3 %v713_v14  ;;  %v731_v12 = vld [vmem:[%s3150_s2 + $0xfd0] sm:$0xff]  ;;  %v476_v13 = vld [vmem:[%s3150_s2 + $0x7d8] sm:$0xff] }
  0xdb   : > { %1098 = vmatpush.msrb.mxu0 %v458_v15  ;;  %1118 = vmatpush.msrb.mxu1 %v714_v16  ;;  %v732_v14 = vld [vmem:[%s3150_s2 + $0xfd8] sm:$0xff]  ;;  %v459_v15 = vld [vmem:[%s3150_s2 + $0x750] sm:$0xff] }
  0xdc   : > { %1059 = vmatpush.msra.mxu2 %v441_v17  ;;  %1079 = vmatpush.msra.mxu3 %v697_v18  ;;  %v715_v16 = vld [vmem:[%s3150_s2 + $0xf50] sm:$0xff]  ;;  %v460_v17 = vld [vmem:[%s3150_s2 + $0x758] sm:$0xff] }
  0xdd   : > { %1099 = vmatpush.msrb.mxu0 %v442_v19  ;;  %1119 = vmatpush.msrb.mxu1 %v698_v20  ;;  %v716_v18 = vld [vmem:[%s3150_s2 + $0xf58] sm:$0xff]  ;;  %v443_v19 = vld [vmem:[%s3150_s2 + $0x6d0] sm:$0xff] }
  0xde   : > { %1060 = vmatpush.msra.mxu2 %v425_v21  ;;  %1080 = vmatpush.msra.mxu3 %v681_v22  ;;  %v699_v20 = vld [vmem:[%s3150_s2 + $0xed0] sm:$0xff]  ;;  %v444_v21 = vld [vmem:[%s3150_s2 + $0x6d8] sm:$0xff] }
  0xdf   : > { %1100 = vmatpush.msrb.mxu0 %v426_v23  ;;  %1120 = vmatpush.msrb.mxu1 %v682_v24  ;;  %v700_v22 = vld [vmem:[%s3150_s2 + $0xed8] sm:$0xff]  ;;  %v427_v23 = vld [vmem:[%s3150_s2 + $0x650] sm:$0xff] }
  0xe0   : > { %1061 = vmatpush.msra.mxu2 %v409_v25  ;;  %1081 = vmatpush.msra.mxu3 %v665_v26  ;;  %v683_v24 = vld [vmem:[%s3150_s2 + $0xe50] sm:$0xff]  ;;  %v428_v25 = vld [vmem:[%s3150_s2 + $0x658] sm:$0xff] }
  0xe1   : > { %1101 = vmatpush.msrb.mxu0 %v410_v27  ;;  %1121 = vmatpush.msrb.mxu1 %v666_v28  ;;  %v684_v26 = vld [vmem:[%s3150_s2 + $0xe58] sm:$0xff]  ;;  %v411_v27 = vld [vmem:[%s3150_s2 + $0x5d0] sm:$0xff] }
  0xe2   : > { %1062 = vmatpush.msra.mxu2 %v393_v29  ;;  %1082 = vmatpush.msra.mxu3 %v649_v30  ;;  %v667_v28 = vld [vmem:[%s3150_s2 + $0xdd0] sm:$0xff]  ;;  %v412_v29 = vld [vmem:[%s3150_s2 + $0x5d8] sm:$0xff] }
  0xe3   : > { %1102 = vmatpush.msrb.mxu0 %v394_v31  ;;  %1122 = vmatpush.msrb.mxu1 %v650_v32  ;;  %v668_v30 = vld [vmem:[%s3150_s2 + $0xdd8] sm:$0xff]  ;;  %v395_v31 = vld [vmem:[%s3150_s2 + $0x550] sm:$0xff] }
  0xe4   : > { %1063 = vmatpush.msra.mxu2 %v377_v33  ;;  %1083 = vmatpush.msra.mxu3 %v633_v34  ;;  %v651_v32 = vld [vmem:[%s3150_s2 + $0xd50] sm:$0xff]  ;;  %v396_v33 = vld [vmem:[%s3150_s2 + $0x558] sm:$0xff] }
  0xe5   : > { %1103 = vmatpush.msrb.mxu0 %v378_v35  ;;  %1123 = vmatpush.msrb.mxu1 %v634_v36  ;;  %v652_v34 = vld [vmem:[%s3150_s2 + $0xd58] sm:$0xff]  ;;  %v379_v35 = vld [vmem:[%s3150_s2 + $0x4d0] sm:$0xff] }
  0xe6   : > { %1064 = vmatpush.msra.mxu2 %v361_v37  ;;  %1084 = vmatpush.msra.mxu3 %v617_v38  ;;  %v635_v36 = vld [vmem:[%s3150_s2 + $0xcd0] sm:$0xff]  ;;  %v380_v37 = vld [vmem:[%s3150_s2 + $0x4d8] sm:$0xff] }
  0xe7   : > { %1104 = vmatpush.msrb.mxu0 %v362_v39  ;;  %1124 = vmatpush.msrb.mxu1 %v618_v40  ;;  %v636_v38 = vld [vmem:[%s3150_s2 + $0xcd8] sm:$0xff]  ;;  %v363_v39 = vld [vmem:[%s3150_s2 + $0x450] sm:$0xff] }
  0xe8   : > { %1065 = vmatpush.msra.mxu2 %v345_v41  ;;  %1085 = vmatpush.msra.mxu3 %v601_v42  ;;  %v619_v40 = vld [vmem:[%s3150_s2 + $0xc50] sm:$0xff]  ;;  %v364_v41 = vld [vmem:[%s3150_s2 + $0x458] sm:$0xff] }
  0xe9   : > { %1105 = vmatpush.msrb.mxu0 %v346_v43  ;;  %1125 = vmatpush.msrb.mxu1 %v602_v44  ;;  %v620_v42 = vld [vmem:[%s3150_s2 + $0xc58] sm:$0xff]  ;;  %v347_v43 = vld [vmem:[%s3150_s2 + $0x3d0] sm:$0xff] }
  0xea   : > { %1066 = vmatpush.msra.mxu2 %v329_v45  ;;  %1086 = vmatpush.msra.mxu3 %v585_v46  ;;  %v603_v44 = vld [vmem:[%s3150_s2 + $0xbd0] sm:$0xff]  ;;  %v348_v45 = vld [vmem:[%s3150_s2 + $0x3d8] sm:$0xff] }
  0xeb   : > { %1106 = vmatpush.msrb.mxu0 %v330_v47  ;;  %1126 = vmatpush.msrb.mxu1 %v586_v48  ;;  %v604_v46 = vld [vmem:[%s3150_s2 + $0xbd8] sm:$0xff]  ;;  %v331_v47 = vld [vmem:[%s3150_s2 + $0x350] sm:$0xff] }
  0xec   : > { %1067 = vmatpush.msra.mxu2 %v313_v49  ;;  %1087 = vmatpush.msra.mxu3 %v569_v50  ;;  %v587_v48 = vld [vmem:[%s3150_s2 + $0xb50] sm:$0xff]  ;;  %v332_v49 = vld [vmem:[%s3150_s2 + $0x358] sm:$0xff] }
  0xed   : > { %1107 = vmatpush.msrb.mxu0 %v314_v51  ;;  %1127 = vmatpush.msrb.mxu1 %v570_v52  ;;  %v588_v50 = vld [vmem:[%s3150_s2 + $0xb58] sm:$0xff]  ;;  %v315_v51 = vld [vmem:[%s3150_s2 + $0x2d0] sm:$0xff] }
  0xee   : > { %1068 = vmatpush.msra.mxu2 %v297_v53  ;;  %1088 = vmatpush.msra.mxu3 %v553_v54  ;;  %v571_v52 = vld [vmem:[%s3150_s2 + $0xad0] sm:$0xff]  ;;  %v316_v53 = vld [vmem:[%s3150_s2 + $0x2d8] sm:$0xff] }
  0xef   : > { %1108 = vmatpush.msrb.mxu0 %v298_v55  ;;  %1128 = vmatpush.msrb.mxu1 %v554_v56  ;;  %v572_v54 = vld [vmem:[%s3150_s2 + $0xad8] sm:$0xff]  ;;  %v299_v55 = vld [vmem:[%s3150_s2 + $0x250] sm:$0xff] }
  0xf0   : > { %1069 = vmatpush.msra.mxu2 %v281_v57  ;;  %1089 = vmatpush.msra.mxu3 %v537_v58  ;;  %v555_v56 = vld [vmem:[%s3150_s2 + $0xa50] sm:$0xff]  ;;  %v300_v57 = vld [vmem:[%s3150_s2 + $0x258] sm:$0xff] }
  0xf1   : > { %1109 = vmatpush.msrb.mxu0 %v282_v59  ;;  %1129 = vmatpush.msrb.mxu1 %v538_v60  ;;  %v556_v58 = vld [vmem:[%s3150_s2 + $0xa58] sm:$0xff] }
  0xf2   : > { %1070 = vmatpush.msra.mxu2 %v265_v61  ;;  %1090 = vmatpush.msra.mxu3 %v521_v62  ;;  %v283_v61 = vld [vmem:[%s3150_s2 + $0x1d0] sm:$0xff] }
  0xf3   : > { %1110 = vmatpush.msrb.mxu0 %v266_v63  ;;  %1130 = vmatpush.msrb.mxu1 %v522_v0  ;;  %v539_v62 = vld [vmem:[%s3150_s2 + $0x9d0] sm:$0xff]  ;;  %v284_v63 = vld [vmem:[%s3150_s2 + $0x1d8] sm:$0xff] }
  0xf4   : > { %1071 = vmatpush.msra.mxu2 %v249_v1  ;;  %1091 = vmatpush.msra.mxu3 %v505_v2  ;;  %v540_v0 = vld [vmem:[%s3150_s2 + $0x9d8] sm:$0xff]  ;;  %v267_v2 = vld [vmem:[%s3150_s2 + $0x150] sm:$0xff] }
  0xf5   : > { %1111 = vmatpush.msrb.mxu0 %v250_v5  ;;  %1131 = vmatpush.msrb.mxu1 %v506_v6  ;;  %v523_v5 = vld [vmem:[%s3150_s2 + $0x950] sm:$0xff]  ;;  %v268_v6 = vld [vmem:[%s3150_s2 + $0x158] sm:$0xff] }
  0xf6   : > { %1072 = vmatpush.msra.mxu2 %v233_v7  ;;  %1092 = vmatpush.msra.mxu3 %v489_v8  ;;  %v524_v7 = vld [vmem:[%s3150_s2 + $0x958] sm:$0xff]  ;;  %v251_v8 = vld [vmem:[%s3150_s2 + $0xd0] sm:$0xff] }
  0xf7   : > { %1112 = vmatpush.msrb.mxu0 %v234_v9  ;;  %1132 = vmatpush.msrb.mxu1 %v490_v10  ;;  %v507_v9 = vld [vmem:[%s3150_s2 + $0x8d0] sm:$0xff] }
  0xf8   : > { %1073 = vmatmul.f32.vlgmr.msra.gmra.mxu2 %v1935_v3  ;;  %1093 = vmatmul.f32.vlgmr.msra.gmra.mxu3 %v1937_v4 }
  0xf9   : > { %1113 = vmatmul.f32.vlgmr.msrb.gmra.mxu0 %v1935_v3  ;;  %1133 = vmatmul.f32.vlgmr.msrb.gmra.mxu1 %v1937_v4 }
  0xfa   : > { %1137 = vmatpush.msrb.mxu2 %v475_v11  ;;  %1157 = vmatpush.msrb.mxu3 %v731_v12  ;;  %v252_v12 = vld [vmem:[%s3150_s2 + $0xd8] sm:$0xff] }
  0xfb   : > { %1177 = vmatpush.msra.mxu0 %v476_v13  ;;  %1197 = vmatpush.msra.mxu1 %v732_v14  ;;  %v508_v13 = vld [vmem:[%s3150_s2 + $0x8d8] sm:$0xff] }
  0xfc   : > { %1138 = vmatpush.msrb.mxu2 %v459_v15  ;;  %1158 = vmatpush.msrb.mxu3 %v715_v16  ;;  %v235_v16 = vld [vmem:[%s3150_s2 + $0x50] sm:$0xff] }
  0xfd   : > { %1178 = vmatpush.msra.mxu0 %v460_v17  ;;  %1198 = vmatpush.msra.mxu1 %v716_v18  ;;  %v491_v17 = vld [vmem:[%s3150_s2 + $0x850] sm:$0xff]  ;;  %v236_v18 = vld [vmem:[%s3150_s2 + $0x58] sm:$0xff] }
  0xfe   : > { %1139 = vmatpush.msrb.mxu2 %v443_v19  ;;  %1159 = vmatpush.msrb.mxu3 %v699_v20  ;;  %v492_v19 = vld [vmem:[%s3150_s2 + $0x858] sm:$0xff] }
  0xff   : > { %1179 = vmatpush.msra.mxu0 %v444_v21  ;;  %1199 = vmatpush.msra.mxu1 %v700_v22 }
 0x100   : > { %1140 = vmatpush.msrb.mxu2 %v427_v23  ;;  %1160 = vmatpush.msrb.mxu3 %v683_v24  ;;  %v477_v23 = vld [vmem:[%s3150_s2 + $0x7e0] sm:$0xff] }
 0x101   : > { %1180 = vmatpush.msra.mxu0 %v428_v25  ;;  %1200 = vmatpush.msra.mxu1 %v684_v26  ;;  %v733_v24 = vld [vmem:[%s3150_s2 + $0xfe0] sm:$0xff]  ;;  %v478_v25 = vld [vmem:[%s3150_s2 + $0x7e8] sm:$0xff] }
 0x102   : > { %1141 = vmatpush.msrb.mxu2 %v411_v27  ;;  %1161 = vmatpush.msrb.mxu3 %v667_v28  ;;  %v734_v26 = vld [vmem:[%s3150_s2 + $0xfe8] sm:$0xff]  ;;  %v461_v28 = vld [vmem:[%s3150_s2 + $0x760] sm:$0xff] }
 0x103   : > { %1181 = vmatpush.msra.mxu0 %v412_v29  ;;  %1201 = vmatpush.msra.mxu1 %v668_v30  ;;  %v717_v29 = vld [vmem:[%s3150_s2 + $0xf60] sm:$0xff]  ;;  %v462_v30 = vld [vmem:[%s3150_s2 + $0x768] sm:$0xff] }
 0x104   : > { %1142 = vmatpush.msrb.mxu2 %v395_v31  ;;  %1162 = vmatpush.msrb.mxu3 %v651_v32  ;;  %v718_v31 = vld [vmem:[%s3150_s2 + $0xf68] sm:$0xff]  ;;  %v445_v32 = vld [vmem:[%s3150_s2 + $0x6e0] sm:$0xff] }
 0x105   : > { %1182 = vmatpush.msra.mxu0 %v396_v33  ;;  %1202 = vmatpush.msra.mxu1 %v652_v34  ;;  %v701_v33 = vld [vmem:[%s3150_s2 + $0xee0] sm:$0xff] }
 0x106   : > { %1143 = vmatpush.msrb.mxu2 %v379_v35  ;;  %1163 = vmatpush.msrb.mxu3 %v635_v36  ;;  %v446_v36 = vld [vmem:[%s3150_s2 + $0x6e8] sm:$0xff] }
 0x107   : > { %1183 = vmatpush.msra.mxu0 %v380_v37  ;;  %1203 = vmatpush.msra.mxu1 %v636_v38  ;;  %v702_v37 = vld [vmem:[%s3150_s2 + $0xee8] sm:$0xff] }
 0x108   : > { %1144 = vmatpush.msrb.mxu2 %v363_v39  ;;  %1164 = vmatpush.msrb.mxu3 %v619_v40  ;;  %v429_v40 = vld [vmem:[%s3150_s2 + $0x660] sm:$0xff] }
 0x109   : > { %1184 = vmatpush.msra.mxu0 %v364_v41  ;;  %1204 = vmatpush.msra.mxu1 %v620_v42  ;;  %v685_v41 = vld [vmem:[%s3150_s2 + $0xe60] sm:$0xff]  ;;  %v430_v42 = vld [vmem:[%s3150_s2 + $0x668] sm:$0xff] }
 0x10a   : > { %1145 = vmatpush.msrb.mxu2 %v347_v43  ;;  %1165 = vmatpush.msrb.mxu3 %v603_v44  ;;  %v686_v43 = vld [vmem:[%s3150_s2 + $0xe68] sm:$0xff] }
 0x10b   : > { %1185 = vmatpush.msra.mxu0 %v348_v45  ;;  %1205 = vmatpush.msra.mxu1 %v604_v46  ;;  %v413_v45 = vld [vmem:[%s3150_s2 + $0x5e0] sm:$0xff] }
 0x10c   : > { %1146 = vmatpush.msrb.mxu2 %v331_v47  ;;  %1166 = vmatpush.msrb.mxu3 %v587_v48  ;;  %v669_v46 = vld [vmem:[%s3150_s2 + $0xde0] sm:$0xff]  ;;  %v414_v47 = vld [vmem:[%s3150_s2 + $0x5e8] sm:$0xff] }
 0x10d   : > { %1186 = vmatpush.msra.mxu0 %v332_v49  ;;  %1206 = vmatpush.msra.mxu1 %v588_v50  ;;  %v814_v60 = vpop.f32.mrf.mxu1  ;;  %v670_v48 = vld [vmem:[%s3150_s2 + $0xde8] sm:$0xff]  ;;  %v397_v49 = vld [vmem:[%s3150_s2 + $0x560] sm:$0xff] }
 0x10e   : > { %1147 = vmatpush.msrb.mxu2 %v315_v51  ;;  %1167 = vmatpush.msrb.mxu3 %v571_v52  ;;  %v653_v50 = vld [vmem:[%s3150_s2 + $0xd60] sm:$0xff]  ;;  %v398_v51 = vld [vmem:[%s3150_s2 + $0x568] sm:$0xff] }
 0x10f   : > { %v794_v59 = vpop.f32.mrf.mxu0  ;;  %1187 = vmatpush.msra.mxu0 %v316_v53  ;;  %1207 = vmatpush.msra.mxu1 %v572_v54  ;;  %v654_v52 = vld [vmem:[%s3150_s2 + $0xd68] sm:$0xff]  ;;  %v381_v53 = vld [vmem:[%s3150_s2 + $0x4e0] sm:$0xff] }
 0x110   : > { %1148 = vmatpush.msrb.mxu2 %v299_v55  ;;  %1168 = vmatpush.msrb.mxu3 %v555_v56  ;;  %v815_v1 = vadd.f32 %v814_v60, %v794_v59  ;;  %v637_v54 = vld [vmem:[%s3150_s2 + $0xce0] sm:$0xff]  ;;  %v382_v55 = vld [vmem:[%s3150_s2 + $0x4e8] sm:$0xff] }
 0x111   : > { %1188 = vmatpush.msra.mxu0 %v300_v57  ;;  %1208 = vmatpush.msra.mxu1 %v556_v58  ;;  %v638_v56 = vld [vmem:[%s3150_s2 + $0xce8] sm:$0xff]  ;;  %v365_v57 = vld [vmem:[%s3150_s2 + $0x460] sm:$0xff] }
 0x112   : > { %1149 = vmatpush.msrb.mxu2 %v283_v61  ;;  %1169 = vmatpush.msrb.mxu3 %v539_v62  ;;  %v1393_v14 = vrot.slane %v815_v1, 4  ;;  %v621_v58 = vld [vmem:[%s3150_s2 + $0xc60] sm:$0xff]  ;;  %v366_v59 = vld [vmem:[%s3150_s2 + $0x468] sm:$0xff] }
 0x113   : > { %1189 = vmatpush.msra.mxu0 %v284_v63  ;;  %1209 = vmatpush.msra.mxu1 %v540_v0  ;;  %v774_v11 = vpop.f32.mrf.mxu3  ;;  %v622_v60 = vld [vmem:[%s3150_s2 + $0xc68] sm:$0xff]  ;;  %v349_v61 = vld [vmem:[%s3150_s2 + $0x3e0] sm:$0xff] }
 0x114   : > { %1150 = vmatpush.msrb.mxu2 %v267_v2  ;;  %1170 = vmatpush.msrb.mxu3 %v523_v5  ;;  %v605_v62 = vld [vmem:[%s3150_s2 + $0xbe0] sm:$0xff]  ;;  %v350_v63 = vld [vmem:[%s3150_s2 + $0x3e8] sm:$0xff] }
 0x115   : > { %v754_v10 = vpop.f32.mrf.mxu2  ;;  %1190 = vmatpush.msra.mxu0 %v268_v6  ;;  %1210 = vmatpush.msra.mxu1 %v524_v7  ;;  %v606_v0 = vld [vmem:[%s3150_s2 + $0xbe8] sm:$0xff]  ;;  %v333_v1 = vld [vmem:[%s3150_s2 + $0x360] sm:$0xff] }
 0x116   : > { %v775_v15 = vadd.f32 %v774_v11, %v754_v10  ;;  %1151 = vmatpush.msrb.mxu2 %v251_v8  ;;  %1171 = vmatpush.msrb.mxu3 %v507_v9  ;;  %v589_v2 = vld [vmem:[%s3150_s2 + $0xb60] sm:$0xff]  ;;  %v334_v5 = vld [vmem:[%s3150_s2 + $0x368] sm:$0xff] }
 0x117   : > { %1191 = vmatpush.msra.mxu0 %v252_v12  ;;  %1211 = vmatpush.msra.mxu1 %v508_v13  ;;  %v590_v6 = vld [vmem:[%s3150_s2 + $0xb68] sm:$0xff]  ;;  %v317_v7 = vld [vmem:[%s3150_s2 + $0x2e0] sm:$0xff] }
 0x118   : > { %v1402_v20 = vsel %vm1401_vm2, %v775_v15, %v1393_v14  ;;  %1152 = vmatpush.msrb.mxu2 %v235_v16  ;;  %1172 = vmatpush.msrb.mxu3 %v491_v17  ;;  %v874_v21 = vpop.f32.mrf.mxu0  ;;  %v894_v22 = vpop.f32.mrf.mxu1  ;;  %v573_v8 = vld [vmem:[%s3150_s2 + $0xae0] sm:$0xff]  ;;  %v318_v9 = vld [vmem:[%s3150_s2 + $0x2e8] sm:$0xff] }
 0x119   : > { %1418 = vst [vmem:[%s2713_s28] sm:$0xff] %v1402_v20  ;;  %1192 = vmatpush.msra.mxu0 %v236_v18  ;;  %1212 = vmatpush.msra.mxu1 %v492_v19  ;;  %v895_v27 = vadd.f32 %v894_v22, %v874_v21  ;;  %v574_v10 = vld [vmem:[%s3150_s2 + $0xae8] sm:$0xff]  ;;  %v301_v11 = vld [vmem:[%s3150_s2 + $0x260] sm:$0xff] }
 0x11a   : > { %1153 = vmatmul.f32.vlgmr.msrb.gmra.mxu2 %v1935_v3  ;;  %1173 = vmatmul.f32.vlgmr.msrb.gmra.mxu3 %v1937_v4  ;;  %v557_v12 = vld [vmem:[%s3150_s2 + $0xa60] sm:$0xff]  ;;  %v302_v13 = vld [vmem:[%s3150_s2 + $0x268] sm:$0xff] }
 0x11b   : > { %1193 = vmatmul.f32.vlgmr.msra.gmra.mxu0 %v1935_v3  ;;  %1213 = vmatmul.f32.vlgmr.msra.gmra.mxu1 %v1937_v4  ;;  %v1394_v38 = vrot.slane %v895_v27, 4  ;;  %v558_v14 = vld [vmem:[%s3150_s2 + $0xa68] sm:$0xff]  ;;  %v285_v15 = vld [vmem:[%s3150_s2 + $0x1e0] sm:$0xff] }
 0x11c   : > { %1217 = vmatpush.msra.mxu2 %v477_v23  ;;  %1237 = vmatpush.msra.mxu3 %v733_v24  ;;  %v541_v16 = vld [vmem:[%s3150_s2 + $0x9e0] sm:$0xff]  ;;  %v286_v17 = vld [vmem:[%s3150_s2 + $0x1e8] sm:$0xff] }
 0x11d   : > { %1257 = vmatpush.msrb.mxu0 %v478_v25  ;;  %1277 = vmatpush.msrb.mxu1 %v734_v26  ;;  %v834_v34 = vpop.f32.mrf.mxu2  ;;  %v854_v35 = vpop.f32.mrf.mxu3  ;;  %v542_v18 = vld [vmem:[%s3150_s2 + $0x9e8] sm:$0xff]  ;;  %v269_v21 = vld [vmem:[%s3150_s2 + $0x160] sm:$0xff] }
 0x11e   : > { %1218 = vmatpush.msra.mxu2 %v461_v28  ;;  %1238 = vmatpush.msra.mxu3 %v717_v29  ;;  %v855_v39 = vadd.f32 %v854_v35, %v834_v34  ;;  %v525_v22 = vld [vmem:[%s3150_s2 + $0x960] sm:$0xff]  ;;  %v270_v23 = vld [vmem:[%s3150_s2 + $0x168] sm:$0xff] }
 0x11f   : > { %1258 = vmatpush.msrb.mxu0 %v462_v30  ;;  %1278 = vmatpush.msrb.mxu1 %v718_v31  ;;  %v526_v24 = vld [vmem:[%s3150_s2 + $0x968] sm:$0xff]  ;;  %v253_v26 = vld [vmem:[%s3150_s2 + $0xe0] sm:$0xff] }
 0x120   : > { %1219 = vmatpush.msra.mxu2 %v445_v32  ;;  %1239 = vmatpush.msra.mxu3 %v701_v33  ;;  %v1403_v44 = vsel %vm1401_vm2, %v855_v39, %v1394_v38  ;;  %v509_v27 = vld [vmem:[%s3150_s2 + $0x8e0] sm:$0xff]  ;;  %v254_v28 = vld [vmem:[%s3150_s2 + $0xe8] sm:$0xff]  ;;  %v479_v39 = vld [vmem:[%s3150_s2 + $0x7f0] sm:$0xff] }
 0x121   : > { %1259 = vmatpush.msrb.mxu0 %v446_v36  ;;  %1279 = vmatpush.msrb.mxu1 %v702_v37  ;;  %1419 = vst [vmem:[%s2713_s28 + $0x8] sm:$0xff] %v1403_v44  ;;  %v510_v29 = vld [vmem:[%s3150_s2 + $0x8e8] sm:$0xff]  ;;  %v237_v30 = vld [vmem:[%s3150_s2 + $0x60] sm:$0xff]  ;;  %v719_v44 = vld [vmem:[%s3150_s2 + $0xf70] sm:$0xff] }
 0x122   : > { %1220 = vmatpush.msra.mxu2 %v429_v40  ;;  %1240 = vmatpush.msra.mxu3 %v685_v41  ;;  %v493_v31 = vld [vmem:[%s3150_s2 + $0x860] sm:$0xff]  ;;  %v238_v34 = vld [vmem:[%s3150_s2 + $0x68] sm:$0xff]  ;;  %v735_v40 = vld [vmem:[%s3150_s2 + $0xff0] sm:$0xff] }
 0x123   : > { %1260 = vmatpush.msrb.mxu0 %v430_v42  ;;  %1280 = vmatpush.msrb.mxu1 %v686_v43  ;;  %v494_v35 = vld [vmem:[%s3150_s2 + $0x868] sm:$0xff]  ;;  %v480_v41 = vld [vmem:[%s3150_s2 + $0x7f8] sm:$0xff]  ;;  %v463_v43 = vld [vmem:[%s3150_s2 + $0x770] sm:$0xff] }
 0x124   : > { %1221 = vmatpush.msra.mxu2 %v413_v45  ;;  %1241 = vmatpush.msra.mxu3 %v669_v46  ;;  %v736_v42 = vld [vmem:[%s3150_s2 + $0xff8] sm:$0xff] }
 0x125   : > { %1261 = vmatpush.msrb.mxu0 %v414_v47  ;;  %1281 = vmatpush.msrb.mxu1 %v670_v48  ;;  %v464_v45 = vld [vmem:[%s3150_s2 + $0x778] sm:$0xff]  ;;  %v447_v47 = vld [vmem:[%s3150_s2 + $0x6f0] sm:$0xff] }
 0x126   : > { %1222 = vmatpush.msra.mxu2 %v397_v49  ;;  %1242 = vmatpush.msra.mxu3 %v653_v50  ;;  %v720_v46 = vld [vmem:[%s3150_s2 + $0xf78] sm:$0xff]  ;;  %v703_v48 = vld [vmem:[%s3150_s2 + $0xef0] sm:$0xff] }
 0x127   : > { %1262 = vmatpush.msrb.mxu0 %v398_v51  ;;  %1282 = vmatpush.msrb.mxu1 %v654_v52  ;;  %v448_v49 = vld [vmem:[%s3150_s2 + $0x6f8] sm:$0xff]  ;;  %v431_v51 = vld [vmem:[%s3150_s2 + $0x670] sm:$0xff] }
 0x128   : > { %1223 = vmatpush.msra.mxu2 %v381_v53  ;;  %1243 = vmatpush.msra.mxu3 %v637_v54  ;;  %v704_v50 = vld [vmem:[%s3150_s2 + $0xef8] sm:$0xff]  ;;  %v687_v52 = vld [vmem:[%s3150_s2 + $0xe70] sm:$0xff] }
 0x129   : > { %1263 = vmatpush.msrb.mxu0 %v382_v55  ;;  %1283 = vmatpush.msrb.mxu1 %v638_v56  ;;  %v432_v53 = vld [vmem:[%s3150_s2 + $0x678] sm:$0xff]  ;;  %v415_v55 = vld [vmem:[%s3150_s2 + $0x5f0] sm:$0xff] }
 0x12a   : > { %1224 = vmatpush.msra.mxu2 %v365_v57  ;;  %1244 = vmatpush.msra.mxu3 %v621_v58  ;;  %v688_v54 = vld [vmem:[%s3150_s2 + $0xe78] sm:$0xff]  ;;  %v671_v56 = vld [vmem:[%s3150_s2 + $0xdf0] sm:$0xff] }
 0x12b   : > { %1264 = vmatpush.msrb.mxu0 %v366_v59  ;;  %1284 = vmatpush.msrb.mxu1 %v622_v60  ;;  %v416_v57 = vld [vmem:[%s3150_s2 + $0x5f8] sm:$0xff]  ;;  %v399_v59 = vld [vmem:[%s3150_s2 + $0x570] sm:$0xff] }
 0x12c   : > { %1225 = vmatpush.msra.mxu2 %v349_v61  ;;  %1245 = vmatpush.msra.mxu3 %v605_v62  ;;  %v672_v58 = vld [vmem:[%s3150_s2 + $0xdf8] sm:$0xff]  ;;  %v655_v60 = vld [vmem:[%s3150_s2 + $0xd70] sm:$0xff] }
 0x12d   : > { %1265 = vmatpush.msrb.mxu0 %v350_v63  ;;  %1285 = vmatpush.msrb.mxu1 %v606_v0  ;;  %v400_v61 = vld [vmem:[%s3150_s2 + $0x578] sm:$0xff]  ;;  %v383_v63 = vld [vmem:[%s3150_s2 + $0x4f0] sm:$0xff] }
 0x12e   : > { %1226 = vmatpush.msra.mxu2 %v333_v1  ;;  %1246 = vmatpush.msra.mxu3 %v589_v2  ;;  %v656_v62 = vld [vmem:[%s3150_s2 + $0xd78] sm:$0xff]  ;;  %v639_v0 = vld [vmem:[%s3150_s2 + $0xcf0] sm:$0xff] }
 0x12f   : > { %1266 = vmatpush.msrb.mxu0 %v334_v5  ;;  %1286 = vmatpush.msrb.mxu1 %v590_v6  ;;  %v384_v1 = vld [vmem:[%s3150_s2 + $0x4f8] sm:$0xff]  ;;  %v367_v5 = vld [vmem:[%s3150_s2 + $0x470] sm:$0xff] }
 0x130   : > { %1227 = vmatpush.msra.mxu2 %v317_v7  ;;  %1247 = vmatpush.msra.mxu3 %v573_v8  ;;  %v640_v2 = vld [vmem:[%s3150_s2 + $0xcf8] sm:$0xff]  ;;  %v623_v6 = vld [vmem:[%s3150_s2 + $0xc70] sm:$0xff] }
 0x131   : > { %1267 = vmatpush.msrb.mxu0 %v318_v9  ;;  %1287 = vmatpush.msrb.mxu1 %v574_v10  ;;  %v368_v7 = vld [vmem:[%s3150_s2 + $0x478] sm:$0xff]  ;;  %v351_v9 = vld [vmem:[%s3150_s2 + $0x3f0] sm:$0xff] }
 0x132   : > { %1228 = vmatpush.msra.mxu2 %v301_v11  ;;  %1248 = vmatpush.msra.mxu3 %v557_v12  ;;  %v954_v19 = vpop.f32.mrf.mxu0  ;;  %v974_v20 = vpop.f32.mrf.mxu1  ;;  %v624_v8 = vld [vmem:[%s3150_s2 + $0xc78] sm:$0xff]  ;;  %v607_v10 = vld [vmem:[%s3150_s2 + $0xbf0] sm:$0xff] }
 0x133   : > { %1268 = vmatpush.msrb.mxu0 %v302_v13  ;;  %1288 = vmatpush.msrb.mxu1 %v558_v14  ;;  %v975_v25 = vadd.f32 %v974_v20, %v954_v19  ;;  %v352_v11 = vld [vmem:[%s3150_s2 + $0x3f8] sm:$0xff]  ;;  %v335_v13 = vld [vmem:[%s3150_s2 + $0x370] sm:$0xff] }
 0x134   : > { %1229 = vmatpush.msra.mxu2 %v285_v15  ;;  %1249 = vmatpush.msra.mxu3 %v541_v16  ;;  %v608_v12 = vld [vmem:[%s3150_s2 + $0xbf8] sm:$0xff]  ;;  %v591_v14 = vld [vmem:[%s3150_s2 + $0xb70] sm:$0xff] }
 0x135   : > { %1269 = vmatpush.msrb.mxu0 %v286_v17  ;;  %1289 = vmatpush.msrb.mxu1 %v542_v18  ;;  %v1395_v36 = vrot.slane %v975_v25, 4  ;;  %v336_v15 = vld [vmem:[%s3150_s2 + $0x378] sm:$0xff]  ;;  %v319_v17 = vld [vmem:[%s3150_s2 + $0x2f0] sm:$0xff] }
 0x136   : > { %1230 = vmatpush.msra.mxu2 %v269_v21  ;;  %1250 = vmatpush.msra.mxu3 %v525_v22  ;;  %v592_v16 = vld [vmem:[%s3150_s2 + $0xb78] sm:$0xff]  ;;  %v575_v18 = vld [vmem:[%s3150_s2 + $0xaf0] sm:$0xff] }
 0x137   : > { %1270 = vmatpush.msrb.mxu0 %v270_v23  ;;  %1290 = vmatpush.msrb.mxu1 %v526_v24  ;;  %v914_v32 = vpop.f32.mrf.mxu2  ;;  %v934_v33 = vpop.f32.mrf.mxu3  ;;  %v320_v19 = vld [vmem:[%s3150_s2 + $0x2f8] sm:$0xff]  ;;  %v303_v21 = vld [vmem:[%s3150_s2 + $0x270] sm:$0xff] }
 0x138   : > { %1231 = vmatpush.msra.mxu2 %v253_v26  ;;  %1251 = vmatpush.msra.mxu3 %v509_v27  ;;  %v935_v37 = vadd.f32 %v934_v33, %v914_v32  ;;  %v576_v20 = vld [vmem:[%s3150_s2 + $0xaf8] sm:$0xff]  ;;  %v559_v22 = vld [vmem:[%s3150_s2 + $0xa70] sm:$0xff] }
 0x139   : > { %1271 = vmatpush.msrb.mxu0 %v254_v28  ;;  %1291 = vmatpush.msrb.mxu1 %v510_v29  ;;  %v304_v23 = vld [vmem:[%s3150_s2 + $0x278] sm:$0xff]  ;;  %v287_v25 = vld [vmem:[%s3150_s2 + $0x1f0] sm:$0xff] }
 0x13a   : > { %1232 = vmatpush.msra.mxu2 %v237_v30  ;;  %1252 = vmatpush.msra.mxu3 %v493_v31  ;;  %v1404_v38 = vsel %vm1401_vm2, %v935_v37, %v1395_v36  ;;  %v560_v24 = vld [vmem:[%s3150_s2 + $0xa78] sm:$0xff]  ;;  %v543_v26 = vld [vmem:[%s3150_s2 + $0x9f0] sm:$0xff] }
 0x13b   : > { %1272 = vmatpush.msrb.mxu0 %v238_v34  ;;  %1292 = vmatpush.msrb.mxu1 %v494_v35  ;;  %1420 = vst [vmem:[%s2713_s28 + $0x10] sm:$0xff] %v1404_v38  ;;  %v288_v27 = vld [vmem:[%s3150_s2 + $0x1f8] sm:$0xff]  ;;  %v271_v31 = vld [vmem:[%s3150_s2 + $0x170] sm:$0xff] }
 0x13c   : > { %1233 = vmatmul.f32.vlgmr.msra.gmra.mxu2 %v1935_v3  ;;  %1253 = vmatmul.f32.vlgmr.msra.gmra.mxu3 %v1937_v4  ;;  %v544_v28 = vld [vmem:[%s3150_s2 + $0x9f8] sm:$0xff]  ;;  %v527_v32 = vld [vmem:[%s3150_s2 + $0x970] sm:$0xff] }
 0x13d   : > { %1273 = vmatmul.f32.vlgmr.msrb.gmra.mxu0 %v1935_v3  ;;  %1293 = vmatmul.f32.vlgmr.msrb.gmra.mxu1 %v1937_v4  ;;  %v272_v33 = vld [vmem:[%s3150_s2 + $0x178] sm:$0xff]  ;;  %v255_v36 = vld [vmem:[%s3150_s2 + $0xf0] sm:$0xff] }
 0x13e   : > { %1297 = vmatpush.msrb.mxu2 %v479_v39  ;;  %1317 = vmatpush.msrb.mxu3 %v735_v40  ;;  %v528_v34 = vld [vmem:[%s3150_s2 + $0x978] sm:$0xff]  ;;  %v511_v37 = vld [vmem:[%s3150_s2 + $0x8f0] sm:$0xff] }
 0x13f   : > { %1337 = vmatpush.msra.mxu0 %v480_v41  ;;  %1357 = vmatpush.msra.mxu1 %v736_v42  ;;  %v256_v38 = vld [vmem:[%s3150_s2 + $0xf8] sm:$0xff]  ;;  %v239_v40 = vld [vmem:[%s3150_s2 + $0x70] sm:$0xff] }
 0x140   : > { %1298 = vmatpush.msrb.mxu2 %v463_v43  ;;  %1318 = vmatpush.msrb.mxu3 %v719_v44  ;;  %v512_v39 = vld [vmem:[%s3150_s2 + $0x8f8] sm:$0xff]  ;;  %v495_v41 = vld [vmem:[%s3150_s2 + $0x870] sm:$0xff] }
 0x141   : > { %1338 = vmatpush.msra.mxu0 %v464_v45  ;;  %1358 = vmatpush.msra.mxu1 %v720_v46  ;;  %v240_v44 = vld [vmem:[%s3150_s2 + $0x78] sm:$0xff] }
 0x142   : > { %1299 = vmatpush.msrb.mxu2 %v447_v47  ;;  %1319 = vmatpush.msrb.mxu3 %v703_v48  ;;  %v496_v45 = vld [vmem:[%s3150_s2 + $0x878] sm:$0xff] }
 0x143   : > { %1339 = vmatpush.msra.mxu0 %v448_v49  ;;  %1359 = vmatpush.msra.mxu1 %v704_v50 }
 0x144   : > { %1300 = vmatpush.msrb.mxu2 %v431_v51  ;;  %1320 = vmatpush.msrb.mxu3 %v687_v52 }
 0x145   : > { %1340 = vmatpush.msra.mxu0 %v432_v53  ;;  %1360 = vmatpush.msra.mxu1 %v688_v54 }
 0x146   : > { %1301 = vmatpush.msrb.mxu2 %v415_v55  ;;  %1321 = vmatpush.msrb.mxu3 %v671_v56 }
 0x147   : > { %1341 = vmatpush.msra.mxu0 %v416_v57  ;;  %1361 = vmatpush.msra.mxu1 %v672_v58 }
 0x148   : > { %1302 = vmatpush.msrb.mxu2 %v399_v59  ;;  %1322 = vmatpush.msrb.mxu3 %v655_v60 }
 0x149   : > { %1342 = vmatpush.msra.mxu0 %v400_v61  ;;  %1362 = vmatpush.msra.mxu1 %v656_v62 }
 0x14a   : > { %1303 = vmatpush.msrb.mxu2 %v383_v63  ;;  %1323 = vmatpush.msrb.mxu3 %v639_v0 }
 0x14b   : > { %1343 = vmatpush.msra.mxu0 %v384_v1  ;;  %1363 = vmatpush.msra.mxu1 %v640_v2 }
 0x14c   : > { %1304 = vmatpush.msrb.mxu2 %v367_v5  ;;  %1324 = vmatpush.msrb.mxu3 %v623_v6 }
 0x14d   : > { %1344 = vmatpush.msra.mxu0 %v368_v7  ;;  %1364 = vmatpush.msra.mxu1 %v624_v8 }
 0x14e   : > { %1305 = vmatpush.msrb.mxu2 %v351_v9  ;;  %1325 = vmatpush.msrb.mxu3 %v607_v10 }
 0x14f   : > { %1345 = vmatpush.msra.mxu0 %v352_v11  ;;  %1365 = vmatpush.msra.mxu1 %v608_v12 }
 0x150   : > { %1306 = vmatpush.msrb.mxu2 %v335_v13  ;;  %1326 = vmatpush.msrb.mxu3 %v591_v14 }
 0x151   : > { %1346 = vmatpush.msra.mxu0 %v336_v15  ;;  %1366 = vmatpush.msra.mxu1 %v592_v16 }
 0x152   : > { %1307 = vmatpush.msrb.mxu2 %v319_v17  ;;  %1327 = vmatpush.msrb.mxu3 %v575_v18 }
 0x153   : > { %1347 = vmatpush.msra.mxu0 %v320_v19  ;;  %1367 = vmatpush.msra.mxu1 %v576_v20 }
 0x154   : > { %1308 = vmatpush.msrb.mxu2 %v303_v21  ;;  %1328 = vmatpush.msrb.mxu3 %v559_v22  ;;  %v1034_v29 = vpop.f32.mrf.mxu0  ;;  %v1054_v30 = vpop.f32.mrf.mxu1 }
 0x155   : > { %1348 = vmatpush.msra.mxu0 %v304_v23  ;;  %1368 = vmatpush.msra.mxu1 %v560_v24  ;;  %v1055_v35 = vadd.f32 %v1054_v30, %v1034_v29 }
 0x156   : > { %1309 = vmatpush.msrb.mxu2 %v287_v25  ;;  %1329 = vmatpush.msrb.mxu3 %v543_v26 }
 0x157   : > { %1349 = vmatpush.msra.mxu0 %v288_v27  ;;  %1369 = vmatpush.msra.mxu1 %v544_v28  ;;  %v1396_v46 = vrot.slane %v1055_v35, 4 }
 0x158   : > { %1310 = vmatpush.msrb.mxu2 %v271_v31  ;;  %1330 = vmatpush.msrb.mxu3 %v527_v32 }
 0x159   : > { %1350 = vmatpush.msra.mxu0 %v272_v33  ;;  %1370 = vmatpush.msra.mxu1 %v528_v34  ;;  %v994_v42 = vpop.f32.mrf.mxu2  ;;  %v1014_v43 = vpop.f32.mrf.mxu3 }
 0x15a   : > { %1311 = vmatpush.msrb.mxu2 %v255_v36  ;;  %1331 = vmatpush.msrb.mxu3 %v511_v37  ;;  %v1015_v47 = vadd.f32 %v1014_v43, %v994_v42 }
 0x15b   : > { %1351 = vmatpush.msra.mxu0 %v256_v38  ;;  %1371 = vmatpush.msra.mxu1 %v512_v39 }
 0x15c   : > { %1312 = vmatpush.msrb.mxu2 %v239_v40  ;;  %1332 = vmatpush.msrb.mxu3 %v495_v41  ;;  %v1405_v48 = vsel %vm1401_vm2, %v1015_v47, %v1396_v46 }
 0x15d   : > { %1352 = vmatpush.msra.mxu0 %v240_v44  ;;  %1372 = vmatpush.msra.mxu1 %v496_v45  ;;  %1421 = vst [vmem:[%s2713_s28 + $0x18] sm:$0xff] %v1405_v48 }
 0x15e   : > { %1313 = vmatmul.f32.vlgmr.msrb.gmra.mxu2 %v1935_v3  ;;  %1333 = vmatmul.f32.vlgmr.msrb.gmra.mxu3 %v1937_v4 }
 0x15f   : > { %1353 = vmatmul.f32.vlgmr.msra.gmra.mxu0 %v1935_v3  ;;  %1373 = vmatmul.f32.vlgmr.msra.gmra.mxu1 %v1937_v4 }
 0x176   : > { %v1114_v49 = vpop.f32.mrf.mxu0  ;;  %v1134_v50 = vpop.f32.mrf.mxu1 }
 0x177   : > { %v1135_v51 = vadd.f32 %v1134_v50, %v1114_v49 }
 0x179   : > { %v1397_v54 = vrot.slane %v1135_v51, 4 }
 0x17b   : > { %v1074_v52 = vpop.f32.mrf.mxu2  ;;  %v1094_v53 = vpop.f32.mrf.mxu3 }
 0x17c   : > { %v1095_v55 = vadd.f32 %v1094_v53, %v1074_v52 }
 0x17e   : > { %v1406_v56 = vsel %vm1401_vm2, %v1095_v55, %v1397_v54 }
 0x17f   : > { %1422 = vst [vmem:[%s2713_s28 + $0x20] sm:$0xff] %v1406_v56 }
 0x198   : > { %v1194_v57 = vpop.f32.mrf.mxu0  ;;  %v1214_v58 = vpop.f32.mrf.mxu1 }
 0x199   : > { %v1215_v59 = vadd.f32 %v1214_v58, %v1194_v57 }
 0x19b   : > { %v1398_v3 = vrot.slane %v1215_v59, 4 }
 0x19d   : > { %v1154_v60 = vpop.f32.mrf.mxu2  ;;  %v1174_v61 = vpop.f32.mrf.mxu3 }
 0x19e   : > { %v1175_v62 = vadd.f32 %v1174_v61, %v1154_v60 }
 0x1a0   : > { %v1407_v4 = vsel %vm1401_vm2, %v1175_v62, %v1398_v3 }
 0x1a1   : > { %1423 = vst [vmem:[%s2713_s28 + $0x28] sm:$0xff] %v1407_v4 }
 0x1ba   : > { %v1274_v63 = vpop.f32.mrf.mxu0  ;;  %v1294_v0 = vpop.f32.mrf.mxu1 }
 0x1bb   : > { %v1295_v1 = vadd.f32 %v1294_v0, %v1274_v63 }
 0x1bd   : > { %v1399_v6 = vrot.slane %v1295_v1, 4 }
 0x1bf   : > { %v1234_v2 = vpop.f32.mrf.mxu2  ;;  %v1254_v5 = vpop.f32.mrf.mxu3 }
 0x1c0   : > { %v1255_v7 = vadd.f32 %v1254_v5, %v1234_v2 }
 0x1c2   : > { %v1408_v8 = vsel %vm1401_vm2, %v1255_v7, %v1399_v6 }
 0x1c3   : > { %1424 = vst [vmem:[%s2713_s28 + $0x30] sm:$0xff] %v1408_v8 }
 0x1dc   : > { %v1354_v9 = vpop.f32.mrf.mxu0  ;;  %v1374_v10 = vpop.f32.mrf.mxu1 }
 0x1dd   : > { %v1375_v11 = vadd.f32 %v1374_v10, %v1354_v9 }
 0x1df   : > { %v1400_v14 = vrot.slane %v1375_v11, 4 }
 0x1e1   : > { %v1314_v12 = vpop.f32.mrf.mxu2  ;;  %v1334_v13 = vpop.f32.mrf.mxu3 }
 0x1e2   : > { %v1335_v15 = vadd.f32 %v1334_v13, %v1314_v12 }
 0x1e4   : > { %v1409_v16 = vsel %vm1401_vm2, %v1335_v15, %v1400_v14 }
 0x1e5   : > { %1425 = vst [vmem:[%s2713_s28 + $0x38] sm:$0xff] %v1409_v16 }
 0x1e6 PF: > { %s13_s12 = sadd.s32 1, %s1512_s12  }
 0x1e7   : > { %p10_p4 = scmp.ge.s32.totalorder %s13_s12, 4  }
 0x1e9   :  { %12 = sbr.rel (!%p10_p4) target bundleno = 1 (0x1), region = 62 }

// kernel: aligned_module_forward.3
= control target key start
LH: loop header
LB: loop body
LE: loop exit
PB: predicated region body
PF: predicated region fallthrough
CT: control target
= control target key end

     0   :  { %s1682_s15 = smov 0   ;;  %s1909_s0 = inlined_call_operand.vmem [shape: f32[2,4,2048], index: 0, kind: input, shape index: {}]   ;;  %s1910_s1 = inlined_call_operand.vmem [shape: f32[4,4], index: 1, kind: input, shape index: {}]   ;;  %s1911_s2 = inlined_call_operand.vmem [shape: f32[4,4], index: 2, kind: input, shape index: {}]   ;;  %s1912_s3 = inlined_call_operand.vmem [shape: f32[4,4], index: 3, kind: input, shape index: {}]   ;;  %s1913_s4 = inlined_call_operand.vmem [shape: f32[2,4,2048], index: 4, kind: output, shape index: {}]  }
   0x1 LB: > { %s1523_s16 = sadd.s32 4294967295, %s1654_s15   ;;  %p1527_p0 = scmp.ge.s32.totalorder %s1654_s15, 1  ;;  %s1654_s15 = sphi %s1682_s15, %s14_s15  }
   0x2   : > { %p162_p1 = scmp.lt.s32.totalorder %s1654_s15, 3 }
   0x4   : > { %p163_p2 = pnand %p1527_p0, %p162_p1 }
   0x5   : > { %p188_p3 = scmp.lt.s32.totalorder (!%p163_p2), %s1523_s16, 1 }
   0x6   : > { %166 = sbr.rel (%p163_p2) target bundleno = 631 (0x277), region = 36 }
   0xb   : > { %s1915_s16 = smov (!%p188_p3, %s1523_s16), 1  ;;  %vm246_vm0 = vcmask 1043456   ;;  %v206_v5 = vld [vmem:[%s1910_s1] sm:$0xf]  ;;  %vm242_vm1 = vcmask 31744  }
   0xc   : > { %s1631_s17 = sshll.u32 %s1915_s16, 6  ;;  %v599_v27 = vld [vmem:[%s1911_s2] sm:$0xf] }
   0xd   : > { %s192_s20 = scalar_lea.vmem %s1909_s0, %s1631_s17  ;;  %s1888_s29 = scalar_lea.vmem %s1913_s4, %s1631_s17 }
   0xe   : > { %v199_v0 = vld [vmem:[%s192_s20 + $0x8] sm:$0xff]  ;;  %v198_v1 = vld [vmem:[%s192_s20] sm:$0xff]  ;;  %v201_v2 = vld [vmem:[%s192_s20 + $0x18] sm:$0xff] }
   0xf   : > { %217 = vst [vmem:[#allocation1 + $0x10] ss:$2 sm:$0xff] %v199_v0  ;;  %v200_v3 = vld [vmem:[%s192_s20 + $0x10] sm:$0xff]  ;;  %v203_v4 = vld [vmem:[%s192_s20 + $0x28] sm:$0xff]  ;;  %v202_v6 = vld [vmem:[%s192_s20 + $0x20] sm:$0xff] }
  0x10   : > { %215 = vst [vmem:[#allocation1] ss:$2 sm:$0xff] %v198_v1  ;;  %v205_v10 = vld [vmem:[%s192_s20 + $0x38] sm:$0xff]  ;;  %v204_v14 = vld [vmem:[%s192_s20 + $0x30] sm:$0xff] }
  0x11   : > { %221 = vst [vmem:[#allocation1 + $0x30] ss:$2 sm:$0xff] %v201_v2 }
  0x12   : > { %219 = vst [vmem:[#allocation1 + $0x20] ss:$2 sm:$0xff] %v200_v3 }
  0x16   : > { %v224_v7 = vld.sshfl [vmem:[#allocation1 + $0x10] sm:$0xff pattern:$0x75316420]  ;;  %v225_v8 = vld.sshfl [vmem:[#allocation1 + $0x18] sm:$0xff pattern:$0x75316420] }
  0x17   : > { %1536 = vmatpush.msk.msra.mxu2 %vm246_vm0, %v224_v7  ;;  %231 = vst [vmem:[#allocation1 + $0x10] ss:$2 sm:$0xff] %v203_v4  ;;  %1538 = vmatpush.msk.msra.mxu3 %vm246_vm0, %v225_v8  ;;  %v222_v9 = vld.sshfl [vmem:[#allocation1] sm:$0xff pattern:$0x75316420] }
  0x18   : > { %1537 = vmatmul.msk.f32.vlgmr.msra.gmra.mxu2 %vm242_vm1, %v206_v5  ;;  %1539 = vmatmul.msk.f32.vlgmr.msra.gmra.mxu3 %vm242_vm1, %v206_v5  ;;  %v223_v11 = vld.sshfl [vmem:[#allocation1 + $0x8] sm:$0xff pattern:$0x75316420]  ;;  %v228_v12 = vld.sshfl [vmem:[#allocation1 + $0x30] sm:$0xff pattern:$0x75316420] }
  0x19   : > { %1532 = vmatpush.msk.msra.mxu0 %vm246_vm0, %v222_v9  ;;  %230 = vst [vmem:[#allocation1] ss:$2 sm:$0xff] %v202_v6  ;;  %1534 = vmatpush.msk.msra.mxu1 %vm246_vm0, %v223_v11  ;;  %v229_v13 = vld.sshfl [vmem:[#allocation1 + $0x38] sm:$0xff pattern:$0x75316420] }
  0x1a   : > { %1544 = vmatpush.msk.msrb.mxu2 %vm246_vm0, %v228_v12  ;;  %1533 = vmatmul.msk.f32.vlgmr.msra.gmra.mxu0 %vm242_vm1, %v206_v5  ;;  %233 = vst [vmem:[#allocation1 + $0x30] ss:$2 sm:$0xff] %v205_v10  ;;  %v226_v15 = vld.sshfl [vmem:[#allocation1 + $0x20] sm:$0xff pattern:$0x75316420] }
  0x1b   : > { %1535 = vmatmul.msk.f32.vlgmr.msra.gmra.mxu1 %vm242_vm1, %v206_v5  ;;  %1546 = vmatpush.msk.msrb.mxu3 %vm246_vm0, %v229_v13  ;;  %v227_v16 = vld.sshfl [vmem:[#allocation1 + $0x28] sm:$0xff pattern:$0x75316420] }
  0x1c   : > { %1540 = vmatpush.msk.msrb.mxu0 %vm246_vm0, %v226_v15  ;;  %232 = vst [vmem:[#allocation1 + $0x20] ss:$2 sm:$0xff] %v204_v14  ;;  %1542 = vmatpush.msk.msrb.mxu1 %vm246_vm0, %v227_v16 }
  0x1e   : > { %v236_v17 = vld.sshfl [vmem:[#allocation1 + $0x10] sm:$0xff pattern:$0x75316420]  ;;  %v237_v18 = vld.sshfl [vmem:[#allocation1 + $0x18] sm:$0xff pattern:$0x75316420] }
  0x1f   : > { %1552 = vmatpush.msk.msra.mxu2 %vm246_vm0, %v236_v17  ;;  %1554 = vmatpush.msk.msra.mxu3 %vm246_vm0, %v237_v18 }
  0x20   : > { %1545 = vmatmul.msk.f32.vlgmr.msrb.gmra.mxu2 %vm242_vm1, %v206_v5  ;;  %1547 = vmatmul.msk.f32.vlgmr.msrb.gmra.mxu3 %vm242_vm1, %v206_v5  ;;  %v234_v19 = vld.sshfl [vmem:[#allocation1] sm:$0xff pattern:$0x75316420]  ;;  %v235_v20 = vld.sshfl [vmem:[#allocation1 + $0x8] sm:$0xff pattern:$0x75316420] }
  0x21   : > { %1548 = vmatpush.msk.msra.mxu0 %vm246_vm0, %v234_v19  ;;  %v240_v21 = vld.sshfl [vmem:[#allocation1 + $0x30] sm:$0xff pattern:$0x75316420]  ;;  %1550 = vmatpush.msk.msra.mxu1 %vm246_vm0, %v235_v20  ;;  %v241_v22 = vld.sshfl [vmem:[#allocation1 + $0x38] sm:$0xff pattern:$0x75316420] }
  0x22   : > { %1541 = vmatmul.msk.f32.vlgmr.msrb.gmra.mxu0 %vm242_vm1, %v206_v5  ;;  %1560 = vmatpush.msk.msrb.mxu2 %vm246_vm0, %v240_v21 }
  0x23   : > { %1543 = vmatmul.msk.f32.vlgmr.msrb.gmra.mxu1 %vm242_vm1, %v206_v5  ;;  %1562 = vmatpush.msk.msrb.mxu3 %vm246_vm0, %v241_v22  ;;  %v238_v23 = vld.sshfl [vmem:[#allocation1 + $0x20] sm:$0xff pattern:$0x75316420]  ;;  %v239_v24 = vld.sshfl [vmem:[#allocation1 + $0x28] sm:$0xff pattern:$0x75316420] }
  0x24   : > { %1556 = vmatpush.msk.msrb.mxu0 %vm246_vm0, %v238_v23  ;;  %1558 = vmatpush.msk.msrb.mxu1 %vm246_vm0, %v239_v24 }
  0x28   : > { %1553 = vmatmul.msk.f32.vlgmr.msra.gmra.mxu2 %vm242_vm1, %v206_v5  ;;  %1555 = vmatmul.msk.f32.vlgmr.msra.gmra.mxu3 %vm242_vm1, %v206_v5 }
  0x2a   : > { %1549 = vmatmul.msk.f32.vlgmr.msra.gmra.mxu0 %vm242_vm1, %v206_v5 }
  0x2b   : > { %1551 = vmatmul.msk.f32.vlgmr.msra.gmra.mxu1 %vm242_vm1, %v206_v5 }
  0x30   : > { %1561 = vmatmul.msk.f32.vlgmr.msrb.gmra.mxu2 %vm242_vm1, %v206_v5  ;;  %1563 = vmatmul.msk.f32.vlgmr.msrb.gmra.mxu3 %vm242_vm1, %v206_v5 }
  0x32   : > { %1557 = vmatmul.msk.f32.vlgmr.msrb.gmra.mxu0 %vm242_vm1, %v206_v5 }
  0x33   : > { %1559 = vmatmul.msk.f32.vlgmr.msrb.gmra.mxu1 %vm242_vm1, %v206_v5 }
  0x97   : > { %v1733_v25 = vpop.f32.mrf.mxu0 }
  0x98   : > { %v1735_v26 = vpop.f32.mrf.mxu1  ;;  %1564 = vmatpush.msk.msra.mxu0 %vm246_vm0, %v1733_v25 }
  0x99   : > { %1566 = vmatpush.msk.msra.mxu1 %vm246_vm0, %v1735_v26  ;;  %1565 = vmatmul.msk.f32.vlgmr.msra.gmra.mxu0 %vm242_vm1, %v599_v27 }
  0x9a   : > { %1567 = vmatmul.msk.f32.vlgmr.msra.gmra.mxu1 %vm242_vm1, %v599_v27 }
  0x9b   : > { %v1746_v28 = vpop.f32.mrf.mxu2  ;;  %v1748_v29 = vpop.f32.mrf.mxu3 }
  0x9c   : > { %1568 = vmatpush.msk.msra.mxu2 %vm246_vm0, %v1746_v28  ;;  %1570 = vmatpush.msk.msra.mxu3 %vm246_vm0, %v1748_v29 }
  0x9d   : > { %1569 = vmatmul.msk.f32.vlgmr.msra.gmra.mxu2 %vm242_vm1, %v599_v27  ;;  %1571 = vmatmul.msk.f32.vlgmr.msra.gmra.mxu3 %vm242_vm1, %v599_v27 }
  0x9f   : > { %v1756_v30 = vpop.f32.mrf.mxu0 }
  0xa0   : > { %1572 = vmatpush.msk.msrb.mxu0 %vm246_vm0, %v1756_v30  ;;  %v1760_v31 = vpop.f32.mrf.mxu1 }
  0xa1   : > { %1573 = vmatmul.msk.f32.vlgmr.msrb.gmra.mxu0 %vm242_vm1, %v599_v27  ;;  %1574 = vmatpush.msk.msrb.mxu1 %vm246_vm0, %v1760_v31 }
  0xa2   : > { %1575 = vmatmul.msk.f32.vlgmr.msrb.gmra.mxu1 %vm242_vm1, %v599_v27 }
  0xa3   : > { %v1766_v32 = vpop.f32.mrf.mxu2  ;;  %v1768_v33 = vpop.f32.mrf.mxu3 }
  0xa4   : > { %1576 = vmatpush.msk.msrb.mxu2 %vm246_vm0, %v1766_v32  ;;  %1578 = vmatpush.msk.msrb.mxu3 %vm246_vm0, %v1768_v33 }
  0xa5   : > { %1577 = vmatmul.msk.f32.vlgmr.msrb.gmra.mxu2 %vm242_vm1, %v599_v27  ;;  %1579 = vmatmul.msk.f32.vlgmr.msrb.gmra.mxu3 %vm242_vm1, %v599_v27 }
  0xa7   : > { %v1776_v34 = vpop.f32.mrf.mxu0 }
  0xa8   : > { %1580 = vmatpush.msk.msra.mxu0 %vm246_vm0, %v1776_v34  ;;  %v1780_v35 = vpop.f32.mrf.mxu1 }
  0xa9   : > { %1581 = vmatmul.msk.f32.vlgmr.msra.gmra.mxu0 %vm242_vm1, %v599_v27  ;;  %1582 = vmatpush.msk.msra.mxu1 %vm246_vm0, %v1780_v35 }
  0xaa   : > { %1583 = vmatmul.msk.f32.vlgmr.msra.gmra.mxu1 %vm242_vm1, %v599_v27 }
  0xab   : > { %v1786_v36 = vpop.f32.mrf.mxu2  ;;  %v1788_v37 = vpop.f32.mrf.mxu3 }
  0xac   : > { %1584 = vmatpush.msk.msra.mxu2 %vm246_vm0, %v1786_v36  ;;  %1586 = vmatpush.msk.msra.mxu3 %vm246_vm0, %v1788_v37 }
  0xad   : > { %1585 = vmatmul.msk.f32.vlgmr.msra.gmra.mxu2 %vm242_vm1, %v599_v27  ;;  %1587 = vmatmul.msk.f32.vlgmr.msra.gmra.mxu3 %vm242_vm1, %v599_v27 }
  0xaf   : > { %v1796_v38 = vpop.f32.mrf.mxu0 }
  0xb0   : > { %1588 = vmatpush.msk.msrb.mxu0 %vm246_vm0, %v1796_v38  ;;  %v1800_v39 = vpop.f32.mrf.mxu1 }
  0xb1   : > { %1589 = vmatmul.msk.f32.vlgmr.msrb.gmra.mxu0 %vm242_vm1, %v599_v27  ;;  %1590 = vmatpush.msk.msrb.mxu1 %vm246_vm0, %v1800_v39 }
  0xb2   : > { %1591 = vmatmul.msk.f32.vlgmr.msrb.gmra.mxu1 %vm242_vm1, %v599_v27 }
  0xb3   : > { %v1806_v40 = vpop.f32.mrf.mxu2  ;;  %v1808_v41 = vpop.f32.mrf.mxu3 }
  0xb4   : > { %1592 = vmatpush.msk.msrb.mxu2 %vm246_vm0, %v1806_v40  ;;  %1594 = vmatpush.msk.msrb.mxu3 %vm246_vm0, %v1808_v41 }
  0xb5   : > { %1593 = vmatmul.msk.f32.vlgmr.msrb.gmra.mxu2 %vm242_vm1, %v599_v27  ;;  %1595 = vmatmul.msk.f32.vlgmr.msrb.gmra.mxu3 %vm242_vm1, %v599_v27  ;;  %v1656_v27 = vmov 2048.0  }
  0xb6   : > { %1642 = vrcp.f32 %v1656_v27 }
 0x116   : > { %v668_v42 = vpop.f32.mrf.mxu0 }
 0x117   : > { %v688_v43 = vpop.f32.mrf.mxu1  ;;  %v971_v44 = vsel %vm246_vm0, %v668_v42, 0.0  ;;  %v1643_v42 = vpop.eup %1642 }
 0x118   : > { %v972_v45 = vsel %vm246_vm0, %v688_v43, 0.0  ;;  %v1005_v43 = vmul.f32 2048.0, %v1643_v42  ;;  %vm1009_vm2 = vweird.f32 %v1643_v42 }
 0x119   : > { %v973_v48 = vadd.f32 %v972_v45, %v971_v44 }
 0x11a   : > { %v1006_v44 = vsub.f32 1.0, %v1005_v43 }
 0x11c   : > { %v1007_v45 = vmul.f32 %v1643_v42, %v1006_v44 }
 0x11e   : > { %v748_v46 = vpop.f32.mrf.mxu0 }
 0x11f   : > { %v768_v47 = vpop.f32.mrf.mxu1  ;;  %v978_v54 = vsel %vm246_vm0, %v748_v46, 0.0  ;;  %v1008_v46 = vadd.f32 %v1643_v42, %v1007_v45 }
 0x120   : > { %v708_v49 = vpop.f32.mrf.mxu2  ;;  %v728_v50 = vpop.f32.mrf.mxu3  ;;  %v980_v56 = vsel %vm246_vm0, %v768_v47, 0.0 }
 0x121   : > { %v974_v51 = vsel %vm246_vm0, %v708_v49, 0.0  ;;  %v976_v52 = vsel %vm246_vm0, %v728_v50, 0.0  ;;  %v1010_v47 = vsel %vm1009_vm2, %v1643_v42, %v1008_v46 }
 0x122   : > { %v975_v53 = vadd.f32 %v974_v51, %v973_v48 }
 0x124   : > { %v977_v55 = vadd.f32 %v976_v52, %v975_v53 }
 0x126   : > { %v979_v57 = vadd.f32 %v978_v54, %v977_v55  ;;  %v828_v58 = vpop.f32.mrf.mxu0 }
 0x127   : > { %v848_v59 = vpop.f32.mrf.mxu1  ;;  %v986_v2 = vsel %vm246_vm0, %v828_v58, 0.0 }
 0x128   : > { %v981_v60 = vadd.f32 %v980_v56, %v979_v57  ;;  %v788_v61 = vpop.f32.mrf.mxu2  ;;  %v808_v62 = vpop.f32.mrf.mxu3  ;;  %v988_v4 = vsel %vm246_vm0, %v848_v59, 0.0 }
 0x129   : > { %v982_v63 = vsel %vm246_vm0, %v788_v61, 0.0  ;;  %v984_v0 = vsel %vm246_vm0, %v808_v62, 0.0 }
 0x12a   : > { %v983_v1 = vadd.f32 %v982_v63, %v981_v60 }
 0x12c   : > { %v985_v3 = vadd.f32 %v984_v0, %v983_v1 }
 0x12e   : > { %v987_v5 = vadd.f32 %v986_v2, %v985_v3  ;;  %v908_v6 = vpop.f32.mrf.mxu0 }
 0x12f   : > { %v928_v13 = vpop.f32.mrf.mxu1  ;;  %v994_v14 = vsel %vm246_vm0, %v908_v6, 0.0 }
 0x130   : > { %v989_v7 = vadd.f32 %v988_v4, %v987_v5  ;;  %v868_v8 = vpop.f32.mrf.mxu2  ;;  %v888_v9 = vpop.f32.mrf.mxu3  ;;  %v996_v16 = vsel %vm246_vm0, %v928_v13, 0.0  ;;  %v1031_v4 = vld [vmem:[%s1912_s3] sm:$0xf] }
 0x131   : > { %v990_v10 = vsel %vm246_vm0, %v868_v8, 0.0  ;;  %v992_v11 = vsel %vm246_vm0, %v888_v9, 0.0 }
 0x132   : > { %v991_v12 = vadd.f32 %v990_v10, %v989_v7 }
 0x134   : > { %v993_v15 = vadd.f32 %v992_v11, %v991_v12 }
 0x136   : > { %v995_v17 = vadd.f32 %v994_v14, %v993_v15 }
 0x138   : > { %v997_v18 = vadd.f32 %v996_v16, %v995_v17  ;;  %v948_v19 = vpop.f32.mrf.mxu2  ;;  %v968_v20 = vpop.f32.mrf.mxu3 }
 0x139   : > { %v998_v21 = vsel %vm246_vm0, %v948_v19, 0.0  ;;  %v1000_v22 = vsel %vm246_vm0, %v968_v20, 0.0 }
 0x13a   : > { %v999_v23 = vadd.f32 %v998_v21, %v997_v18 }
 0x13c   : > { %v1001_v24 = vadd.f32 %v1000_v22, %v999_v23 }
 0x13e   : > { %1002 = vadd.xlane.f32.xlu0 %v1001_v24 }
 0x1b1   : > { %v1003_v48 = vpop.xlane.xlu0 %1002 }
 0x1b2   : > { %v1011_v49 = vmul.f32 %v1010_v47, %v1003_v48 }
 0x1b4   : > { %v1596_v50 = vmul.f32 -1.442695, %v1011_v49 }
 0x1b6   : > { %1644 = vpow2.f32 %v1596_v50 }
 0x1bc   : > { %v1645_v51 = vpop.eup %1644 }
 0x1bd   : > { %v1015_v52 = vadd.f32 1.0, %v1645_v51 }
 0x1bf   : > { %1646 = vrcp.f32 %v1015_v52  ;;  %v1027_v56 = vand.u32 2147483648, %v1015_v52  ;;  %v1025_v58 = vand.u32 2147483647, %v1015_v52  ;;  %vm1021_vm4 = vweird.f32 %v1015_v52 }
 0x1c1   : > { %v1028_v60 = vor.u32 1.1754944e-38, %v1027_v56  ;;  %vm1026_vm6 = vcmp.eq.f32.partialorder %v1025_v58, 8.507059e+37 }
 0x1c5   : > { %v1647_v53 = vpop.eup %1646 }
 0x1c6   : > { %v1017_v54 = vmul.f32 %v1647_v53, %v1015_v52  ;;  %vm1022_vm3 = vweird.f32 %v1647_v53 }
 0x1c7   : > { %vm1023_vm5 = vmor %vm1021_vm4, %vm1022_vm3 }
 0x1c8   : > { %v1018_v55 = vsub.f32 1.0, %v1017_v54 }
 0x1ca   : > { %v1019_v57 = vmul.f32 %v1647_v53, %v1018_v55 }
 0x1cc   : > { %v1020_v59 = vadd.f32 %v1647_v53, %v1019_v57 }
 0x1ce   : > { %v1024_v61 = vsel %vm1023_vm5, %v1647_v53, %v1020_v59 }
 0x1cf   : > { %v1029_v62 = vsel %vm1026_vm6, %v1028_v60, %v1024_v61 }
 0x1d0   : > { %v1032_v63 = vadd.f32 1.0, %v1029_v62 }
 0x1d2   : > { %v1033_v0 = vmul.f32 %v1032_v63, %v1733_v25  ;;  %v1034_v1 = vmul.f32 %v1032_v63, %v1735_v26  ;;  %v1035_v2 = vmul.f32 %v1032_v63, %v1746_v28  ;;  %v1036_v3 = vmul.f32 %v1032_v63, %v1748_v29 }
 0x1d3   : > { %v1037_v5 = vmul.f32 %v1032_v63, %v1756_v30  ;;  %v1038_v6 = vmul.f32 %v1032_v63, %v1760_v31  ;;  %v1039_v25 = vmul.f32 %v1032_v63, %v1766_v32  ;;  %v1040_v26 = vmul.f32 %v1032_v63, %v1768_v33 }
 0x1d4   : > { %1597 = vmatpush.msk.msra.mxu0 %vm246_vm0, %v1033_v0  ;;  %1599 = vmatpush.msk.msra.mxu1 %vm246_vm0, %v1034_v1  ;;  %v1041_v28 = vmul.f32 %v1032_v63, %v1776_v34  ;;  %v1042_v29 = vmul.f32 %v1032_v63, %v1780_v35  ;;  %v1043_v30 = vmul.f32 %v1032_v63, %v1786_v36 }
 0x1d5   : > { %1601 = vmatpush.msk.msra.mxu2 %vm246_vm0, %v1035_v2  ;;  %1603 = vmatpush.msk.msra.mxu3 %vm246_vm0, %v1036_v3  ;;  %v1044_v31 = vmul.f32 %v1032_v63, %v1788_v37  ;;  %v1045_v32 = vmul.f32 %v1032_v63, %v1796_v38  ;;  %v1046_v33 = vmul.f32 %v1032_v63, %v1800_v39 }
 0x1d6   : > { %1598 = vmatmul.msk.f32.vlgmr.msra.gmra.mxu0 %vm242_vm1, %v1031_v4  ;;  %1600 = vmatmul.msk.f32.vlgmr.msra.gmra.mxu1 %vm242_vm1, %v1031_v4  ;;  %v1047_v34 = vmul.f32 %v1032_v63, %v1806_v40  ;;  %v1048_v35 = vmul.f32 %v1032_v63, %v1808_v41 }
 0x1d7   : > { %1602 = vmatmul.msk.f32.vlgmr.msra.gmra.mxu2 %vm242_vm1, %v1031_v4  ;;  %1604 = vmatmul.msk.f32.vlgmr.msra.gmra.mxu3 %vm242_vm1, %v1031_v4 }
 0x1d8   : > { %1605 = vmatpush.msk.msrb.mxu0 %vm246_vm0, %v1037_v5  ;;  %1607 = vmatpush.msk.msrb.mxu1 %vm246_vm0, %v1038_v6 }
 0x1d9   : > { %1609 = vmatpush.msk.msrb.mxu2 %vm246_vm0, %v1039_v25  ;;  %1611 = vmatpush.msk.msrb.mxu3 %vm246_vm0, %v1040_v26 }
 0x1da   : > { %1613 = vmatpush.msk.msra.mxu0 %vm246_vm0, %v1041_v28  ;;  %1615 = vmatpush.msk.msra.mxu1 %vm246_vm0, %v1042_v29 }
 0x1db   : > { %1617 = vmatpush.msk.msra.mxu2 %vm246_vm0, %v1043_v30  ;;  %1619 = vmatpush.msk.msra.mxu3 %vm246_vm0, %v1044_v31 }
 0x1de   : > { %1606 = vmatmul.msk.f32.vlgmr.msrb.gmra.mxu0 %vm242_vm1, %v1031_v4  ;;  %1608 = vmatmul.msk.f32.vlgmr.msrb.gmra.mxu1 %vm242_vm1, %v1031_v4 }
 0x1df   : > { %1610 = vmatmul.msk.f32.vlgmr.msrb.gmra.mxu2 %vm242_vm1, %v1031_v4  ;;  %1612 = vmatmul.msk.f32.vlgmr.msrb.gmra.mxu3 %vm242_vm1, %v1031_v4 }
 0x1e0   : > { %1621 = vmatpush.msk.msrb.mxu0 %vm246_vm0, %v1045_v32  ;;  %1623 = vmatpush.msk.msrb.mxu1 %vm246_vm0, %v1046_v33 }
 0x1e1   : > { %1625 = vmatpush.msk.msrb.mxu2 %vm246_vm0, %v1047_v34  ;;  %1627 = vmatpush.msk.msrb.mxu3 %vm246_vm0, %v1048_v35 }
 0x1e6   : > { %1616 = vmatmul.msk.f32.vlgmr.msra.gmra.mxu1 %vm242_vm1, %v1031_v4  ;;  %1614 = vmatmul.msk.f32.vlgmr.msra.gmra.mxu0 %vm242_vm1, %v1031_v4 }
 0x1e7   : > { %1620 = vmatmul.msk.f32.vlgmr.msra.gmra.mxu3 %vm242_vm1, %v1031_v4  ;;  %1618 = vmatmul.msk.f32.vlgmr.msra.gmra.mxu2 %vm242_vm1, %v1031_v4 }
 0x1ee   : > { %1624 = vmatmul.msk.f32.vlgmr.msrb.gmra.mxu1 %vm242_vm1, %v1031_v4  ;;  %1622 = vmatmul.msk.f32.vlgmr.msrb.gmra.mxu0 %vm242_vm1, %v1031_v4 }
 0x1ef   : > { %1628 = vmatmul.msk.f32.vlgmr.msrb.gmra.mxu3 %vm242_vm1, %v1031_v4  ;;  %1626 = vmatmul.msk.f32.vlgmr.msrb.gmra.mxu2 %vm242_vm1, %v1031_v4 }
 0x253   : > { %v1137_v36 = vpop.f32.mrf.mxu1  ;;  %v1117_v37 = vpop.f32.mrf.mxu0 }
 0x254   : > { %v1436_v38 = vrot.slane %v1137_v36, 4 }
 0x256   : > { %v1444_v39 = vsel %vm246_vm0, %v1117_v37, %v1436_v38 }
 0x257   : > { %1460 = vst [vmem:[%s1888_s29] sm:$0xff] %v1444_v39 }
 0x25a   : > { %v1177_v40 = vpop.f32.mrf.mxu3  ;;  %v1157_v41 = vpop.f32.mrf.mxu2 }
 0x25b   : > { %v1437_v7 = vrot.slane %v1177_v40, 4  ;;  %v1217_v8 = vpop.f32.mrf.mxu1  ;;  %v1197_v9 = vpop.f32.mrf.mxu0 }
 0x25c   : > { %v1438_v10 = vrot.slane %v1217_v8, 4 }
 0x25d   : > { %v1445_v11 = vsel %vm246_vm0, %v1157_v41, %v1437_v7 }
 0x25e   : > { %1461 = vst [vmem:[%s1888_s29 + $0x8] sm:$0xff] %v1445_v11  ;;  %v1446_v12 = vsel %vm246_vm0, %v1197_v9, %v1438_v10 }
 0x25f   : > { %1462 = vst [vmem:[%s1888_s29 + $0x10] sm:$0xff] %v1446_v12 }
 0x262   : > { %v1257_v13 = vpop.f32.mrf.mxu3  ;;  %v1237_v14 = vpop.f32.mrf.mxu2 }
 0x263   : > { %v1439_v15 = vrot.slane %v1257_v13, 4  ;;  %v1297_v16 = vpop.f32.mrf.mxu1  ;;  %v1277_v17 = vpop.f32.mrf.mxu0 }
 0x264   : > { %v1440_v18 = vrot.slane %v1297_v16, 4 }
 0x265   : > { %v1447_v19 = vsel %vm246_vm0, %v1237_v14, %v1439_v15 }
 0x266   : > { %1463 = vst [vmem:[%s1888_s29 + $0x18] sm:$0xff] %v1447_v19  ;;  %v1448_v20 = vsel %vm246_vm0, %v1277_v17, %v1440_v18 }
 0x267   : > { %1464 = vst [vmem:[%s1888_s29 + $0x20] sm:$0xff] %v1448_v20 }
 0x26a   : > { %v1337_v21 = vpop.f32.mrf.mxu3  ;;  %v1317_v22 = vpop.f32.mrf.mxu2 }
 0x26b   : > { %v1441_v23 = vrot.slane %v1337_v21, 4  ;;  %v1377_v24 = vpop.f32.mrf.mxu1  ;;  %v1357_v27 = vpop.f32.mrf.mxu0 }
 0x26c   : > { %v1442_v42 = vrot.slane %v1377_v24, 4 }
 0x26d   : > { %v1449_v43 = vsel %vm246_vm0, %v1317_v22, %v1441_v23 }
 0x26e   : > { %1465 = vst [vmem:[%s1888_s29 + $0x28] sm:$0xff] %v1449_v43  ;;  %v1450_v44 = vsel %vm246_vm0, %v1357_v27, %v1442_v42 }
 0x26f   : > { %1466 = vst [vmem:[%s1888_s29 + $0x30] sm:$0xff] %v1450_v44 }
 0x272   : > { %v1417_v45 = vpop.f32.mrf.mxu3  ;;  %v1397_v46 = vpop.f32.mrf.mxu2 }
 0x273   : > { %v1443_v47 = vrot.slane %v1417_v45, 4 }
 0x275   : > { %v1451_v48 = vsel %vm246_vm0, %v1397_v46, %v1443_v47 }
 0x276   : > { %1467 = vst [vmem:[%s1888_s29 + $0x38] sm:$0xff] %v1451_v48 }
 0x277 PF: > { %s14_s15 = sadd.s32 1, %s1654_s15  }
 0x278   : > { %p11_p4 = scmp.ge.s32.totalorder %s14_s15, 4  }
 0x27a   :  { %13 = sbr.rel (!%p11_p4) target bundleno = 1 (0x1), region = 69 }

// kernel: aligned_module_forward.5
= control target key start
LH: loop header
LB: loop body
LE: loop exit
PB: predicated region body
PF: predicated region fallthrough
CT: control target
= control target key end

     0   :  { %s6443_s21 = smov 0   ;;  %s6445_s22 = smov 0   ;;  %s13354_s0 = inlined_call_operand.vmem [shape: f32[2,32,256], index: 0, kind: input, shape index: {}]   ;;  %s13355_s1 = inlined_call_operand.vmem [shape: f32[2,32,256], index: 1, kind: input, shape index: {}]   ;;  %s13356_s2 = inlined_call_operand.vmem [shape: f32[2,6,256], index: 2, kind: input, shape index: {}]   ;;  %s13357_s3 = inlined_call_operand.vmem [shape: f32[256,2304], index: 3, kind: input, shape index: {}]   ;;  %s13358_s4 = inlined_call_operand.vmem [shape: f32[8,9,3,32], index: 4, kind: input, shape index: {}]   ;;  %s13359_s5 = inlined_call_operand.vmem [shape: f32[8,9,3,32], index: 5, kind: input, shape index: {}]   ;;  %s13360_s6 = inlined_call_operand.vmem [shape: f32[2,8,6,256], index: 6, kind: output, shape index: {}]  }
   0x1   :  { %s6447_s23 = smov 0   ;;  %s6449_s24 = smov 0  }
   0x2   :  { %s6451_s25 = smov 0  }
   0x3 LB: > { %s25_s26 = sadd.s32 1, %s6397_s23  ;;  %s28_s27 = sadd.s32 1, %s6401_s24  ;;  %s6405_s25 = sphi %s6451_s25, %s16_s25   ;;  %s6401_s24 = sphi %s6449_s24, %s13510_s24   ;;  %s6397_s23 = sphi %s6447_s23, %s13509_s23   ;;  %s6393_s22 = sphi %s6445_s22, %s13508_s22   ;;  %s6389_s21 = sphi %s6443_s21, %s13507_s21  }
   0x4   : > { %p26_p0 = scmp.ge.s32.totalorder %s25_s26, 8  ;;  %p6158_p1 = scmp.ge.s32.totalorder %s6405_s25, 1 }
   0x5   : > { %p266_p2 = scmp.lt.s32.totalorder %s6405_s25, 17 }
   0x6   : > { %s13512_s26 = smov (%p26_p0, %s25_s26), 0  ;;  %s13514_s27 = smov (!%p26_p0, %s28_s27), %s6401_s24 }
   0x7   : > { %p267_p3 = pnand %p6158_p1, %p266_p2  ;;  %p30_p4 = scmp.ge.s32.totalorder %s13514_s27, 2 }
   0x9   : > { %s13516_s27 = smov (%p30_p4, %s13514_s27), 0  ;;  %270 = sbr.rel (%p267_p3) target bundleno = 2896 (0xb50), region = 44 }
   0xe   : > { %v6480_v0 = vld [vmem:[%s13357_s3 + $0x870] sm:$0xff]  ;;  %v6490_v2 = vld [vmem:[%s13357_s3 + $0x878] sm:$0xff]  ;;  %v6502_v4 = vld [vmem:[%s13357_s3 + $0x7e0] sm:$0xff]  ;;  %p320_p5 = scmp.lt.s32.totalorder %s6393_s22, 1  ;;  %p335_p6 = scmp.lt.s32.totalorder %s6389_s21, 7  ;;  %vm668_vm0 = vcmask 261120  }
   0xf   : > { %v6485_v1 = vld [vmem:[%s13357_s3 + $0x1170] sm:$0xff]  ;;  %434 = vmatpush.msra.mxu0 %v6480_v0  ;;  %v6497_v3 = vld [vmem:[%s13357_s3 + $0x1178] sm:$0xff]  ;;  %v6507_v5 = vld [vmem:[%s13357_s3 + $0x10e0] sm:$0xff]  ;;  %492 = vmatpush.msra.mxu2 %v6490_v2  ;;  %vm3883_vm3 = vcmask 1042432   ;;  %vm3879_vm4 = vcmask 23552  }
  0x10   : > { %463 = vmatpush.msra.mxu1 %v6485_v1  ;;  %521 = vmatpush.msra.mxu3 %v6497_v3  ;;  %v6514_v6 = vld [vmem:[%s13357_s3 + $0x7e8] sm:$0xff]  ;;  %v6524_v8 = vld [vmem:[%s13357_s3 + $0x750] sm:$0xff]  ;;  %v6536_v10 = vld [vmem:[%s13357_s3 + $0x758] sm:$0xff]  ;;  %s13518_s22 = smov (!%p320_p5, %s6393_s22), 1 }
  0x11   : > { %v6519_v7 = vld [vmem:[%s13357_s3 + $0x10e8] sm:$0xff]  ;;  %435 = vmatpush.msra.mxu0 %v6502_v4  ;;  %v6531_v9 = vld [vmem:[%s13357_s3 + $0x1050] sm:$0xff]  ;;  %v6541_v11 = vld [vmem:[%s13357_s3 + $0x1058] sm:$0xff]  ;;  %493 = vmatpush.msra.mxu2 %v6514_v6  ;;  %s6258_s10 = sshll.u32 %s13518_s22, 6 }
  0x12   : > { %464 = vmatpush.msra.mxu1 %v6507_v5  ;;  %522 = vmatpush.msra.mxu3 %v6519_v7  ;;  %v6548_v12 = vld [vmem:[%s13357_s3 + $0x6c0] sm:$0xff]  ;;  %v6560_v14 = vld [vmem:[%s13357_s3 + $0x6c8] sm:$0xff]  ;;  %v6572_v16 = vld [vmem:[%s13357_s3 + $0x630] sm:$0xff]  ;;  %s6843_s8 = scalar_lea.vmem %s13354_s0, %s6258_s10  ;;  %s6974_s20 = scalar_lea.vmem %s13355_s1, %s6258_s10 }
  0x13   : > { %v6553_v13 = vld [vmem:[%s13357_s3 + $0xfc0] sm:$0xff]  ;;  %436 = vmatpush.msra.mxu0 %v6524_v8  ;;  %v6565_v15 = vld [vmem:[%s13357_s3 + $0xfc8] sm:$0xff]  ;;  %494 = vmatpush.msra.mxu2 %v6536_v10  ;;  %v6577_v17 = vld [vmem:[%s13357_s3 + $0xf30] sm:$0xff]  ;;  %s7028_s10 = scalar_select %p335_p6, %s6389_s21, 7 }
  0x14   : > { %465 = vmatpush.msra.mxu1 %v6531_v9  ;;  %523 = vmatpush.msra.mxu3 %v6541_v11  ;;  %v6584_v18 = vld [vmem:[%s13357_s3 + $0x638] sm:$0xff]  ;;  %v6596_v20 = vld [vmem:[%s13357_s3 + $0x5a0] sm:$0xff]  ;;  %v6608_v22 = vld [vmem:[%s13357_s3 + $0x5a8] sm:$0xff] }
  0x15   : > { %437 = vmatpush.msra.mxu0 %v6548_v12  ;;  %v6589_v19 = vld [vmem:[%s13357_s3 + $0xf38] sm:$0xff]  ;;  %495 = vmatpush.msra.mxu2 %v6560_v14  ;;  %v6601_v21 = vld [vmem:[%s13357_s3 + $0xea0] sm:$0xff]  ;;  %v6613_v23 = vld [vmem:[%s13357_s3 + $0xea8] sm:$0xff]  ;;  %s6261_s28 = smul.u32 36, %s7028_s10  ;;  %s6167_s16 = sshll.u32 %s7028_s10, 1 }
  0x16   : > { %466 = vmatpush.msra.mxu1 %v6553_v13  ;;  %524 = vmatpush.msra.mxu3 %v6565_v15  ;;  %v6620_v24 = vld [vmem:[%s13357_s3 + $0x510] sm:$0xff]  ;;  %v6632_v26 = vld [vmem:[%s13357_s3 + $0x518] sm:$0xff]  ;;  %v6644_v28 = vld [vmem:[%s13357_s3 + $0x480] sm:$0xff] }
  0x17   : > { %438 = vmatpush.msra.mxu0 %v6572_v16  ;;  %496 = vmatpush.msra.mxu2 %v6584_v18  ;;  %v6625_v25 = vld [vmem:[%s13357_s3 + $0xe10] sm:$0xff]  ;;  %v6637_v27 = vld [vmem:[%s13357_s3 + $0xe18] sm:$0xff]  ;;  %v6649_v29 = vld [vmem:[%s13357_s3 + $0xd80] sm:$0xff]  ;;  %s7036_s7 = scalar_lea.vmem %s13358_s4, %s6261_s28  ;;  %s7398_s9 = scalar_lea.vmem %s13359_s5, %s6261_s28 }
  0x18   : > { %467 = vmatpush.msra.mxu1 %v6577_v17  ;;  %525 = vmatpush.msra.mxu3 %v6589_v19  ;;  %v6656_v30 = vld [vmem:[%s13357_s3 + $0x488] sm:$0xff]  ;;  %v6668_v32 = vld [vmem:[%s13357_s3 + $0x3f0] sm:$0xff]  ;;  %v6680_v34 = vld [vmem:[%s13357_s3 + $0x3f8] sm:$0xff] }
  0x19   : > { %439 = vmatpush.msra.mxu0 %v6596_v20  ;;  %497 = vmatpush.msra.mxu2 %v6608_v22  ;;  %v6661_v31 = vld [vmem:[%s13357_s3 + $0xd88] sm:$0xff]  ;;  %v6673_v33 = vld [vmem:[%s13357_s3 + $0xcf0] sm:$0xff]  ;;  %v6685_v35 = vld [vmem:[%s13357_s3 + $0xcf8] sm:$0xff] }
  0x1a   : > { %468 = vmatpush.msra.mxu1 %v6601_v21  ;;  %526 = vmatpush.msra.mxu3 %v6613_v23  ;;  %v6692_v36 = vld [vmem:[%s13357_s3 + $0x360] sm:$0xff]  ;;  %v6705_v38 = vld [vmem:[%s13357_s3 + $0x368] sm:$0xff]  ;;  %v6717_v40 = vld [vmem:[%s13357_s3 + $0x2d0] sm:$0xff] }
  0x1b   : > { %440 = vmatpush.msra.mxu0 %v6620_v24  ;;  %498 = vmatpush.msra.mxu2 %v6632_v26  ;;  %v6697_v37 = vld [vmem:[%s13357_s3 + $0xc60] sm:$0xff]  ;;  %v6710_v39 = vld [vmem:[%s13357_s3 + $0xc68] sm:$0xff]  ;;  %v6722_v41 = vld [vmem:[%s13357_s3 + $0xbd0] sm:$0xff] }
  0x1c   : > { %469 = vmatpush.msra.mxu1 %v6625_v25  ;;  %527 = vmatpush.msra.mxu3 %v6637_v27  ;;  %v6729_v42 = vld [vmem:[%s13357_s3 + $0x2d8] sm:$0xff]  ;;  %v6741_v44 = vld [vmem:[%s13357_s3 + $0x240] sm:$0xff]  ;;  %v6758_v46 = vld [vmem:[%s13357_s3 + $0x248] sm:$0xff] }
  0x1d   : > { %441 = vmatpush.msra.mxu0 %v6644_v28  ;;  %499 = vmatpush.msra.mxu2 %v6656_v30  ;;  %v6734_v43 = vld [vmem:[%s13357_s3 + $0xbd8] sm:$0xff]  ;;  %v6746_v45 = vld [vmem:[%s13357_s3 + $0xb40] sm:$0xff]  ;;  %v6763_v47 = vld [vmem:[%s13357_s3 + $0xb48] sm:$0xff] }
  0x1e   : > { %470 = vmatpush.msra.mxu1 %v6649_v29  ;;  %528 = vmatpush.msra.mxu3 %v6661_v31  ;;  %v6770_v48 = vld [vmem:[%s13357_s3 + $0x1b0] sm:$0xff]  ;;  %v6782_v50 = vld [vmem:[%s13357_s3 + $0x1b8] sm:$0xff]  ;;  %v6794_v52 = vld [vmem:[%s13357_s3 + $0x120] sm:$0xff] }
  0x1f   : > { %442 = vmatpush.msra.mxu0 %v6668_v32  ;;  %500 = vmatpush.msra.mxu2 %v6680_v34  ;;  %v6775_v49 = vld [vmem:[%s13357_s3 + $0xab0] sm:$0xff]  ;;  %v6787_v51 = vld [vmem:[%s13357_s3 + $0xab8] sm:$0xff]  ;;  %v6799_v53 = vld [vmem:[%s13357_s3 + $0xa20] sm:$0xff] }
  0x20   : > { %471 = vmatpush.msra.mxu1 %v6673_v33  ;;  %529 = vmatpush.msra.mxu3 %v6685_v35  ;;  %v6807_v54 = vld [vmem:[%s13357_s3 + $0x128] sm:$0xff]  ;;  %v6819_v56 = vld [vmem:[%s13357_s3 + $0x90] sm:$0xff]  ;;  %v6831_v58 = vld [vmem:[%s13357_s3 + $0x98] sm:$0xff] }
  0x21   : > { %443 = vmatpush.msra.mxu0 %v6692_v36  ;;  %501 = vmatpush.msra.mxu2 %v6705_v38  ;;  %13401 = vst [vmem:[#allocation2_spill] sm:$0xff] %v6807_v54  ;;  %v6812_v55 = vld [vmem:[%s13357_s3 + $0xa28] sm:$0xff]  ;;  %v6824_v57 = vld [vmem:[%s13357_s3 + $0x990] sm:$0xff]  ;;  %v6836_v59 = vld [vmem:[%s13357_s3 + $0x998] sm:$0xff] }
  0x22   : > { %472 = vmatpush.msra.mxu1 %v6697_v37  ;;  %530 = vmatpush.msra.mxu3 %v6710_v39  ;;  %13402 = vst [vmem:[#allocation3_spill] sm:$0xff] %v6812_v55  ;;  %v6850_v60 = vld [vmem:[%s13357_s3] sm:$0xff]  ;;  %v6862_v62 = vld [vmem:[%s13357_s3 + $0x8] sm:$0xff] }
  0x23   : > { %444 = vmatpush.msra.mxu0 %v6717_v40  ;;  %502 = vmatpush.msra.mxu2 %v6729_v42  ;;  %v6855_v61 = vld [vmem:[%s13357_s3 + $0x900] sm:$0xff]  ;;  %v6867_v63 = vld [vmem:[%s13357_s3 + $0x908] sm:$0xff] }
  0x24   : > { %473 = vmatpush.msra.mxu1 %v6722_v41  ;;  %531 = vmatpush.msra.mxu3 %v6734_v43 }
  0x25   : > { %445 = vmatpush.msra.mxu0 %v6741_v44  ;;  %503 = vmatpush.msra.mxu2 %v6758_v46 }
  0x26   : > { %474 = vmatpush.msra.mxu1 %v6746_v45  ;;  %532 = vmatpush.msra.mxu3 %v6763_v47 }
  0x27   : > { %446 = vmatpush.msra.mxu0 %v6770_v48  ;;  %504 = vmatpush.msra.mxu2 %v6782_v50 }
  0x28   : > { %475 = vmatpush.msra.mxu1 %v6775_v49  ;;  %533 = vmatpush.msra.mxu3 %v6787_v51 }
  0x29   : > { %447 = vmatpush.msra.mxu0 %v6794_v52  ;;  %505 = vmatpush.msra.mxu2 %v6807_v54  ;;  %v6875_v54 = vld [vmem:[%s6843_s8 + $0x8] sm:$0xff] }
  0x2a   : > { %476 = vmatpush.msra.mxu1 %v6799_v53  ;;  %534 = vmatpush.msra.mxu3 %v6812_v55  ;;  %v6872_v55 = vld [vmem:[%s6843_s8] sm:$0xff] }
  0x2b   : > { %448 = vmatpush.msra.mxu0 %v6819_v56  ;;  %506 = vmatpush.msra.mxu2 %v6831_v58 }
  0x2c   : > { %477 = vmatpush.msra.mxu1 %v6824_v57  ;;  %535 = vmatpush.msra.mxu3 %v6836_v59 }
  0x2d   : > { %449 = vmatpush.msra.mxu0 %v6850_v60  ;;  %507 = vmatpush.msra.mxu2 %v6862_v62 }
  0x2e   : > { %478 = vmatpush.msra.mxu1 %v6855_v61  ;;  %536 = vmatpush.msra.mxu3 %v6867_v63 }
  0x2f   : > { %450 = vmatmul.f32.vlgmr.msra.gmra.mxu0 %v6872_v55  ;;  %479 = vmatmul.f32.vlgmr.msra.gmra.mxu1 %v6875_v54 }
  0x30   : > { %508 = vmatmul.f32.vlgmr.msra.gmra.mxu2 %v6872_v55  ;;  %537 = vmatmul.f32.vlgmr.msra.gmra.mxu3 %v6875_v54 }
  0x31   : > { %550 = vmatpush.msrb.mxu0 %v6480_v0  ;;  %579 = vmatpush.msrb.mxu1 %v6485_v1  ;;  %v6898_v0 = vld [vmem:[%s6843_s8 + $0x10] sm:$0xff]  ;;  %v6901_v1 = vld [vmem:[%s6843_s8 + $0x18] sm:$0xff] }
  0x32   : > { %608 = vmatpush.msrb.mxu2 %v6490_v2  ;;  %637 = vmatpush.msrb.mxu3 %v6497_v3  ;;  %v6924_v2 = vld [vmem:[%s6843_s8 + $0x20] sm:$0xff]  ;;  %v6927_v3 = vld [vmem:[%s6843_s8 + $0x28] sm:$0xff] }
  0x33   : > { %551 = vmatpush.msrb.mxu0 %v6502_v4  ;;  %580 = vmatpush.msrb.mxu1 %v6507_v5  ;;  %v6950_v4 = vld [vmem:[%s6843_s8 + $0x30] sm:$0xff]  ;;  %v6953_v5 = vld [vmem:[%s6843_s8 + $0x38] sm:$0xff] }
  0x34   : > { %609 = vmatpush.msrb.mxu2 %v6514_v6  ;;  %638 = vmatpush.msrb.mxu3 %v6519_v7  ;;  %v13403_v6 = vld [vmem:[#allocation2_spill] sm:$0xff]  ;;  %v13404_v7 = vld [vmem:[#allocation3_spill] sm:$0xff] }
  0x35   : > { %552 = vmatpush.msrb.mxu0 %v6524_v8  ;;  %581 = vmatpush.msrb.mxu1 %v6531_v9  ;;  %v6983_v8 = vld [vmem:[%s6974_s20] sm:$0xff]  ;;  %v6986_v9 = vld [vmem:[%s6974_s20 + $0x8] sm:$0xff] }
  0x36   : > { %610 = vmatpush.msrb.mxu2 %v6536_v10  ;;  %639 = vmatpush.msrb.mxu3 %v6541_v11  ;;  %v6997_v10 = vld [vmem:[%s6974_s20 + $0x10] sm:$0xff]  ;;  %v7000_v11 = vld [vmem:[%s6974_s20 + $0x18] sm:$0xff] }
  0x37   : > { %553 = vmatpush.msrb.mxu0 %v6548_v12  ;;  %582 = vmatpush.msrb.mxu1 %v6553_v13  ;;  %v7007_v12 = vld [vmem:[%s6974_s20 + $0x20] sm:$0xff]  ;;  %v7010_v13 = vld [vmem:[%s6974_s20 + $0x28] sm:$0xff] }
  0x38   : > { %611 = vmatpush.msrb.mxu2 %v6560_v14  ;;  %640 = vmatpush.msrb.mxu3 %v6565_v15  ;;  %v7017_v14 = vld [vmem:[%s6974_s20 + $0x30] sm:$0xff]  ;;  %v7020_v15 = vld [vmem:[%s6974_s20 + $0x38] sm:$0xff] }
  0x39   : > { %453 = vmatmul.f32.gmra.mxu0 %v6898_v0  ;;  %482 = vmatmul.f32.gmra.mxu1 %v6901_v1 }
  0x3a   : > { %511 = vmatmul.f32.gmra.mxu2 %v6898_v0  ;;  %540 = vmatmul.f32.gmra.mxu3 %v6901_v1 }
  0x3b   : > { %554 = vmatpush.msrb.mxu0 %v6572_v16  ;;  %583 = vmatpush.msrb.mxu1 %v6577_v17 }
  0x3c   : > { %612 = vmatpush.msrb.mxu2 %v6584_v18  ;;  %641 = vmatpush.msrb.mxu3 %v6589_v19 }
  0x3d   : > { %555 = vmatpush.msrb.mxu0 %v6596_v20  ;;  %584 = vmatpush.msrb.mxu1 %v6601_v21 }
  0x3e   : > { %613 = vmatpush.msrb.mxu2 %v6608_v22  ;;  %642 = vmatpush.msrb.mxu3 %v6613_v23 }
  0x3f   : > { %556 = vmatpush.msrb.mxu0 %v6620_v24  ;;  %585 = vmatpush.msrb.mxu1 %v6625_v25 }
  0x40   : > { %614 = vmatpush.msrb.mxu2 %v6632_v26  ;;  %643 = vmatpush.msrb.mxu3 %v6637_v27 }
  0x41   : > { %557 = vmatpush.msrb.mxu0 %v6644_v28  ;;  %586 = vmatpush.msrb.mxu1 %v6649_v29 }
  0x42   : > { %615 = vmatpush.msrb.mxu2 %v6656_v30  ;;  %644 = vmatpush.msrb.mxu3 %v6661_v31 }
  0x43   : > { %456 = vmatmul.f32.gmra.mxu0 %v6924_v2  ;;  %485 = vmatmul.f32.gmra.mxu1 %v6927_v3 }
  0x44   : > { %514 = vmatmul.f32.gmra.mxu2 %v6924_v2  ;;  %543 = vmatmul.f32.gmra.mxu3 %v6927_v3 }
  0x45   : > { %558 = vmatpush.msrb.mxu0 %v6668_v32  ;;  %587 = vmatpush.msrb.mxu1 %v6673_v33 }
  0x46   : > { %616 = vmatpush.msrb.mxu2 %v6680_v34  ;;  %645 = vmatpush.msrb.mxu3 %v6685_v35 }
  0x47   : > { %559 = vmatpush.msrb.mxu0 %v6692_v36  ;;  %588 = vmatpush.msrb.mxu1 %v6697_v37  ;;  %v7041_v36 = vld [vmem:[%s13357_s3 + $0x888] sm:$0xff] }
  0x48   : > { %617 = vmatpush.msrb.mxu2 %v6705_v38  ;;  %646 = vmatpush.msrb.mxu3 %v6710_v39  ;;  %v7046_v38 = vld [vmem:[%s13357_s3 + $0x7f8] sm:$0xff]  ;;  %v666_v39 = vld [vmem:[%s7036_s7] sm:$0x7] }
  0x49   : > { %560 = vmatpush.msrb.mxu0 %v6717_v40  ;;  %589 = vmatpush.msrb.mxu1 %v6722_v41 }
  0x4a   : > { %618 = vmatpush.msrb.mxu2 %v6729_v42  ;;  %647 = vmatpush.msrb.mxu3 %v6734_v43  ;;  %v7057_v43 = vld [vmem:[%s13357_s3 + $0x768] sm:$0xff] }
  0x4b   : > { %561 = vmatpush.msrb.mxu0 %v6741_v44  ;;  %590 = vmatpush.msrb.mxu1 %v6746_v45  ;;  %v7064_v45 = vld [vmem:[%s13357_s3 + $0x6d8] sm:$0xff] }
  0x4c   : > { %619 = vmatpush.msrb.mxu2 %v6758_v46  ;;  %648 = vmatpush.msrb.mxu3 %v6763_v47  ;;  %v7069_v47 = vld [vmem:[%s13357_s3 + $0x1188] sm:$0xff] }
  0x4d   : > { %459 = vmatmul.f32.gmra.mxu0 %v6950_v4  ;;  %488 = vmatmul.f32.gmra.mxu1 %v6953_v5 }
  0x4e   : > { %517 = vmatmul.f32.gmra.mxu2 %v6950_v4  ;;  %546 = vmatmul.f32.gmra.mxu3 %v6953_v5 }
  0x4f   : > { %562 = vmatpush.msrb.mxu0 %v6770_v48  ;;  %591 = vmatpush.msrb.mxu1 %v6775_v49  ;;  %v7075_v48 = vld [vmem:[%s13357_s3 + $0x648] sm:$0xff]  ;;  %v7080_v49 = vld [vmem:[%s13357_s3 + $0x10f8] sm:$0xff] }
  0x50   : > { %620 = vmatpush.msrb.mxu2 %v6782_v50  ;;  %649 = vmatpush.msrb.mxu3 %v6787_v51 }
  0x51   : > { %563 = vmatpush.msrb.mxu0 %v6794_v52  ;;  %592 = vmatpush.msrb.mxu1 %v6799_v53  ;;  %v7091_v52 = vld [vmem:[%s13357_s3 + $0x5b8] sm:$0xff] }
  0x52   : > { %621 = vmatpush.msrb.mxu2 %v13403_v6  ;;  %650 = vmatpush.msrb.mxu3 %v13404_v7 }
  0x53   : > { %564 = vmatpush.msrb.mxu0 %v6819_v56  ;;  %593 = vmatpush.msrb.mxu1 %v6824_v57  ;;  %v7096_v57 = vld [vmem:[%s13357_s3 + $0x1068] sm:$0xff] }
  0x54   : > { %622 = vmatpush.msrb.mxu2 %v6831_v58  ;;  %651 = vmatpush.msrb.mxu3 %v6836_v59  ;;  %v7104_v58 = vld [vmem:[%s13357_s3 + $0x528] sm:$0xff]  ;;  %v7109_v59 = vld [vmem:[%s13357_s3 + $0xfd8] sm:$0xff] }
  0x55   : > { %565 = vmatpush.msrb.mxu0 %v6850_v60  ;;  %594 = vmatpush.msrb.mxu1 %v6855_v61  ;;  %v7116_v60 = vld [vmem:[%s13357_s3 + $0x498] sm:$0xff]  ;;  %v7121_v61 = vld [vmem:[%s13357_s3 + $0xf48] sm:$0xff] }
  0x56   : > { %623 = vmatpush.msrb.mxu2 %v6862_v62  ;;  %652 = vmatpush.msrb.mxu3 %v6867_v63  ;;  %v7128_v62 = vld [vmem:[%s13357_s3 + $0x408] sm:$0xff]  ;;  %v7133_v63 = vld [vmem:[%s13357_s3 + $0xeb8] sm:$0xff] }
  0x57   : > { %566 = vmatmul.f32.vlgmr.msrb.gmra.mxu0 %v6983_v8  ;;  %595 = vmatmul.f32.vlgmr.msrb.gmra.mxu1 %v6986_v9 }
  0x58   : > { %624 = vmatmul.f32.vlgmr.msrb.gmra.mxu2 %v6983_v8  ;;  %653 = vmatmul.f32.vlgmr.msrb.gmra.mxu3 %v6986_v9 }
  0x5f   : > { %569 = vmatmul.f32.gmra.mxu0 %v6997_v10  ;;  %598 = vmatmul.f32.gmra.mxu1 %v7000_v11 }
  0x60   : > { %627 = vmatmul.f32.gmra.mxu2 %v6997_v10  ;;  %656 = vmatmul.f32.gmra.mxu3 %v7000_v11 }
  0x67   : > { %572 = vmatmul.f32.gmra.mxu0 %v7007_v12  ;;  %601 = vmatmul.f32.gmra.mxu1 %v7010_v13 }
  0x68   : > { %630 = vmatmul.f32.gmra.mxu2 %v7007_v12  ;;  %659 = vmatmul.f32.gmra.mxu3 %v7010_v13 }
  0x6f   : > { %575 = vmatmul.f32.gmra.mxu0 %v7017_v14  ;;  %604 = vmatmul.f32.gmra.mxu1 %v7020_v15 }
  0x70   : > { %633 = vmatmul.f32.gmra.mxu2 %v7017_v14  ;;  %662 = vmatmul.f32.gmra.mxu3 %v7020_v15 }
  0xac   : > { %v451_v16 = vpop.f32.mrf.mxu0  ;;  %v480_v17 = vpop.f32.mrf.mxu1 }
  0xad   : > { %v481_v33 = vadd.f32 %v480_v17, %v451_v16  ;;  %v7140_v16 = vld [vmem:[%s13357_s3 + $0x378] sm:$0xff] }
  0xb3   : > { %v509_v18 = vpop.f32.mrf.mxu2  ;;  %v538_v19 = vpop.f32.mrf.mxu3 }
  0xb4   : > { %v539_v46 = vadd.f32 %v538_v19, %v509_v18  ;;  %v7145_v19 = vld [vmem:[%s13357_s3 + $0xe28] sm:$0xff] }
  0xb6   : > { %v454_v20 = vpop.f32.mrf.mxu0  ;;  %v483_v21 = vpop.f32.mrf.mxu1 }
  0xb7   : > { %v484_v32 = vadd.f32 %v483_v21, %v454_v20  ;;  %v7152_v20 = vld [vmem:[%s13357_s3 + $0x2e8] sm:$0xff]  ;;  %v7157_v21 = vld [vmem:[%s13357_s3 + $0xd98] sm:$0xff] }
  0xbd   : > { %v512_v22 = vpop.f32.mrf.mxu2  ;;  %v541_v23 = vpop.f32.mrf.mxu3 }
  0xbe   : > { %v542_v44 = vadd.f32 %v541_v23, %v512_v22  ;;  %v7164_v22 = vld [vmem:[%s13357_s3 + $0x258] sm:$0xff]  ;;  %v7169_v23 = vld [vmem:[%s13357_s3 + $0xd08] sm:$0xff] }
  0xc0   : > { %v457_v24 = vpop.f32.mrf.mxu0  ;;  %v486_v25 = vpop.f32.mrf.mxu1 }
  0xc1   : > { %v487_v31 = vadd.f32 %v486_v25, %v457_v24  ;;  %v7176_v24 = vld [vmem:[%s13357_s3 + $0x1c8] sm:$0xff]  ;;  %v7181_v25 = vld [vmem:[%s13357_s3 + $0xc78] sm:$0xff] }
  0xc7   : > { %v515_v26 = vpop.f32.mrf.mxu2  ;;  %v544_v27 = vpop.f32.mrf.mxu3 }
  0xc8   : > { %v545_v40 = vadd.f32 %v544_v27, %v515_v26 }
  0xca   : > { %v460_v28 = vpop.f32.mrf.mxu0  ;;  %v489_v29 = vpop.f32.mrf.mxu1 }
  0xcb   : > { %v490_v30 = vadd.f32 %v489_v29, %v460_v28  ;;  %v7188_v28 = vld [vmem:[%s13357_s3 + $0x138] sm:$0xff] }
  0xcd   : > { %727 = vmatpush.msra.mxu2 %v490_v30 }
  0xcf   : > { %728 = vmatpush.msra.mxu2 %v487_v31  ;;  %v7193_v31 = vld [vmem:[%s13357_s3 + $0xbe8] sm:$0xff] }
  0xd1   : > { %v518_v34 = vpop.f32.mrf.mxu2  ;;  %v547_v35 = vpop.f32.mrf.mxu3  ;;  %729 = vmatpush.msra.mxu2 %v484_v32 }
  0xd2   : > { %v548_v37 = vadd.f32 %v547_v35, %v518_v34  ;;  %v7205_v34 = vld [vmem:[%s13357_s3 + $0xb58] sm:$0xff] }
  0xd3   : > { %730 = vmatpush.msra.mxu2 %v481_v33  ;;  %v7200_v33 = vld [vmem:[%s13357_s3 + $0xa8] sm:$0xff] }
  0xd4   : > { %v7049_v41 = vpop.f32.mrf.mxu0  ;;  %v7051_v42 = vpop.f32.mrf.mxu1  ;;  %747 = vmatpush.msra.mxu3 %v548_v37  ;;  %6172 = vmatmul.msk.f32.vlgmr.msra.gmra.mxu2 %vm668_vm0, %v666_v39  ;;  %v7212_v37 = vld [vmem:[%s13357_s3 + $0x18] sm:$0xff] }
  0xd5   : > { %877 = vmatpush.msrb.mxu2 %v7041_v36 }
  0xd6   : > { %748 = vmatpush.msra.mxu3 %v545_v40 }
  0xd7   : > { %878 = vmatpush.msrb.mxu2 %v7046_v38 }
  0xd8   : > { %749 = vmatpush.msra.mxu3 %v542_v44  ;;  %v7224_v44 = vld [vmem:[%s13357_s3 + $0xa38] sm:$0xff] }
  0xd9   : > { %879 = vmatpush.msrb.mxu2 %v7057_v43 }
  0xda   : > { %750 = vmatpush.msra.mxu3 %v539_v46  ;;  %v597_v46 = vadd.f32 %v7051_v42, %v7049_v41  ;;  %v7245_v41 = vld [vmem:[%s13357_s3 + $0x7f0] sm:$0xff] }
  0xdb   : > { %880 = vmatpush.msrb.mxu2 %v7064_v45  ;;  %v7083_v50 = vpop.f32.mrf.mxu2  ;;  %v7085_v51 = vpop.f32.mrf.mxu3  ;;  %6173 = vmatmul.msk.f32.vlgmr.msra.gmra.mxu3 %vm668_vm0, %v666_v39  ;;  %v7217_v39 = vld [vmem:[%s13357_s3 + $0xac8] sm:$0xff] }
  0xdc   : > { %906 = vmatpush.msrb.mxu3 %v7069_v47  ;;  %v570_v53 = vpop.f32.mrf.mxu0  ;;  %v599_v56 = vpop.f32.mrf.mxu1 }
  0xdd   : > { %881 = vmatpush.msrb.mxu2 %v7075_v48  ;;  %v600_v40 = vadd.f32 %v599_v56, %v570_v53  ;;  %v7233_v53 = vld [vmem:[%s13357_s3 + $0x880] sm:$0xff] }
  0xde   : > { %907 = vmatpush.msrb.mxu3 %v7080_v49 }
  0xdf   : > { %882 = vmatpush.msrb.mxu2 %v7091_v52 }
  0xe0   : > { %908 = vmatpush.msrb.mxu3 %v7096_v57 }
  0xe1   : > { %883 = vmatpush.msrb.mxu2 %v7104_v58 }
  0xe2   : > { %909 = vmatpush.msrb.mxu3 %v7109_v59 }
  0xe3   : > { %884 = vmatpush.msrb.mxu2 %v7116_v60  ;;  %v628_v6 = vpop.f32.mrf.mxu2  ;;  %v657_v7 = vpop.f32.mrf.mxu3 }
  0xe4   : > { %910 = vmatpush.msrb.mxu3 %v7121_v61  ;;  %v573_v17 = vpop.f32.mrf.mxu0  ;;  %v602_v18 = vpop.f32.mrf.mxu1 }
  0xe5   : > { %885 = vmatpush.msrb.mxu2 %v7128_v62  ;;  %v603_v35 = vadd.f32 %v602_v18, %v573_v17 }
  0xe6   : > { %911 = vmatpush.msrb.mxu3 %v7133_v63 }
  0xe7   : > { %886 = vmatpush.msrb.mxu2 %v7140_v16 }
  0xe8   : > { %912 = vmatpush.msrb.mxu3 %v7145_v19 }
  0xe9   : > { %887 = vmatpush.msrb.mxu2 %v7152_v20 }
  0xea   : > { %913 = vmatpush.msrb.mxu3 %v7157_v21 }
  0xeb   : > { %888 = vmatpush.msrb.mxu2 %v7164_v22  ;;  %v631_v26 = vpop.f32.mrf.mxu2  ;;  %v660_v27 = vpop.f32.mrf.mxu3 }
  0xec   : > { %914 = vmatpush.msrb.mxu3 %v7169_v23  ;;  %v576_v29 = vpop.f32.mrf.mxu0  ;;  %v605_v30 = vpop.f32.mrf.mxu1  ;;  %v661_v42 = vadd.f32 %v660_v27, %v631_v26  ;;  %v7259_v26 = vld [vmem:[%s13357_s3 + $0x760] sm:$0xff]  ;;  %v655_v27 = vadd.f32 %v7085_v51, %v7083_v50 }
  0xed   : > { %889 = vmatpush.msrb.mxu2 %v7176_v24  ;;  %v606_v32 = vadd.f32 %v605_v30, %v576_v29  ;;  %v7238_v29 = vld [vmem:[%s13357_s3 + $0x9a8] sm:$0xff]  ;;  %v7250_v30 = vld [vmem:[%s13357_s3 + $0x918] sm:$0xff]  ;;  %v7294_v50 = vld [vmem:[%s13357_s3 + $0x1060] sm:$0xff] }
  0xee   : > { %915 = vmatpush.msrb.mxu3 %v7181_v25  ;;  %v7326_v51 = vld [vmem:[%s13357_s3 + $0x520] sm:$0xff] }
  0xef   : > { %890 = vmatpush.msrb.mxu2 %v7188_v28  ;;  %684 = vmatpush.msra.mxu0 %v606_v32  ;;  %v658_v32 = vadd.f32 %v657_v7, %v628_v6  ;;  %v7276_v6 = vld [vmem:[%s13357_s3 + $0x6d0] sm:$0xff]  ;;  %v7389_v7 = vld [vmem:[%s13357_s3 + $0x2e0] sm:$0xff] }
  0xf0   : > { %916 = vmatpush.msrb.mxu3 %v7193_v31 }
  0xf1   : > { %891 = vmatpush.msrb.mxu2 %v7200_v33  ;;  %685 = vmatpush.msra.mxu0 %v603_v35  ;;  %v755_v35 = vld [vmem:[%s13357_s3 + $0x10] sm:$0xff] }
  0xf2   : > { %917 = vmatpush.msrb.mxu3 %v7205_v34 }
  0xf3   : > { %892 = vmatpush.msrb.mxu2 %v7212_v37  ;;  %v634_v17 = vpop.f32.mrf.mxu2  ;;  %v663_v18 = vpop.f32.mrf.mxu3  ;;  %686 = vmatpush.msra.mxu0 %v600_v40  ;;  %v7532_v40 = vld [vmem:[%s7036_s7 + $0x4] sm:$0x7] }
  0xf4   : > { %918 = vmatpush.msrb.mxu3 %v7217_v39  ;;  %v664_v56 = vadd.f32 %v663_v18, %v634_v17  ;;  %893 = vmatmul.f32.vlgmr.msrb.gmra.mxu2 %v6872_v55  ;;  %v7548_v18 = vld [vmem:[%s13357_s3 + $0x1100] sm:$0xff] }
  0xf5   : > { %687 = vmatpush.msra.mxu0 %v597_v46  ;;  %993 = vmatpush.msra.mxu2 %v7041_v36  ;;  %v7269_v36 = vld [vmem:[%s13357_s3 + $0x1180] sm:$0xff] }
  0xf6   : > { %919 = vmatpush.msrb.mxu3 %v7224_v44  ;;  %704 = vmatpush.msra.mxu1 %v664_v56 }
  0xf7   : > { %819 = vmatpush.msrb.mxu0 %v7233_v53  ;;  %994 = vmatpush.msra.mxu2 %v7046_v38  ;;  %v7281_v38 = vld [vmem:[%s13357_s3 + $0x10f0] sm:$0xff] }
  0xf8   : > { %920 = vmatpush.msrb.mxu3 %v7238_v29  ;;  %705 = vmatpush.msra.mxu1 %v661_v42  ;;  %v7566_v42 = vld [vmem:[%s13357_s3 + $0xf50] sm:$0xff] }
  0xf9   : > { %820 = vmatpush.msrb.mxu0 %v7245_v41  ;;  %995 = vmatpush.msra.mxu2 %v7057_v43  ;;  %v7303_v43 = vld [vmem:[%s13357_s3 + $0xfd0] sm:$0xff] }
  0xfa   : > { %921 = vmatpush.msrb.mxu3 %v7250_v30  ;;  %706 = vmatpush.msra.mxu1 %v658_v32  ;;  %v7572_v32 = vld [vmem:[%s13357_s3 + $0xec0] sm:$0xff] }
  0xfb   : > { %922 = vmatmul.f32.vlgmr.msrb.gmra.mxu3 %v6875_v54  ;;  %821 = vmatpush.msrb.mxu0 %v7259_v26 }
  0xfc   : > { %1022 = vmatpush.msra.mxu3 %v7069_v47  ;;  %707 = vmatpush.msra.mxu1 %v655_v27  ;;  %v7289_v47 = vld [vmem:[%s13357_s3 + $0x640] sm:$0xff] }
  0xfd   : > { %822 = vmatpush.msrb.mxu0 %v7276_v6  ;;  %996 = vmatpush.msra.mxu2 %v7064_v45  ;;  %v7312_v45 = vld [vmem:[%s13357_s3 + $0x5b0] sm:$0xff] }
  0xfe   : > { %848 = vmatpush.msrb.mxu1 %v7269_v36  ;;  %1023 = vmatpush.msra.mxu3 %v7080_v49  ;;  %v7318_v49 = vld [vmem:[%s13357_s3 + $0xf40] sm:$0xff] }
  0xff   : > { %896 = vmatmul.f32.gmra.mxu2 %v6898_v0  ;;  %823 = vmatpush.msrb.mxu0 %v7289_v47 }
 0x100   : > { %849 = vmatpush.msrb.mxu1 %v7281_v38  ;;  %1024 = vmatpush.msra.mxu3 %v7096_v57  ;;  %v7332_v57 = vld [vmem:[%s13357_s3 + $0xeb0] sm:$0xff] }
 0x101   : > { %997 = vmatpush.msra.mxu2 %v7075_v48  ;;  %824 = vmatpush.msrb.mxu0 %v7312_v45  ;;  %v7340_v48 = vld [vmem:[%s13357_s3 + $0x490] sm:$0xff] }
 0x102   : > { %850 = vmatpush.msrb.mxu1 %v7294_v50  ;;  %1025 = vmatpush.msra.mxu3 %v7109_v59  ;;  %v7346_v59 = vld [vmem:[%s13357_s3 + $0xe20] sm:$0xff] }
 0x103   : > { %925 = vmatmul.f32.gmra.mxu3 %v6901_v1  ;;  %998 = vmatpush.msra.mxu2 %v7091_v52  ;;  %v7355_v52 = vld [vmem:[%s13357_s3 + $0xd90] sm:$0xff] }
 0x104   : > { %851 = vmatpush.msrb.mxu1 %v7303_v43  ;;  %1026 = vmatpush.msra.mxu3 %v7121_v61  ;;  %v7361_v61 = vld [vmem:[%s13357_s3 + $0x400] sm:$0xff] }
 0x105   : > { %825 = vmatpush.msrb.mxu0 %v7326_v51  ;;  %999 = vmatpush.msra.mxu2 %v7104_v58  ;;  %v7370_v58 = vld [vmem:[%s13357_s3 + $0xd00] sm:$0xff] }
 0x106   : > { %852 = vmatpush.msrb.mxu1 %v7318_v49  ;;  %1027 = vmatpush.msra.mxu3 %v7133_v63  ;;  %v7384_v63 = vld [vmem:[%s13357_s3 + $0xc70] sm:$0xff] }
 0x107   : > { %826 = vmatpush.msrb.mxu0 %v7340_v48  ;;  %1000 = vmatpush.msra.mxu2 %v7116_v60  ;;  %v7375_v60 = vld [vmem:[%s13357_s3 + $0x370] sm:$0xff] }
 0x108   : > { %853 = vmatpush.msrb.mxu1 %v7332_v57  ;;  %1028 = vmatpush.msra.mxu3 %v7145_v19  ;;  %v7410_v19 = vld [vmem:[%s13357_s3 + $0x250] sm:$0xff] }
 0x109   : > { %899 = vmatmul.f32.gmra.mxu2 %v6924_v2  ;;  %827 = vmatpush.msrb.mxu0 %v7361_v61 }
 0x10a   : > { %854 = vmatpush.msrb.mxu1 %v7346_v59  ;;  %1029 = vmatpush.msra.mxu3 %v7157_v21  ;;  %v667_v21 = vld [vmem:[%s7398_s9] sm:$0x7] }
 0x10b   : > { %928 = vmatmul.f32.gmra.mxu3 %v6927_v3  ;;  %1001 = vmatpush.msra.mxu2 %v7128_v62  ;;  %v7405_v62 = vld [vmem:[%s13357_s3 + $0xbe0] sm:$0xff] }
 0x10c   : > { %855 = vmatpush.msrb.mxu1 %v7355_v52  ;;  %1030 = vmatpush.msra.mxu3 %v7169_v23  ;;  %v7436_v23 = vld [vmem:[%s13357_s3 + $0xac0] sm:$0xff] }
 0x10d   : > { %828 = vmatpush.msrb.mxu0 %v7375_v60  ;;  %1002 = vmatpush.msra.mxu2 %v7140_v16  ;;  %v7419_v16 = vld [vmem:[%s13357_s3 + $0xb50] sm:$0xff] }
 0x10e   : > { %856 = vmatpush.msrb.mxu1 %v7370_v58  ;;  %1031 = vmatpush.msra.mxu3 %v7181_v25  ;;  %v791_v25 = vld [vmem:[%s13357_s3 + $0xa30] sm:$0xff] }
 0x10f   : > { %829 = vmatpush.msrb.mxu0 %v7389_v7  ;;  %1003 = vmatpush.msra.mxu2 %v7152_v20  ;;  %v7429_v20 = vld [vmem:[%s13357_s3 + $0x1c0] sm:$0xff] }
 0x110   : > { %857 = vmatpush.msrb.mxu1 %v7384_v63  ;;  %1032 = vmatpush.msra.mxu3 %v7193_v31  ;;  %v757_v31 = vld [vmem:[%s13357_s3 + $0xa0] sm:$0xff] }
 0x111   : > { %830 = vmatpush.msrb.mxu0 %v7410_v19  ;;  %1004 = vmatpush.msra.mxu2 %v7164_v22  ;;  %v7443_v22 = vld [vmem:[%s13357_s3 + $0x130] sm:$0xff] }
 0x112   : > { %858 = vmatpush.msrb.mxu1 %v7405_v62  ;;  %1033 = vmatpush.msra.mxu3 %v7205_v34  ;;  %v789_v34 = vld [vmem:[%s13357_s3 + $0x9a0] sm:$0xff] }
 0x113   : > { %6170 = vmatmul.msk.f32.vlgmr.msra.gmra.mxu0 %vm668_vm0, %v667_v21  ;;  %6171 = vmatmul.msk.f32.vlgmr.msra.gmra.mxu1 %vm668_vm0, %v667_v21 }
 0x114   : > { %859 = vmatpush.msrb.mxu1 %v7419_v16  ;;  %902 = vmatmul.f32.gmra.mxu2 %v6950_v4 }
 0x115   : > { %931 = vmatmul.f32.gmra.mxu3 %v6953_v5  ;;  %831 = vmatpush.msrb.mxu0 %v7429_v20 }
 0x116   : > { %860 = vmatpush.msrb.mxu1 %v7436_v23  ;;  %1005 = vmatpush.msra.mxu2 %v7176_v24  ;;  %v787_v24 = vld [vmem:[%s13357_s3 + $0x910] sm:$0xff] }
 0x117   : > { %1034 = vmatpush.msra.mxu3 %v7217_v39  ;;  %832 = vmatpush.msrb.mxu0 %v7443_v22 }
 0x118   : > { %861 = vmatpush.msrb.mxu1 %v791_v25  ;;  %1006 = vmatpush.msra.mxu2 %v7188_v28 }
 0x119   : > { %1035 = vmatpush.msra.mxu3 %v7224_v44  ;;  %833 = vmatpush.msrb.mxu0 %v757_v31  ;;  %v7537_v44 = vld [vmem:[%s13357_s3 + $0x1190] sm:$0xff] }
 0x11a   : > { %862 = vmatpush.msrb.mxu1 %v789_v34  ;;  %1007 = vmatpush.msra.mxu2 %v7200_v33 }
 0x11b   : > { %1036 = vmatpush.msra.mxu3 %v7238_v29  ;;  %834 = vmatpush.msrb.mxu0 %v755_v35  ;;  %v7554_v29 = vld [vmem:[%s13357_s3 + $0x1070] sm:$0xff] }
 0x11c   : > { %863 = vmatpush.msrb.mxu1 %v787_v24  ;;  %1008 = vmatpush.msra.mxu2 %v7212_v37 }
 0x11d   : > { %1037 = vmatpush.msra.mxu3 %v7250_v30  ;;  %835 = vmatmul.f32.vlgmr.msrb.gmra.mxu0 %v6872_v55 }
 0x11e   : > { %864 = vmatmul.f32.vlgmr.msrb.gmra.mxu1 %v6875_v54  ;;  %1009 = vmatmul.f32.vlgmr.msra.gmra.mxu2 %v6983_v8 }
 0x11f   : > { %1038 = vmatmul.f32.vlgmr.msra.gmra.mxu3 %v6986_v9  ;;  %935 = vmatpush.msra.mxu0 %v7233_v53 }
 0x120   : > { %964 = vmatpush.msra.mxu1 %v7269_v36  ;;  %v7578_v36 = vld [vmem:[%s13357_s3 + $0xe30] sm:$0xff] }
 0x121   : > { %936 = vmatpush.msra.mxu0 %v7245_v41  ;;  %v7560_v41 = vld [vmem:[%s13357_s3 + $0xfe0] sm:$0xff] }
 0x122   : > { %965 = vmatpush.msra.mxu1 %v7281_v38  ;;  %v7584_v38 = vld [vmem:[%s13357_s3 + $0xda0] sm:$0xff] }
 0x123   : > { %937 = vmatpush.msra.mxu0 %v7259_v26 }
 0x124   : > { %966 = vmatpush.msra.mxu1 %v7294_v50  ;;  %v7596_v50 = vld [vmem:[%s13357_s3 + $0xc80] sm:$0xff] }
 0x125   : > { %938 = vmatpush.msra.mxu0 %v7276_v6 }
 0x126   : > { %967 = vmatpush.msra.mxu1 %v7303_v43  ;;  %838 = vmatmul.f32.gmra.mxu0 %v6898_v0 }
 0x127   : > { %867 = vmatmul.f32.gmra.mxu1 %v6901_v1  ;;  %1012 = vmatmul.f32.gmra.mxu2 %v6997_v10 }
 0x128   : > { %1041 = vmatmul.f32.gmra.mxu3 %v7000_v11  ;;  %939 = vmatpush.msra.mxu0 %v7289_v47  ;;  %v7590_v47 = vld [vmem:[%s13357_s3 + $0xd10] sm:$0xff] }
 0x129   : > { %968 = vmatpush.msra.mxu1 %v7318_v49  ;;  %v7602_v49 = vld [vmem:[%s13357_s3 + $0xbf0] sm:$0xff] }
 0x12a   : > { %940 = vmatpush.msra.mxu0 %v7312_v45 }
 0x12b   : > { %969 = vmatpush.msra.mxu1 %v7332_v57 }
 0x12c   : > { %941 = vmatpush.msra.mxu0 %v7326_v51 }
 0x12d   : > { %970 = vmatpush.msra.mxu1 %v7346_v59 }
 0x12e   : > { %942 = vmatpush.msra.mxu0 %v7340_v48  ;;  %v7608_v48 = vld [vmem:[%s13357_s3 + $0xb60] sm:$0xff] }
 0x12f   : > { %971 = vmatpush.msra.mxu1 %v7355_v52  ;;  %841 = vmatmul.f32.gmra.mxu0 %v6924_v2  ;;  %v7614_v52 = vld [vmem:[%s13357_s3 + $0xad0] sm:$0xff] }
 0x130   : > { %870 = vmatmul.f32.gmra.mxu1 %v6927_v3  ;;  %1015 = vmatmul.f32.gmra.mxu2 %v7007_v12 }
 0x131   : > { %1044 = vmatmul.f32.gmra.mxu3 %v7010_v13  ;;  %943 = vmatpush.msra.mxu0 %v7361_v61 }
 0x132   : > { %972 = vmatpush.msra.mxu1 %v7370_v58  ;;  %v7620_v58 = vld [vmem:[%s13357_s3 + $0xa40] sm:$0xff] }
 0x133   : > { %944 = vmatpush.msra.mxu0 %v7375_v60 }
 0x134   : > { %973 = vmatpush.msra.mxu1 %v7384_v63 }
 0x135   : > { %945 = vmatpush.msra.mxu0 %v7389_v7  ;;  %v7626_v7 = vld [vmem:[%s13357_s3 + $0x9b0] sm:$0xff] }
 0x136   : > { %974 = vmatpush.msra.mxu1 %v7405_v62 }
 0x137   : > { %946 = vmatpush.msra.mxu0 %v7410_v19 }
 0x138   : > { %975 = vmatpush.msra.mxu1 %v7419_v16  ;;  %844 = vmatmul.f32.gmra.mxu0 %v6950_v4 }
 0x139   : > { %873 = vmatmul.f32.gmra.mxu1 %v6953_v5  ;;  %1018 = vmatmul.f32.gmra.mxu2 %v7017_v14 }
 0x13a   : > { %1047 = vmatmul.f32.gmra.mxu3 %v7020_v15  ;;  %947 = vmatpush.msra.mxu0 %v7429_v20 }
 0x13b   : > { %976 = vmatpush.msra.mxu1 %v7436_v23  ;;  %v7634_v23 = vld [vmem:[%s13357_s3 + $0x890] sm:$0xff] }
 0x13c   : > { %948 = vmatpush.msra.mxu0 %v7443_v22  ;;  %v7639_v22 = vld [vmem:[%s13357_s3 + $0x920] sm:$0xff] }
 0x13d   : > { %977 = vmatpush.msra.mxu1 %v791_v25 }
 0x13e   : > { %949 = vmatpush.msra.mxu0 %v757_v31 }
 0x13f   : > { %978 = vmatpush.msra.mxu1 %v789_v34  ;;  %v7649_v34 = vld [vmem:[%s13357_s3 + $0x800] sm:$0xff] }
 0x140   : > { %950 = vmatpush.msra.mxu0 %v755_v35  ;;  %v7656_v35 = vld [vmem:[%s13357_s3 + $0x770] sm:$0xff] }
 0x141   : > { %979 = vmatpush.msra.mxu1 %v787_v24  ;;  %951 = vmatmul.f32.vlgmr.msra.gmra.mxu0 %v6983_v8 }
 0x142   : > { %980 = vmatmul.f32.vlgmr.msra.gmra.mxu1 %v6986_v9 }
 0x149   : > { %954 = vmatmul.f32.gmra.mxu0 %v6997_v10 }
 0x14a   : > { %983 = vmatmul.f32.gmra.mxu1 %v7000_v11 }
 0x151   : > { %957 = vmatmul.f32.gmra.mxu0 %v7007_v12 }
 0x152   : > { %986 = vmatmul.f32.gmra.mxu1 %v7010_v13 }
 0x157   : > { %v7523_v55 = vpop.f32.mrf.mxu2 }
 0x159   : > { %960 = vmatmul.f32.gmra.mxu0 %v7017_v14 }
 0x15a   : > { %989 = vmatmul.f32.gmra.mxu1 %v7020_v15 }
 0x15e   : > { %v7525_v0 = vpop.f32.mrf.mxu3 }
 0x15f   : > { %13405 = vst [vmem:[#allocation2_spill] sm:$0xff] %v7525_v0  ;;  %v8366_v0 = vld [vmem:[%s13357_s3 + $0x1e8] sm:$0xff] }
 0x177   : > { %v894_v2 = vpop.f32.mrf.mxu2 }
 0x17e   : > { %v923_v3 = vpop.f32.mrf.mxu3 }
 0x17f   : > { %v924_v39 = vadd.f32 %v923_v3, %v894_v2  ;;  %v7664_v2 = vld [vmem:[%s7398_s9 + $0x4] sm:$0x7] }
 0x180   : > { %v7669_v3 = vld [vmem:[%s13357_s3 + $0x6e0] sm:$0xff] }
 0x182   : > { %v897_v4 = vpop.f32.mrf.mxu2 }
 0x186   : > { %v926_v5 = vpop.f32.mrf.mxu3 }
 0x187   : > { %v927_v33 = vadd.f32 %v926_v5, %v897_v4  ;;  %v7683_v5 = vld [vmem:[%s13357_s3 + $0x650] sm:$0xff] }
 0x18c   : > { %v900_v8 = vpop.f32.mrf.mxu2 }
 0x18e   : > { %v929_v9 = vpop.f32.mrf.mxu3 }
 0x18f   : > { %v930_v14 = vadd.f32 %v929_v9, %v900_v8  ;;  %v7693_v9 = vld [vmem:[%s13357_s3 + $0x1108] sm:$0xff] }
 0x190   : > { %v7527_v10 = vpop.f32.mrf.mxu0  ;;  %v7529_v11 = vpop.f32.mrf.mxu1 }
 0x191   : > { %13406 = vst [vmem:[#allocation3_spill] sm:$0xff] %v7529_v11 }
 0x197   : > { %v903_v12 = vpop.f32.mrf.mxu2 }
 0x198   : > { %v932_v13 = vpop.f32.mrf.mxu3 }
 0x199   : > { %v933_v28 = vadd.f32 %v932_v13, %v903_v12  ;;  %v7698_v12 = vld [vmem:[%s13357_s3 + $0x5c0] sm:$0xff]  ;;  %v7706_v13 = vld [vmem:[%s13357_s3 + $0x1078] sm:$0xff] }
 0x19a   : > { %v836_v15 = vpop.f32.mrf.mxu0 }
 0x19b   : > { %v865_v37 = vpop.f32.mrf.mxu1  ;;  %1088 = vmatpush.msrb.mxu1 %v933_v28  ;;  %v7719_v28 = vld [vmem:[%s13357_s3 + $0xfe8] sm:$0xff] }
 0x19c   : > { %v866_v62 = vadd.f32 %v865_v37, %v836_v15  ;;  %v7725_v15 = vld [vmem:[%s13357_s3 + $0x4a0] sm:$0xff] }
 0x19d   : > { %1089 = vmatpush.msrb.mxu1 %v930_v14  ;;  %v7711_v14 = vld [vmem:[%s13357_s3 + $0x530] sm:$0xff] }
 0x19f   : > { %1090 = vmatpush.msrb.mxu1 %v927_v33  ;;  %v7733_v33 = vld [vmem:[%s13357_s3 + $0xf58] sm:$0xff] }
 0x1a1   : > { %v7539_v46 = vpop.f32.mrf.mxu2  ;;  %1091 = vmatpush.msrb.mxu1 %v924_v39 }
 0x1a2   : > { %v7541_v17 = vpop.f32.mrf.mxu3  ;;  %6176 = vmatmul.msk.f32.vlgmr.msrb.gmra.mxu1 %vm668_vm0, %v7532_v40 }
 0x1a3   : > { %v839_v53 = vpop.f32.mrf.mxu0  ;;  %1238 = vmatpush.msra.mxu1 %v7537_v44  ;;  %v1040_v24 = vadd.f32 %v7541_v17, %v7539_v46  ;;  %v7759_v46 = vld [vmem:[%s13357_s3 + $0xe38] sm:$0xff]  ;;  %v7764_v17 = vld [vmem:[%s13357_s3 + $0x2f0] sm:$0xff] }
 0x1a4   : > { %v868_v56 = vpop.f32.mrf.mxu1 }
 0x1a5   : > { %1239 = vmatpush.msra.mxu1 %v7548_v18  ;;  %v869_v60 = vadd.f32 %v868_v56, %v839_v53  ;;  %v7775_v53 = vld [vmem:[%s6843_s8 + $0x28] sm:$0xff]  ;;  %v7781_v56 = vld [vmem:[%s13357_s3 + $0x260] sm:$0xff] }
 0x1a7   : > { %1240 = vmatpush.msra.mxu1 %v7554_v29 }
 0x1a9   : > { %1241 = vmatpush.msra.mxu1 %v7560_v41 }
 0x1aa   : > { %v1013_v30 = vpop.f32.mrf.mxu2 }
 0x1ab   : > { %v1042_v26 = vpop.f32.mrf.mxu3  ;;  %1242 = vmatpush.msra.mxu1 %v7566_v42 }
 0x1ac   : > { %v842_v27 = vpop.f32.mrf.mxu0  ;;  %v1043_v31 = vadd.f32 %v1042_v26, %v1013_v30 }
 0x1ad   : > { %v871_v6 = vpop.f32.mrf.mxu1  ;;  %1243 = vmatpush.msra.mxu1 %v7572_v32 }
 0x1ae   : > { %v872_v61 = vadd.f32 %v871_v6, %v842_v27  ;;  %v7807_v27 = vld [vmem:[%s13357_s3 + $0x140] sm:$0xff] }
 0x1af   : > { %1244 = vmatpush.msra.mxu1 %v7578_v36 }
 0x1b1   : > { %1245 = vmatpush.msra.mxu1 %v7584_v38 }
 0x1b3   : > { %v1016_v43 = vpop.f32.mrf.mxu2  ;;  %1246 = vmatpush.msra.mxu1 %v7590_v47 }
 0x1b4   : > { %v1045_v45 = vpop.f32.mrf.mxu3 }
 0x1b5   : > { %v845_v51 = vpop.f32.mrf.mxu0  ;;  %1247 = vmatpush.msra.mxu1 %v7596_v50  ;;  %v1046_v16 = vadd.f32 %v1045_v45, %v1016_v43  ;;  %v7835_v43 = vld [vmem:[%s13357_s3 + $0x20] sm:$0xff]  ;;  %v7840_v45 = vld [vmem:[%s6843_s8 + $0x38] sm:$0xff] }
 0x1b6   : > { %v874_v57 = vpop.f32.mrf.mxu1 }
 0x1b7   : > { %v875_v59 = vadd.f32 %v874_v57, %v845_v51  ;;  %1248 = vmatpush.msra.mxu1 %v7602_v49  ;;  %v7850_v51 = vld [vmem:[%s13357_s3 + $0x898] sm:$0xff] }
 0x1b8   : > { %v7855_v57 = vld [vmem:[%s13357_s3 + $0xad8] sm:$0xff] }
 0x1b9   : > { %1068 = vmatpush.msrb.mxu0 %v875_v59  ;;  %1249 = vmatpush.msra.mxu1 %v7608_v48  ;;  %v7868_v59 = vld [vmem:[%s13357_s3 + $0x808] sm:$0xff] }
 0x1bb   : > { %1069 = vmatpush.msrb.mxu0 %v872_v61  ;;  %1250 = vmatpush.msra.mxu1 %v7614_v52  ;;  %v7873_v61 = vld [vmem:[%s13357_s3 + $0xa48] sm:$0xff] }
 0x1bc   : > { %v1019_v63 = vpop.f32.mrf.mxu2 }
 0x1bd   : > { %v1048_v19 = vpop.f32.mrf.mxu3  ;;  %1070 = vmatpush.msrb.mxu0 %v869_v60  ;;  %1251 = vmatpush.msra.mxu1 %v7620_v58  ;;  %v7887_v60 = vld [vmem:[%s13357_s3 + $0x9b8] sm:$0xff] }
 0x1be   : > { %v1049_v21 = vadd.f32 %v1048_v19, %v1019_v63  ;;  %v7629_v20 = vpop.f32.mrf.mxu0  ;;  %v7895_v63 = vld [vmem:[%s13357_s3 + $0x6e8] sm:$0xff] }
 0x1bf   : > { %v7641_v25 = vpop.f32.mrf.mxu1  ;;  %1071 = vmatpush.msrb.mxu0 %v866_v62  ;;  %1252 = vmatpush.msra.mxu1 %v7626_v7  ;;  %v7909_v62 = vld [vmem:[%s13357_s3 + $0x658] sm:$0xff]  ;;  %v7921_v19 = vld [vmem:[%s13357_s3 + $0x5c8] sm:$0xff] }
 0x1c0   : > { %1135 = vmatpush.msrb.mxu3 %v1049_v21  ;;  %6175 = vmatmul.msk.f32.vlgmr.msrb.gmra.mxu0 %vm668_vm0, %v7532_v40  ;;  %v7746_v40 = vld [vmem:[%s13357_s3 + $0xec8] sm:$0xff]  ;;  %v7933_v21 = vld [vmem:[%s13357_s3 + $0x538] sm:$0xff] }
 0x1c1   : > { %1209 = vmatpush.msra.mxu0 %v7634_v23  ;;  %1253 = vmatpush.msra.mxu1 %v7639_v22 }
 0x1c2   : > { %1136 = vmatpush.msrb.mxu3 %v1046_v16  ;;  %1254 = vmatmul.f32.vlgmr.msra.gmra.mxu1 %v6875_v54  ;;  %v7675_v54 = vld [vmem:[%s13357_s3 + $0x1198] sm:$0xff]  ;;  %v7926_v16 = vld [vmem:[%s6843_s8 + $0x8] sm:$0xff] }
 0x1c3   : > { %1210 = vmatpush.msra.mxu0 %v7649_v34  ;;  %1354 = vmatpush.msrb.mxu1 %v7537_v44  ;;  %v7751_v44 = vld [vmem:[%s13357_s3 + $0x380] sm:$0xff] }
 0x1c4   : > { %1137 = vmatpush.msrb.mxu3 %v1043_v31  ;;  %v7964_v31 = vld [vmem:[%s13357_s3 + $0x388] sm:$0xff] }
 0x1c5   : > { %1211 = vmatpush.msra.mxu0 %v7656_v35  ;;  %1355 = vmatpush.msrb.mxu1 %v7548_v18  ;;  %v7772_v18 = vld [vmem:[%s13357_s3 + $0xda8] sm:$0xff] }
 0x1c6   : > { %1138 = vmatpush.msrb.mxu3 %v1040_v24  ;;  %v7678_v4 = vpop.f32.mrf.mxu0  ;;  %v7979_v24 = vld [vmem:[%s6974_s20 + $0x18] sm:$0xff] }
 0x1c7   : > { %v7685_v8 = vpop.f32.mrf.mxu1  ;;  %6179 = vmatmul.msk.f32.vlgmr.msrb.gmra.mxu3 %vm668_vm0, %v7664_v2  ;;  %1212 = vmatpush.msra.mxu0 %v7669_v3 }
 0x1c8   : > { %1296 = vmatpush.msra.mxu3 %v7675_v54  ;;  %1356 = vmatpush.msrb.mxu1 %v7554_v29  ;;  %v7789_v29 = vld [vmem:[%s13357_s3 + $0xd18] sm:$0xff] }
 0x1c9   : > { %1213 = vmatpush.msra.mxu0 %v7683_v5 }
 0x1ca   : > { %1297 = vmatpush.msra.mxu3 %v7693_v9  ;;  %1357 = vmatpush.msrb.mxu1 %v7560_v41 }
 0x1cb   : > { %1214 = vmatpush.msra.mxu0 %v7698_v12  ;;  %1257 = vmatmul.f32.gmra.mxu1 %v6901_v1  ;;  %v7738_v1 = vld [vmem:[%s13357_s3 + $0x410] sm:$0xff] }
 0x1cc   : > { %1298 = vmatpush.msra.mxu3 %v7706_v13  ;;  %1358 = vmatpush.msrb.mxu1 %v7566_v42  ;;  %v7794_v42 = vld [vmem:[%s13357_s3 + $0x1d0] sm:$0xff] }
 0x1cd   : > { %1215 = vmatpush.msra.mxu0 %v7711_v14 }
 0x1ce   : > { %v958_v37 = vpop.f32.mrf.mxu0  ;;  %1299 = vmatpush.msra.mxu3 %v7719_v28  ;;  %1359 = vmatpush.msrb.mxu1 %v7572_v32  ;;  %v7802_v32 = vld [vmem:[%s13357_s3 + $0xc88] sm:$0xff] }
 0x1cf   : > { %v987_v39 = vpop.f32.mrf.mxu1  ;;  %1216 = vmatpush.msra.mxu0 %v7725_v15 }
 0x1d0   : > { %1300 = vmatpush.msra.mxu3 %v7733_v33  ;;  %1360 = vmatpush.msrb.mxu1 %v7578_v36  ;;  %v7815_v36 = vld [vmem:[%s13357_s3 + $0xbf8] sm:$0xff]  ;;  %v988_v6 = vadd.f32 %v987_v39, %v958_v37 }
 0x1d1   : > { %1217 = vmatpush.msra.mxu0 %v7738_v1 }
 0x1d2   : > { %1301 = vmatpush.msra.mxu3 %v7746_v40  ;;  %1361 = vmatpush.msrb.mxu1 %v7584_v38  ;;  %v7820_v38 = vld [vmem:[%s13357_s3 + $0xb0] sm:$0xff] }
 0x1d3   : > { %1218 = vmatpush.msra.mxu0 %v7751_v44  ;;  %1260 = vmatmul.f32.gmra.mxu1 %v7775_v53 }
 0x1d4   : > { %1302 = vmatpush.msra.mxu3 %v7759_v46  ;;  %1362 = vmatpush.msrb.mxu1 %v7590_v47  ;;  %v7827_v47 = vld [vmem:[%s13357_s3 + $0xb68] sm:$0xff] }
 0x1d5   : > { %1219 = vmatpush.msra.mxu0 %v7764_v17 }
 0x1d6   : > { %v961_v41 = vpop.f32.mrf.mxu0  ;;  %1303 = vmatpush.msra.mxu3 %v7772_v18  ;;  %1363 = vmatpush.msrb.mxu1 %v7596_v50  ;;  %v985_v50 = vadd.f32 %v7685_v8, %v7678_v4  ;;  %v1150_v4 = vld [vmem:[%s13357_s3 + $0x148] sm:$0xff] }
 0x1d7   : > { %v990_v30 = vpop.f32.mrf.mxu1  ;;  %1220 = vmatpush.msra.mxu0 %v7781_v56  ;;  %v8008_v8 = vld [vmem:[%s6974_s20 + $0x28] sm:$0xff] }
 0x1d8   : > { %v991_v26 = vadd.f32 %v990_v30, %v961_v41  ;;  %1304 = vmatpush.msra.mxu3 %v7789_v29  ;;  %1364 = vmatpush.msrb.mxu1 %v7602_v49  ;;  %v982_v49 = vadd.f32 %v7641_v25, %v7629_v20  ;;  %v7936_v20 = vld [vmem:[%s6974_s20 + $0x8] sm:$0xff]  ;;  %v7957_v25 = vld [vmem:[%s6843_s8 + $0x20] sm:$0xff] }
 0x1d9   : > { %1221 = vmatpush.msra.mxu0 %v7794_v42 }
 0x1da   : > { %1115 = vmatpush.msrb.mxu2 %v991_v26  ;;  %1305 = vmatpush.msra.mxu3 %v7802_v32 }
 0x1db   : > { %1222 = vmatpush.msra.mxu0 %v7807_v27  ;;  %1365 = vmatpush.msrb.mxu1 %v7608_v48  ;;  %v7859_v48 = vld [vmem:[%s6843_s8] sm:$0xff] }
 0x1dc   : > { %1116 = vmatpush.msrb.mxu2 %v988_v6  ;;  %1306 = vmatpush.msra.mxu3 %v7815_v36  ;;  %v8078_v6 = vld [vmem:[%s7036_s7 + $0x8] sm:$0x7] }
 0x1dd   : > { %1223 = vmatpush.msra.mxu0 %v7820_v38  ;;  %1263 = vmatmul.f32.gmra.mxu1 %v7840_v45 }
 0x1de   : > { %1117 = vmatpush.msrb.mxu2 %v985_v50  ;;  %1307 = vmatpush.msra.mxu3 %v7827_v47 }
 0x1df   : > { %1224 = vmatpush.msra.mxu0 %v7835_v43  ;;  %1366 = vmatpush.msrb.mxu1 %v7614_v52  ;;  %v7881_v52 = vld [vmem:[%s13357_s3 + $0x778] sm:$0xff] }
 0x1e0   : > { %1118 = vmatpush.msrb.mxu2 %v982_v49  ;;  %1225 = vmatmul.f32.vlgmr.msra.gmra.mxu0 %v7859_v48 }
 0x1e1   : > { %6178 = vmatmul.msk.f32.vlgmr.msrb.gmra.mxu2 %vm668_vm0, %v7664_v2  ;;  %1325 = vmatpush.msrb.mxu0 %v7634_v23  ;;  %v7945_v23 = vld [vmem:[%s13357_s3 + $0x4a8] sm:$0xff] }
 0x1e2   : > { %1267 = vmatpush.msra.mxu2 %v7850_v51  ;;  %1308 = vmatpush.msra.mxu3 %v7855_v57  ;;  %v1154_v2 = vld [vmem:[%s13357_s3 + $0x268] sm:$0xff] }
 0x1e3   : > { %1326 = vmatpush.msrb.mxu0 %v7649_v34  ;;  %1367 = vmatpush.msrb.mxu1 %v7620_v58  ;;  %v7903_v58 = vld [vmem:[%s13357_s3 + $0x928] sm:$0xff]  ;;  %v7969_v34 = vld [vmem:[%s6843_s8 + $0x18] sm:$0xff] }
 0x1e4   : > { %1268 = vmatpush.msra.mxu2 %v7868_v59  ;;  %1309 = vmatpush.msra.mxu3 %v7873_v61 }
 0x1e5   : > { %1327 = vmatpush.msrb.mxu0 %v7656_v35  ;;  %1368 = vmatpush.msrb.mxu1 %v7626_v7  ;;  %v7914_v7 = vld [vmem:[%s6843_s8 + $0x10] sm:$0xff]  ;;  %v1156_v35 = vld [vmem:[%s13357_s3 + $0x2f8] sm:$0xff] }
 0x1e6   : > { %1269 = vmatpush.msra.mxu2 %v7881_v52  ;;  %1310 = vmatpush.msra.mxu3 %v7887_v60 }
 0x1e7   : > { %1328 = vmatpush.msrb.mxu0 %v7669_v3  ;;  %1369 = vmatpush.msrb.mxu1 %v7639_v22  ;;  %v7953_v22 = vld [vmem:[%s13357_s3 + $0x418] sm:$0xff] }
 0x1e8   : > { %1270 = vmatpush.msra.mxu2 %v7895_v63  ;;  %1228 = vmatmul.f32.gmra.mxu0 %v7914_v7  ;;  %v1152_v3 = vld [vmem:[%s13357_s3 + $0x1d8] sm:$0xff] }
 0x1e9   : > { %1329 = vmatpush.msrb.mxu0 %v7683_v5  ;;  %1311 = vmatpush.msra.mxu3 %v7903_v58  ;;  %v1148_v5 = vld [vmem:[%s13357_s3 + $0xb8] sm:$0xff] }
 0x1ea   : > { %1271 = vmatpush.msra.mxu2 %v7909_v62  ;;  %1312 = vmatmul.f32.vlgmr.msra.gmra.mxu3 %v7926_v16 }
 0x1eb   : > { %1330 = vmatpush.msrb.mxu0 %v7698_v12  ;;  %1370 = vmatmul.f32.vlgmr.msrb.gmra.mxu1 %v7936_v20  ;;  %v8019_v12 = vld [vmem:[%s6974_s20] sm:$0xff] }
 0x1ec   : > { %1272 = vmatpush.msra.mxu2 %v7921_v19  ;;  %1412 = vmatpush.msrb.mxu3 %v7675_v54  ;;  %v7993_v54 = vld [vmem:[%s6843_s8 + $0x30] sm:$0xff] }
 0x1ed   : > { %1331 = vmatpush.msrb.mxu0 %v7711_v14  ;;  %v8037_v14 = vld [vmem:[%s6974_s20 + $0x10] sm:$0xff] }
 0x1ee   : > { %1273 = vmatpush.msra.mxu2 %v7933_v21  ;;  %1413 = vmatpush.msrb.mxu3 %v7693_v9  ;;  %v1146_v9 = vld [vmem:[%s13357_s3 + $0x28] sm:$0xff] }
 0x1ef   : > { %1332 = vmatpush.msrb.mxu0 %v7725_v15  ;;  %v8057_v15 = vld [vmem:[%s6974_s20 + $0x30] sm:$0xff] }
 0x1f0   : > { %1274 = vmatpush.msra.mxu2 %v7945_v23  ;;  %1231 = vmatmul.f32.gmra.mxu0 %v7957_v25 }
 0x1f1   : > { %1333 = vmatpush.msrb.mxu0 %v7738_v1  ;;  %1414 = vmatpush.msrb.mxu3 %v7706_v13  ;;  %v8029_v13 = vld [vmem:[%s6974_s20 + $0x38] sm:$0xff] }
 0x1f2   : > { %1275 = vmatpush.msra.mxu2 %v7953_v22  ;;  %1315 = vmatmul.f32.gmra.mxu3 %v7969_v34 }
 0x1f3   : > { %1334 = vmatpush.msrb.mxu0 %v7751_v44  ;;  %1415 = vmatpush.msrb.mxu3 %v7719_v28  ;;  %v8049_v28 = vld [vmem:[%s6974_s20 + $0x20] sm:$0xff] }
 0x1f4   : > { %1276 = vmatpush.msra.mxu2 %v7964_v31  ;;  %1373 = vmatmul.f32.gmra.mxu1 %v7979_v24 }
 0x1f5   : > { %1335 = vmatpush.msrb.mxu0 %v7764_v17  ;;  %1416 = vmatpush.msrb.mxu3 %v7733_v33 }
 0x1f6   : > { %1277 = vmatpush.msra.mxu2 %v1156_v35 }
 0x1f7   : > { %1336 = vmatpush.msrb.mxu0 %v7781_v56  ;;  %1417 = vmatpush.msrb.mxu3 %v7746_v40 }
 0x1f8   : > { %1278 = vmatpush.msra.mxu2 %v1154_v2  ;;  %1234 = vmatmul.f32.gmra.mxu0 %v7993_v54 }
 0x1f9   : > { %1337 = vmatpush.msrb.mxu0 %v7794_v42  ;;  %1418 = vmatpush.msrb.mxu3 %v7759_v46 }
 0x1fa   : > { %1279 = vmatpush.msra.mxu2 %v1152_v3  ;;  %1318 = vmatmul.f32.gmra.mxu3 %v7775_v53 }
 0x1fb   : > { %1338 = vmatpush.msrb.mxu0 %v7807_v27  ;;  %1419 = vmatpush.msrb.mxu3 %v7772_v18 }
 0x1fc   : > { %1280 = vmatpush.msra.mxu2 %v1150_v4  ;;  %1376 = vmatmul.f32.gmra.mxu1 %v8008_v8 }
 0x1fd   : > { %1339 = vmatpush.msrb.mxu0 %v7820_v38  ;;  %1420 = vmatpush.msrb.mxu3 %v7789_v29 }
 0x1fe   : > { %1281 = vmatpush.msra.mxu2 %v1148_v5 }
 0x1ff   : > { %1340 = vmatpush.msrb.mxu0 %v7835_v43  ;;  %1421 = vmatpush.msrb.mxu3 %v7802_v32 }
 0x200   : > { %1282 = vmatpush.msra.mxu2 %v1146_v9  ;;  %1341 = vmatmul.f32.vlgmr.msrb.gmra.mxu0 %v8019_v12 }
 0x201   : > { %1283 = vmatmul.f32.vlgmr.msra.gmra.mxu2 %v7859_v48  ;;  %1422 = vmatpush.msrb.mxu3 %v7815_v36 }
 0x202   : > { %1383 = vmatpush.msrb.mxu2 %v7850_v51  ;;  %1321 = vmatmul.f32.gmra.mxu3 %v7840_v45  ;;  %v8085_v51 = vld [vmem:[%s13357_s3 + $0x8a0] sm:$0xff] }
 0x203   : > { %1423 = vmatpush.msrb.mxu3 %v7827_v47 }
 0x204   : > { %1384 = vmatpush.msrb.mxu2 %v7868_v59  ;;  %1379 = vmatmul.f32.gmra.mxu1 %v8029_v13 }
 0x205   : > { %1424 = vmatpush.msrb.mxu3 %v7855_v57  ;;  %v8091_v57 = vld [vmem:[%s13357_s3 + $0x810] sm:$0xff] }
 0x206   : > { %1385 = vmatpush.msrb.mxu2 %v7881_v52  ;;  %v8097_v52 = vld [vmem:[%s13357_s3 + $0x780] sm:$0xff] }
 0x207   : > { %1425 = vmatpush.msrb.mxu3 %v7873_v61 }
 0x208   : > { %1386 = vmatpush.msrb.mxu2 %v7895_v63  ;;  %1344 = vmatmul.f32.gmra.mxu0 %v8037_v14  ;;  %v8103_v63 = vld [vmem:[%s13357_s3 + $0x6f0] sm:$0xff] }
 0x209   : > { %1286 = vmatmul.f32.gmra.mxu2 %v7914_v7  ;;  %1426 = vmatpush.msrb.mxu3 %v7887_v60 }
 0x20a   : > { %1387 = vmatpush.msrb.mxu2 %v7909_v62  ;;  %v8109_v62 = vld [vmem:[%s13357_s3 + $0x660] sm:$0xff] }
 0x20b   : > { %1427 = vmatpush.msrb.mxu3 %v7903_v58 }
 0x20c   : > { %1388 = vmatpush.msrb.mxu2 %v7921_v19  ;;  %1428 = vmatmul.f32.vlgmr.msrb.gmra.mxu3 %v7936_v20  ;;  %v8115_v19 = vld [vmem:[%s13357_s3 + $0x5d0] sm:$0xff] }
 0x20e   : > { %1389 = vmatpush.msrb.mxu2 %v7933_v21  ;;  %v8121_v21 = vld [vmem:[%s13357_s3 + $0x540] sm:$0xff] }
 0x210   : > { %1390 = vmatpush.msrb.mxu2 %v7945_v23  ;;  %1347 = vmatmul.f32.gmra.mxu0 %v8049_v28 }
 0x211   : > { %1289 = vmatmul.f32.gmra.mxu2 %v7957_v25 }
 0x212   : > { %1391 = vmatpush.msrb.mxu2 %v7953_v22 }
 0x214   : > { %1392 = vmatpush.msrb.mxu2 %v7964_v31  ;;  %1431 = vmatmul.f32.gmra.mxu3 %v7979_v24 }
 0x216   : > { %1393 = vmatpush.msrb.mxu2 %v1156_v35  ;;  %v8127_v35 = vld [vmem:[%s13357_s3 + $0x4b0] sm:$0xff] }
 0x218   : > { %1394 = vmatpush.msrb.mxu2 %v1154_v2  ;;  %1350 = vmatmul.f32.gmra.mxu0 %v8057_v15 }
 0x219   : > { %1292 = vmatmul.f32.gmra.mxu2 %v7993_v54 }
 0x21a   : > { %1395 = vmatpush.msrb.mxu2 %v1152_v3  ;;  %v8133_v3 = vld [vmem:[%s13357_s3 + $0x420] sm:$0xff] }
 0x21c   : > { %1396 = vmatpush.msrb.mxu2 %v1150_v4  ;;  %1434 = vmatmul.f32.gmra.mxu3 %v8008_v8 }
 0x21e   : > { %1397 = vmatpush.msrb.mxu2 %v1148_v5 }
 0x21f   : > { %v8067_v33 = vpop.f32.mrf.mxu1 }
 0x220   : > { %1398 = vmatpush.msrb.mxu2 %v1146_v9  ;;  %13407 = vst [vmem:[#allocation4_spill] sm:$0xff] %v8067_v33  ;;  %v8139_v9 = vld [vmem:[%s13357_s3 + $0x390] sm:$0xff] }
 0x221   : > { %1399 = vmatmul.f32.vlgmr.msrb.gmra.mxu2 %v8019_v12 }
 0x224   : > { %1437 = vmatmul.f32.gmra.mxu3 %v8029_v13 }
 0x229   : > { %1402 = vmatmul.f32.gmra.mxu2 %v8037_v14 }
 0x231   : > { %1405 = vmatmul.f32.gmra.mxu2 %v8049_v28 }
 0x239   : > { %1408 = vmatmul.f32.gmra.mxu2 %v8057_v15 }
 0x23d   : > { %v8069_v1 = vpop.f32.mrf.mxu0 }
 0x23f   : > { %v1255_v37 = vpop.f32.mrf.mxu1 }
 0x248   : > { %v1258_v39 = vpop.f32.mrf.mxu1 }
 0x24a   : > { %v8071_v18 = vpop.f32.mrf.mxu3 }
 0x24b   : > { %13408 = vst [vmem:[#allocation5_spill] sm:$0xff] %v8071_v18  ;;  %v8351_v18 = vld [vmem:[%s13357_s3 + $0xae0] sm:$0xff] }
 0x250   : > { %v1261_v44 = vpop.f32.mrf.mxu1 }
 0x25a   : > { %v1264_v17 = vpop.f32.mrf.mxu1 }
 0x25d   : > { %v1226_v40 = vpop.f32.mrf.mxu0 }
 0x25e   : > { %v1256_v27 = vadd.f32 %v1255_v37, %v1226_v40 }
 0x264   : > { %v8075_v36 = vpop.f32.mrf.mxu2 }
 0x265   : > { %v1229_v46 = vpop.f32.mrf.mxu0 }
 0x266   : > { %v1259_v26 = vadd.f32 %v1258_v39, %v1229_v46  ;;  %v8145_v39 = vld [vmem:[%s13357_s3 + $0x300] sm:$0xff]  ;;  %v8149_v46 = vld [vmem:[%s7398_s9 + $0x8] sm:$0x7] }
 0x268   : > { %v1371_v42 = vpop.f32.mrf.mxu1 }
 0x26d   : > { %v1232_v56 = vpop.f32.mrf.mxu0  ;;  %v8073_v29 = vpop.f32.mrf.mxu3 }
 0x26e   : > { %v1262_v30 = vadd.f32 %v1261_v44, %v1232_v56  ;;  %v8156_v56 = vld [vmem:[%s13357_s3 + $0x270] sm:$0xff] }
 0x271   : > { %v1374_v50 = vpop.f32.mrf.mxu1 }
 0x275   : > { %v1235_v41 = vpop.f32.mrf.mxu0  ;;  %v1316_v47 = vpop.f32.mrf.mxu3 }
 0x276   : > { %v1265_v32 = vadd.f32 %v1264_v17, %v1235_v41 }
 0x278   : > { %1458 = vmatpush.msra.mxu0 %v1265_v32  ;;  %v8169_v32 = vld [vmem:[%s13357_s3 + $0x150] sm:$0xff] }
 0x279   : > { %v1377_v61 = vpop.f32.mrf.mxu1 }
 0x27a   : > { %1459 = vmatpush.msra.mxu0 %v1262_v30 }
 0x27c   : > { %1460 = vmatpush.msra.mxu0 %v1259_v26 }
 0x27d   : > { %v1342_v38 = vpop.f32.mrf.mxu0  ;;  %v1319_v59 = vpop.f32.mrf.mxu3 }
 0x27e   : > { %1461 = vmatpush.msra.mxu0 %v1256_v27  ;;  %v1372_v40 = vadd.f32 %v1371_v42, %v1342_v38  ;;  %v8162_v42 = vld [vmem:[%s13357_s3 + $0x1e0] sm:$0xff] }
 0x27f   : > { %6181 = vmatmul.msk.f32.vlgmr.msra.gmra.mxu0 %vm668_vm0, %v8078_v6  ;;  %v8175_v27 = vld [vmem:[%s13357_s3 + $0xc0] sm:$0xff] }
 0x280   : > { %1599 = vmatpush.msrb.mxu0 %v8085_v51 }
 0x281   : > { %v1380_v22 = vpop.f32.mrf.mxu1 }
 0x282   : > { %1600 = vmatpush.msrb.mxu0 %v8091_v57 }
 0x284   : > { %v1284_v43 = vpop.f32.mrf.mxu2  ;;  %1601 = vmatpush.msrb.mxu0 %v8097_v52 }
 0x285   : > { %v1345_v49 = vpop.f32.mrf.mxu0  ;;  %v1322_v23 = vpop.f32.mrf.mxu3  ;;  %v1314_v38 = vadd.f32 %v8073_v29, %v1284_v43  ;;  %v8197_v29 = vld [vmem:[%s13357_s3 + $0x1110] sm:$0xff] }
 0x286   : > { %1602 = vmatpush.msrb.mxu0 %v8103_v63  ;;  %v1375_v37 = vadd.f32 %v1374_v50, %v1345_v49  ;;  %v8182_v50 = vld [vmem:[%s13357_s3 + $0x30] sm:$0xff] }
 0x288   : > { %1603 = vmatpush.msrb.mxu0 %v8109_v62 }
 0x28a   : > { %1604 = vmatpush.msrb.mxu0 %v8115_v19 }
 0x28c   : > { %v1287_v60 = vpop.f32.mrf.mxu2  ;;  %1605 = vmatpush.msrb.mxu0 %v8121_v21 }
 0x28d   : > { %v1348_v58 = vpop.f32.mrf.mxu0  ;;  %v1317_v26 = vadd.f32 %v1316_v47, %v1287_v60  ;;  %v8189_v47 = vld [vmem:[%s13357_s3 + $0x11a0] sm:$0xff]  ;;  %v8225_v60 = vld [vmem:[%s13357_s3 + $0x788] sm:$0xff] }
 0x28e   : > { %1606 = vmatpush.msrb.mxu0 %v8127_v35  ;;  %v1378_v4 = vadd.f32 %v1377_v61, %v1348_v58  ;;  %v8217_v61 = vld [vmem:[%s13357_s3 + $0x1080] sm:$0xff]  ;;  %v8230_v58 = vld [vmem:[%s13357_s3 + $0xff0] sm:$0xff] }
 0x28f   : > { %v8151_v17 = vpop.f32.mrf.mxu3 }
 0x290   : > { %1607 = vmatpush.msrb.mxu0 %v8133_v3 }
 0x292   : > { %1608 = vmatpush.msrb.mxu0 %v8139_v9 }
 0x294   : > { %v1290_v31 = vpop.f32.mrf.mxu2  ;;  %1609 = vmatpush.msrb.mxu0 %v8145_v39 }
 0x295   : > { %v1351_v2 = vpop.f32.mrf.mxu0  ;;  %v1320_v30 = vadd.f32 %v1319_v59, %v1290_v31  ;;  %v8205_v59 = vld [vmem:[%s13357_s3 + $0x8a8] sm:$0xff] }
 0x296   : > { %v1381_v5 = vadd.f32 %v1380_v22, %v1351_v2  ;;  %1610 = vmatpush.msrb.mxu0 %v8156_v56  ;;  %v8245_v22 = vld [vmem:[%s13357_s3 + $0xf60] sm:$0xff]  ;;  %v8260_v31 = vld [vmem:[%s13357_s3 + $0x668] sm:$0xff] }
 0x297   : > { %v8199_v43 = vpop.f32.mrf.mxu3  ;;  %v8272_v2 = vld [vmem:[%s13357_s3 + $0xe40] sm:$0xff] }
 0x298   : > { %1505 = vmatpush.msra.mxu2 %v1381_v5  ;;  %1611 = vmatpush.msrb.mxu0 %v8162_v42  ;;  %v8285_v5 = vld [vmem:[%s13357_s3 + $0xdb0] sm:$0xff] }
 0x29a   : > { %1506 = vmatpush.msra.mxu2 %v1378_v4  ;;  %1612 = vmatpush.msrb.mxu0 %v8169_v32  ;;  %v8280_v4 = vld [vmem:[%s13357_s3 + $0x548] sm:$0xff] }
 0x29c   : > { %v1293_v44 = vpop.f32.mrf.mxu2  ;;  %1507 = vmatpush.msra.mxu2 %v1375_v37  ;;  %1613 = vmatpush.msrb.mxu0 %v8175_v27 }
 0x29d   : > { %v1323_v41 = vadd.f32 %v1322_v23, %v1293_v44  ;;  %v8313_v44 = vld [vmem:[%s13357_s3 + $0x428] sm:$0xff] }
 0x29e   : > { %1508 = vmatpush.msra.mxu2 %v1372_v40  ;;  %1614 = vmatpush.msrb.mxu0 %v8182_v50  ;;  %v8298_v40 = vld [vmem:[%s13357_s3 + $0xd20] sm:$0xff] }
 0x29f   : > { %1478 = vmatpush.msra.mxu1 %v1323_v41  ;;  %6184 = vmatmul.msk.f32.vlgmr.msra.gmra.mxu2 %vm668_vm0, %v8149_v46  ;;  %v8325_v41 = vld [vmem:[%s13357_s3 + $0xc00] sm:$0xff] }
 0x2a0   : > { %1615 = vmatmul.f32.vlgmr.msrb.gmra.mxu0 %v7859_v48  ;;  %1657 = vmatpush.msrb.mxu2 %v8205_v59 }
 0x2a1   : > { %1479 = vmatpush.msra.mxu1 %v1320_v30  ;;  %1715 = vmatpush.msra.mxu0 %v8085_v51  ;;  %v8238_v51 = vld [vmem:[%s13357_s3 + $0x6f8] sm:$0xff] }
 0x2a3   : > { %1480 = vmatpush.msra.mxu1 %v1317_v26  ;;  %1716 = vmatpush.msra.mxu0 %v8091_v57  ;;  %v8253_v57 = vld [vmem:[%s13357_s3 + $0xed0] sm:$0xff] }
 0x2a4   : > { %v8184_v49 = vpop.f32.mrf.mxu2  ;;  %v8338_v26 = vld [vmem:[%s13357_s3 + $0xb70] sm:$0xff] }
 0x2a5   : > { %1481 = vmatpush.msra.mxu1 %v1314_v38  ;;  %1717 = vmatpush.msra.mxu0 %v8097_v52  ;;  %v8267_v52 = vld [vmem:[%s13357_s3 + $0x5d8] sm:$0xff] }
 0x2a6   : > { %6182 = vmatmul.msk.f32.vlgmr.msra.gmra.mxu1 %vm668_vm0, %v8078_v6  ;;  %v8212_v6 = vld [vmem:[%s13357_s3 + $0x818] sm:$0xff] }
 0x2a7   : > { %1628 = vmatpush.msrb.mxu1 %v8189_v47  ;;  %1658 = vmatpush.msrb.mxu2 %v8212_v6 }
 0x2a8   : > { %1718 = vmatpush.msra.mxu0 %v8103_v63  ;;  %v1435_v63 = vpop.f32.mrf.mxu3 }
 0x2a9   : > { %1629 = vmatpush.msrb.mxu1 %v8197_v29  ;;  %1659 = vmatpush.msrb.mxu2 %v8225_v60 }
 0x2aa   : > { %1618 = vmatmul.f32.gmra.mxu0 %v7914_v7 }
 0x2ab   : > { %1630 = vmatpush.msrb.mxu1 %v8217_v61  ;;  %1660 = vmatpush.msrb.mxu2 %v8238_v51 }
 0x2ac   : > { %v8240_v23 = vpop.f32.mrf.mxu2  ;;  %1719 = vmatpush.msra.mxu0 %v8109_v62  ;;  %v8293_v62 = vld [vmem:[%s13357_s3 + $0x4b8] sm:$0xff] }
 0x2ad   : > { %1631 = vmatpush.msrb.mxu1 %v8230_v58  ;;  %1661 = vmatpush.msrb.mxu2 %v8260_v31 }
 0x2ae   : > { %1720 = vmatpush.msra.mxu0 %v8115_v19  ;;  %v8306_v19 = vld [vmem:[%s13357_s3 + $0xc90] sm:$0xff] }
 0x2af   : > { %1632 = vmatpush.msrb.mxu1 %v8245_v22  ;;  %1662 = vmatpush.msrb.mxu2 %v8267_v52 }
 0x2b0   : > { %1721 = vmatpush.msra.mxu0 %v8121_v21  ;;  %v8320_v21 = vld [vmem:[%s13357_s3 + $0x398] sm:$0xff]  ;;  %v1438_v30 = vpop.f32.mrf.mxu3 }
 0x2b1   : > { %1633 = vmatpush.msrb.mxu1 %v8253_v57  ;;  %1663 = vmatpush.msrb.mxu2 %v8280_v4 }
 0x2b2   : > { %1722 = vmatpush.msra.mxu0 %v8127_v35  ;;  %v8333_v35 = vld [vmem:[%s13357_s3 + $0x308] sm:$0xff] }
 0x2b3   : > { %1634 = vmatpush.msrb.mxu1 %v8272_v2  ;;  %1664 = vmatpush.msrb.mxu2 %v8293_v62 }
 0x2b4   : > { %v1406_v37 = vpop.f32.mrf.mxu2  ;;  %1621 = vmatmul.f32.gmra.mxu0 %v7957_v25 }
 0x2b5   : > { %1635 = vmatpush.msrb.mxu1 %v8285_v5  ;;  %1665 = vmatpush.msrb.mxu2 %v8313_v44  ;;  %v1436_v11 = vadd.f32 %v1435_v63, %v1406_v37  ;;  %v8392_v63 = vld [vmem:[%s13357_s3 + $0x930] sm:$0xff]  ;;  %v8572_v37 = vld [vmem:[%s13357_s3 + $0x820] sm:$0xff] }
 0x2b6   : > { %1723 = vmatpush.msra.mxu0 %v8133_v3  ;;  %v8346_v3 = vld [vmem:[%s13357_s3 + $0x278] sm:$0xff] }
 0x2b7   : > { %1636 = vmatpush.msrb.mxu1 %v8298_v40  ;;  %1666 = vmatpush.msrb.mxu2 %v8320_v21 }
 0x2b8   : > { %1724 = vmatpush.msra.mxu0 %v8139_v9  ;;  %v8359_v9 = vld [vmem:[%s13357_s3 + $0xa50] sm:$0xff] }
 0x2b9   : > { %1637 = vmatpush.msrb.mxu1 %v8306_v19  ;;  %1667 = vmatpush.msrb.mxu2 %v8333_v35 }
 0x2ba   : > { %1725 = vmatpush.msra.mxu0 %v8145_v39  ;;  %v8372_v39 = vld [vmem:[%s13357_s3 + $0x158] sm:$0xff] }
 0x2bb   : > { %1638 = vmatpush.msrb.mxu1 %v8325_v41  ;;  %1668 = vmatpush.msrb.mxu2 %v8346_v3 }
 0x2bc   : > { %v1409_v38 = vpop.f32.mrf.mxu2  ;;  %1726 = vmatpush.msra.mxu0 %v8156_v56  ;;  %v1433_v56 = vadd.f32 %v8199_v43, %v8240_v23  ;;  %v1430_v43 = vadd.f32 %v8151_v17, %v8184_v49  ;;  %v8418_v17 = vld [vmem:[%s13357_s3 + $0x1118] sm:$0xff] }
 0x2bd   : > { %v1439_v33 = vadd.f32 %v1438_v30, %v1409_v38  ;;  %1639 = vmatpush.msrb.mxu1 %v8338_v26  ;;  %v8377_v30 = vld [vmem:[%s13357_s3 + $0x9c0] sm:$0xff]  ;;  %1624 = vmatmul.f32.gmra.mxu0 %v7993_v54  ;;  %v1584_v49 = vld [vmem:[%s13357_s3 + $0xdb8] sm:$0xff]  ;;  %v8602_v38 = vld [vmem:[%s13357_s3 + $0x550] sm:$0xff] }
 0x2be   : > { %1669 = vmatpush.msrb.mxu2 %v8366_v0  ;;  %1727 = vmatpush.msra.mxu0 %v8162_v42  ;;  %v8410_v42 = vld [vmem:[%s13357_s3 + $0x38] sm:$0xff] }
 0x2bf   : > { %1640 = vmatpush.msrb.mxu1 %v8351_v18  ;;  %1525 = vmatpush.msra.mxu3 %v1439_v33  ;;  %v8387_v33 = vld [vmem:[%s13357_s3 + $0xc8] sm:$0xff] }
 0x2c0   : > { %1670 = vmatpush.msrb.mxu2 %v8372_v39  ;;  %1728 = vmatpush.msra.mxu0 %v8169_v32  ;;  %v8425_v32 = vld [vmem:[%s13357_s3 + $0x1088] sm:$0xff] }
 0x2c1   : > { %1641 = vmatpush.msrb.mxu1 %v8359_v9  ;;  %1526 = vmatpush.msra.mxu3 %v1436_v11  ;;  %v8402_v11 = vld [vmem:[%s13357_s3 + $0x11a8] sm:$0xff] }
 0x2c2   : > { %1671 = vmatpush.msrb.mxu2 %v8387_v33  ;;  %1729 = vmatpush.msra.mxu0 %v8175_v27  ;;  %v8443_v27 = vld [vmem:[%s13357_s3 + $0xf68] sm:$0xff] }
 0x2c3   : > { %1642 = vmatpush.msrb.mxu1 %v8377_v30  ;;  %1527 = vmatpush.msra.mxu3 %v1433_v56  ;;  %v8608_v56 = vld [vmem:[%s13357_s3 + $0x4c0] sm:$0xff] }
 0x2c4   : > { %1672 = vmatpush.msrb.mxu2 %v8410_v42  ;;  %1730 = vmatpush.msra.mxu0 %v8182_v50  ;;  %v8461_v50 = vld [vmem:[%s13357_s3 + $0xe48] sm:$0xff] }
 0x2c5   : > { %1643 = vmatpush.msrb.mxu1 %v8392_v63  ;;  %1528 = vmatpush.msra.mxu3 %v1430_v43 }
 0x2c6   : > { %1644 = vmatmul.f32.vlgmr.msrb.gmra.mxu1 %v7926_v16  ;;  %6185 = vmatmul.msk.f32.vlgmr.msra.gmra.mxu3 %vm668_vm0, %v8149_v46  ;;  %v8434_v46 = vld [vmem:[%s13357_s3 + $0xff8] sm:$0xff] }
 0x2c7   : > { %1686 = vmatpush.msrb.mxu3 %v8402_v11  ;;  %1744 = vmatpush.msra.mxu1 %v8189_v47  ;;  %v1582_v47 = vld [vmem:[%s13357_s3 + $0xd28] sm:$0xff] }
 0x2c8   : > { %1673 = vmatmul.f32.vlgmr.msrb.gmra.mxu2 %v7859_v48  ;;  %1731 = vmatmul.f32.vlgmr.msra.gmra.mxu0 %v8019_v12  ;;  %v8453_v48 = vld [vmem:[%s13357_s3 + $0xed8] sm:$0xff] }
 0x2c9   : > { %1687 = vmatpush.msrb.mxu3 %v8418_v17  ;;  %1745 = vmatpush.msra.mxu1 %v8197_v29  ;;  %v1580_v29 = vld [vmem:[%s13357_s3 + $0xc98] sm:$0xff] }
 0x2ca   : > { %1773 = vmatpush.msra.mxu2 %v8205_v59  ;;  %v1578_v59 = vld [vmem:[%s13357_s3 + $0xc08] sm:$0xff] }
 0x2cb   : > { %1688 = vmatpush.msrb.mxu3 %v8425_v32  ;;  %1746 = vmatpush.msra.mxu1 %v8217_v61  ;;  %v1574_v61 = vld [vmem:[%s13357_s3 + $0xae8] sm:$0xff] }
 0x2cc   : > { %1774 = vmatpush.msra.mxu2 %v8212_v6  ;;  %v1576_v6 = vld [vmem:[%s13357_s3 + $0xb78] sm:$0xff] }
 0x2cd   : > { %1689 = vmatpush.msrb.mxu3 %v8434_v46  ;;  %1747 = vmatpush.msra.mxu1 %v8230_v58  ;;  %v1570_v58 = vld [vmem:[%s13357_s3 + $0x9c8] sm:$0xff] }
 0x2ce   : > { %1647 = vmatmul.f32.gmra.mxu1 %v7969_v34  ;;  %1775 = vmatpush.msra.mxu2 %v8225_v60  ;;  %v1572_v60 = vld [vmem:[%s13357_s3 + $0xa58] sm:$0xff] }
 0x2cf   : > { %1690 = vmatpush.msrb.mxu3 %v8443_v27  ;;  %1748 = vmatpush.msra.mxu1 %v8245_v22 }
 0x2d0   : > { %1776 = vmatpush.msra.mxu2 %v8238_v51  ;;  %1734 = vmatmul.f32.gmra.mxu0 %v8037_v14  ;;  %v1568_v51 = vld [vmem:[%s13357_s3 + $0x938] sm:$0xff] }
 0x2d1   : > { %1691 = vmatpush.msrb.mxu3 %v8453_v48  ;;  %1749 = vmatpush.msra.mxu1 %v8253_v57  ;;  %v8559_v57 = vld [vmem:[%s7036_s7 + $0xc] sm:$0x7] }
 0x2d2   : > { %1676 = vmatmul.f32.gmra.mxu2 %v7914_v7 }
 0x2d3   : > { %1692 = vmatpush.msrb.mxu3 %v8461_v50  ;;  %1750 = vmatpush.msra.mxu1 %v8272_v2 }
 0x2d4   : > { %1777 = vmatpush.msra.mxu2 %v8260_v31 }
 0x2d5   : > { %1693 = vmatpush.msrb.mxu3 %v1584_v49  ;;  %1751 = vmatpush.msra.mxu1 %v8285_v5  ;;  %v8566_v5 = vld [vmem:[%s13357_s3 + $0x8b0] sm:$0xff] }
 0x2d6   : > { %1650 = vmatmul.f32.gmra.mxu1 %v7775_v53  ;;  %1778 = vmatpush.msra.mxu2 %v8267_v52 }
 0x2d7   : > { %1694 = vmatpush.msrb.mxu3 %v1582_v47  ;;  %1752 = vmatpush.msra.mxu1 %v8298_v40 }
 0x2d8   : > { %1779 = vmatpush.msra.mxu2 %v8280_v4  ;;  %1737 = vmatmul.f32.gmra.mxu0 %v8049_v28 }
 0x2d9   : > { %1695 = vmatpush.msrb.mxu3 %v1580_v29  ;;  %1753 = vmatpush.msra.mxu1 %v8306_v19  ;;  %v8578_v19 = vld [vmem:[%s13357_s3 + $0x790] sm:$0xff] }
 0x2da   : > { %1780 = vmatpush.msra.mxu2 %v8293_v62 }
 0x2db   : > { %1696 = vmatpush.msrb.mxu3 %v1578_v59  ;;  %1754 = vmatpush.msra.mxu1 %v8325_v41  ;;  %v8584_v41 = vld [vmem:[%s13357_s3 + $0x700] sm:$0xff] }
 0x2dc   : > { %1679 = vmatmul.f32.gmra.mxu2 %v7957_v25 }
 0x2dd   : > { %1697 = vmatpush.msrb.mxu3 %v1576_v6  ;;  %1755 = vmatpush.msra.mxu1 %v8338_v26 }
 0x2de   : > { %1653 = vmatmul.f32.gmra.mxu1 %v7840_v45  ;;  %1781 = vmatpush.msra.mxu2 %v8313_v44 }
 0x2df   : > { %1698 = vmatpush.msrb.mxu3 %v1574_v61  ;;  %1756 = vmatpush.msra.mxu1 %v8351_v18 }
 0x2e0   : > { %1782 = vmatpush.msra.mxu2 %v8320_v21  ;;  %1740 = vmatmul.f32.gmra.mxu0 %v8057_v15 }
 0x2e1   : > { %1699 = vmatpush.msrb.mxu3 %v1572_v60  ;;  %1757 = vmatpush.msra.mxu1 %v8359_v9 }
 0x2e2   : > { %1783 = vmatpush.msra.mxu2 %v8333_v35  ;;  %v8590_v35 = vld [vmem:[%s13357_s3 + $0x670] sm:$0xff] }
 0x2e3   : > { %1700 = vmatpush.msrb.mxu3 %v1570_v58  ;;  %1758 = vmatpush.msra.mxu1 %v8377_v30 }
 0x2e4   : > { %1784 = vmatpush.msra.mxu2 %v8346_v3  ;;  %v8596_v3 = vld [vmem:[%s13357_s3 + $0x5e0] sm:$0xff] }
 0x2e5   : > { %1701 = vmatpush.msrb.mxu3 %v1568_v51  ;;  %1759 = vmatpush.msra.mxu1 %v8392_v63 }
 0x2e6   : > { %1702 = vmatmul.f32.vlgmr.msrb.gmra.mxu3 %v7926_v16  ;;  %1760 = vmatmul.f32.vlgmr.msra.gmra.mxu1 %v7936_v20 }
 0x2e7   : > { %1802 = vmatpush.msra.mxu3 %v8402_v11  ;;  %1682 = vmatmul.f32.gmra.mxu2 %v7993_v54 }
 0x2e8   : > { %1785 = vmatpush.msra.mxu2 %v8366_v0 }
 0x2e9   : > { %1803 = vmatpush.msra.mxu3 %v8418_v17 }
 0x2ea   : > { %1786 = vmatpush.msra.mxu2 %v8372_v39 }
 0x2eb   : > { %1804 = vmatpush.msra.mxu3 %v8425_v32  ;;  %v8626_v32 = vld [vmem:[%s13357_s3 + $0x310] sm:$0xff] }
 0x2ec   : > { %1787 = vmatpush.msra.mxu2 %v8387_v33  ;;  %v8614_v33 = vld [vmem:[%s13357_s3 + $0x430] sm:$0xff] }
 0x2ed   : > { %1805 = vmatpush.msra.mxu3 %v8434_v46 }
 0x2ee   : > { %1705 = vmatmul.f32.gmra.mxu3 %v7969_v34  ;;  %1763 = vmatmul.f32.gmra.mxu1 %v7979_v24 }
 0x2ef   : > { %1806 = vmatpush.msra.mxu3 %v8443_v27  ;;  %1788 = vmatpush.msra.mxu2 %v8410_v42  ;;  %v8620_v42 = vld [vmem:[%s13357_s3 + $0x3a0] sm:$0xff] }
 0x2f0   : > { %1789 = vmatmul.f32.vlgmr.msra.gmra.mxu2 %v8019_v12 }
 0x2f1   : > { %1807 = vmatpush.msra.mxu3 %v8453_v48 }
 0x2f3   : > { %1808 = vmatpush.msra.mxu3 %v8461_v50  ;;  %v8634_v50 = vld [vmem:[%s13357_s3 + $0x280] sm:$0xff] }
 0x2f5   : > { %1809 = vmatpush.msra.mxu3 %v1584_v49 }
 0x2f6   : > { %1708 = vmatmul.f32.gmra.mxu3 %v7775_v53  ;;  %1766 = vmatmul.f32.gmra.mxu1 %v8008_v8 }
 0x2f7   : > { %1810 = vmatpush.msra.mxu3 %v1582_v47  ;;  %v8637_v47 = vld [vmem:[%s7398_s9 + $0xc] sm:$0x7] }
 0x2f8   : > { %1792 = vmatmul.f32.gmra.mxu2 %v8037_v14 }
 0x2f9   : > { %1811 = vmatpush.msra.mxu3 %v1580_v29  ;;  %v8643_v29 = vld [vmem:[%s13357_s3 + $0x1f0] sm:$0xff] }
 0x2fb   : > { %1812 = vmatpush.msra.mxu3 %v1578_v59 }
 0x2fc   : > { %v8548_v0 = vpop.f32.mrf.mxu0 }
 0x2fd   : > { %1813 = vmatpush.msra.mxu3 %v1576_v6  ;;  %13409 = vst [vmem:[#allocation6_spill] sm:$0xff] %v8548_v0  ;;  %v8648_v6 = vld [vmem:[%s13357_s3 + $0x160] sm:$0xff] }
 0x2fe   : > { %1711 = vmatmul.f32.gmra.mxu3 %v7840_v45  ;;  %1769 = vmatmul.f32.gmra.mxu1 %v8029_v13 }
 0x2ff   : > { %1814 = vmatpush.msra.mxu3 %v1574_v61 }
 0x300   : > { %1795 = vmatmul.f32.gmra.mxu2 %v8049_v28 }
 0x301   : > { %1815 = vmatpush.msra.mxu3 %v1572_v60  ;;  %v8656_v60 = vld [vmem:[%s13357_s3 + $0xd0] sm:$0xff] }
 0x303   : > { %1816 = vmatpush.msra.mxu3 %v1570_v58 }
 0x305   : > { %1817 = vmatpush.msra.mxu3 %v1568_v51  ;;  %v8663_v51 = vld [vmem:[%s13357_s3 + $0x40] sm:$0xff] }
 0x306   : > { %1818 = vmatmul.f32.vlgmr.msra.gmra.mxu3 %v7936_v20 }
 0x308   : > { %1798 = vmatmul.f32.gmra.mxu2 %v8057_v15 }
 0x30e   : > { %1821 = vmatmul.f32.gmra.mxu3 %v7979_v24 }
 0x316   : > { %1824 = vmatmul.f32.gmra.mxu3 %v8008_v8 }
 0x31d   : > { %v1616_v53 = vpop.f32.mrf.mxu0 }
 0x31e   : > { %1827 = vmatmul.f32.gmra.mxu3 %v8029_v13 }
 0x322   : > { %v8552_v12 = vpop.f32.mrf.mxu2 }
 0x323   : > { %v8550_v45 = vpop.f32.mrf.mxu1  ;;  %13411 = vst [vmem:[#allocation8_spill] sm:$0xff] %v8552_v12  ;;  %v9384_v12 = vld [vmem:[%s13357_s3 + $0x208] sm:$0xff] }
 0x324   : > { %13410 = vst [vmem:[#allocation7_spill] sm:$0xff] %v8550_v45 }
 0x327   : > { %v1619_v16 = vpop.f32.mrf.mxu0 }
 0x331   : > { %v1622_v34 = vpop.f32.mrf.mxu0 }
 0x33a   : > { %v1625_v20 = vpop.f32.mrf.mxu0 }
 0x343   : > { %v1645_v25 = vpop.f32.mrf.mxu1 }
 0x344   : > { %v1646_v23 = vadd.f32 %v1645_v25, %v1616_v53  ;;  %v8678_v25 = vld [vmem:[%s13357_s3 + $0x1120] sm:$0xff] }
 0x345   : > { %v1732_v8 = vpop.f32.mrf.mxu0 }
 0x349   : > { %v8556_v22 = vpop.f32.mrf.mxu3 }
 0x34a   : > { %13412 = vst [vmem:[#allocation9_spill] sm:$0xff] %v8556_v22  ;;  %v9356_v22 = vld [vmem:[%s13357_s3 + $0xb90] sm:$0xff] }
 0x34b   : > { %v1648_v54 = vpop.f32.mrf.mxu1  ;;  %v8554_v28 = vpop.f32.mrf.mxu2 }
 0x34c   : > { %v1649_v18 = vadd.f32 %v1648_v54, %v1619_v16  ;;  %v8670_v16 = vld [vmem:[%s13357_s3 + $0x11b0] sm:$0xff]  ;;  %v8686_v54 = vld [vmem:[%s13357_s3 + $0x8b8] sm:$0xff] }
 0x34d   : > { %v1735_v2 = vpop.f32.mrf.mxu0 }
 0x353   : > { %v1651_v14 = vpop.f32.mrf.mxu1 }
 0x354   : > { %v1652_v15 = vadd.f32 %v1651_v14, %v1622_v34  ;;  %v8696_v14 = vld [vmem:[%s13357_s3 + $0x828] sm:$0xff] }
 0x355   : > { %v1677_v52 = vpop.f32.mrf.mxu2  ;;  %v1738_v44 = vpop.f32.mrf.mxu0 }
 0x35b   : > { %v1654_v24 = vpop.f32.mrf.mxu1 }
 0x35c   : > { %v1655_v13 = vadd.f32 %v1654_v24, %v1625_v20  ;;  %v8690_v20 = vld [vmem:[%s6843_s8] sm:$0xff]  ;;  %v8709_v24 = vld [vmem:[%s13357_s3 + $0x798] sm:$0xff] }
 0x35d   : > { %v1741_v30 = vpop.f32.mrf.mxu0 }
 0x35e   : > { %1848 = vmatpush.msrb.mxu0 %v1655_v13 }
 0x35f   : > { %v1680_v40 = vpop.f32.mrf.mxu2 }
 0x360   : > { %1849 = vmatpush.msrb.mxu0 %v1652_v15  ;;  %v8722_v15 = vld [vmem:[%s13357_s3 + $0x708] sm:$0xff] }
 0x362   : > { %1850 = vmatpush.msrb.mxu0 %v1649_v18  ;;  %v8729_v18 = vld [vmem:[%s13357_s3 + $0xf70] sm:$0xff] }
 0x363   : > { %v1761_v31 = vpop.f32.mrf.mxu1 }
 0x364   : > { %1851 = vmatpush.msrb.mxu0 %v1646_v23  ;;  %v1762_v46 = vadd.f32 %v1761_v31, %v1732_v8  ;;  %v8714_v8 = vld [vmem:[%s13357_s3 + $0x1000] sm:$0xff]  ;;  %v8751_v31 = vld [vmem:[%s13357_s3 + $0x5e8] sm:$0xff] }
 0x365   : > { %6187 = vmatmul.msk.f32.vlgmr.msrb.gmra.mxu0 %vm668_vm0, %v8559_v57  ;;  %v8737_v23 = vld [vmem:[%s13357_s3 + $0xee0] sm:$0xff] }
 0x366   : > { %1989 = vmatpush.msra.mxu0 %v8566_v5 }
 0x368   : > { %1990 = vmatpush.msra.mxu0 %v8572_v37 }
 0x369   : > { %v1703_v4 = vpop.f32.mrf.mxu3 }
 0x36a   : > { %1991 = vmatpush.msra.mxu0 %v8578_v19  ;;  %v1683_v9 = vpop.f32.mrf.mxu2  ;;  %v1704_v58 = vadd.f32 %v1703_v4, %v8554_v28  ;;  %v8701_v28 = vld [vmem:[%s13357_s3 + $0x1090] sm:$0xff]  ;;  %v8769_v4 = vld [vmem:[%s13357_s3 + $0xdc0] sm:$0xff] }
 0x36b   : > { %v1764_v62 = vpop.f32.mrf.mxu1 }
 0x36c   : > { %1992 = vmatpush.msra.mxu0 %v8584_v41  ;;  %v1765_v17 = vadd.f32 %v1764_v62, %v1735_v2 }
 0x36e   : > { %1993 = vmatpush.msra.mxu0 %v8590_v35 }
 0x370   : > { %1994 = vmatpush.msra.mxu0 %v8596_v3 }
 0x371   : > { %v1706_v21 = vpop.f32.mrf.mxu3 }
 0x372   : > { %1995 = vmatpush.msra.mxu0 %v8602_v38  ;;  %v1707_v61 = vadd.f32 %v1706_v21, %v1677_v52  ;;  %v8756_v52 = vld [vmem:[%s13357_s3 + $0xe50] sm:$0xff]  ;;  %v8807_v21 = vld [vmem:[%s13357_s3 + $0x3a8] sm:$0xff] }
 0x373   : > { %v1767_v26 = vpop.f32.mrf.mxu1  ;;  %v8629_v48 = vpop.f32.mrf.mxu2 }
 0x374   : > { %1996 = vmatpush.msra.mxu0 %v8608_v56  ;;  %v1768_v43 = vadd.f32 %v1767_v26, %v1738_v44  ;;  %v8801_v44 = vld [vmem:[%s6843_s8 + $0x20] sm:$0xff] }
 0x376   : > { %1997 = vmatpush.msra.mxu0 %v8614_v33 }
 0x378   : > { %1998 = vmatpush.msra.mxu0 %v8620_v42 }
 0x379   : > { %v1709_v39 = vpop.f32.mrf.mxu3 }
 0x37a   : > { %1999 = vmatpush.msra.mxu0 %v8626_v32  ;;  %v1710_v59 = vadd.f32 %v1709_v39, %v1680_v40  ;;  %v8790_v40 = vld [vmem:[%s13357_s3 + $0xca0] sm:$0xff]  ;;  %v8838_v39 = vld [vmem:[%s13357_s3 + $0xaf0] sm:$0xff] }
 0x37b   : > { %v1770_v63 = vpop.f32.mrf.mxu1  ;;  %v8680_v34 = vpop.f32.mrf.mxu2 }
 0x37c   : > { %v1771_v11 = vadd.f32 %v1770_v63, %v1741_v30  ;;  %2000 = vmatpush.msra.mxu0 %v8634_v50 }
 0x37e   : > { %1895 = vmatpush.msrb.mxu2 %v1771_v11  ;;  %2001 = vmatpush.msra.mxu0 %v8643_v29  ;;  %v8864_v11 = vld [vmem:[%s13357_s3 + $0x9d0] sm:$0xff] }
 0x380   : > { %1896 = vmatpush.msrb.mxu2 %v1768_v43  ;;  %2002 = vmatpush.msra.mxu0 %v8648_v6  ;;  %v8859_v43 = vld [vmem:[%s13357_s3 + $0x168] sm:$0xff] }
 0x381   : > { %v1712_v27 = vpop.f32.mrf.mxu3 }
 0x382   : > { %v1713_v49 = vadd.f32 %v1712_v27, %v1683_v9  ;;  %1897 = vmatpush.msrb.mxu2 %v1765_v17  ;;  %2003 = vmatpush.msra.mxu0 %v8656_v60 }
 0x383   : > { %v1796_v2 = vpop.f32.mrf.mxu2 }
 0x384   : > { %1868 = vmatpush.msrb.mxu1 %v1713_v49  ;;  %1898 = vmatpush.msrb.mxu2 %v1762_v46  ;;  %v8882_v46 = vld [vmem:[%s13357_s3 + $0x940] sm:$0xff]  ;;  %v8900_v49 = vld [vmem:[%s13357_s3 + $0x48] sm:$0xff] }
 0x385   : > { %6190 = vmatmul.msk.f32.vlgmr.msrb.gmra.mxu2 %vm668_vm0, %v8637_v47  ;;  %2004 = vmatpush.msra.mxu0 %v8663_v51 }
 0x386   : > { %1869 = vmatpush.msrb.mxu1 %v1710_v59  ;;  %2005 = vmatmul.f32.vlgmr.msra.gmra.mxu0 %v8690_v20  ;;  %v8918_v59 = vld [vmem:[%s13357_s3 + $0x1098] sm:$0xff] }
 0x387   : > { %2047 = vmatpush.msra.mxu2 %v8686_v54  ;;  %2105 = vmatpush.msrb.mxu0 %v8566_v5  ;;  %v8777_v5 = vld [vmem:[%s13357_s3 + $0x4c8] sm:$0xff] }
 0x388   : > { %1870 = vmatpush.msrb.mxu1 %v1707_v61  ;;  %v8939_v61 = vld [vmem:[%s6974_s20] sm:$0xff] }
 0x389   : > { %v8665_v53 = vpop.f32.mrf.mxu3  ;;  %2048 = vmatpush.msra.mxu2 %v8696_v14  ;;  %2106 = vmatpush.msrb.mxu0 %v8572_v37  ;;  %v8782_v37 = vld [vmem:[%s13357_s3 + $0xd30] sm:$0xff] }
 0x38a   : > { %1871 = vmatpush.msrb.mxu1 %v1704_v58  ;;  %v1820_v27 = vadd.f32 %v8665_v53, %v8629_v48  ;;  %v8903_v48 = vld [vmem:[%s6843_s8 + $0x8] sm:$0xff] }
 0x38b   : > { %6188 = vmatmul.msk.f32.vlgmr.msrb.gmra.mxu1 %vm668_vm0, %v8559_v57  ;;  %2049 = vmatpush.msra.mxu2 %v8709_v24  ;;  %v8744_v57 = vld [vmem:[%s13357_s3 + $0x678] sm:$0xff]  ;;  %v1799_v26 = vpop.f32.mrf.mxu2  ;;  %v8952_v58 = vld [vmem:[%s13357_s3 + $0xee8] sm:$0xff] }
 0x38c   : > { %2018 = vmatpush.msra.mxu1 %v8670_v16  ;;  %2107 = vmatpush.msrb.mxu0 %v8578_v19  ;;  %v8797_v19 = vld [vmem:[%s13357_s3 + $0x438] sm:$0xff]  ;;  %v8968_v53 = vld [vmem:[%s13357_s3 + $0xdc8] sm:$0xff] }
 0x38d   : > { %2050 = vmatpush.msra.mxu2 %v8722_v15 }
 0x38e   : > { %2019 = vmatpush.msra.mxu1 %v8678_v25  ;;  %2108 = vmatpush.msrb.mxu0 %v8584_v41  ;;  %v8812_v41 = vld [vmem:[%s13357_s3 + $0xc10] sm:$0xff] }
 0x38f   : > { %2008 = vmatmul.f32.gmra.mxu0 %v7914_v7  ;;  %2051 = vmatpush.msra.mxu2 %v8744_v57  ;;  %v8764_v7 = vld [vmem:[%s13357_s3 + $0x558] sm:$0xff] }
 0x390   : > { %2020 = vmatpush.msra.mxu1 %v8701_v28  ;;  %2109 = vmatpush.msrb.mxu0 %v8590_v35  ;;  %v8820_v35 = vld [vmem:[%s13357_s3 + $0x318] sm:$0xff] }
 0x391   : > { %v8724_v13 = vpop.f32.mrf.mxu3  ;;  %2052 = vmatpush.msra.mxu2 %v8751_v31 }
 0x392   : > { %2021 = vmatpush.msra.mxu1 %v8714_v8  ;;  %2110 = vmatpush.msrb.mxu0 %v8596_v3  ;;  %v8825_v3 = vld [vmem:[%s13357_s3 + $0xb80] sm:$0xff]  ;;  %v1823_v17 = vadd.f32 %v8724_v13, %v8680_v34  ;;  %v8983_v34 = vld [vmem:[%s6974_s20 + $0x10] sm:$0xff]  ;;  %v9018_v13 = vld [vmem:[%s6843_s8 + $0x38] sm:$0xff] }
 0x393   : > { %2053 = vmatpush.msra.mxu2 %v8764_v7 }
 0x394   : > { %2022 = vmatpush.msra.mxu1 %v8729_v18  ;;  %2111 = vmatpush.msrb.mxu0 %v8602_v38  ;;  %v8833_v38 = vld [vmem:[%s13357_s3 + $0x288] sm:$0xff] }
 0x395   : > { %2054 = vmatpush.msra.mxu2 %v8777_v5 }
 0x396   : > { %2023 = vmatpush.msra.mxu1 %v8737_v23  ;;  %2112 = vmatpush.msrb.mxu0 %v8608_v56  ;;  %v8846_v56 = vld [vmem:[%s13357_s3 + $0xa60] sm:$0xff] }
 0x397   : > { %2011 = vmatmul.f32.gmra.mxu0 %v8801_v44  ;;  %2055 = vmatpush.msra.mxu2 %v8797_v19 }
 0x398   : > { %2024 = vmatpush.msra.mxu1 %v8756_v52  ;;  %2113 = vmatpush.msrb.mxu0 %v8614_v33  ;;  %v8853_v33 = vld [vmem:[%s13357_s3 + $0x1f8] sm:$0xff] }
 0x399   : > { %v1825_v62 = vpop.f32.mrf.mxu3  ;;  %2056 = vmatpush.msra.mxu2 %v8807_v21 }
 0x39a   : > { %2025 = vmatpush.msra.mxu1 %v8769_v4  ;;  %2114 = vmatpush.msrb.mxu0 %v8620_v42  ;;  %v1826_v63 = vadd.f32 %v1825_v62, %v1796_v2  ;;  %v8867_v42 = vld [vmem:[%s6843_s8 + $0x30] sm:$0xff]  ;;  %v9058_v2 = vld [vmem:[%s6974_s20 + $0x18] sm:$0xff] }
 0x39b   : > { %2057 = vmatpush.msra.mxu2 %v8820_v35 }
 0x39c   : > { %2026 = vmatpush.msra.mxu1 %v8782_v37  ;;  %2115 = vmatpush.msrb.mxu0 %v8626_v32  ;;  %v8877_v32 = vld [vmem:[%s13357_s3 + $0xd8] sm:$0xff] }
 0x39d   : > { %2058 = vmatpush.msra.mxu2 %v8833_v38 }
 0x39e   : > { %2027 = vmatpush.msra.mxu1 %v8790_v40  ;;  %2116 = vmatpush.msrb.mxu0 %v8634_v50  ;;  %v8892_v50 = vld [vmem:[%s13357_s3 + $0x11b8] sm:$0xff] }
 0x39f   : > { %2014 = vmatmul.f32.gmra.mxu0 %v8867_v42  ;;  %2059 = vmatpush.msra.mxu2 %v8853_v33 }
 0x3a0   : > { %2028 = vmatpush.msra.mxu1 %v8812_v41  ;;  %2117 = vmatpush.msrb.mxu0 %v8643_v29  ;;  %v8911_v29 = vld [vmem:[%s13357_s3 + $0x1128] sm:$0xff] }
 0x3a1   : > { %v1828_v9 = vpop.f32.mrf.mxu3  ;;  %2060 = vmatpush.msra.mxu2 %v8859_v43 }
 0x3a2   : > { %v1829_v30 = vadd.f32 %v1828_v9, %v1799_v26  ;;  %2029 = vmatpush.msra.mxu1 %v8825_v3  ;;  %2118 = vmatpush.msrb.mxu0 %v8648_v6  ;;  %v8936_v6 = vld [vmem:[%s13357_s3 + $0xf78] sm:$0xff] }
 0x3a3   : > { %2061 = vmatpush.msra.mxu2 %v8877_v32 }
 0x3a4   : > { %2030 = vmatpush.msra.mxu1 %v8838_v39  ;;  %1915 = vmatpush.msrb.mxu3 %v1829_v30 }
 0x3a5   : > { %2119 = vmatpush.msrb.mxu0 %v8656_v60  ;;  %2062 = vmatpush.msra.mxu2 %v8900_v49  ;;  %v8946_v60 = vld [vmem:[%s6843_s8 + $0x18] sm:$0xff] }
 0x3a6   : > { %2031 = vmatpush.msra.mxu1 %v8846_v56  ;;  %1916 = vmatpush.msrb.mxu3 %v1826_v63 }
 0x3a7   : > { %2120 = vmatpush.msrb.mxu0 %v8663_v51  ;;  %2063 = vmatmul.f32.vlgmr.msra.gmra.mxu2 %v8690_v20  ;;  %v8960_v51 = vld [vmem:[%s13357_s3 + $0xe58] sm:$0xff] }
 0x3a8   : > { %2032 = vmatpush.msra.mxu1 %v8864_v11  ;;  %1917 = vmatpush.msrb.mxu3 %v1823_v17 }
 0x3a9   : > { %2121 = vmatmul.f32.vlgmr.msrb.gmra.mxu0 %v8939_v61  ;;  %2163 = vmatpush.msrb.mxu2 %v8686_v54  ;;  %v8989_v54 = vld [vmem:[%s6843_s8 + $0x28] sm:$0xff] }
 0x3aa   : > { %2033 = vmatpush.msra.mxu1 %v8882_v46  ;;  %1918 = vmatpush.msrb.mxu3 %v1820_v27 }
 0x3ab   : > { %2034 = vmatmul.f32.vlgmr.msra.gmra.mxu1 %v8903_v48  ;;  %6191 = vmatmul.msk.f32.vlgmr.msrb.gmra.mxu3 %vm668_vm0, %v8637_v47  ;;  %v8927_v47 = vld [vmem:[%s13357_s3 + $0x1008] sm:$0xff] }
 0x3ac   : > { %2076 = vmatpush.msra.mxu3 %v8892_v50  ;;  %2134 = vmatpush.msrb.mxu1 %v8670_v16  ;;  %v8976_v16 = vld [vmem:[%s13357_s3 + $0xd38] sm:$0xff] }
 0x3ad   : > { %2164 = vmatpush.msrb.mxu2 %v8696_v14  ;;  %v1970_v14 = vld [vmem:[%s13357_s3 + $0xca8] sm:$0xff] }
 0x3ae   : > { %2077 = vmatpush.msra.mxu3 %v8911_v29  ;;  %2135 = vmatpush.msrb.mxu1 %v8678_v25  ;;  %v8979_v25 = vld [vmem:[%s6843_s8 + $0x10] sm:$0xff] }
 0x3af   : > { %2165 = vmatpush.msrb.mxu2 %v8709_v24  ;;  %v1966_v24 = vld [vmem:[%s13357_s3 + $0xb88] sm:$0xff] }
 0x3b0   : > { %2078 = vmatpush.msra.mxu3 %v8918_v59  ;;  %2136 = vmatpush.msrb.mxu1 %v8701_v28  ;;  %v1968_v28 = vld [vmem:[%s13357_s3 + $0xc18] sm:$0xff] }
 0x3b1   : > { %2166 = vmatpush.msrb.mxu2 %v8722_v15  ;;  %2124 = vmatmul.f32.gmra.mxu0 %v8983_v34  ;;  %v9013_v15 = vld [vmem:[%s6974_s20 + $0x20] sm:$0xff] }
 0x3b2   : > { %2079 = vmatpush.msra.mxu3 %v8927_v47  ;;  %2137 = vmatpush.msrb.mxu1 %v8714_v8  ;;  %v1964_v8 = vld [vmem:[%s13357_s3 + $0xaf8] sm:$0xff] }
 0x3b3   : > { %2037 = vmatmul.f32.gmra.mxu1 %v8946_v60  ;;  %2066 = vmatmul.f32.gmra.mxu2 %v8979_v25 }
 0x3b4   : > { %2080 = vmatpush.msra.mxu3 %v8936_v6  ;;  %2138 = vmatpush.msrb.mxu1 %v8729_v18  ;;  %v1962_v18 = vld [vmem:[%s13357_s3 + $0xa68] sm:$0xff] }
 0x3b5   : > { %2167 = vmatpush.msrb.mxu2 %v8744_v57  ;;  %v1958_v57 = vld [vmem:[%s13357_s3 + $0x948] sm:$0xff] }
 0x3b6   : > { %2081 = vmatpush.msra.mxu3 %v8952_v58  ;;  %2139 = vmatpush.msrb.mxu1 %v8737_v23  ;;  %v1960_v23 = vld [vmem:[%s13357_s3 + $0x9d8] sm:$0xff] }
 0x3b7   : > { %2168 = vmatpush.msrb.mxu2 %v8751_v31  ;;  %v9038_v31 = vld [vmem:[%s6974_s20 + $0x30] sm:$0xff] }
 0x3b8   : > { %2082 = vmatpush.msra.mxu3 %v8960_v51  ;;  %2140 = vmatpush.msrb.mxu1 %v8756_v52  ;;  %v9044_v52 = vld [vmem:[%s6974_s20 + $0x8] sm:$0xff] }
 0x3b9   : > { %2169 = vmatpush.msrb.mxu2 %v8764_v7  ;;  %2127 = vmatmul.f32.gmra.mxu0 %v9013_v15  ;;  %v9069_v7 = vld [vmem:[%s6974_s20 + $0x28] sm:$0xff] }
 0x3ba   : > { %2083 = vmatpush.msra.mxu3 %v8968_v53  ;;  %2141 = vmatpush.msrb.mxu1 %v8769_v4  ;;  %v9076_v4 = vld [vmem:[%s6974_s20 + $0x38] sm:$0xff] }
 0x3bb   : > { %2040 = vmatmul.f32.gmra.mxu1 %v8989_v54  ;;  %2170 = vmatpush.msrb.mxu2 %v8777_v5 }
 0x3bc   : > { %2084 = vmatpush.msra.mxu3 %v8976_v16  ;;  %2142 = vmatpush.msrb.mxu1 %v8782_v37 }
 0x3bd   : > { %2069 = vmatmul.f32.gmra.mxu2 %v8801_v44 }
 0x3be   : > { %2085 = vmatpush.msra.mxu3 %v1970_v14  ;;  %2143 = vmatpush.msrb.mxu1 %v8790_v40 }
 0x3bf   : > { %2171 = vmatpush.msrb.mxu2 %v8797_v19 }
 0x3c0   : > { %2086 = vmatpush.msra.mxu3 %v1968_v28  ;;  %2144 = vmatpush.msrb.mxu1 %v8812_v41 }
 0x3c1   : > { %2172 = vmatpush.msrb.mxu2 %v8807_v21  ;;  %2130 = vmatmul.f32.gmra.mxu0 %v9038_v31 }
 0x3c2   : > { %2087 = vmatpush.msra.mxu3 %v1966_v24  ;;  %2145 = vmatpush.msrb.mxu1 %v8825_v3 }
 0x3c3   : > { %2043 = vmatmul.f32.gmra.mxu1 %v9018_v13  ;;  %2173 = vmatpush.msrb.mxu2 %v8820_v35 }
 0x3c4   : > { %2088 = vmatpush.msra.mxu3 %v1964_v8  ;;  %2146 = vmatpush.msrb.mxu1 %v8838_v39 }
 0x3c5   : > { %2174 = vmatpush.msrb.mxu2 %v8833_v38 }
 0x3c6   : > { %2089 = vmatpush.msra.mxu3 %v1962_v18  ;;  %2147 = vmatpush.msrb.mxu1 %v8846_v56 }
 0x3c7   : > { %2072 = vmatmul.f32.gmra.mxu2 %v8867_v42 }
 0x3c8   : > { %2090 = vmatpush.msra.mxu3 %v1960_v23  ;;  %2148 = vmatpush.msrb.mxu1 %v8864_v11  ;;  %v9096_v11 = vld [vmem:[%s7036_s7 + $0x10] sm:$0x7] }
 0x3c9   : > { %2175 = vmatpush.msrb.mxu2 %v8853_v33 }
 0x3ca   : > { %2091 = vmatpush.msra.mxu3 %v1958_v57  ;;  %2149 = vmatpush.msrb.mxu1 %v8882_v46 }
 0x3cb   : > { %2092 = vmatmul.f32.vlgmr.msra.gmra.mxu3 %v8903_v48  ;;  %2150 = vmatmul.f32.vlgmr.msrb.gmra.mxu1 %v9044_v52 }
 0x3cc   : > { %2192 = vmatpush.msrb.mxu3 %v8892_v50  ;;  %2176 = vmatpush.msrb.mxu2 %v8859_v43  ;;  %v9103_v50 = vld [vmem:[%s13357_s3 + $0x8c0] sm:$0xff] }
 0x3ce   : > { %2193 = vmatpush.msrb.mxu3 %v8911_v29  ;;  %2177 = vmatpush.msrb.mxu2 %v8877_v32  ;;  %v9109_v29 = vld [vmem:[%s13357_s3 + $0x830] sm:$0xff] }
 0x3d0   : > { %2194 = vmatpush.msrb.mxu3 %v8918_v59  ;;  %2178 = vmatpush.msrb.mxu2 %v8900_v49 }
 0x3d1   : > { %2179 = vmatmul.f32.vlgmr.msrb.gmra.mxu2 %v8939_v61 }
 0x3d2   : > { %2195 = vmatpush.msrb.mxu3 %v8927_v47  ;;  %v9115_v47 = vld [vmem:[%s13357_s3 + $0x7a0] sm:$0xff] }
 0x3d3   : > { %2095 = vmatmul.f32.gmra.mxu3 %v8946_v60  ;;  %2153 = vmatmul.f32.gmra.mxu1 %v9058_v2 }
 0x3d4   : > { %2196 = vmatpush.msrb.mxu3 %v8936_v6 }
 0x3d6   : > { %2197 = vmatpush.msrb.mxu3 %v8952_v58 }
 0x3d8   : > { %2198 = vmatpush.msrb.mxu3 %v8960_v51  ;;  %v9121_v51 = vld [vmem:[%s13357_s3 + $0x710] sm:$0xff] }
 0x3d9   : > { %2182 = vmatmul.f32.gmra.mxu2 %v8983_v34 }
 0x3da   : > { %2199 = vmatpush.msrb.mxu3 %v8968_v53  ;;  %v9127_v53 = vld [vmem:[%s13357_s3 + $0x680] sm:$0xff] }
 0x3db   : > { %2098 = vmatmul.f32.gmra.mxu3 %v8989_v54  ;;  %2156 = vmatmul.f32.gmra.mxu1 %v9069_v7 }
 0x3dc   : > { %2200 = vmatpush.msrb.mxu3 %v8976_v16 }
 0x3de   : > { %2201 = vmatpush.msrb.mxu3 %v1970_v14  ;;  %v9133_v14 = vld [vmem:[%s13357_s3 + $0x5f0] sm:$0xff] }
 0x3e0   : > { %2202 = vmatpush.msrb.mxu3 %v1968_v28  ;;  %v9139_v28 = vld [vmem:[%s13357_s3 + $0x560] sm:$0xff] }
 0x3e1   : > { %2185 = vmatmul.f32.gmra.mxu2 %v9013_v15 }
 0x3e2   : > { %2203 = vmatpush.msrb.mxu3 %v1966_v24  ;;  %v9085_v5 = vpop.f32.mrf.mxu0 }
 0x3e3   : > { %2101 = vmatmul.f32.gmra.mxu3 %v9018_v13  ;;  %2159 = vmatmul.f32.gmra.mxu1 %v9076_v4  ;;  %13413 = vst [vmem:[#allocation10_spill] sm:$0xff] %v9085_v5 }
 0x3e4   : > { %2204 = vmatpush.msrb.mxu3 %v1964_v8 }
 0x3e6   : > { %2205 = vmatpush.msrb.mxu3 %v1962_v18 }
 0x3e8   : > { %2206 = vmatpush.msrb.mxu3 %v1960_v23  ;;  %v9145_v23 = vld [vmem:[%s13357_s3 + $0x4d0] sm:$0xff] }
 0x3e9   : > { %2188 = vmatmul.f32.gmra.mxu2 %v9038_v31 }
 0x3ea   : > { %2207 = vmatpush.msrb.mxu3 %v1958_v57  ;;  %v9151_v57 = vld [vmem:[%s13357_s3 + $0x440] sm:$0xff] }
 0x3eb   : > { %2208 = vmatmul.f32.vlgmr.msrb.gmra.mxu3 %v9044_v52 }
 0x3f3   : > { %2211 = vmatmul.f32.gmra.mxu3 %v9058_v2 }
 0x3fb   : > { %2214 = vmatmul.f32.gmra.mxu3 %v9069_v7 }
 0x403   : > { %2217 = vmatmul.f32.gmra.mxu3 %v9076_v4  ;;  %v2006_v62 = vpop.f32.mrf.mxu0 }
 0x408   : > { %v9087_v37 = vpop.f32.mrf.mxu1  ;;  %v9089_v35 = vpop.f32.mrf.mxu2 }
 0x409   : > { %13414 = vst [vmem:[#allocation11_spill] sm:$0xff] %v9087_v37 }
 0x40a   : > { %13415 = vst [vmem:[#allocation12_spill] sm:$0xff] %v9089_v35  ;;  %v9369_v35 = vld [vmem:[%s13357_s3 + $0xb00] sm:$0xff] }
 0x40c   : > { %v2009_v40 = vpop.f32.mrf.mxu0 }
 0x414   : > { %v2012_v21 = vpop.f32.mrf.mxu0 }
 0x41c   : > { %v2015_v26 = vpop.f32.mrf.mxu0 }
 0x426   : > { %v2122_v39 = vpop.f32.mrf.mxu0 }
 0x428   : > { %v2035_v19 = vpop.f32.mrf.mxu1 }
 0x429   : > { %v2036_v63 = vadd.f32 %v2035_v19, %v2006_v62 }
 0x42a   : > { %v9091_v38 = vpop.f32.mrf.mxu2 }
 0x42e   : > { %v9093_v43 = vpop.f32.mrf.mxu3  ;;  %v2125_v46 = vpop.f32.mrf.mxu0 }
 0x42f   : > { %13416 = vst [vmem:[#allocation13_spill] sm:$0xff] %v9093_v43  ;;  %v9343_v43 = vld [vmem:[%s13357_s3 + $0xc20] sm:$0xff] }
 0x430   : > { %v2038_v41 = vpop.f32.mrf.mxu1 }
 0x431   : > { %v2039_v33 = vadd.f32 %v2038_v41, %v2009_v40 }
 0x436   : > { %v2067_v32 = vpop.f32.mrf.mxu2  ;;  %v2128_v6 = vpop.f32.mrf.mxu0 }
 0x438   : > { %v2041_v3 = vpop.f32.mrf.mxu1 }
 0x439   : > { %v2042_v30 = vadd.f32 %v2041_v3, %v2012_v21  ;;  %v9157_v21 = vld [vmem:[%s13357_s3 + $0x3b0] sm:$0xff] }
 0x43e   : > { %v2131_v18 = vpop.f32.mrf.mxu0 }
 0x440   : > { %v2044_v9 = vpop.f32.mrf.mxu1  ;;  %v2070_v59 = vpop.f32.mrf.mxu2 }
 0x441   : > { %v2045_v56 = vadd.f32 %v2044_v9, %v2015_v26  ;;  %v9163_v26 = vld [vmem:[%s13357_s3 + $0x320] sm:$0xff] }
 0x443   : > { %2238 = vmatpush.msra.mxu0 %v2045_v56  ;;  %v9171_v56 = vld [vmem:[%s13357_s3 + $0x290] sm:$0xff] }
 0x445   : > { %2239 = vmatpush.msra.mxu0 %v2042_v30 }
 0x447   : > { %2240 = vmatpush.msra.mxu0 %v2039_v33 }
 0x448   : > { %v2151_v17 = vpop.f32.mrf.mxu1 }
 0x449   : > { %2241 = vmatpush.msra.mxu0 %v2036_v63  ;;  %v2152_v3 = vadd.f32 %v2151_v17, %v2122_v39  ;;  %v9174_v63 = vld [vmem:[%s7398_s9 + $0x10] sm:$0x7]  ;;  %v9180_v39 = vld [vmem:[%s13357_s3 + $0x200] sm:$0xff] }
 0x44a   : > { %6193 = vmatmul.msk.f32.vlgmr.msra.gmra.mxu0 %vm668_vm0, %v9096_v11  ;;  %v2073_v24 = vpop.f32.mrf.mxu2 }
 0x44b   : > { %2379 = vmatpush.msrb.mxu0 %v9103_v50 }
 0x44d   : > { %2380 = vmatpush.msrb.mxu0 %v9109_v29 }
 0x44e   : > { %v2093_v27 = vpop.f32.mrf.mxu3 }
 0x44f   : > { %2381 = vmatpush.msrb.mxu0 %v9115_v47 }
 0x450   : > { %v2154_v49 = vpop.f32.mrf.mxu1 }
 0x451   : > { %2382 = vmatpush.msrb.mxu0 %v9121_v51  ;;  %v2155_v41 = vadd.f32 %v2154_v49, %v2125_v46  ;;  %v9185_v46 = vld [vmem:[%s13357_s3 + $0x170] sm:$0xff] }
 0x453   : > { %2383 = vmatpush.msrb.mxu0 %v9127_v53 }
 0x454   : > { %v9166_v30 = vpop.f32.mrf.mxu2 }
 0x455   : > { %2384 = vmatpush.msrb.mxu0 %v9133_v14 }
 0x456   : > { %v2096_v58 = vpop.f32.mrf.mxu3 }
 0x457   : > { %2385 = vmatpush.msrb.mxu0 %v9139_v28  ;;  %v2097_v49 = vadd.f32 %v2096_v58, %v2067_v32  ;;  %v9207_v32 = vld [vmem:[%s13357_s3 + $0x11c0] sm:$0xff]  ;;  %v9223_v58 = vld [vmem:[%s13357_s3 + $0x8c8] sm:$0xff] }
 0x458   : > { %v2157_v16 = vpop.f32.mrf.mxu1 }
 0x459   : > { %2386 = vmatpush.msrb.mxu0 %v9145_v23  ;;  %v2158_v40 = vadd.f32 %v2157_v16, %v2128_v6  ;;  %v9193_v6 = vld [vmem:[%s13357_s3 + $0xe0] sm:$0xff]  ;;  %v9200_v16 = vld [vmem:[%s13357_s3 + $0x50] sm:$0xff] }
 0x45b   : > { %2387 = vmatpush.msrb.mxu0 %v9151_v57 }
 0x45d   : > { %2388 = vmatpush.msrb.mxu0 %v9157_v21 }
 0x45e   : > { %v2099_v8 = vpop.f32.mrf.mxu3 }
 0x45f   : > { %2389 = vmatpush.msrb.mxu0 %v9163_v26  ;;  %v2100_v17 = vadd.f32 %v2099_v8, %v2070_v59  ;;  %v2094_v59 = vadd.f32 %v2093_v27, %v9091_v38  ;;  %v9215_v38 = vld [vmem:[%s13357_s3 + $0x1130] sm:$0xff]  ;;  %v9217_v27 = vpop.f32.mrf.mxu2  ;;  %v9235_v8 = vld [vmem:[%s13357_s3 + $0x10a0] sm:$0xff] }
 0x460   : > { %v2160_v62 = vpop.f32.mrf.mxu1 }
 0x461   : > { %v2161_v19 = vadd.f32 %v2160_v62, %v2131_v18  ;;  %2390 = vmatpush.msrb.mxu0 %v9171_v56  ;;  %v9243_v18 = vld [vmem:[%s13357_s3 + $0x7a8] sm:$0xff]  ;;  %v9248_v62 = vld [vmem:[%s13357_s3 + $0x1010] sm:$0xff] }
 0x463   : > { %2285 = vmatpush.msra.mxu2 %v2161_v19  ;;  %2391 = vmatpush.msrb.mxu0 %v9180_v39  ;;  %v9263_v19 = vld [vmem:[%s13357_s3 + $0xf80] sm:$0xff] }
 0x465   : > { %2286 = vmatpush.msra.mxu2 %v2158_v40  ;;  %2392 = vmatpush.msrb.mxu0 %v9185_v46 }
 0x466   : > { %v2102_v9 = vpop.f32.mrf.mxu3 }
 0x467   : > { %v2103_v33 = vadd.f32 %v2102_v9, %v2073_v24  ;;  %2287 = vmatpush.msra.mxu2 %v2155_v41  ;;  %2393 = vmatpush.msrb.mxu0 %v9193_v6  ;;  %v9278_v41 = vld [vmem:[%s13357_s3 + $0x688] sm:$0xff] }
 0x468   : > { %v9298_v9 = vld [vmem:[%s13357_s3 + $0x568] sm:$0xff] }
 0x469   : > { %2258 = vmatpush.msra.mxu1 %v2103_v33  ;;  %2288 = vmatpush.msra.mxu2 %v2152_v3  ;;  %v9290_v3 = vld [vmem:[%s13357_s3 + $0xe60] sm:$0xff]  ;;  %v9303_v33 = vld [vmem:[%s13357_s3 + $0xdd0] sm:$0xff] }
 0x46a   : > { %6196 = vmatmul.msk.f32.vlgmr.msra.gmra.mxu2 %vm668_vm0, %v9174_v63  ;;  %2394 = vmatpush.msrb.mxu0 %v9200_v16 }
 0x46b   : > { %2259 = vmatpush.msra.mxu1 %v2100_v17  ;;  %2395 = vmatmul.f32.vlgmr.msrb.gmra.mxu0 %v8690_v20 }
 0x46c   : > { %2437 = vmatpush.msrb.mxu2 %v9223_v58  ;;  %2495 = vmatpush.msra.mxu0 %v9103_v50  ;;  %v9256_v50 = vld [vmem:[%s13357_s3 + $0x718] sm:$0xff] }
 0x46d   : > { %2260 = vmatpush.msra.mxu1 %v2097_v49  ;;  %v9316_v49 = vld [vmem:[%s13357_s3 + $0xd40] sm:$0xff] }
 0x46e   : > { %v9202_v24 = vpop.f32.mrf.mxu3  ;;  %2496 = vmatpush.msra.mxu0 %v9109_v29  ;;  %v9271_v29 = vld [vmem:[%s13357_s3 + $0xef0] sm:$0xff] }
 0x46f   : > { %2261 = vmatpush.msra.mxu1 %v2094_v59  ;;  %v9331_v59 = vld [vmem:[%s13357_s3 + $0x448] sm:$0xff] }
 0x470   : > { %6194 = vmatmul.msk.f32.vlgmr.msra.gmra.mxu1 %vm668_vm0, %v9096_v11  ;;  %v9230_v11 = vld [vmem:[%s13357_s3 + $0x838] sm:$0xff]  ;;  %2497 = vmatpush.msra.mxu0 %v9115_v47 }
 0x471   : > { %2408 = vmatpush.msrb.mxu1 %v9207_v32  ;;  %2438 = vmatpush.msrb.mxu2 %v9230_v11  ;;  %v9285_v47 = vld [vmem:[%s13357_s3 + $0x5f8] sm:$0xff] }
 0x472   : > { %2498 = vmatpush.msra.mxu0 %v9121_v51  ;;  %v2186_v51 = vpop.f32.mrf.mxu2 }
 0x473   : > { %2409 = vmatpush.msrb.mxu1 %v9215_v38  ;;  %2439 = vmatpush.msrb.mxu2 %v9243_v18 }
 0x474   : > { %2398 = vmatmul.f32.gmra.mxu0 %v8979_v25 }
 0x475   : > { %2410 = vmatpush.msrb.mxu1 %v9235_v8  ;;  %2440 = vmatpush.msrb.mxu2 %v9256_v50 }
 0x476   : > { %v9258_v40 = vpop.f32.mrf.mxu3  ;;  %2499 = vmatpush.msra.mxu0 %v9127_v53  ;;  %v9311_v53 = vld [vmem:[%s13357_s3 + $0x4d8] sm:$0xff] }
 0x477   : > { %2411 = vmatpush.msrb.mxu1 %v9248_v62  ;;  %2441 = vmatpush.msrb.mxu2 %v9278_v41 }
 0x478   : > { %2500 = vmatpush.msra.mxu0 %v9133_v14  ;;  %v9324_v14 = vld [vmem:[%s13357_s3 + $0xcb0] sm:$0xff] }
 0x479   : > { %2412 = vmatpush.msrb.mxu1 %v9263_v19  ;;  %2442 = vmatpush.msrb.mxu2 %v9285_v47 }
 0x47a   : > { %2501 = vmatpush.msra.mxu0 %v9139_v28  ;;  %v9338_v28 = vld [vmem:[%s13357_s3 + $0x3b8] sm:$0xff]  ;;  %v2189_v37 = vpop.f32.mrf.mxu2 }
 0x47b   : > { %2413 = vmatpush.msrb.mxu1 %v9271_v29  ;;  %2443 = vmatpush.msrb.mxu2 %v9298_v9 }
 0x47c   : > { %2502 = vmatpush.msra.mxu0 %v9145_v23  ;;  %v9351_v23 = vld [vmem:[%s13357_s3 + $0x328] sm:$0xff] }
 0x47d   : > { %2414 = vmatpush.msrb.mxu1 %v9290_v3  ;;  %2444 = vmatpush.msrb.mxu2 %v9311_v53 }
 0x47e   : > { %v2215_v17 = vpop.f32.mrf.mxu3  ;;  %2401 = vmatmul.f32.gmra.mxu0 %v8801_v44 }
 0x47f   : > { %2415 = vmatpush.msrb.mxu1 %v9303_v33  ;;  %2445 = vmatpush.msrb.mxu2 %v9331_v59  ;;  %v2216_v0 = vadd.f32 %v2215_v17, %v2186_v51 }
 0x480   : > { %2503 = vmatpush.msra.mxu0 %v9151_v57  ;;  %v9364_v57 = vld [vmem:[%s13357_s3 + $0x298] sm:$0xff] }
 0x481   : > { %2416 = vmatpush.msrb.mxu1 %v9316_v49  ;;  %2446 = vmatpush.msrb.mxu2 %v9338_v28 }
 0x482   : > { %2504 = vmatpush.msra.mxu0 %v9157_v21  ;;  %v9377_v21 = vld [vmem:[%s13357_s3 + $0xa70] sm:$0xff] }
 0x483   : > { %2417 = vmatpush.msrb.mxu1 %v9324_v14  ;;  %2447 = vmatpush.msrb.mxu2 %v9351_v23 }
 0x484   : > { %2505 = vmatpush.msra.mxu0 %v9163_v26  ;;  %v2213_v26 = vadd.f32 %v9258_v40, %v9217_v27  ;;  %v2210_v27 = vadd.f32 %v9202_v24, %v9166_v30  ;;  %v9436_v30 = vld [vmem:[%s13357_s3 + $0x1138] sm:$0xff]  ;;  %v9577_v40 = vld [vmem:[%s7036_s7 + $0x14] sm:$0x7] }
 0x485   : > { %2418 = vmatpush.msrb.mxu1 %v9343_v43  ;;  %2448 = vmatpush.msrb.mxu2 %v9364_v57  ;;  %v2364_v24 = vld [vmem:[%s13357_s3 + $0xdd8] sm:$0xff] }
 0x486   : > { %v2218_v45 = vpop.f32.mrf.mxu3  ;;  %2506 = vmatpush.msra.mxu0 %v9171_v56  ;;  %v9410_v56 = vld [vmem:[%s13357_s3 + $0x950] sm:$0xff] }
 0x487   : > { %v2219_v5 = vadd.f32 %v2218_v45, %v2189_v37  ;;  %2419 = vmatpush.msrb.mxu1 %v9356_v22  ;;  %v9390_v45 = vld [vmem:[%s13357_s3 + $0x178] sm:$0xff]  ;;  %v9395_v37 = vld [vmem:[%s13357_s3 + $0x9e0] sm:$0xff]  ;;  %2404 = vmatmul.f32.gmra.mxu0 %v8867_v42 }
 0x488   : > { %2449 = vmatpush.msrb.mxu2 %v9384_v12  ;;  %2507 = vmatpush.msra.mxu0 %v9180_v39  ;;  %v9428_v39 = vld [vmem:[%s13357_s3 + $0x58] sm:$0xff] }
 0x489   : > { %2420 = vmatpush.msrb.mxu1 %v9369_v35  ;;  %2305 = vmatpush.msra.mxu3 %v2219_v5  ;;  %v9405_v5 = vld [vmem:[%s13357_s3 + $0xe8] sm:$0xff] }
 0x48a   : > { %2450 = vmatpush.msrb.mxu2 %v9390_v45  ;;  %2508 = vmatpush.msra.mxu0 %v9185_v46  ;;  %v9443_v46 = vld [vmem:[%s13357_s3 + $0x10a8] sm:$0xff] }
 0x48b   : > { %2421 = vmatpush.msrb.mxu1 %v9377_v21  ;;  %2306 = vmatpush.msra.mxu3 %v2216_v0  ;;  %v9420_v0 = vld [vmem:[%s13357_s3 + $0x11c8] sm:$0xff] }
 0x48c   : > { %2451 = vmatpush.msrb.mxu2 %v9405_v5  ;;  %2509 = vmatpush.msra.mxu0 %v9193_v6  ;;  %v9461_v6 = vld [vmem:[%s13357_s3 + $0xf88] sm:$0xff] }
 0x48d   : > { %2422 = vmatpush.msrb.mxu1 %v9395_v37  ;;  %2307 = vmatpush.msra.mxu3 %v2213_v26  ;;  %v9626_v26 = vld [vmem:[%s13357_s3 + $0x4e0] sm:$0xff] }
 0x48e   : > { %2452 = vmatpush.msrb.mxu2 %v9428_v39  ;;  %2510 = vmatpush.msra.mxu0 %v9200_v16  ;;  %v9479_v16 = vld [vmem:[%s13357_s3 + $0xe68] sm:$0xff] }
 0x48f   : > { %2423 = vmatpush.msrb.mxu1 %v9410_v56  ;;  %2308 = vmatpush.msra.mxu3 %v2210_v27 }
 0x490   : > { %2424 = vmatmul.f32.vlgmr.msrb.gmra.mxu1 %v8903_v48  ;;  %6197 = vmatmul.msk.f32.vlgmr.msra.gmra.mxu3 %vm668_vm0, %v9174_v63  ;;  %v9452_v63 = vld [vmem:[%s13357_s3 + $0x1018] sm:$0xff] }
 0x491   : > { %2466 = vmatpush.msrb.mxu3 %v9420_v0  ;;  %2524 = vmatpush.msra.mxu1 %v9207_v32  ;;  %v2362_v32 = vld [vmem:[%s13357_s3 + $0xd48] sm:$0xff] }
 0x492   : > { %2453 = vmatmul.f32.vlgmr.msrb.gmra.mxu2 %v8690_v20  ;;  %2511 = vmatmul.f32.vlgmr.msra.gmra.mxu0 %v8939_v61  ;;  %v9471_v20 = vld [vmem:[%s13357_s3 + $0xef8] sm:$0xff] }
 0x493   : > { %2467 = vmatpush.msrb.mxu3 %v9436_v30  ;;  %2525 = vmatpush.msra.mxu1 %v9215_v38  ;;  %v2360_v38 = vld [vmem:[%s13357_s3 + $0xcb8] sm:$0xff] }
 0x494   : > { %2553 = vmatpush.msra.mxu2 %v9223_v58  ;;  %v2358_v58 = vld [vmem:[%s13357_s3 + $0xc28] sm:$0xff] }
 0x495   : > { %2468 = vmatpush.msrb.mxu3 %v9443_v46  ;;  %2526 = vmatpush.msra.mxu1 %v9235_v8  ;;  %v2354_v8 = vld [vmem:[%s13357_s3 + $0xb08] sm:$0xff] }
 0x496   : > { %2554 = vmatpush.msra.mxu2 %v9230_v11  ;;  %v2356_v11 = vld [vmem:[%s13357_s3 + $0xb98] sm:$0xff] }
 0x497   : > { %2469 = vmatpush.msrb.mxu3 %v9452_v63  ;;  %2527 = vmatpush.msra.mxu1 %v9248_v62 }
 0x498   : > { %2427 = vmatmul.f32.gmra.mxu1 %v8946_v60  ;;  %2555 = vmatpush.msra.mxu2 %v9243_v18  ;;  %v2352_v18 = vld [vmem:[%s13357_s3 + $0xa78] sm:$0xff] }
 0x499   : > { %2470 = vmatpush.msrb.mxu3 %v9461_v6  ;;  %2528 = vmatpush.msra.mxu1 %v9263_v19 }
 0x49a   : > { %2556 = vmatpush.msra.mxu2 %v9256_v50  ;;  %2514 = vmatmul.f32.gmra.mxu0 %v8983_v34 }
 0x49b   : > { %2471 = vmatpush.msrb.mxu3 %v9471_v20  ;;  %2529 = vmatpush.msra.mxu1 %v9271_v29 }
 0x49c   : > { %2456 = vmatmul.f32.gmra.mxu2 %v8979_v25 }
 0x49d   : > { %2472 = vmatpush.msrb.mxu3 %v9479_v16  ;;  %2530 = vmatpush.msra.mxu1 %v9290_v3  ;;  %v9584_v3 = vld [vmem:[%s13357_s3 + $0x8d0] sm:$0xff] }
 0x49e   : > { %2557 = vmatpush.msra.mxu2 %v9278_v41 }
 0x49f   : > { %2473 = vmatpush.msrb.mxu3 %v2364_v24  ;;  %2531 = vmatpush.msra.mxu1 %v9303_v33 }
 0x4a0   : > { %2430 = vmatmul.f32.gmra.mxu1 %v8989_v54  ;;  %2558 = vmatpush.msra.mxu2 %v9285_v47 }
 0x4a1   : > { %2474 = vmatpush.msrb.mxu3 %v2362_v32  ;;  %2532 = vmatpush.msra.mxu1 %v9316_v49 }
 0x4a2   : > { %2559 = vmatpush.msra.mxu2 %v9298_v9  ;;  %2517 = vmatmul.f32.gmra.mxu0 %v9013_v15  ;;  %v9590_v9 = vld [vmem:[%s13357_s3 + $0x840] sm:$0xff] }
 0x4a3   : > { %2475 = vmatpush.msrb.mxu3 %v2360_v38  ;;  %2533 = vmatpush.msra.mxu1 %v9324_v14  ;;  %v9602_v14 = vld [vmem:[%s13357_s3 + $0x720] sm:$0xff] }
 0x4a4   : > { %2560 = vmatpush.msra.mxu2 %v9311_v53  ;;  %v9596_v53 = vld [vmem:[%s13357_s3 + $0x7b0] sm:$0xff] }
 0x4a5   : > { %2476 = vmatpush.msrb.mxu3 %v2358_v58  ;;  %2534 = vmatpush.msra.mxu1 %v9343_v43  ;;  %v2350_v43 = vld [vmem:[%s13357_s3 + $0x9e8] sm:$0xff] }
 0x4a6   : > { %2459 = vmatmul.f32.gmra.mxu2 %v8801_v44 }
 0x4a7   : > { %2477 = vmatpush.msrb.mxu3 %v2356_v11  ;;  %2535 = vmatpush.msra.mxu1 %v9356_v22  ;;  %v2348_v22 = vld [vmem:[%s13357_s3 + $0x958] sm:$0xff] }
 0x4a8   : > { %2433 = vmatmul.f32.gmra.mxu1 %v9018_v13  ;;  %2561 = vmatpush.msra.mxu2 %v9331_v59  ;;  %v9608_v59 = vld [vmem:[%s13357_s3 + $0x690] sm:$0xff] }
 0x4a9   : > { %2478 = vmatpush.msrb.mxu3 %v2354_v8  ;;  %2536 = vmatpush.msra.mxu1 %v9369_v35 }
 0x4aa   : > { %2562 = vmatpush.msra.mxu2 %v9338_v28  ;;  %2520 = vmatmul.f32.gmra.mxu0 %v9038_v31 }
 0x4ab   : > { %2479 = vmatpush.msrb.mxu3 %v2352_v18  ;;  %2537 = vmatpush.msra.mxu1 %v9377_v21 }
 0x4ac   : > { %2563 = vmatpush.msra.mxu2 %v9351_v23  ;;  %v9614_v23 = vld [vmem:[%s13357_s3 + $0x600] sm:$0xff] }
 0x4ad   : > { %2480 = vmatpush.msrb.mxu3 %v2350_v43  ;;  %2538 = vmatpush.msra.mxu1 %v9395_v37 }
 0x4ae   : > { %2564 = vmatpush.msra.mxu2 %v9364_v57  ;;  %v9620_v57 = vld [vmem:[%s13357_s3 + $0x570] sm:$0xff] }
 0x4af   : > { %2481 = vmatpush.msrb.mxu3 %v2348_v22  ;;  %2539 = vmatpush.msra.mxu1 %v9410_v56 }
 0x4b0   : > { %2482 = vmatmul.f32.vlgmr.msrb.gmra.mxu3 %v8903_v48  ;;  %2540 = vmatmul.f32.vlgmr.msra.gmra.mxu1 %v9044_v52 }
 0x4b1   : > { %2582 = vmatpush.msra.mxu3 %v9420_v0  ;;  %2462 = vmatmul.f32.gmra.mxu2 %v8867_v42 }
 0x4b2   : > { %2565 = vmatpush.msra.mxu2 %v9384_v12 }
 0x4b3   : > { %2583 = vmatpush.msra.mxu3 %v9436_v30 }
 0x4b4   : > { %2566 = vmatpush.msra.mxu2 %v9390_v45 }
 0x4b5   : > { %2584 = vmatpush.msra.mxu3 %v9443_v46  ;;  %v9644_v46 = vld [vmem:[%s13357_s3 + $0x330] sm:$0xff] }
 0x4b6   : > { %2567 = vmatpush.msra.mxu2 %v9405_v5  ;;  %v9632_v5 = vld [vmem:[%s13357_s3 + $0x450] sm:$0xff] }
 0x4b7   : > { %2585 = vmatpush.msra.mxu3 %v9452_v63 }
 0x4b8   : > { %2485 = vmatmul.f32.gmra.mxu3 %v8946_v60  ;;  %2543 = vmatmul.f32.gmra.mxu1 %v9058_v2 }
 0x4b9   : > { %2586 = vmatpush.msra.mxu3 %v9461_v6  ;;  %2568 = vmatpush.msra.mxu2 %v9428_v39  ;;  %v9638_v39 = vld [vmem:[%s13357_s3 + $0x3c0] sm:$0xff] }
 0x4ba   : > { %2569 = vmatmul.f32.vlgmr.msra.gmra.mxu2 %v8939_v61 }
 0x4bb   : > { %2587 = vmatpush.msra.mxu3 %v9471_v20 }
 0x4bd   : > { %2588 = vmatpush.msra.mxu3 %v9479_v16  ;;  %v9652_v16 = vld [vmem:[%s13357_s3 + $0x2a0] sm:$0xff] }
 0x4bf   : > { %2589 = vmatpush.msra.mxu3 %v2364_v24 }
 0x4c0   : > { %2488 = vmatmul.f32.gmra.mxu3 %v8989_v54  ;;  %2546 = vmatmul.f32.gmra.mxu1 %v9069_v7 }
 0x4c1   : > { %2590 = vmatpush.msra.mxu3 %v2362_v32  ;;  %v9655_v32 = vld [vmem:[%s7398_s9 + $0x14] sm:$0x7] }
 0x4c2   : > { %2572 = vmatmul.f32.gmra.mxu2 %v8983_v34 }
 0x4c3   : > { %2591 = vmatpush.msra.mxu3 %v2360_v38  ;;  %v9661_v38 = vld [vmem:[%s13357_s3 + $0x210] sm:$0xff] }
 0x4c5   : > { %2592 = vmatpush.msra.mxu3 %v2358_v58 }
 0x4c7   : > { %2593 = vmatpush.msra.mxu3 %v2356_v11  ;;  %v9566_v12 = vpop.f32.mrf.mxu0  ;;  %v9666_v11 = vld [vmem:[%s13357_s3 + $0x180] sm:$0xff] }
 0x4c8   : > { %2491 = vmatmul.f32.gmra.mxu3 %v9018_v13  ;;  %2549 = vmatmul.f32.gmra.mxu1 %v9076_v4  ;;  %13417 = vst [vmem:[#allocation14_spill] sm:$0xff] %v9566_v12 }
 0x4c9   : > { %2594 = vmatpush.msra.mxu3 %v2354_v8 }
 0x4ca   : > { %2575 = vmatmul.f32.gmra.mxu2 %v9013_v15 }
 0x4cb   : > { %2595 = vmatpush.msra.mxu3 %v2352_v18  ;;  %v9674_v18 = vld [vmem:[%s13357_s3 + $0xf0] sm:$0xff] }
 0x4cd   : > { %2596 = vmatpush.msra.mxu3 %v2350_v43 }
 0x4cf   : > { %2597 = vmatpush.msra.mxu3 %v2348_v22  ;;  %v9681_v22 = vld [vmem:[%s13357_s3 + $0x60] sm:$0xff] }
 0x4d0   : > { %2598 = vmatmul.f32.vlgmr.msra.gmra.mxu3 %v9044_v52 }
 0x4d2   : > { %2578 = vmatmul.f32.gmra.mxu2 %v9038_v31 }
 0x4d8   : > { %2601 = vmatmul.f32.gmra.mxu3 %v9058_v2 }
 0x4e0   : > { %2604 = vmatmul.f32.gmra.mxu3 %v9069_v7 }
 0x4e8   : > { %2607 = vmatmul.f32.gmra.mxu3 %v9076_v4  ;;  %v2396_v44 = vpop.f32.mrf.mxu0 }
 0x4ed   : > { %v9568_v42 = vpop.f32.mrf.mxu1  ;;  %v9570_v54 = vpop.f32.mrf.mxu2 }
 0x4ee   : > { %13418 = vst [vmem:[#allocation15_spill] sm:$0xff] %v9568_v42 }
 0x4ef   : > { %13419 = vst [vmem:[#allocation16_spill] sm:$0xff] %v9570_v54  ;;  %v10402_v54 = vld [vmem:[%s13357_s3 + $0x228] sm:$0xff] }
 0x4f1   : > { %v2399_v48 = vpop.f32.mrf.mxu0 }
 0x4fb   : > { %v2402_v60 = vpop.f32.mrf.mxu0 }
 0x504   : > { %v2405_v15 = vpop.f32.mrf.mxu0 }
 0x50d   : > { %v2425_v61 = vpop.f32.mrf.mxu1 }
 0x50e   : > { %v2426_v62 = vadd.f32 %v2425_v61, %v2396_v44  ;;  %v9696_v61 = vld [vmem:[%s13357_s3 + $0x1140] sm:$0xff] }
 0x50f   : > { %v2512_v2 = vpop.f32.mrf.mxu0 }
 0x513   : > { %v9574_v50 = vpop.f32.mrf.mxu3 }
 0x514   : > { %13420 = vst [vmem:[#allocation17_spill] sm:$0xff] %v9574_v50  ;;  %v10374_v50 = vld [vmem:[%s13357_s3 + $0xbb0] sm:$0xff] }
 0x515   : > { %v2428_v34 = vpop.f32.mrf.mxu1  ;;  %v9572_v31 = vpop.f32.mrf.mxu2 }
 0x516   : > { %v2429_v35 = vadd.f32 %v2428_v34, %v2399_v48  ;;  %v9688_v48 = vld [vmem:[%s13357_s3 + $0x11d0] sm:$0xff]  ;;  %v9704_v34 = vld [vmem:[%s13357_s3 + $0x8d8] sm:$0xff] }
 0x517   : > { %v2515_v41 = vpop.f32.mrf.mxu0 }
 0x51d   : > { %v2431_v13 = vpop.f32.mrf.mxu1 }
 0x51e   : > { %v2432_v7 = vadd.f32 %v2431_v13, %v2402_v60  ;;  %v9714_v13 = vld [vmem:[%s13357_s3 + $0x848] sm:$0xff] }
 0x51f   : > { %v2457_v29 = vpop.f32.mrf.mxu2  ;;  %v2518_v17 = vpop.f32.mrf.mxu0 }
 0x525   : > { %v2434_v52 = vpop.f32.mrf.mxu1 }
 0x526   : > { %v2435_v4 = vadd.f32 %v2434_v52, %v2405_v15  ;;  %v9708_v15 = vld [vmem:[%s6843_s8] sm:$0xff]  ;;  %v9727_v52 = vld [vmem:[%s13357_s3 + $0x7b8] sm:$0xff] }
 0x527   : > { %v2521_v37 = vpop.f32.mrf.mxu0 }
 0x528   : > { %2628 = vmatpush.msrb.mxu0 %v2435_v4 }
 0x529   : > { %v2460_v33 = vpop.f32.mrf.mxu2 }
 0x52a   : > { %2629 = vmatpush.msrb.mxu0 %v2432_v7  ;;  %v9740_v7 = vld [vmem:[%s13357_s3 + $0x728] sm:$0xff] }
 0x52c   : > { %2630 = vmatpush.msrb.mxu0 %v2429_v35  ;;  %v9747_v35 = vld [vmem:[%s13357_s3 + $0xf90] sm:$0xff] }
 0x52d   : > { %v2541_v19 = vpop.f32.mrf.mxu1 }
 0x52e   : > { %2631 = vmatpush.msrb.mxu0 %v2426_v62  ;;  %v2542_v63 = vadd.f32 %v2541_v19, %v2512_v2  ;;  %v9732_v2 = vld [vmem:[%s13357_s3 + $0x1020] sm:$0xff]  ;;  %v9769_v19 = vld [vmem:[%s13357_s3 + $0x608] sm:$0xff] }
 0x52f   : > { %6199 = vmatmul.msk.f32.vlgmr.msrb.gmra.mxu0 %vm668_vm0, %v9577_v40  ;;  %v9755_v62 = vld [vmem:[%s13357_s3 + $0xf00] sm:$0xff] }
 0x530   : > { %2769 = vmatpush.msra.mxu0 %v9584_v3 }
 0x532   : > { %2770 = vmatpush.msra.mxu0 %v9590_v9 }
 0x533   : > { %v2483_v47 = vpop.f32.mrf.mxu3 }
 0x534   : > { %2771 = vmatpush.msra.mxu0 %v9596_v53  ;;  %v2463_v21 = vpop.f32.mrf.mxu2  ;;  %v2484_v43 = vadd.f32 %v2483_v47, %v9572_v31  ;;  %v9719_v31 = vld [vmem:[%s13357_s3 + $0x10b0] sm:$0xff]  ;;  %v9787_v47 = vld [vmem:[%s13357_s3 + $0xde0] sm:$0xff] }
 0x535   : > { %v2544_v51 = vpop.f32.mrf.mxu1 }
 0x536   : > { %2772 = vmatpush.msra.mxu0 %v9602_v14  ;;  %v2545_v30 = vadd.f32 %v2544_v51, %v2515_v41 }
 0x538   : > { %2773 = vmatpush.msra.mxu0 %v9608_v59 }
 0x53a   : > { %2774 = vmatpush.msra.mxu0 %v9614_v23 }
 0x53b   : > { %v2486_v49 = vpop.f32.mrf.mxu3 }
 0x53c   : > { %2775 = vmatpush.msra.mxu0 %v9620_v57  ;;  %v2487_v8 = vadd.f32 %v2486_v49, %v2457_v29  ;;  %v9774_v29 = vld [vmem:[%s13357_s3 + $0xe70] sm:$0xff]  ;;  %v9825_v49 = vld [vmem:[%s13357_s3 + $0x3c8] sm:$0xff] }
 0x53d   : > { %v2547_v28 = vpop.f32.mrf.mxu1  ;;  %v9647_v20 = vpop.f32.mrf.mxu2 }
 0x53e   : > { %2776 = vmatpush.msra.mxu0 %v9626_v26  ;;  %v2548_v27 = vadd.f32 %v2547_v28, %v2518_v17  ;;  %v9819_v17 = vld [vmem:[%s6843_s8 + $0x20] sm:$0xff] }
 0x540   : > { %2777 = vmatpush.msra.mxu0 %v9632_v5 }
 0x542   : > { %2778 = vmatpush.msra.mxu0 %v9638_v39 }
 0x543   : > { %v2489_v45 = vpop.f32.mrf.mxu3 }
 0x544   : > { %2779 = vmatpush.msra.mxu0 %v9644_v46  ;;  %v2490_v58 = vadd.f32 %v2489_v45, %v2460_v33  ;;  %v9808_v33 = vld [vmem:[%s13357_s3 + $0xcc0] sm:$0xff]  ;;  %v9856_v45 = vld [vmem:[%s13357_s3 + $0xb10] sm:$0xff] }
 0x545   : > { %v2550_v56 = vpop.f32.mrf.mxu1  ;;  %v9698_v60 = vpop.f32.mrf.mxu2 }
 0x546   : > { %v2551_v0 = vadd.f32 %v2550_v56, %v2521_v37  ;;  %2780 = vmatpush.msra.mxu0 %v9652_v16 }
 0x548   : > { %2675 = vmatpush.msrb.mxu2 %v2551_v0  ;;  %2781 = vmatpush.msra.mxu0 %v9661_v38  ;;  %v9882_v0 = vld [vmem:[%s13357_s3 + $0x9f0] sm:$0xff] }
 0x54a   : > { %2676 = vmatpush.msrb.mxu2 %v2548_v27  ;;  %2782 = vmatpush.msra.mxu0 %v9666_v11  ;;  %v9877_v27 = vld [vmem:[%s13357_s3 + $0x188] sm:$0xff] }
 0x54b   : > { %v2492_v6 = vpop.f32.mrf.mxu3 }
 0x54c   : > { %v2493_v24 = vadd.f32 %v2492_v6, %v2463_v21  ;;  %2677 = vmatpush.msrb.mxu2 %v2545_v30  ;;  %2783 = vmatpush.msra.mxu0 %v9674_v18 }
 0x54d   : > { %v2576_v41 = vpop.f32.mrf.mxu2 }
 0x54e   : > { %2648 = vmatpush.msrb.mxu1 %v2493_v24  ;;  %2678 = vmatpush.msrb.mxu2 %v2542_v63  ;;  %v9900_v63 = vld [vmem:[%s13357_s3 + $0x960] sm:$0xff]  ;;  %v9918_v24 = vld [vmem:[%s13357_s3 + $0x68] sm:$0xff] }
 0x54f   : > { %6202 = vmatmul.msk.f32.vlgmr.msrb.gmra.mxu2 %vm668_vm0, %v9655_v32  ;;  %2784 = vmatpush.msra.mxu0 %v9681_v22 }
 0x550   : > { %2649 = vmatpush.msrb.mxu1 %v2490_v58  ;;  %2785 = vmatmul.f32.vlgmr.msra.gmra.mxu0 %v9708_v15  ;;  %v9936_v58 = vld [vmem:[%s13357_s3 + $0x10b8] sm:$0xff] }
 0x551   : > { %2827 = vmatpush.msra.mxu2 %v9704_v34  ;;  %2885 = vmatpush.msrb.mxu0 %v9584_v3  ;;  %v9795_v3 = vld [vmem:[%s13357_s3 + $0x4e8] sm:$0xff] }
 0x552   : > { %2650 = vmatpush.msrb.mxu1 %v2487_v8  ;;  %v9957_v8 = vld [vmem:[%s6974_s20] sm:$0xff] }
 0x553   : > { %v9683_v44 = vpop.f32.mrf.mxu3  ;;  %2828 = vmatpush.msra.mxu2 %v9714_v13  ;;  %2886 = vmatpush.msrb.mxu0 %v9590_v9  ;;  %v9800_v9 = vld [vmem:[%s13357_s3 + $0xd50] sm:$0xff] }
 0x554   : > { %2651 = vmatpush.msrb.mxu1 %v2484_v43  ;;  %v2600_v6 = vadd.f32 %v9683_v44, %v9647_v20  ;;  %v9921_v20 = vld [vmem:[%s6843_s8 + $0x8] sm:$0xff] }
 0x555   : > { %6200 = vmatmul.msk.f32.vlgmr.msrb.gmra.mxu1 %vm668_vm0, %v9577_v40  ;;  %2829 = vmatpush.msra.mxu2 %v9727_v52  ;;  %v9762_v40 = vld [vmem:[%s13357_s3 + $0x698] sm:$0xff]  ;;  %v2579_v28 = vpop.f32.mrf.mxu2  ;;  %v9970_v43 = vld [vmem:[%s13357_s3 + $0xf08] sm:$0xff] }
 0x556   : > { %2798 = vmatpush.msra.mxu1 %v9688_v48  ;;  %2887 = vmatpush.msrb.mxu0 %v9596_v53  ;;  %v9815_v53 = vld [vmem:[%s13357_s3 + $0x458] sm:$0xff]  ;;  %v9986_v44 = vld [vmem:[%s13357_s3 + $0xde8] sm:$0xff] }
 0x557   : > { %2830 = vmatpush.msra.mxu2 %v9740_v7 }
 0x558   : > { %2799 = vmatpush.msra.mxu1 %v9696_v61  ;;  %2888 = vmatpush.msrb.mxu0 %v9602_v14  ;;  %v9830_v14 = vld [vmem:[%s13357_s3 + $0xc30] sm:$0xff] }
 0x559   : > { %2788 = vmatmul.f32.gmra.mxu0 %v8979_v25  ;;  %2831 = vmatpush.msra.mxu2 %v9762_v40  ;;  %v9782_v25 = vld [vmem:[%s13357_s3 + $0x578] sm:$0xff] }
 0x55a   : > { %2800 = vmatpush.msra.mxu1 %v9719_v31  ;;  %2889 = vmatpush.msrb.mxu0 %v9608_v59  ;;  %v9838_v59 = vld [vmem:[%s13357_s3 + $0x338] sm:$0xff] }
 0x55b   : > { %v9742_v4 = vpop.f32.mrf.mxu3  ;;  %2832 = vmatpush.msra.mxu2 %v9769_v19 }
 0x55c   : > { %2801 = vmatpush.msra.mxu1 %v9732_v2  ;;  %2890 = vmatpush.msrb.mxu0 %v9614_v23  ;;  %v9843_v23 = vld [vmem:[%s13357_s3 + $0xba0] sm:$0xff]  ;;  %v2603_v30 = vadd.f32 %v9742_v4, %v9698_v60  ;;  %v10001_v60 = vld [vmem:[%s6974_s20 + $0x10] sm:$0xff]  ;;  %v10036_v4 = vld [vmem:[%s6843_s8 + $0x38] sm:$0xff] }
 0x55d   : > { %2833 = vmatpush.msra.mxu2 %v9782_v25 }
 0x55e   : > { %2802 = vmatpush.msra.mxu1 %v9747_v35  ;;  %2891 = vmatpush.msrb.mxu0 %v9620_v57  ;;  %v9851_v57 = vld [vmem:[%s13357_s3 + $0x2a8] sm:$0xff] }
 0x55f   : > { %2834 = vmatpush.msra.mxu2 %v9795_v3 }
 0x560   : > { %2803 = vmatpush.msra.mxu1 %v9755_v62  ;;  %2892 = vmatpush.msrb.mxu0 %v9626_v26  ;;  %v9864_v26 = vld [vmem:[%s13357_s3 + $0xa80] sm:$0xff] }
 0x561   : > { %2791 = vmatmul.f32.gmra.mxu0 %v9819_v17  ;;  %2835 = vmatpush.msra.mxu2 %v9815_v53 }
 0x562   : > { %2804 = vmatpush.msra.mxu1 %v9774_v29  ;;  %2893 = vmatpush.msrb.mxu0 %v9632_v5  ;;  %v9871_v5 = vld [vmem:[%s13357_s3 + $0x218] sm:$0xff] }
 0x563   : > { %v2605_v51 = vpop.f32.mrf.mxu3  ;;  %2836 = vmatpush.msra.mxu2 %v9825_v49 }
 0x564   : > { %2805 = vmatpush.msra.mxu1 %v9787_v47  ;;  %2894 = vmatpush.msrb.mxu0 %v9638_v39  ;;  %v2606_v56 = vadd.f32 %v2605_v51, %v2576_v41  ;;  %v9885_v39 = vld [vmem:[%s6843_s8 + $0x30] sm:$0xff]  ;;  %v10076_v41 = vld [vmem:[%s6974_s20 + $0x18] sm:$0xff] }
 0x565   : > { %2837 = vmatpush.msra.mxu2 %v9838_v59 }
 0x566   : > { %2806 = vmatpush.msra.mxu1 %v9800_v9  ;;  %2895 = vmatpush.msrb.mxu0 %v9644_v46  ;;  %v9895_v46 = vld [vmem:[%s13357_s3 + $0xf8] sm:$0xff] }
 0x567   : > { %2838 = vmatpush.msra.mxu2 %v9851_v57 }
 0x568   : > { %2807 = vmatpush.msra.mxu1 %v9808_v33  ;;  %2896 = vmatpush.msrb.mxu0 %v9652_v16  ;;  %v9910_v16 = vld [vmem:[%s13357_s3 + $0x11d8] sm:$0xff] }
 0x569   : > { %2794 = vmatmul.f32.gmra.mxu0 %v9885_v39  ;;  %2839 = vmatpush.msra.mxu2 %v9871_v5 }
 0x56a   : > { %2808 = vmatpush.msra.mxu1 %v9830_v14  ;;  %2897 = vmatpush.msrb.mxu0 %v9661_v38  ;;  %v9929_v38 = vld [vmem:[%s13357_s3 + $0x1148] sm:$0xff] }
 0x56b   : > { %v2608_v21 = vpop.f32.mrf.mxu3  ;;  %2840 = vmatpush.msra.mxu2 %v9877_v27 }
 0x56c   : > { %v2609_v37 = vadd.f32 %v2608_v21, %v2579_v28  ;;  %2809 = vmatpush.msra.mxu1 %v9843_v23  ;;  %2898 = vmatpush.msrb.mxu0 %v9666_v11  ;;  %v9954_v11 = vld [vmem:[%s13357_s3 + $0xf98] sm:$0xff] }
 0x56d   : > { %2841 = vmatpush.msra.mxu2 %v9895_v46 }
 0x56e   : > { %2810 = vmatpush.msra.mxu1 %v9856_v45  ;;  %2695 = vmatpush.msrb.mxu3 %v2609_v37 }
 0x56f   : > { %2899 = vmatpush.msrb.mxu0 %v9674_v18  ;;  %2842 = vmatpush.msra.mxu2 %v9918_v24  ;;  %v9964_v18 = vld [vmem:[%s6843_s8 + $0x18] sm:$0xff] }
 0x570   : > { %2811 = vmatpush.msra.mxu1 %v9864_v26  ;;  %2696 = vmatpush.msrb.mxu3 %v2606_v56 }
 0x571   : > { %2900 = vmatpush.msrb.mxu0 %v9681_v22  ;;  %2843 = vmatmul.f32.vlgmr.msra.gmra.mxu2 %v9708_v15  ;;  %v9978_v22 = vld [vmem:[%s13357_s3 + $0xe78] sm:$0xff] }
 0x572   : > { %2812 = vmatpush.msra.mxu1 %v9882_v0  ;;  %2697 = vmatpush.msrb.mxu3 %v2603_v30 }
 0x573   : > { %2901 = vmatmul.f32.vlgmr.msrb.gmra.mxu0 %v9957_v8  ;;  %2943 = vmatpush.msrb.mxu2 %v9704_v34  ;;  %v10007_v34 = vld [vmem:[%s6843_s8 + $0x28] sm:$0xff] }
 0x574   : > { %2813 = vmatpush.msra.mxu1 %v9900_v63  ;;  %2698 = vmatpush.msrb.mxu3 %v2600_v6 }
 0x575   : > { %2814 = vmatmul.f32.vlgmr.msra.gmra.mxu1 %v9921_v20  ;;  %6203 = vmatmul.msk.f32.vlgmr.msrb.gmra.mxu3 %vm668_vm0, %v9655_v32  ;;  %v9945_v32 = vld [vmem:[%s13357_s3 + $0x1028] sm:$0xff] }
 0x576   : > { %2856 = vmatpush.msra.mxu3 %v9910_v16  ;;  %2914 = vmatpush.msrb.mxu1 %v9688_v48  ;;  %v9994_v48 = vld [vmem:[%s13357_s3 + $0xd58] sm:$0xff] }
 0x577   : > { %2944 = vmatpush.msrb.mxu2 %v9714_v13  ;;  %v2750_v13 = vld [vmem:[%s13357_s3 + $0xcc8] sm:$0xff] }
 0x578   : > { %2857 = vmatpush.msra.mxu3 %v9929_v38  ;;  %2915 = vmatpush.msrb.mxu1 %v9696_v61  ;;  %v9997_v61 = vld [vmem:[%s6843_s8 + $0x10] sm:$0xff] }
 0x579   : > { %2945 = vmatpush.msrb.mxu2 %v9727_v52  ;;  %v2746_v52 = vld [vmem:[%s13357_s3 + $0xba8] sm:$0xff] }
 0x57a   : > { %2858 = vmatpush.msra.mxu3 %v9936_v58  ;;  %2916 = vmatpush.msrb.mxu1 %v9719_v31  ;;  %v2748_v31 = vld [vmem:[%s13357_s3 + $0xc38] sm:$0xff] }
 0x57b   : > { %2946 = vmatpush.msrb.mxu2 %v9740_v7  ;;  %2904 = vmatmul.f32.gmra.mxu0 %v10001_v60  ;;  %v10031_v7 = vld [vmem:[%s6974_s20 + $0x20] sm:$0xff] }
 0x57c   : > { %2859 = vmatpush.msra.mxu3 %v9945_v32  ;;  %2917 = vmatpush.msrb.mxu1 %v9732_v2  ;;  %v2744_v2 = vld [vmem:[%s13357_s3 + $0xb18] sm:$0xff] }
 0x57d   : > { %2817 = vmatmul.f32.gmra.mxu1 %v9964_v18  ;;  %2846 = vmatmul.f32.gmra.mxu2 %v9997_v61 }
 0x57e   : > { %2860 = vmatpush.msra.mxu3 %v9954_v11  ;;  %2918 = vmatpush.msrb.mxu1 %v9747_v35  ;;  %v2742_v35 = vld [vmem:[%s13357_s3 + $0xa88] sm:$0xff] }
 0x57f   : > { %2947 = vmatpush.msrb.mxu2 %v9762_v40  ;;  %v2738_v40 = vld [vmem:[%s13357_s3 + $0x968] sm:$0xff] }
 0x580   : > { %2861 = vmatpush.msra.mxu3 %v9970_v43  ;;  %2919 = vmatpush.msrb.mxu1 %v9755_v62  ;;  %v2740_v62 = vld [vmem:[%s13357_s3 + $0x9f8] sm:$0xff] }
 0x581   : > { %2948 = vmatpush.msrb.mxu2 %v9769_v19  ;;  %v10056_v19 = vld [vmem:[%s6974_s20 + $0x30] sm:$0xff] }
 0x582   : > { %2862 = vmatpush.msra.mxu3 %v9978_v22  ;;  %2920 = vmatpush.msrb.mxu1 %v9774_v29  ;;  %v10062_v29 = vld [vmem:[%s6974_s20 + $0x8] sm:$0xff] }
 0x583   : > { %2949 = vmatpush.msrb.mxu2 %v9782_v25  ;;  %2907 = vmatmul.f32.gmra.mxu0 %v10031_v7  ;;  %v10087_v25 = vld [vmem:[%s6974_s20 + $0x28] sm:$0xff] }
 0x584   : > { %2863 = vmatpush.msra.mxu3 %v9986_v44  ;;  %2921 = vmatpush.msrb.mxu1 %v9787_v47  ;;  %v10094_v47 = vld [vmem:[%s6974_s20 + $0x38] sm:$0xff] }
 0x585   : > { %2820 = vmatmul.f32.gmra.mxu1 %v10007_v34  ;;  %2950 = vmatpush.msrb.mxu2 %v9795_v3 }
 0x586   : > { %2864 = vmatpush.msra.mxu3 %v9994_v48  ;;  %2922 = vmatpush.msrb.mxu1 %v9800_v9 }
 0x587   : > { %2849 = vmatmul.f32.gmra.mxu2 %v9819_v17 }
 0x588   : > { %2865 = vmatpush.msra.mxu3 %v2750_v13  ;;  %2923 = vmatpush.msrb.mxu1 %v9808_v33 }
 0x589   : > { %2951 = vmatpush.msrb.mxu2 %v9815_v53 }
 0x58a   : > { %2866 = vmatpush.msra.mxu3 %v2748_v31  ;;  %2924 = vmatpush.msrb.mxu1 %v9830_v14 }
 0x58b   : > { %2952 = vmatpush.msrb.mxu2 %v9825_v49  ;;  %2910 = vmatmul.f32.gmra.mxu0 %v10056_v19 }
 0x58c   : > { %2867 = vmatpush.msra.mxu3 %v2746_v52  ;;  %2925 = vmatpush.msrb.mxu1 %v9843_v23 }
 0x58d   : > { %2823 = vmatmul.f32.gmra.mxu1 %v10036_v4  ;;  %2953 = vmatpush.msrb.mxu2 %v9838_v59 }
 0x58e   : > { %2868 = vmatpush.msra.mxu3 %v2744_v2  ;;  %2926 = vmatpush.msrb.mxu1 %v9856_v45 }
 0x58f   : > { %2954 = vmatpush.msrb.mxu2 %v9851_v57 }
 0x590   : > { %2869 = vmatpush.msra.mxu3 %v2742_v35  ;;  %2927 = vmatpush.msrb.mxu1 %v9864_v26 }
 0x591   : > { %2852 = vmatmul.f32.gmra.mxu2 %v9885_v39 }
 0x592   : > { %2870 = vmatpush.msra.mxu3 %v2740_v62  ;;  %2928 = vmatpush.msrb.mxu1 %v9882_v0  ;;  %v10114_v0 = vld [vmem:[%s7036_s7 + $0x18] sm:$0x7] }
 0x593   : > { %2955 = vmatpush.msrb.mxu2 %v9871_v5 }
 0x594   : > { %2871 = vmatpush.msra.mxu3 %v2738_v40  ;;  %2929 = vmatpush.msrb.mxu1 %v9900_v63 }
 0x595   : > { %2872 = vmatmul.f32.vlgmr.msra.gmra.mxu3 %v9921_v20  ;;  %2930 = vmatmul.f32.vlgmr.msrb.gmra.mxu1 %v10062_v29 }
 0x596   : > { %2972 = vmatpush.msrb.mxu3 %v9910_v16  ;;  %2956 = vmatpush.msrb.mxu2 %v9877_v27  ;;  %v10121_v16 = vld [vmem:[%s13357_s3 + $0x8e0] sm:$0xff] }
 0x598   : > { %2973 = vmatpush.msrb.mxu3 %v9929_v38  ;;  %2957 = vmatpush.msrb.mxu2 %v9895_v46  ;;  %v10127_v38 = vld [vmem:[%s13357_s3 + $0x850] sm:$0xff] }
 0x59a   : > { %2974 = vmatpush.msrb.mxu3 %v9936_v58  ;;  %2958 = vmatpush.msrb.mxu2 %v9918_v24 }
 0x59b   : > { %2959 = vmatmul.f32.vlgmr.msrb.gmra.mxu2 %v9957_v8 }
 0x59c   : > { %2975 = vmatpush.msrb.mxu3 %v9945_v32  ;;  %v10133_v32 = vld [vmem:[%s13357_s3 + $0x7c0] sm:$0xff] }
 0x59d   : > { %2875 = vmatmul.f32.gmra.mxu3 %v9964_v18  ;;  %2933 = vmatmul.f32.gmra.mxu1 %v10076_v41 }
 0x59e   : > { %2976 = vmatpush.msrb.mxu3 %v9954_v11 }
 0x5a0   : > { %2977 = vmatpush.msrb.mxu3 %v9970_v43 }
 0x5a2   : > { %2978 = vmatpush.msrb.mxu3 %v9978_v22  ;;  %v10139_v22 = vld [vmem:[%s13357_s3 + $0x730] sm:$0xff] }
 0x5a3   : > { %2962 = vmatmul.f32.gmra.mxu2 %v10001_v60 }
 0x5a4   : > { %2979 = vmatpush.msrb.mxu3 %v9986_v44  ;;  %v10145_v44 = vld [vmem:[%s13357_s3 + $0x6a0] sm:$0xff] }
 0x5a5   : > { %2878 = vmatmul.f32.gmra.mxu3 %v10007_v34  ;;  %2936 = vmatmul.f32.gmra.mxu1 %v10087_v25 }
 0x5a6   : > { %2980 = vmatpush.msrb.mxu3 %v9994_v48 }
 0x5a8   : > { %2981 = vmatpush.msrb.mxu3 %v2750_v13  ;;  %v10151_v13 = vld [vmem:[%s13357_s3 + $0x610] sm:$0xff] }
 0x5aa   : > { %2982 = vmatpush.msrb.mxu3 %v2748_v31  ;;  %v10157_v31 = vld [vmem:[%s13357_s3 + $0x580] sm:$0xff] }
 0x5ab   : > { %2965 = vmatmul.f32.gmra.mxu2 %v10031_v7 }
 0x5ac   : > { %2983 = vmatpush.msrb.mxu3 %v2746_v52  ;;  %v10103_v3 = vpop.f32.mrf.mxu0 }
 0x5ad   : > { %2881 = vmatmul.f32.gmra.mxu3 %v10036_v4  ;;  %2939 = vmatmul.f32.gmra.mxu1 %v10094_v47  ;;  %13421 = vst [vmem:[#allocation18_spill] sm:$0xff] %v10103_v3 }
 0x5ae   : > { %2984 = vmatpush.msrb.mxu3 %v2744_v2 }
 0x5b0   : > { %2985 = vmatpush.msrb.mxu3 %v2742_v35 }
 0x5b2   : > { %2986 = vmatpush.msrb.mxu3 %v2740_v62  ;;  %v10163_v62 = vld [vmem:[%s13357_s3 + $0x4f0] sm:$0xff] }
 0x5b3   : > { %2968 = vmatmul.f32.gmra.mxu2 %v10056_v19 }
 0x5b4   : > { %2987 = vmatpush.msrb.mxu3 %v2738_v40  ;;  %v10169_v40 = vld [vmem:[%s13357_s3 + $0x460] sm:$0xff] }
 0x5b5   : > { %2988 = vmatmul.f32.vlgmr.msrb.gmra.mxu3 %v10062_v29 }
 0x5bd   : > { %2991 = vmatmul.f32.gmra.mxu3 %v10076_v41 }
 0x5c5   : > { %2994 = vmatmul.f32.gmra.mxu3 %v10087_v25 }
 0x5cd   : > { %2997 = vmatmul.f32.gmra.mxu3 %v10094_v47  ;;  %v2786_v51 = vpop.f32.mrf.mxu0 }
 0x5d2   : > { %v10105_v9 = vpop.f32.mrf.mxu1  ;;  %v10107_v59 = vpop.f32.mrf.mxu2 }
 0x5d3   : > { %13422 = vst [vmem:[#allocation19_spill] sm:$0xff] %v10105_v9 }
 0x5d4   : > { %13423 = vst [vmem:[#allocation20_spill] sm:$0xff] %v10107_v59  ;;  %v10387_v59 = vld [vmem:[%s13357_s3 + $0xb20] sm:$0xff] }
 0x5d6   : > { %v2789_v33 = vpop.f32.mrf.mxu0 }
 0x5de   : > { %v2792_v49 = vpop.f32.mrf.mxu0 }
 0x5e6   : > { %v2795_v28 = vpop.f32.mrf.mxu0 }
 0x5f0   : > { %v2902_v45 = vpop.f32.mrf.mxu0 }
 0x5f2   : > { %v2815_v53 = vpop.f32.mrf.mxu1 }
 0x5f3   : > { %v2816_v56 = vadd.f32 %v2815_v53, %v2786_v51 }
 0x5f4   : > { %v10109_v57 = vpop.f32.mrf.mxu2 }
 0x5f8   : > { %v10111_v27 = vpop.f32.mrf.mxu3  ;;  %v2905_v63 = vpop.f32.mrf.mxu0 }
 0x5f9   : > { %13424 = vst [vmem:[#allocation21_spill] sm:$0xff] %v10111_v27  ;;  %v10361_v27 = vld [vmem:[%s13357_s3 + $0xc40] sm:$0xff] }
 0x5fa   : > { %v2818_v14 = vpop.f32.mrf.mxu1 }
 0x5fb   : > { %v2819_v5 = vadd.f32 %v2818_v14, %v2789_v33 }
 0x600   : > { %v2847_v46 = vpop.f32.mrf.mxu2  ;;  %v2908_v11 = vpop.f32.mrf.mxu0 }
 0x602   : > { %v2821_v23 = vpop.f32.mrf.mxu1 }
 0x603   : > { %v2822_v37 = vadd.f32 %v2821_v23, %v2792_v49  ;;  %v10175_v49 = vld [vmem:[%s13357_s3 + $0x3d0] sm:$0xff] }
 0x608   : > { %v2911_v35 = vpop.f32.mrf.mxu0 }
 0x60a   : > { %v2824_v21 = vpop.f32.mrf.mxu1  ;;  %v2850_v58 = vpop.f32.mrf.mxu2 }
 0x60b   : > { %v2825_v26 = vadd.f32 %v2824_v21, %v2795_v28  ;;  %v10181_v28 = vld [vmem:[%s13357_s3 + $0x340] sm:$0xff] }
 0x60d   : > { %3018 = vmatpush.msra.mxu0 %v2825_v26  ;;  %v10189_v26 = vld [vmem:[%s13357_s3 + $0x2b0] sm:$0xff] }
 0x60f   : > { %3019 = vmatpush.msra.mxu0 %v2822_v37 }
 0x611   : > { %3020 = vmatpush.msra.mxu0 %v2819_v5 }
 0x612   : > { %v2931_v30 = vpop.f32.mrf.mxu1 }
 0x613   : > { %3021 = vmatpush.msra.mxu0 %v2816_v56  ;;  %v2932_v23 = vadd.f32 %v2931_v30, %v2902_v45  ;;  %v10192_v56 = vld [vmem:[%s7398_s9 + $0x18] sm:$0x7]  ;;  %v10198_v45 = vld [vmem:[%s13357_s3 + $0x220] sm:$0xff] }
 0x614   : > { %6205 = vmatmul.msk.f32.vlgmr.msra.gmra.mxu0 %vm668_vm0, %v10114_v0  ;;  %v2853_v52 = vpop.f32.mrf.mxu2 }
 0x615   : > { %3159 = vmatpush.msrb.mxu0 %v10121_v16 }
 0x617   : > { %3160 = vmatpush.msrb.mxu0 %v10127_v38 }
 0x618   : > { %v2873_v6 = vpop.f32.mrf.mxu3 }
 0x619   : > { %3161 = vmatpush.msrb.mxu0 %v10133_v32 }
 0x61a   : > { %v2934_v24 = vpop.f32.mrf.mxu1 }
 0x61b   : > { %3162 = vmatpush.msrb.mxu0 %v10139_v22  ;;  %v2935_v14 = vadd.f32 %v2934_v24, %v2905_v63  ;;  %v10203_v63 = vld [vmem:[%s13357_s3 + $0x190] sm:$0xff] }
 0x61d   : > { %3163 = vmatpush.msrb.mxu0 %v10145_v44 }
 0x61e   : > { %v10184_v37 = vpop.f32.mrf.mxu2 }
 0x61f   : > { %3164 = vmatpush.msrb.mxu0 %v10151_v13 }
 0x620   : > { %v2876_v43 = vpop.f32.mrf.mxu3 }
 0x621   : > { %3165 = vmatpush.msrb.mxu0 %v10157_v31  ;;  %v2877_v24 = vadd.f32 %v2876_v43, %v2847_v46  ;;  %v10225_v46 = vld [vmem:[%s13357_s3 + $0x11e0] sm:$0xff]  ;;  %v10241_v43 = vld [vmem:[%s13357_s3 + $0x8e8] sm:$0xff] }
 0x622   : > { %v2937_v48 = vpop.f32.mrf.mxu1 }
 0x623   : > { %3166 = vmatpush.msrb.mxu0 %v10163_v62  ;;  %v2938_v33 = vadd.f32 %v2937_v48, %v2908_v11  ;;  %v10211_v11 = vld [vmem:[%s13357_s3 + $0x100] sm:$0xff]  ;;  %v10218_v48 = vld [vmem:[%s13357_s3 + $0x70] sm:$0xff] }
 0x625   : > { %3167 = vmatpush.msrb.mxu0 %v10169_v40 }
 0x627   : > { %3168 = vmatpush.msrb.mxu0 %v10175_v49 }
 0x628   : > { %v2879_v2 = vpop.f32.mrf.mxu3 }
 0x629   : > { %3169 = vmatpush.msrb.mxu0 %v10181_v28  ;;  %v2880_v30 = vadd.f32 %v2879_v2, %v2850_v58  ;;  %v2874_v58 = vadd.f32 %v2873_v6, %v10109_v57  ;;  %v10233_v57 = vld [vmem:[%s13357_s3 + $0x1150] sm:$0xff]  ;;  %v10235_v6 = vpop.f32.mrf.mxu2  ;;  %v10253_v2 = vld [vmem:[%s13357_s3 + $0x10c0] sm:$0xff] }
 0x62a   : > { %v2940_v51 = vpop.f32.mrf.mxu1 }
 0x62b   : > { %v2941_v53 = vadd.f32 %v2940_v51, %v2911_v35  ;;  %3170 = vmatpush.msrb.mxu0 %v10189_v26  ;;  %v10261_v35 = vld [vmem:[%s13357_s3 + $0x7c8] sm:$0xff]  ;;  %v10266_v51 = vld [vmem:[%s13357_s3 + $0x1030] sm:$0xff] }
 0x62d   : > { %3065 = vmatpush.msra.mxu2 %v2941_v53  ;;  %3171 = vmatpush.msrb.mxu0 %v10198_v45  ;;  %v10281_v53 = vld [vmem:[%s13357_s3 + $0xfa0] sm:$0xff] }
 0x62f   : > { %3066 = vmatpush.msra.mxu2 %v2938_v33  ;;  %3172 = vmatpush.msrb.mxu0 %v10203_v63 }
 0x630   : > { %v2882_v21 = vpop.f32.mrf.mxu3 }
 0x631   : > { %v2883_v5 = vadd.f32 %v2882_v21, %v2853_v52  ;;  %3067 = vmatpush.msra.mxu2 %v2935_v14  ;;  %3173 = vmatpush.msrb.mxu0 %v10211_v11  ;;  %v10296_v14 = vld [vmem:[%s13357_s3 + $0x6a8] sm:$0xff] }
 0x632   : > { %v10316_v21 = vld [vmem:[%s13357_s3 + $0x588] sm:$0xff] }
 0x633   : > { %3038 = vmatpush.msra.mxu1 %v2883_v5  ;;  %3068 = vmatpush.msra.mxu2 %v2932_v23  ;;  %v10308_v23 = vld [vmem:[%s13357_s3 + $0xe80] sm:$0xff]  ;;  %v10321_v5 = vld [vmem:[%s13357_s3 + $0xdf0] sm:$0xff] }
 0x634   : > { %6208 = vmatmul.msk.f32.vlgmr.msra.gmra.mxu2 %vm668_vm0, %v10192_v56  ;;  %3174 = vmatpush.msrb.mxu0 %v10218_v48 }
 0x635   : > { %3039 = vmatpush.msra.mxu1 %v2880_v30  ;;  %3175 = vmatmul.f32.vlgmr.msrb.gmra.mxu0 %v9708_v15 }
 0x636   : > { %3217 = vmatpush.msrb.mxu2 %v10241_v43  ;;  %3275 = vmatpush.msra.mxu0 %v10121_v16  ;;  %v10274_v16 = vld [vmem:[%s13357_s3 + $0x738] sm:$0xff] }
 0x637   : > { %3040 = vmatpush.msra.mxu1 %v2877_v24  ;;  %v10334_v24 = vld [vmem:[%s13357_s3 + $0xd60] sm:$0xff] }
 0x638   : > { %v10220_v52 = vpop.f32.mrf.mxu3  ;;  %3276 = vmatpush.msra.mxu0 %v10127_v38  ;;  %v10289_v38 = vld [vmem:[%s13357_s3 + $0xf10] sm:$0xff] }
 0x639   : > { %3041 = vmatpush.msra.mxu1 %v2874_v58  ;;  %v10349_v58 = vld [vmem:[%s13357_s3 + $0x468] sm:$0xff] }
 0x63a   : > { %6206 = vmatmul.msk.f32.vlgmr.msra.gmra.mxu1 %vm668_vm0, %v10114_v0  ;;  %v10248_v0 = vld [vmem:[%s13357_s3 + $0x858] sm:$0xff]  ;;  %3277 = vmatpush.msra.mxu0 %v10133_v32 }
 0x63b   : > { %3188 = vmatpush.msrb.mxu1 %v10225_v46  ;;  %3218 = vmatpush.msrb.mxu2 %v10248_v0  ;;  %v10303_v32 = vld [vmem:[%s13357_s3 + $0x618] sm:$0xff] }
 0x63c   : > { %3278 = vmatpush.msra.mxu0 %v10139_v22  ;;  %v2966_v22 = vpop.f32.mrf.mxu2 }
 0x63d   : > { %3189 = vmatpush.msrb.mxu1 %v10233_v57  ;;  %3219 = vmatpush.msrb.mxu2 %v10261_v35 }
 0x63e   : > { %3178 = vmatmul.f32.gmra.mxu0 %v9997_v61 }
 0x63f   : > { %3190 = vmatpush.msrb.mxu1 %v10253_v2  ;;  %3220 = vmatpush.msrb.mxu2 %v10274_v16 }
 0x640   : > { %v10276_v33 = vpop.f32.mrf.mxu3  ;;  %3279 = vmatpush.msra.mxu0 %v10145_v44  ;;  %v10329_v44 = vld [vmem:[%s13357_s3 + $0x4f8] sm:$0xff] }
 0x641   : > { %3191 = vmatpush.msrb.mxu1 %v10266_v51  ;;  %3221 = vmatpush.msrb.mxu2 %v10296_v14 }
 0x642   : > { %3280 = vmatpush.msra.mxu0 %v10151_v13  ;;  %v10342_v13 = vld [vmem:[%s13357_s3 + $0xcd0] sm:$0xff] }
 0x643   : > { %3192 = vmatpush.msrb.mxu1 %v10281_v53  ;;  %3222 = vmatpush.msrb.mxu2 %v10303_v32 }
 0x644   : > { %3281 = vmatpush.msra.mxu0 %v10157_v31  ;;  %v10356_v31 = vld [vmem:[%s13357_s3 + $0x3d8] sm:$0xff]  ;;  %v2969_v9 = vpop.f32.mrf.mxu2 }
 0x645   : > { %3193 = vmatpush.msrb.mxu1 %v10289_v38  ;;  %3223 = vmatpush.msrb.mxu2 %v10316_v21 }
 0x646   : > { %3282 = vmatpush.msra.mxu0 %v10163_v62  ;;  %v10369_v62 = vld [vmem:[%s13357_s3 + $0x348] sm:$0xff] }
 0x647   : > { %3194 = vmatpush.msrb.mxu1 %v10308_v23  ;;  %3224 = vmatpush.msrb.mxu2 %v10329_v44 }
 0x648   : > { %v2995_v30 = vpop.f32.mrf.mxu3  ;;  %3181 = vmatmul.f32.gmra.mxu0 %v9819_v17 }
 0x649   : > { %3195 = vmatpush.msrb.mxu1 %v10321_v5  ;;  %3225 = vmatpush.msrb.mxu2 %v10349_v58  ;;  %v2996_v12 = vadd.f32 %v2995_v30, %v2966_v22 }
 0x64a   : > { %3283 = vmatpush.msra.mxu0 %v10169_v40  ;;  %v10382_v40 = vld [vmem:[%s13357_s3 + $0x2b8] sm:$0xff] }
 0x64b   : > { %3196 = vmatpush.msrb.mxu1 %v10334_v24  ;;  %3226 = vmatpush.msrb.mxu2 %v10356_v31 }
 0x64c   : > { %3284 = vmatpush.msra.mxu0 %v10175_v49  ;;  %v10395_v49 = vld [vmem:[%s13357_s3 + $0xa90] sm:$0xff] }
 0x64d   : > { %3197 = vmatpush.msrb.mxu1 %v10342_v13  ;;  %3227 = vmatpush.msrb.mxu2 %v10369_v62 }
 0x64e   : > { %3285 = vmatpush.msra.mxu0 %v10181_v28  ;;  %v2993_v28 = vadd.f32 %v10276_v33, %v10235_v6  ;;  %v2990_v6 = vadd.f32 %v10220_v52, %v10184_v37  ;;  %v10454_v37 = vld [vmem:[%s13357_s3 + $0x1158] sm:$0xff] }
 0x64f   : > { %3198 = vmatpush.msrb.mxu1 %v10361_v27  ;;  %3228 = vmatpush.msrb.mxu2 %v10382_v40  ;;  %v3144_v52 = vld [vmem:[%s13357_s3 + $0xdf8] sm:$0xff] }
 0x650   : > { %v2998_v42 = vpop.f32.mrf.mxu3  ;;  %3286 = vmatpush.msra.mxu0 %v10189_v26  ;;  %v10428_v26 = vld [vmem:[%s13357_s3 + $0x970] sm:$0xff] }
 0x651   : > { %v2999_v3 = vadd.f32 %v2998_v42, %v2969_v9  ;;  %3199 = vmatpush.msrb.mxu1 %v10374_v50  ;;  %v10408_v42 = vld [vmem:[%s13357_s3 + $0x198] sm:$0xff]  ;;  %v10413_v9 = vld [vmem:[%s13357_s3 + $0xa00] sm:$0xff]  ;;  %3184 = vmatmul.f32.gmra.mxu0 %v9885_v39 }
 0x652   : > { %3229 = vmatpush.msrb.mxu2 %v10402_v54  ;;  %3287 = vmatpush.msra.mxu0 %v10198_v45  ;;  %v10446_v45 = vld [vmem:[%s13357_s3 + $0x78] sm:$0xff] }
 0x653   : > { %3200 = vmatpush.msrb.mxu1 %v10387_v59  ;;  %3085 = vmatpush.msra.mxu3 %v2999_v3  ;;  %v10423_v3 = vld [vmem:[%s13357_s3 + $0x108] sm:$0xff] }
 0x654   : > { %3230 = vmatpush.msrb.mxu2 %v10408_v42  ;;  %3288 = vmatpush.msra.mxu0 %v10203_v63  ;;  %v10461_v63 = vld [vmem:[%s13357_s3 + $0x10c8] sm:$0xff] }
 0x655   : > { %3201 = vmatpush.msrb.mxu1 %v10395_v49  ;;  %3086 = vmatpush.msra.mxu3 %v2996_v12  ;;  %v10438_v12 = vld [vmem:[%s13357_s3 + $0x11e8] sm:$0xff] }
 0x656   : > { %3231 = vmatpush.msrb.mxu2 %v10423_v3  ;;  %3289 = vmatpush.msra.mxu0 %v10211_v11  ;;  %v10479_v11 = vld [vmem:[%s13357_s3 + $0xfa8] sm:$0xff] }
 0x657   : > { %3202 = vmatpush.msrb.mxu1 %v10413_v9  ;;  %3087 = vmatpush.msra.mxu3 %v2993_v28  ;;  %v13442_v28 = vld [vmem:[#allocation17_spill] sm:$0xff] }
 0x658   : > { %3232 = vmatpush.msrb.mxu2 %v10446_v45  ;;  %3290 = vmatpush.msra.mxu0 %v10218_v48  ;;  %v10497_v48 = vld [vmem:[%s13357_s3 + $0xe88] sm:$0xff] }
 0x659   : > { %3203 = vmatpush.msrb.mxu1 %v10428_v26  ;;  %3088 = vmatpush.msra.mxu3 %v2990_v6  ;;  %v13443_v6 = vld [vmem:[#allocation19_spill] sm:$0xff] }
 0x65a   : > { %3204 = vmatmul.f32.vlgmr.msrb.gmra.mxu1 %v9921_v20  ;;  %6209 = vmatmul.msk.f32.vlgmr.msra.gmra.mxu3 %vm668_vm0, %v10192_v56  ;;  %v10470_v56 = vld [vmem:[%s13357_s3 + $0x1038] sm:$0xff] }
 0x65b   : > { %3246 = vmatpush.msrb.mxu3 %v10438_v12  ;;  %3304 = vmatpush.msra.mxu1 %v10225_v46  ;;  %v3142_v46 = vld [vmem:[%s13357_s3 + $0xd68] sm:$0xff] }
 0x65c   : > { %3233 = vmatmul.f32.vlgmr.msrb.gmra.mxu2 %v9708_v15  ;;  %3291 = vmatmul.f32.vlgmr.msra.gmra.mxu0 %v9957_v8  ;;  %v10489_v15 = vld [vmem:[%s13357_s3 + $0xf18] sm:$0xff] }
 0x65d   : > { %3247 = vmatpush.msrb.mxu3 %v10454_v37  ;;  %3305 = vmatpush.msra.mxu1 %v10233_v57  ;;  %v3140_v57 = vld [vmem:[%s13357_s3 + $0xcd8] sm:$0xff] }
 0x65e   : > { %3333 = vmatpush.msra.mxu2 %v10241_v43  ;;  %v3136_v43 = vld [vmem:[%s13357_s3 + $0xbb8] sm:$0xff] }
 0x65f   : > { %3248 = vmatpush.msrb.mxu3 %v10461_v63  ;;  %3306 = vmatpush.msra.mxu1 %v10253_v2  ;;  %v3132_v2 = vld [vmem:[%s13357_s3 + $0xa98] sm:$0xff] }
 0x660   : > { %3334 = vmatpush.msra.mxu2 %v10248_v0  ;;  %v3134_v0 = vld [vmem:[%s13357_s3 + $0xb28] sm:$0xff] }
 0x661   : > { %3249 = vmatpush.msrb.mxu3 %v10470_v56  ;;  %3307 = vmatpush.msra.mxu1 %v10266_v51 }
 0x662   : > { %3207 = vmatmul.f32.gmra.mxu1 %v9964_v18  ;;  %3335 = vmatpush.msra.mxu2 %v10261_v35  ;;  %v13430_v35 = vld [vmem:[#allocation16_spill] sm:$0xff] }
 0x663   : > { %3250 = vmatpush.msrb.mxu3 %v10479_v11  ;;  %3308 = vmatpush.msra.mxu1 %v10281_v53 }
 0x664   : > { %3336 = vmatpush.msra.mxu2 %v10274_v16  ;;  %3294 = vmatmul.f32.gmra.mxu0 %v10001_v60 }
 0x665   : > { %3251 = vmatpush.msrb.mxu3 %v10489_v15  ;;  %3309 = vmatpush.msra.mxu1 %v10289_v38  ;;  %v13433_v38 = vld [vmem:[#allocation3_spill] sm:$0xff] }
 0x666   : > { %3236 = vmatmul.f32.gmra.mxu2 %v9997_v61  ;;  %v3138_v61 = vld [vmem:[%s13357_s3 + $0xc48] sm:$0xff] }
 0x667   : > { %3252 = vmatpush.msrb.mxu3 %v10497_v48  ;;  %3310 = vmatpush.msra.mxu1 %v10308_v23  ;;  %v13435_v23 = vld [vmem:[#allocation4_spill] sm:$0xff] }
 0x668   : > { %3337 = vmatpush.msra.mxu2 %v10296_v14  ;;  %v13434_v14 = vld [vmem:[#allocation2_spill] sm:$0xff] }
 0x669   : > { %3253 = vmatpush.msrb.mxu3 %v3144_v52  ;;  %3311 = vmatpush.msra.mxu1 %v10321_v5 }
 0x66a   : > { %3210 = vmatmul.f32.gmra.mxu1 %v10007_v34  ;;  %3338 = vmatpush.msra.mxu2 %v10303_v32 }
 0x66b   : > { %3254 = vmatpush.msrb.mxu3 %v3142_v46  ;;  %3312 = vmatpush.msra.mxu1 %v10334_v24  ;;  %v13438_v24 = vld [vmem:[#allocation9_spill] sm:$0xff] }
 0x66c   : > { %3339 = vmatpush.msra.mxu2 %v10316_v21  ;;  %3297 = vmatmul.f32.gmra.mxu0 %v10031_v7  ;;  %v13436_v21 = vld [vmem:[#allocation5_spill] sm:$0xff] }
 0x66d   : > { %3255 = vmatpush.msrb.mxu3 %v3140_v57  ;;  %3313 = vmatpush.msra.mxu1 %v10342_v13 }
 0x66e   : > { %3340 = vmatpush.msra.mxu2 %v10329_v44  ;;  %v13437_v44 = vld [vmem:[#allocation7_spill] sm:$0xff] }
 0x66f   : > { %3256 = vmatpush.msrb.mxu3 %v3138_v61  ;;  %3314 = vmatpush.msra.mxu1 %v10361_v27  ;;  %v3130_v27 = vld [vmem:[%s13357_s3 + $0xa08] sm:$0xff] }
 0x670   : > { %3239 = vmatmul.f32.gmra.mxu2 %v9819_v17 }
 0x671   : > { %3257 = vmatpush.msrb.mxu3 %v3136_v43  ;;  %3315 = vmatpush.msra.mxu1 %v10374_v50  ;;  %v3128_v50 = vld [vmem:[%s13357_s3 + $0x978] sm:$0xff] }
 0x672   : > { %3213 = vmatmul.f32.gmra.mxu1 %v10036_v4  ;;  %3341 = vmatpush.msra.mxu2 %v10349_v58  ;;  %v13439_v58 = vld [vmem:[#allocation11_spill] sm:$0xff] }
 0x673   : > { %3258 = vmatpush.msrb.mxu3 %v3134_v0  ;;  %3316 = vmatpush.msra.mxu1 %v10387_v59 }
 0x674   : > { %3342 = vmatpush.msra.mxu2 %v10356_v31  ;;  %3300 = vmatmul.f32.gmra.mxu0 %v10056_v19 }
 0x675   : > { %3259 = vmatpush.msrb.mxu3 %v3132_v2  ;;  %3317 = vmatpush.msra.mxu1 %v10395_v49 }
 0x676   : > { %3343 = vmatpush.msra.mxu2 %v10369_v62 }
 0x677   : > { %3260 = vmatpush.msrb.mxu3 %v3130_v27  ;;  %3318 = vmatpush.msra.mxu1 %v10413_v9 }
 0x678   : > { %3344 = vmatpush.msra.mxu2 %v10382_v40  ;;  %v13440_v40 = vld [vmem:[#allocation13_spill] sm:$0xff] }
 0x679   : > { %3261 = vmatpush.msrb.mxu3 %v3128_v50  ;;  %3319 = vmatpush.msra.mxu1 %v10428_v26 }
 0x67a   : > { %3262 = vmatmul.f32.vlgmr.msrb.gmra.mxu3 %v9921_v20  ;;  %3320 = vmatmul.f32.vlgmr.msra.gmra.mxu1 %v10062_v29  ;;  %v13425_v20 = vld [vmem:[#allocation6_spill] sm:$0xff] }
 0x67b   : > { %3362 = vmatpush.msra.mxu3 %v10438_v12  ;;  %3242 = vmatmul.f32.gmra.mxu2 %v9885_v39 }
 0x67c   : > { %3345 = vmatpush.msra.mxu2 %v10402_v54  ;;  %v733_v54 = vadd.f32 %v7523_v55, %v7527_v10  ;;  %v13431_v10 = vld [vmem:[#allocation18_spill] sm:$0xff] }
 0x67d   : > { %3363 = vmatpush.msra.mxu3 %v10454_v37 }
 0x67e   : > { %3346 = vmatpush.msra.mxu2 %v10408_v42  ;;  %v1096_v17 = vadd.f32 %v8069_v1, %v733_v54  ;;  %v13441_v42 = vld [vmem:[#allocation15_spill] sm:$0xff]  ;;  %v10615_v54 = vld [vmem:[%s7036_s7 + $0x1c] sm:$0x7] }
 0x67f   : > { %3364 = vmatpush.msra.mxu3 %v10461_v63 }
 0x680   : > { %3347 = vmatpush.msra.mxu2 %v10423_v3  ;;  %v1143_v39 = vadd.f32 %v8075_v36, %v1096_v17  ;;  %v13432_v36 = vld [vmem:[#allocation20_spill] sm:$0xff] }
 0x681   : > { %3365 = vmatpush.msra.mxu3 %v10470_v56 }
 0x682   : > { %3265 = vmatmul.f32.gmra.mxu3 %v9964_v18  ;;  %3323 = vmatmul.f32.gmra.mxu1 %v10076_v41  ;;  %v13426_v18 = vld [vmem:[#allocation8_spill] sm:$0xff] }
 0x683   : > { %3366 = vmatpush.msra.mxu3 %v10479_v11  ;;  %3348 = vmatpush.msra.mxu2 %v10446_v45  ;;  %v13444_v45 = vld [vmem:[#allocation21_spill] sm:$0xff] }
 0x684   : > { %3349 = vmatmul.f32.vlgmr.msra.gmra.mxu2 %v9957_v8  ;;  %v1486_v8 = vadd.f32 %v13425_v20, %v1143_v39 }
 0x685   : > { %3367 = vmatpush.msra.mxu3 %v10489_v15 }
 0x687   : > { %3368 = vmatpush.msra.mxu3 %v10497_v48 }
 0x689   : > { %3369 = vmatpush.msra.mxu3 %v3144_v52 }
 0x68a   : > { %3268 = vmatmul.f32.gmra.mxu3 %v10007_v34  ;;  %3326 = vmatmul.f32.gmra.mxu1 %v10087_v25  ;;  %v13427_v34 = vld [vmem:[#allocation10_spill] sm:$0xff] }
 0x68b   : > { %3370 = vmatpush.msra.mxu3 %v3142_v46 }
 0x68c   : > { %3352 = vmatmul.f32.gmra.mxu2 %v10001_v60  ;;  %v1533_v60 = vadd.f32 %v13426_v18, %v1486_v8  ;;  %v10622_v18 = vld [vmem:[%s13357_s3 + $0x8f0] sm:$0xff] }
 0x68d   : > { %3371 = vmatpush.msra.mxu3 %v3140_v57 }
 0x68f   : > { %3372 = vmatpush.msra.mxu3 %v3138_v61 }
 0x691   : > { %3373 = vmatpush.msra.mxu3 %v3136_v43 }
 0x692   : > { %3271 = vmatmul.f32.gmra.mxu3 %v10036_v4  ;;  %3329 = vmatmul.f32.gmra.mxu1 %v10094_v47  ;;  %v13428_v4 = vld [vmem:[#allocation12_spill] sm:$0xff] }
 0x693   : > { %3374 = vmatpush.msra.mxu3 %v3134_v0 }
 0x694   : > { %3355 = vmatmul.f32.gmra.mxu2 %v10031_v7  ;;  %v1876_v7 = vadd.f32 %v13427_v34, %v1533_v60  ;;  %v10628_v34 = vld [vmem:[%s13357_s3 + $0x860] sm:$0xff] }
 0x695   : > { %3375 = vmatpush.msra.mxu3 %v3132_v2 }
 0x697   : > { %3376 = vmatpush.msra.mxu3 %v3130_v27 }
 0x699   : > { %3377 = vmatpush.msra.mxu3 %v3128_v50 }
 0x69a   : > { %3378 = vmatmul.f32.vlgmr.msra.gmra.mxu3 %v10062_v29  ;;  %v1923_v29 = vadd.f32 %v13428_v4, %v1876_v7  ;;  %v10634_v4 = vld [vmem:[%s13357_s3 + $0x7d0] sm:$0xff] }
 0x69c   : > { %3358 = vmatmul.f32.gmra.mxu2 %v10056_v19  ;;  %v13429_v19 = vld [vmem:[#allocation14_spill] sm:$0xff] }
 0x69d   : > { %v2266_v59 = vadd.f32 %v13429_v19, %v1923_v29 }
 0x69f   : > { %v2313_v55 = vadd.f32 %v13430_v35, %v2266_v59  ;;  %v10640_v59 = vld [vmem:[%s13357_s3 + $0x740] sm:$0xff]  ;;  %v10646_v35 = vld [vmem:[%s13357_s3 + $0x6b0] sm:$0xff] }
 0x6a1   : > { %v2656_v1 = vadd.f32 %v13431_v10, %v2313_v55  ;;  %v10652_v10 = vld [vmem:[%s13357_s3 + $0x620] sm:$0xff] }
 0x6a2   : > { %3381 = vmatmul.f32.gmra.mxu3 %v10076_v41  ;;  %v3023_v41 = vpop.f32.mrf.mxu0 }
 0x6a3   : > { %v2703_v51 = vadd.f32 %v13432_v36, %v2656_v1  ;;  %v10658_v1 = vld [vmem:[%s13357_s3 + $0x590] sm:$0xff] }
 0x6a5   : > { %v3046_v16 = vadd.f32 %v3023_v41, %v2703_v51 }
 0x6aa   : > { %3384 = vmatmul.f32.gmra.mxu3 %v10087_v25  ;;  %v753_v25 = vadd.f32 %v13434_v14, %v13433_v38 }
 0x6ac   : > { %v1097_v22 = vadd.f32 %v13435_v23, %v753_v25 }
 0x6ae   : > { %v1144_v5 = vadd.f32 %v13436_v21, %v1097_v22  ;;  %v10682_v22 = vld [vmem:[%s13357_s3 + $0x350] sm:$0xff] }
 0x6b0   : > { %v1487_v30 = vadd.f32 %v13437_v44, %v1144_v5 }
 0x6b2   : > { %3387 = vmatmul.f32.gmra.mxu3 %v10094_v47  ;;  %v3176_v32 = vpop.f32.mrf.mxu0  ;;  %v1534_v13 = vadd.f32 %v13438_v24, %v1487_v30  ;;  %v10690_v30 = vld [vmem:[%s13357_s3 + $0x2c0] sm:$0xff] }
 0x6b4   : > { %v1877_v31 = vadd.f32 %v13439_v58, %v1534_v13  ;;  %v10693_v13 = vld [vmem:[%s7398_s9 + $0x1c] sm:$0x7] }
 0x6b6   : > { %v1924_v49 = vadd.f32 %v13440_v40, %v1877_v31  ;;  %v10704_v31 = vld [vmem:[%s13357_s3 + $0x1a0] sm:$0xff]  ;;  %v10712_v40 = vld [vmem:[%s13357_s3 + $0x110] sm:$0xff] }
 0x6b7   : > { %v3070_v33 = vpop.f32.mrf.mxu2  ;;  %v3043_v47 = vpop.f32.mrf.mxu1 }
 0x6b8   : > { %v10596_v53 = vadd.f32 %v3070_v33, %v3046_v16  ;;  %v2267_v9 = vadd.f32 %v13441_v42, %v1924_v49  ;;  %v10664_v16 = vld [vmem:[%s13357_s3 + $0x500] sm:$0xff]  ;;  %v10670_v33 = vld [vmem:[%s13357_s3 + $0x470] sm:$0xff] }
 0x6b9   : > { %v10719_v42 = vld [vmem:[%s13357_s3 + $0x80] sm:$0xff] }
 0x6ba   : > { %v2314_v3 = vadd.f32 %v13442_v28, %v2267_v9  ;;  %v10726_v28 = vld [vmem:[%s13357_s3 + $0x11f0] sm:$0xff] }
 0x6bb   : > { %v3179_v62 = vpop.f32.mrf.mxu0 }
 0x6bc   : > { %v2657_v12 = vadd.f32 %v13443_v6, %v2314_v3  ;;  %v10734_v3 = vld [vmem:[%s13357_s3 + $0x1160] sm:$0xff]  ;;  %v10742_v6 = vld [vmem:[%s13357_s3 + $0x8f8] sm:$0xff] }
 0x6be   : > { %v2704_v37 = vadd.f32 %v13444_v45, %v2657_v12  ;;  %v10746_v12 = vld [vmem:[%s6843_s8] sm:$0xff]  ;;  %v10752_v45 = vld [vmem:[%s13357_s3 + $0x868] sm:$0xff] }
 0x6c0   : > { %v3047_v56 = vadd.f32 %v3043_v47, %v2704_v37  ;;  %v10699_v47 = vld [vmem:[%s13357_s3 + $0x230] sm:$0xff] }
 0x6c1   : > { %v10757_v37 = vld [vmem:[%s13357_s3 + $0x10d0] sm:$0xff] }
 0x6c5   : > { %v3182_v63 = vpop.f32.mrf.mxu0 }
 0x6ce   : > { %v3185_v52 = vpop.f32.mrf.mxu0 }
 0x6d7   : > { %v3205_v26 = vpop.f32.mrf.mxu1 }
 0x6d8   : > { %v3206_v50 = vadd.f32 %v3205_v26, %v3176_v32  ;;  %v10676_v32 = vld [vmem:[%s13357_s3 + $0x3e0] sm:$0xff] }
 0x6d9   : > { %v3292_v43 = vpop.f32.mrf.mxu0 }
 0x6dd   : > { %v3090_v11 = vpop.f32.mrf.mxu3 }
 0x6de   : > { %v10610_v15 = vadd.f32 %v3090_v11, %v3047_v56  ;;  %v10770_v56 = vld [vmem:[%s13357_s3 + $0x1040] sm:$0xff]  ;;  %v10778_v11 = vld [vmem:[%s13357_s3 + $0x748] sm:$0xff] }
 0x6df   : > { %v3208_v48 = vpop.f32.mrf.mxu1  ;;  %v10612_v57 = vpop.f32.mrf.mxu2 }
 0x6e0   : > { %v3209_v27 = vadd.f32 %v3208_v48, %v3179_v62 }
 0x6e1   : > { %v3295_v20 = vpop.f32.mrf.mxu0 }
 0x6e7   : > { %v3211_v46 = vpop.f32.mrf.mxu1 }
 0x6e8   : > { %v3212_v0 = vadd.f32 %v3211_v46, %v3182_v63  ;;  %v10765_v63 = vld [vmem:[%s13357_s3 + $0x7d8] sm:$0xff]  ;;  %v10793_v46 = vld [vmem:[%s13357_s3 + $0xf20] sm:$0xff] }
 0x6e9   : > { %v3237_v39 = vpop.f32.mrf.mxu2  ;;  %v3298_v29 = vpop.f32.mrf.mxu0 }
 0x6ef   : > { %v3214_v61 = vpop.f32.mrf.mxu1 }
 0x6f0   : > { %v3215_v2 = vadd.f32 %v3214_v61, %v3185_v52  ;;  %v10785_v52 = vld [vmem:[%s13357_s3 + $0xfb0] sm:$0xff] }
 0x6f1   : > { %v3301_v51 = vpop.f32.mrf.mxu0  ;;  %v10804_v61 = vld [vmem:[%s6843_s8 + $0x10] sm:$0xff] }
 0x6f2   : > { %3408 = vmatpush.msrb.mxu0 %v3215_v2 }
 0x6f3   : > { %v3240_v7 = vpop.f32.mrf.mxu2 }
 0x6f4   : > { %3409 = vmatpush.msrb.mxu0 %v3212_v0  ;;  %v10815_v0 = vld [vmem:[%s13357_s3 + $0xe90] sm:$0xff] }
 0x6f6   : > { %3410 = vmatpush.msrb.mxu0 %v3209_v27  ;;  %v10823_v27 = vld [vmem:[%s13357_s3 + $0x598] sm:$0xff] }
 0x6f7   : > { %v3321_v17 = vpop.f32.mrf.mxu1 }
 0x6f8   : > { %3411 = vmatpush.msrb.mxu0 %v3206_v50  ;;  %v3322_v21 = vadd.f32 %v3321_v17, %v3292_v43  ;;  %v10810_v43 = vld [vmem:[%s13357_s3 + $0x628] sm:$0xff]  ;;  %v10828_v50 = vld [vmem:[%s13357_s3 + $0xe00] sm:$0xff] }
 0x6f9   : > { %6211 = vmatmul.msk.f32.vlgmr.msrb.gmra.mxu0 %vm668_vm0, %v10615_v54 }
 0x6fa   : > { %3549 = vmatpush.msra.mxu0 %v10622_v18 }
 0x6fc   : > { %3550 = vmatpush.msra.mxu0 %v10628_v34 }
 0x6fd   : > { %v3263_v8 = vpop.f32.mrf.mxu3 }
 0x6fe   : > { %3551 = vmatpush.msra.mxu0 %v10634_v4  ;;  %v3243_v41 = vpop.f32.mrf.mxu2  ;;  %v3264_v49 = vadd.f32 %v3263_v8, %v10612_v57  ;;  %v10800_v57 = vld [vmem:[%s13357_s3 + $0x6b8] sm:$0xff] }
 0x6ff   : > { %v3324_v60 = vpop.f32.mrf.mxu1  ;;  %v10856_v8 = vld [vmem:[%s13357_s3 + $0x478] sm:$0xff] }
 0x700   : > { %3552 = vmatpush.msra.mxu0 %v10640_v59  ;;  %v3325_v23 = vadd.f32 %v3324_v60, %v3295_v20  ;;  %v10849_v20 = vld [vmem:[%s13357_s3 + $0xce0] sm:$0xff]  ;;  %v10866_v60 = vld [vmem:[%s13357_s3 + $0x3e8] sm:$0xff] }
 0x702   : > { %3553 = vmatpush.msra.mxu0 %v10646_v35 }
 0x704   : > { %3554 = vmatpush.msra.mxu0 %v10652_v10 }
 0x705   : > { %v3266_v19 = vpop.f32.mrf.mxu3 }
 0x706   : > { %3555 = vmatpush.msra.mxu0 %v10658_v1  ;;  %v3267_v62 = vadd.f32 %v3266_v19, %v3237_v39  ;;  %v10841_v39 = vld [vmem:[%s13357_s3 + $0xd70] sm:$0xff]  ;;  %v10892_v19 = vld [vmem:[%s13357_s3 + $0x2c8] sm:$0xff] }
 0x707   : > { %v3327_v55 = vpop.f32.mrf.mxu1  ;;  %v10685_v44 = vpop.f32.mrf.mxu2 }
 0x708   : > { %3556 = vmatpush.msra.mxu0 %v10664_v16  ;;  %v3328_v14 = vadd.f32 %v3327_v55, %v3298_v29  ;;  %v10884_v29 = vld [vmem:[%s13357_s3 + $0xbc0] sm:$0xff] }
 0x70a   : > { %3557 = vmatpush.msra.mxu0 %v10670_v33 }
 0x70c   : > { %3558 = vmatpush.msra.mxu0 %v10676_v32 }
 0x70d   : > { %v3269_v36 = vpop.f32.mrf.mxu3 }
 0x70e   : > { %3559 = vmatpush.msra.mxu0 %v10682_v22  ;;  %v3270_v58 = vadd.f32 %v3269_v36, %v3240_v7  ;;  %v10879_v7 = vld [vmem:[%s13357_s3 + $0x358] sm:$0xff]  ;;  %v10918_v36 = vld [vmem:[%s13357_s3 + $0x1a8] sm:$0xff] }
 0x70f   : > { %v3330_v38 = vpop.f32.mrf.mxu1  ;;  %v10736_v26 = vpop.f32.mrf.mxu2 }
 0x710   : > { %v3331_v25 = vadd.f32 %v3330_v38, %v3301_v51  ;;  %3560 = vmatpush.msra.mxu0 %v10690_v30  ;;  %v10923_v51 = vld [vmem:[%s13357_s3 + $0xa10] sm:$0xff]  ;;  %v10936_v38 = vld [vmem:[%s13357_s3 + $0x118] sm:$0xff] }
 0x712   : > { %3455 = vmatpush.msrb.mxu2 %v3331_v25  ;;  %3561 = vmatpush.msra.mxu0 %v10699_v47 }
 0x714   : > { %3456 = vmatpush.msrb.mxu2 %v3328_v14  ;;  %3562 = vmatpush.msra.mxu0 %v10704_v31  ;;  %v10941_v14 = vld [vmem:[%s13357_s3 + $0x980] sm:$0xff] }
 0x715   : > { %v3272_v5 = vpop.f32.mrf.mxu3 }
 0x716   : > { %v3273_v24 = vadd.f32 %v3272_v5, %v3243_v41  ;;  %3457 = vmatpush.msrb.mxu2 %v3325_v23  ;;  %3563 = vmatpush.msra.mxu0 %v10712_v40  ;;  %v10959_v23 = vld [vmem:[%s13357_s3 + $0x88] sm:$0xff]  ;;  %v10977_v5 = vld [vmem:[%s13357_s3 + $0x10d8] sm:$0xff] }
 0x717   : > { %v3356_v2 = vpop.f32.mrf.mxu2 }
 0x718   : > { %3428 = vmatpush.msrb.mxu1 %v3273_v24  ;;  %3458 = vmatpush.msrb.mxu2 %v3322_v21  ;;  %v10970_v21 = vld [vmem:[%s13357_s3 + $0x1168] sm:$0xff]  ;;  %v10998_v24 = vld [vmem:[%s6974_s20] sm:$0xff] }
 0x719   : > { %6214 = vmatmul.msk.f32.vlgmr.msrb.gmra.mxu2 %vm668_vm0, %v10693_v13  ;;  %3564 = vmatpush.msra.mxu0 %v10719_v42 }
 0x71a   : > { %3429 = vmatpush.msrb.mxu1 %v3270_v58  ;;  %3565 = vmatmul.f32.vlgmr.msra.gmra.mxu0 %v10746_v12  ;;  %v11019_v58 = vld [vmem:[%s13357_s3 + $0xe98] sm:$0xff] }
 0x71b   : > { %3607 = vmatpush.msra.mxu2 %v10742_v6  ;;  %3665 = vmatpush.msrb.mxu0 %v10622_v18  ;;  %v10860_v18 = vld [vmem:[%s6843_s8 + $0x20] sm:$0xff] }
 0x71c   : > { %3430 = vmatpush.msrb.mxu1 %v3267_v62  ;;  %v11035_v62 = vld [vmem:[%s13357_s3 + $0xd78] sm:$0xff] }
 0x71d   : > { %v10721_v9 = vpop.f32.mrf.mxu3  ;;  %3608 = vmatpush.msra.mxu2 %v10752_v45  ;;  %3666 = vmatpush.msrb.mxu0 %v10628_v34  ;;  %v10871_v34 = vld [vmem:[%s13357_s3 + $0xc50] sm:$0xff] }
 0x71e   : > { %3431 = vmatpush.msrb.mxu1 %v3264_v49  ;;  %v3380_v25 = vadd.f32 %v10721_v9, %v10685_v44  ;;  %v10986_v44 = vld [vmem:[%s13357_s3 + $0x1048] sm:$0xff]  ;;  %v3528_v9 = vld [vmem:[%s13357_s3 + $0xc58] sm:$0xff] }
 0x71f   : > { %6212 = vmatmul.msk.f32.vlgmr.msrb.gmra.mxu1 %vm668_vm0, %v10615_v54  ;;  %3609 = vmatpush.msra.mxu2 %v10765_v63  ;;  %v10836_v54 = vld [vmem:[%s13357_s3 + $0x508] sm:$0xff] }
 0x720   : > { %3578 = vmatpush.msra.mxu1 %v10726_v28  ;;  %3667 = vmatpush.msrb.mxu0 %v10634_v4  ;;  %v3359_v4 = vpop.f32.mrf.mxu2  ;;  %v6359_v49 = vld [vmem:[%s6843_s8 + $0x28] sm:$0xff] }
 0x721   : > { %3610 = vmatpush.msra.mxu2 %v10778_v11 }
 0x722   : > { %3579 = vmatpush.msra.mxu1 %v10734_v3  ;;  %3668 = vmatpush.msrb.mxu0 %v10640_v59 }
 0x723   : > { %3568 = vmatmul.f32.gmra.mxu0 %v10804_v61  ;;  %3611 = vmatpush.msra.mxu2 %v10800_v57 }
 0x724   : > { %3580 = vmatpush.msra.mxu1 %v10757_v37  ;;  %3669 = vmatpush.msrb.mxu0 %v10646_v35  ;;  %v10897_v35 = vld [vmem:[%s13357_s3 + $0xb30] sm:$0xff] }
 0x725   : > { %v10780_v48 = vpop.f32.mrf.mxu3  ;;  %3612 = vmatpush.msra.mxu2 %v10810_v43 }
 0x726   : > { %3581 = vmatpush.msra.mxu1 %v10770_v56  ;;  %3670 = vmatpush.msrb.mxu0 %v10652_v10  ;;  %v10905_v10 = vld [vmem:[%s13357_s3 + $0xaa0] sm:$0xff] }
 0x727   : > { %3613 = vmatpush.msra.mxu2 %v10823_v27 }
 0x728   : > { %3582 = vmatpush.msra.mxu1 %v10785_v52  ;;  %3671 = vmatpush.msrb.mxu0 %v10658_v1  ;;  %v10912_v1 = vld [vmem:[%s13357_s3 + $0x238] sm:$0xff] }
 0x729   : > { %3614 = vmatpush.msra.mxu2 %v10836_v54 }
 0x72a   : > { %3583 = vmatpush.msra.mxu1 %v10793_v46  ;;  %3672 = vmatpush.msrb.mxu0 %v10664_v16  ;;  %v10926_v16 = vld [vmem:[%s6843_s8 + $0x30] sm:$0xff] }
 0x72b   : > { %3571 = vmatmul.f32.gmra.mxu0 %v10860_v18  ;;  %3615 = vmatpush.msra.mxu2 %v10856_v8 }
 0x72c   : > { %3584 = vmatpush.msra.mxu1 %v10815_v0  ;;  %3673 = vmatpush.msrb.mxu0 %v10670_v33  ;;  %v3383_v33 = vadd.f32 %v10780_v48, %v10736_v26  ;;  %v6360_v26 = vld [vmem:[%s6974_s20 + $0x20] sm:$0xff]  ;;  %v6365_v48 = vld [vmem:[%s6974_s20 + $0x28] sm:$0xff] }
 0x72d   : > { %v3385_v17 = vpop.f32.mrf.mxu3  ;;  %3616 = vmatpush.msra.mxu2 %v10866_v60 }
 0x72e   : > { %3585 = vmatpush.msra.mxu1 %v10828_v50  ;;  %3674 = vmatpush.msrb.mxu0 %v10676_v32  ;;  %v3386_v41 = vadd.f32 %v3385_v17, %v3356_v2  ;;  %v10951_v32 = vld [vmem:[%s13357_s3 + $0x11f8] sm:$0xff] }
 0x72f   : > { %3617 = vmatpush.msra.mxu2 %v10879_v7 }
 0x730   : > { %3586 = vmatpush.msra.mxu1 %v10841_v39  ;;  %3675 = vmatpush.msrb.mxu0 %v10682_v22  ;;  %v10962_v22 = vld [vmem:[%s6843_s8 + $0x8] sm:$0xff] }
 0x731   : > { %3618 = vmatpush.msra.mxu2 %v10892_v19 }
 0x732   : > { %3587 = vmatpush.msra.mxu1 %v10849_v20  ;;  %3676 = vmatpush.msrb.mxu0 %v10690_v30  ;;  %v10995_v30 = vld [vmem:[%s13357_s3 + $0xfb8] sm:$0xff] }
 0x733   : > { %3574 = vmatmul.f32.gmra.mxu0 %v10926_v16  ;;  %3619 = vmatpush.msra.mxu2 %v10912_v1 }
 0x734   : > { %3588 = vmatpush.msra.mxu1 %v10871_v34  ;;  %3677 = vmatpush.msrb.mxu0 %v10699_v47  ;;  %v11011_v47 = vld [vmem:[%s13357_s3 + $0xf28] sm:$0xff] }
 0x735   : > { %v3388_v59 = vpop.f32.mrf.mxu3  ;;  %3620 = vmatpush.msra.mxu2 %v10918_v36 }
 0x736   : > { %v3389_v55 = vadd.f32 %v3388_v59, %v3359_v4  ;;  %3589 = vmatpush.msra.mxu1 %v10884_v29  ;;  %3678 = vmatpush.msrb.mxu0 %v10704_v31  ;;  %v11027_v31 = vld [vmem:[%s13357_s3 + $0xe08] sm:$0xff]  ;;  %v6216_v59 = vld [vmem:[%s7036_s7 + $0x20] sm:$0x7] }
 0x737   : > { %3621 = vmatpush.msra.mxu2 %v10936_v38 }
 0x738   : > { %3590 = vmatpush.msra.mxu1 %v10897_v35  ;;  %3475 = vmatpush.msrb.mxu3 %v3389_v55 }
 0x739   : > { %3679 = vmatpush.msrb.mxu0 %v10712_v40  ;;  %3622 = vmatpush.msra.mxu2 %v10959_v23  ;;  %v11039_v40 = vld [vmem:[%s6974_s20 + $0x10] sm:$0xff] }
 0x73a   : > { %3591 = vmatpush.msra.mxu1 %v10905_v10  ;;  %3476 = vmatpush.msrb.mxu3 %v3386_v41 }
 0x73b   : > { %3680 = vmatpush.msrb.mxu0 %v10719_v42  ;;  %3623 = vmatmul.f32.vlgmr.msra.gmra.mxu2 %v10746_v12  ;;  %v3530_v42 = vld [vmem:[%s13357_s3 + $0xce8] sm:$0xff] }
 0x73c   : > { %3592 = vmatpush.msra.mxu1 %v10923_v51  ;;  %3477 = vmatpush.msrb.mxu3 %v3383_v33  ;;  %v3522_v12 = vld [vmem:[%s13357_s3 + $0xaa8] sm:$0xff] }
 0x73d   : > { %3681 = vmatmul.f32.vlgmr.msrb.gmra.mxu0 %v10998_v24  ;;  %3723 = vmatpush.msrb.mxu2 %v10742_v6  ;;  %v6361_v6 = vld [vmem:[%s6843_s8 + $0x38] sm:$0xff] }
 0x73e   : > { %3593 = vmatpush.msra.mxu1 %v10941_v14  ;;  %3478 = vmatpush.msrb.mxu3 %v3380_v25 }
 0x73f   : > { %3594 = vmatmul.f32.vlgmr.msra.gmra.mxu1 %v10962_v22  ;;  %6215 = vmatmul.msk.f32.vlgmr.msrb.gmra.mxu3 %vm668_vm0, %v10693_v13  ;;  %v11005_v13 = vld [vmem:[%s6843_s8 + $0x18] sm:$0xff] }
 0x740   : > { %3636 = vmatpush.msra.mxu3 %v10951_v32  ;;  %3694 = vmatpush.msrb.mxu1 %v10726_v28  ;;  %v3526_v28 = vld [vmem:[%s13357_s3 + $0xbc8] sm:$0xff] }
 0x741   : > { %3724 = vmatpush.msrb.mxu2 %v10752_v45  ;;  %v3520_v45 = vld [vmem:[%s13357_s3 + $0xa18] sm:$0xff] }
 0x742   : > { %3637 = vmatpush.msra.mxu3 %v10970_v21  ;;  %3695 = vmatpush.msrb.mxu1 %v10734_v3  ;;  %v3524_v3 = vld [vmem:[%s13357_s3 + $0xb38] sm:$0xff] }
 0x743   : > { %3725 = vmatpush.msrb.mxu2 %v10765_v63  ;;  %v6362_v63 = vld [vmem:[%s6974_s20 + $0x30] sm:$0xff] }
 0x744   : > { %3638 = vmatpush.msra.mxu3 %v10977_v5  ;;  %3696 = vmatpush.msrb.mxu1 %v10757_v37  ;;  %v3518_v37 = vld [vmem:[%s13357_s3 + $0x988] sm:$0xff] }
 0x745   : > { %3726 = vmatpush.msrb.mxu2 %v10778_v11  ;;  %3684 = vmatmul.f32.gmra.mxu0 %v11039_v40  ;;  %v6364_v11 = vld [vmem:[%s6974_s20 + $0x18] sm:$0xff] }
 0x746   : > { %3639 = vmatpush.msra.mxu3 %v10986_v44  ;;  %3697 = vmatpush.msrb.mxu1 %v10770_v56  ;;  %v6363_v56 = vld [vmem:[%s6974_s20 + $0x8] sm:$0xff] }
 0x747   : > { %3597 = vmatmul.f32.gmra.mxu1 %v11005_v13  ;;  %3626 = vmatmul.f32.gmra.mxu2 %v10804_v61 }
 0x748   : > { %3640 = vmatpush.msra.mxu3 %v10995_v30  ;;  %3698 = vmatpush.msrb.mxu1 %v10785_v52 }
 0x749   : > { %3727 = vmatpush.msrb.mxu2 %v10800_v57  ;;  %v6366_v57 = vld [vmem:[%s6974_s20 + $0x38] sm:$0xff]  ;;  %s4020_s20 = scvt.s32.f32 %s6389_s21  ;;  %s6260_s21 = sshll.u32 %s13518_s22, 4 }
 0x74a   : > { %3641 = vmatpush.msra.mxu3 %v11011_v47  ;;  %3699 = vmatpush.msrb.mxu1 %v10793_v46  ;;  %s334_s15 = scalar_lea.vmem %s13356_s2, %s6260_s21  ;;  %s351_s17 = sadd.s32 %s6260_s21, %s6167_s16 }
 0x74b   : > { %3728 = vmatpush.msrb.mxu2 %v10810_v43  ;;  %s6169_s18 = sshll.u32 %s351_s17, 3 }
 0x74c   : > { %3642 = vmatpush.msra.mxu3 %v11019_v58  ;;  %3700 = vmatpush.msrb.mxu1 %v10815_v0  ;;  %s353_s30 = scalar_lea.vmem %s13360_s6, %s6169_s18 }
 0x74d   : > { %3729 = vmatpush.msrb.mxu2 %v10823_v27  ;;  %3687 = vmatmul.f32.gmra.mxu0 %v6360_v26 }
 0x74e   : > { %3643 = vmatpush.msra.mxu3 %v11027_v31  ;;  %3701 = vmatpush.msrb.mxu1 %v10828_v50 }
 0x74f   : > { %3600 = vmatmul.f32.gmra.mxu1 %v6359_v49  ;;  %3730 = vmatpush.msrb.mxu2 %v10836_v54 }
 0x750   : > { %3644 = vmatpush.msra.mxu3 %v11035_v62  ;;  %3702 = vmatpush.msrb.mxu1 %v10841_v39 }
 0x751   : > { %3629 = vmatmul.f32.gmra.mxu2 %v10860_v18 }
 0x752   : > { %3645 = vmatpush.msra.mxu3 %v3530_v42  ;;  %3703 = vmatpush.msrb.mxu1 %v10849_v20 }
 0x753   : > { %3731 = vmatpush.msrb.mxu2 %v10856_v8 }
 0x754   : > { %3646 = vmatpush.msra.mxu3 %v3528_v9  ;;  %3704 = vmatpush.msrb.mxu1 %v10871_v34 }
 0x755   : > { %3732 = vmatpush.msrb.mxu2 %v10866_v60  ;;  %3690 = vmatmul.f32.gmra.mxu0 %v6362_v63 }
 0x756   : > { %3647 = vmatpush.msra.mxu3 %v3526_v28  ;;  %3705 = vmatpush.msrb.mxu1 %v10884_v29 }
 0x757   : > { %3603 = vmatmul.f32.gmra.mxu1 %v6361_v6  ;;  %3733 = vmatpush.msrb.mxu2 %v10879_v7 }
 0x758   : > { %3648 = vmatpush.msra.mxu3 %v3524_v3  ;;  %3706 = vmatpush.msrb.mxu1 %v10897_v35 }
 0x759   : > { %3734 = vmatpush.msrb.mxu2 %v10892_v19 }
 0x75a   : > { %3649 = vmatpush.msra.mxu3 %v3522_v12  ;;  %3707 = vmatpush.msrb.mxu1 %v10905_v10 }
 0x75b   : > { %3632 = vmatmul.f32.gmra.mxu2 %v10926_v16 }
 0x75c   : > { %3650 = vmatpush.msra.mxu3 %v3520_v45  ;;  %3708 = vmatpush.msrb.mxu1 %v10923_v51 }
 0x75d   : > { %3735 = vmatpush.msrb.mxu2 %v10912_v1 }
 0x75e   : > { %3651 = vmatpush.msra.mxu3 %v3518_v37  ;;  %3709 = vmatpush.msrb.mxu1 %v10941_v14 }
 0x75f   : > { %3652 = vmatmul.f32.vlgmr.msra.gmra.mxu3 %v10962_v22  ;;  %3710 = vmatmul.f32.vlgmr.msrb.gmra.mxu1 %v6363_v56 }
 0x760   : > { %3752 = vmatpush.msrb.mxu3 %v10951_v32  ;;  %3736 = vmatpush.msrb.mxu2 %v10918_v36 }
 0x762   : > { %3753 = vmatpush.msrb.mxu3 %v10970_v21  ;;  %3737 = vmatpush.msrb.mxu2 %v10936_v38 }
 0x764   : > { %3754 = vmatpush.msrb.mxu3 %v10977_v5  ;;  %3738 = vmatpush.msrb.mxu2 %v10959_v23 }
 0x765   : > { %3739 = vmatmul.f32.vlgmr.msrb.gmra.mxu2 %v10998_v24 }
 0x766   : > { %3755 = vmatpush.msrb.mxu3 %v10986_v44 }
 0x767   : > { %3655 = vmatmul.f32.gmra.mxu3 %v11005_v13  ;;  %3713 = vmatmul.f32.gmra.mxu1 %v6364_v11  ;;  %v6219_v13 = vld [vmem:[%s7398_s9 + $0x20] sm:$0x7] }
 0x768   : > { %3756 = vmatpush.msrb.mxu3 %v10995_v30 }
 0x76a   : > { %3757 = vmatpush.msrb.mxu3 %v11011_v47 }
 0x76c   : > { %3758 = vmatpush.msrb.mxu3 %v11019_v58 }
 0x76d   : > { %3742 = vmatmul.f32.gmra.mxu2 %v11039_v40 }
 0x76e   : > { %3759 = vmatpush.msrb.mxu3 %v11027_v31 }
 0x76f   : > { %3658 = vmatmul.f32.gmra.mxu3 %v6359_v49  ;;  %3716 = vmatmul.f32.gmra.mxu1 %v6365_v48 }
 0x770   : > { %3760 = vmatpush.msrb.mxu3 %v11035_v62 }
 0x772   : > { %3761 = vmatpush.msrb.mxu3 %v3530_v42 }
 0x774   : > { %3762 = vmatpush.msrb.mxu3 %v3528_v9 }
 0x775   : > { %3745 = vmatmul.f32.gmra.mxu2 %v6360_v26 }
 0x776   : > { %3763 = vmatpush.msrb.mxu3 %v3526_v28  ;;  %v3413_v52 = vpop.f32.mrf.mxu0 }
 0x777   : > { %v3436_v46 = vadd.f32 %v3413_v52, %v10596_v53  ;;  %3661 = vmatmul.f32.gmra.mxu3 %v6361_v6  ;;  %3719 = vmatmul.f32.gmra.mxu1 %v6366_v57 }
 0x778   : > { %3764 = vmatpush.msrb.mxu3 %v3524_v3 }
 0x77a   : > { %3765 = vmatpush.msrb.mxu3 %v3522_v12 }
 0x77c   : > { %3766 = vmatpush.msrb.mxu3 %v3520_v45 }
 0x77d   : > { %3748 = vmatmul.f32.gmra.mxu2 %v6362_v63 }
 0x77e   : > { %3767 = vmatpush.msrb.mxu3 %v3518_v37  ;;  %v3875_v37 = vlaneseq }
 0x77f   : > { %3768 = vmatmul.f32.vlgmr.msrb.gmra.mxu3 %v6363_v56 }
 0x780   : > { %v3876_v63 = vand.u32 127, %v3875_v37 }
 0x782   : > { %vm3877_vm1 = vcmp.eq.s32.totalorder %v3876_v63, 0  ;;  %vm3930_vm2 = vcmp.eq.s32.totalorder %v3876_v63, 1  ;;  %vm3975_vm5 = vcmp.eq.s32.totalorder %v3876_v63, 2 }
 0x787   : > { %3771 = vmatmul.f32.gmra.mxu3 %v6364_v11 }
 0x78f   : > { %3774 = vmatmul.f32.gmra.mxu3 %v6365_v48 }
 0x797   : > { %3777 = vmatmul.f32.gmra.mxu3 %v6366_v57  ;;  %v3566_v53 = vpop.f32.mrf.mxu0 }
 0x79c   : > { %v3433_v61 = vpop.f32.mrf.mxu1  ;;  %v3460_v43 = vpop.f32.mrf.mxu2 }
 0x79d   : > { %v3437_v0 = vadd.f32 %v3433_v61, %v10610_v15  ;;  %v11111_v2 = vadd.f32 %v3460_v43, %v3436_v46  ;;  %v6407_v46 = vmov 0.0  }
 0x79e   : > { %v3878_v57 = vsel %vm3877_vm1, 1.0, %v6407_v46  ;;  %v3931_v61 = vsel %vm3930_vm2, 1.0, %v6407_v46  ;;  %v3976_v43 = vsel %vm3975_vm5, 1.0, %v6407_v46 }
 0x7a0   : > { %v3569_v27 = vpop.f32.mrf.mxu0 }
 0x7a8   : > { %v3572_v54 = vpop.f32.mrf.mxu0 }
 0x7b0   : > { %v3575_v8 = vpop.f32.mrf.mxu0 }
 0x7ba   : > { %v3682_v7 = vpop.f32.mrf.mxu0 }
 0x7bc   : > { %v3595_v50 = vpop.f32.mrf.mxu1 }
 0x7bd   : > { %v3596_v15 = vadd.f32 %v3595_v50, %v3566_v53  ;;  %v4022_v50 = vcvt.s32.f32 %v3876_v63 }
 0x7be   : > { %v3624_v60 = vpop.f32.mrf.mxu2 }
 0x7c2   : > { %v3480_v17 = vpop.f32.mrf.mxu3  ;;  %v3685_v10 = vpop.f32.mrf.mxu0 }
 0x7c3   : > { %v11113_v39 = vadd.f32 %v3480_v17, %v3437_v0 }
 0x7c4   : > { %v3598_v20 = vpop.f32.mrf.mxu1 }
 0x7c5   : > { %v3599_v19 = vadd.f32 %v3598_v20, %v3569_v27 }
 0x7ca   : > { %v3627_v55 = vpop.f32.mrf.mxu2  ;;  %v3688_v51 = vpop.f32.mrf.mxu0 }
 0x7cc   : > { %v3601_v18 = vpop.f32.mrf.mxu1 }
 0x7cd   : > { %v3602_v4 = vadd.f32 %v3601_v18, %v3572_v54  ;;  %v4024_v54 = vadd.f32 0.5, %v4022_v50 }
 0x7cf   : > { %v4026_v17 = vmul.f32 0.0625, %v4024_v54 }
 0x7d1   : > { %v4028_v20 = vfloor.f32 %v4026_v17 }
 0x7d2   : > { %v3691_v25 = vpop.f32.mrf.mxu0 }
 0x7d4   : > { %v3604_v34 = vpop.f32.mrf.mxu1  ;;  %v3630_v36 = vpop.f32.mrf.mxu2 }
 0x7d5   : > { %v3605_v29 = vadd.f32 %v3604_v34, %v3575_v8  ;;  %v4021_v8 = vadd.s32 128, %v3876_v63 }
 0x7d7   : > { %3798 = vmatpush.msra.mxu0 %v3605_v29 }
 0x7d9   : > { %3799 = vmatpush.msra.mxu0 %v3602_v4 }
 0x7db   : > { %3800 = vmatpush.msra.mxu0 %v3599_v19 }
 0x7dc   : > { %v3711_v35 = vpop.f32.mrf.mxu1 }
 0x7dd   : > { %3801 = vmatpush.msra.mxu0 %v3596_v15  ;;  %v3712_v5 = vadd.f32 %v3711_v35, %v3682_v7  ;;  %v11139_v15 = vstv %s4020_s20 }
 0x7de   : > { %6217 = vmatmul.msk.f32.vlgmr.msra.gmra.mxu0 %vm668_vm0, %v6216_v59  ;;  %v3633_v38 = vpop.f32.mrf.mxu2 }
 0x7e2   : > { %v3653_v1 = vpop.f32.mrf.mxu3 }
 0x7e3   : > { %v3654_v31 = vadd.f32 %v3653_v1, %v3624_v60  ;;  %v4023_v60 = vcvt.s32.f32 %v4021_v8 }
 0x7e4   : > { %v3714_v41 = vpop.f32.mrf.mxu1 }
 0x7e5   : > { %v3715_v21 = vadd.f32 %v3714_v41, %v3685_v10  ;;  %v4025_v29 = vadd.f32 0.5, %v4023_v60 }
 0x7e7   : > { %v11141_v10 = vmul.f32 0.0625, %v4025_v29 }
 0x7e8   : > { %v3740_v30 = vpop.f32.mrf.mxu2 }
 0x7ea   : > { %v3656_v16 = vpop.f32.mrf.mxu3 }
 0x7eb   : > { %v3657_v58 = vadd.f32 %v3656_v16, %v3627_v55 }
 0x7ec   : > { %v3717_v33 = vpop.f32.mrf.mxu1 }
 0x7ed   : > { %v3718_v23 = vadd.f32 %v3717_v33, %v3688_v51 }
 0x7f0   : > { %v3743_v40 = vpop.f32.mrf.mxu2 }
 0x7f2   : > { %v3659_v14 = vpop.f32.mrf.mxu3 }
 0x7f3   : > { %v3660_v47 = vadd.f32 %v3659_v14, %v3630_v36  ;;  %v4029_v14 = vfloor.f32 %v11141_v10 }
 0x7f4   : > { %v3720_v32 = vpop.f32.mrf.mxu1 }
 0x7f5   : > { %v3721_v22 = vadd.f32 %v3720_v32, %v3691_v25  ;;  %v11145_v25 = vshrl.u32 %v3875_v37, 7 }
 0x7f7   : > { %3845 = vmatpush.msra.mxu2 %v3721_v22 }
 0x7f8   : > { %v3746_v42 = vpop.f32.mrf.mxu2 }
 0x7f9   : > { %3846 = vmatpush.msra.mxu2 %v3718_v23 }
 0x7fa   : > { %v3662_v44 = vpop.f32.mrf.mxu3 }
 0x7fb   : > { %v3663_v24 = vadd.f32 %v3662_v44, %v3633_v38  ;;  %3847 = vmatpush.msra.mxu2 %v3715_v21 }
 0x7fd   : > { %3818 = vmatpush.msra.mxu1 %v3663_v24  ;;  %3848 = vmatpush.msra.mxu2 %v3712_v5  ;;  %v4031_v5 = vmul.f32 16.0, %v4029_v14 }
 0x7fe   : > { %6220 = vmatmul.msk.f32.vlgmr.msra.gmra.mxu2 %vm668_vm0, %v6219_v13 }
 0x7ff   : > { %3819 = vmatpush.msra.mxu1 %v3660_v47 }
 0x800   : > { %v3749_v28 = vpop.f32.mrf.mxu2 }
 0x801   : > { %3820 = vmatpush.msra.mxu1 %v3657_v58 }
 0x802   : > { %v3769_v62 = vpop.f32.mrf.mxu3 }
 0x803   : > { %3821 = vmatpush.msra.mxu1 %v3654_v31  ;;  %v3770_v45 = vadd.f32 %v3769_v62, %v3740_v30 }
 0x804   : > { %6218 = vmatmul.msk.f32.vlgmr.msra.gmra.mxu1 %vm668_vm0, %v6216_v59 }
 0x80a   : > { %v3772_v49 = vpop.f32.mrf.mxu3 }
 0x80b   : > { %v3773_v12 = vadd.f32 %v3772_v49, %v3743_v40  ;;  %v11153_v40 = vsub.f32 %v4023_v60, %v4031_v5  ;;  %v4093_v49 = vadd.s32 120, %v11145_v25 }
 0x812   : > { %v3775_v9 = vpop.f32.mrf.mxu3 }
 0x813   : > { %v3776_v6 = vadd.f32 %v3775_v9, %v3746_v42 }
 0x81a   : > { %v3778_v3 = vpop.f32.mrf.mxu3 }
 0x81b   : > { %v3779_v26 = vadd.f32 %v3778_v3, %v3749_v28 }
 0x81d   : > { %3865 = vmatpush.msra.mxu3 %v3779_v26 }
 0x81f   : > { %3866 = vmatpush.msra.mxu3 %v3776_v6 }
 0x821   : > { %3867 = vmatpush.msra.mxu3 %v3773_v12 }
 0x823   : > { %3868 = vmatpush.msra.mxu3 %v3770_v45 }
 0x824   : > { %6221 = vmatmul.msk.f32.vlgmr.msra.gmra.mxu3 %vm668_vm0, %v6219_v13 }
 0x85b   : > { %v3803_v56 = vpop.f32.mrf.mxu0 }
 0x85c   : > { %v3826_v11 = vadd.f32 %v3803_v56, %v11111_v2 }
 0x881   : > { %v3850_v48 = vpop.f32.mrf.mxu2  ;;  %v3823_v0 = vpop.f32.mrf.mxu1 }
 0x882   : > { %v3873_v52 = vadd.f32 %v3850_v48, %v3826_v11  ;;  %v3827_v2 = vadd.f32 %v3823_v0, %v11113_v39  ;;  %v4030_v39 = vmul.f32 16.0, %v4028_v20  ;;  %v11187_v48 = vcvt.s32.f32 %v4093_v49 }
 0x884   : > { %6222 = vmatpush.msk.msrb.mxu0 %vm3883_vm3, %v3873_v52  ;;  %6226 = vmatpush.msk.msrb.mxu2 %vm3883_vm3, %v3873_v52  ;;  %v4032_v18 = vsub.f32 %v4022_v50, %v4030_v39 }
 0x885   : > { %6223 = vmatmul.msk.f32.vlgmr.msrb.gmra.mxu0 %vm3879_vm4, %v3878_v57  ;;  %6227 = vmatmul.msk.f32.vlgmr.msrb.gmra.mxu2 %vm3879_vm4, %v3931_v61 }
 0x886   : > { %6230 = vmatpush.msk.msra.mxu0 %vm3883_vm3, %v3873_v52  ;;  %v4109_v52 = vadd.s32 248, %v11145_v25 }
 0x888   : > { %v11209_v60 = vcvt.s32.f32 %v4109_v52 }
 0x88d   : > { %6231 = vmatmul.msk.f32.vlgmr.msra.gmra.mxu0 %vm3879_vm4, %v3976_v43 }
 0x8a7   : > { %v3870_v53 = vpop.f32.mrf.mxu3 }
 0x8a8   : > { %v3874_v27 = vadd.f32 %v3870_v53, %v3827_v2 }
 0x8aa   : > { %6224 = vmatpush.msk.msrb.mxu1 %vm3883_vm3, %v3874_v27  ;;  %6228 = vmatpush.msk.msrb.mxu3 %vm3883_vm3, %v3874_v27 }
 0x8ab   : > { %6225 = vmatmul.msk.f32.vlgmr.msrb.gmra.mxu1 %vm3879_vm4, %v3878_v57  ;;  %6229 = vmatmul.msk.f32.vlgmr.msrb.gmra.mxu3 %vm3879_vm4, %v3931_v61 }
 0x8ac   : > { %6232 = vmatpush.msk.msra.mxu1 %vm3883_vm3, %v3874_v27 }
 0x8b3   : > { %6233 = vmatmul.msk.f32.vlgmr.msra.gmra.mxu1 %vm3879_vm4, %v3976_v43 }
 0x902   : > { %v3907_v34 = vpop.f32.mrf.mxu0 }
 0x903   : > { %v4034_v7 = vadd.f32 %v4032_v18, %v3907_v34 }
 0x905   : > { %v4036_v4 = vmul.f32 0.0625, %v4034_v7 }
 0x907   : > { %v4047_v19 = vadd.f32 1.0, %v4036_v4 }
 0x908   : > { %v3952_v59 = vpop.f32.mrf.mxu2 }
 0x909   : > { %v4049_v35 = vmul.f32 4.0, %v4047_v19  ;;  %v4038_v55 = vadd.f32 %v4028_v20, %v3952_v59 }
 0x90a   : > { %v3997_v1 = vpop.f32.mrf.mxu0 }
 0x90b   : > { %v6234_v41 = vadd.f32 -0.5, %v4049_v35  ;;  %v4043_v36 = vadd.f32 %v11139_v15, %v3997_v1  ;;  %v4040_v51 = vmul.f32 0.0625, %v4038_v55 }
 0x90d   : > { %v4065_v16 = vfloor.f32 %v6234_v41  ;;  %v4045_v33 = vmul.f32 0.125, %v4043_v36  ;;  %v4053_v38 = vadd.f32 1.0, %v4040_v51 }
 0x90f   : > { %v4402_v32 = vadd.f32 1.0, %v4065_v16  ;;  %v4059_v23 = vadd.f32 1.0, %v4045_v33  ;;  %v4055_v22 = vmul.f32 4.0, %v4053_v38  ;;  %v4071_v21 = vsub.f32 %v6234_v41, %v4065_v16 }
 0x910   : > { %vm4154_vm6 = vcmp.ge.f32.partialorder %v4065_v16, 0.0  ;;  %vm4156_vm7 = vcmp.le.f32.partialorder %v4065_v16, 7.0  ;;  %v4200_v24 = vmax.f32 %v4065_v16, 0.0 }
 0x911   : > { %v4061_v44 = vmul.f32 2.0, %v4059_v23  ;;  %v6236_v30 = vadd.f32 -0.5, %v4055_v22  ;;  %v4428_v13 = vmax.f32 %v4402_v32, 0.0  ;;  %vm4404_vm8 = vcmp.ge.f32.partialorder %v4402_v32, 0.0  ;;  %vm11149_vm10 = vmand %vm4154_vm6, %vm4156_vm7 }
 0x912   : > { %vm4406_vm9 = vcmp.le.f32.partialorder %v4402_v32, 7.0  ;;  %v4148_v62 = vsub.f32 1.0, %v4071_v21  ;;  %v11162_v3 = vmin.f32 %v4200_v24, 7.0 }
 0x913   : > { %v6238_v58 = vadd.f32 -0.5, %v4061_v44  ;;  %v4067_v31 = vfloor.f32 %v6236_v30  ;;  %vm11158_vm13 = vmand %vm4404_vm8, %vm4406_vm9  ;;  %v11164_v26 = vmin.f32 %v4428_v13, 7.0 }
 0x915   : > { %v11156_v42 = vfloor.f32 %v6238_v58  ;;  %v4073_v9 = vsub.f32 %v6236_v30, %v4067_v31  ;;  %vm4160_vm11 = vcmp.ge.f32.partialorder %v4067_v31, 0.0  ;;  %vm4164_vm12 = vcmp.le.f32.partialorder %v4067_v31, 7.0 }
 0x916   : > { %vm4162_vm14 = vmand %vm11149_vm10, %vm4160_vm11  ;;  %v4192_v6 = vmax.f32 %v4067_v31, 0.0  ;;  %v11169_v12 = vadd.f32 1.0, %v4067_v31 }
 0x917   : > { %v4075_v45 = vsub.f32 %v6238_v58, %v11156_v42  ;;  %vm4168_vm15 = vcmp.ge.f32.partialorder %v11156_v42, 0.0  ;;  %vm4172_vm0 = vcmp.le.f32.partialorder %v11156_v42, 3.0  ;;  %v4186_v37 = vmax.f32 %v11156_v42, 0.0  ;;  %vm11176_vm1 = vmand %vm4162_vm14, %vm4164_vm12 }
 0x918   : > { %v11181_v56 = vadd.f32 1.0, %v11156_v42  ;;  %v4150_v11 = vsub.f32 1.0, %v4073_v9  ;;  %vm4170_vm2 = vmand %vm11176_vm1, %vm4168_vm15  ;;  %v4194_v43 = vmin.f32 %v4192_v6, 7.0  ;;  %v4644_v0 = vmul.f32 %v4148_v62, %v4073_v9 }
 0x919   : > { %v4152_v57 = vsub.f32 1.0, %v4075_v45  ;;  %v4188_v61 = vmin.f32 %v4186_v37, 3.0  ;;  %vm4174_vm3 = vmand %vm4170_vm2, %vm4172_vm0  ;;  %vm4632_vm5 = vcmp.ge.f32.partialorder %v11169_v12, 0.0  ;;  %v4654_v20 = vmax.f32 %v11169_v12, 0.0 }
 0x91a   : > { %v5094_v2 = vmax.f32 %v11181_v56, 0.0  ;;  %v4176_v53 = vmul.f32 %v4150_v11, %v4148_v62  ;;  %vm4410_vm4 = vmand %vm11158_vm13, %vm4160_vm11  ;;  %v4418_v27 = vmul.f32 %v4150_v11, %v4071_v21  ;;  %v6240_v54 = vsel %vm4174_vm3, 1.0, %v6407_v46 }
 0x91b   : > { %v4190_v50 = vmul.f32 8.0, %v4188_v61  ;;  %vm11199_vm6 = vmand %vm4410_vm4, %vm4164_vm12  ;;  %v4868_v39 = vmul.f32 %v4073_v9, %v4071_v21  ;;  %vm4636_vm8 = vcmp.le.f32.partialorder %v11169_v12, 7.0  ;;  %v4646_v7 = vmul.f32 %v4644_v0, %v4152_v57 }
 0x91c   : > { %v4178_v8 = vmul.f32 %v4176_v53, %v4152_v57  ;;  %vm4414_vm7 = vmand %vm11199_vm6, %vm4168_vm15  ;;  %v4420_v18 = vmul.f32 %v4418_v27, %v4152_v57  ;;  %v4656_v4 = vmin.f32 %v4654_v20, 7.0  ;;  %vm5078_vm11 = vcmp.ge.f32.partialorder %v11181_v56, 0.0 }
 0x91d   : > { %v4196_v34 = vadd.f32 %v4194_v43, %v4190_v50  ;;  %vm4416_vm9 = vmand %vm4414_vm7, %vm4172_vm0  ;;  %vm5082_vm14 = vcmp.le.f32.partialorder %v11181_v56, 3.0  ;;  %v5096_v59 = vmin.f32 %v5094_v2, 3.0  ;;  %v4870_v41 = vmul.f32 %v4868_v39, %v4152_v57 }
 0x91e   : > { %v4184_v29 = vmul.f32 %v6240_v54, %v4178_v8  ;;  %v6242_v19 = vsel %vm4416_vm9, 1.0, %v6407_v46  ;;  %vm4634_vm12 = vmand %vm11149_vm10, %vm4632_vm5  ;;  %v4658_v1 = vadd.f32 %v4656_v4, %v4190_v50  ;;  %v5086_v36 = vmul.f32 %v4176_v53, %v4075_v45 }
 0x91f   : > { %v4198_v35 = vmul.f32 8.0, %v4196_v34  ;;  %vm11222_vm2 = vmand %vm4634_vm12, %vm4636_vm8  ;;  %v4426_v51 = vmul.f32 %v6242_v19, %v4420_v18  ;;  %v5098_v16 = vmul.f32 8.0, %v5096_v59  ;;  %v5306_v33 = vmul.f32 %v4418_v27, %v4075_v45 }
 0x920   : > { %vm4640_vm3 = vmand %vm11222_vm2, %vm4168_vm15  ;;  %v11230_v38 = vmul.f32 %v4644_v0, %v4075_v45  ;;  %v11233_v23 = vperm.slane %v4184_v29, 0  ;;  %v4660_v21 = vmul.f32 8.0, %v4658_v1  ;;  %v11243_v24 = vmul.f32 %v4868_v39, %v4075_v45 }
 0x921   : > { %v4204_v32 = vadd.f32 %v11162_v3, %v4198_v35  ;;  %v4432_v22 = vadd.f32 %v11164_v26, %v4198_v35  ;;  %vm4642_vm10 = vmand %vm4640_vm3, %vm4172_vm0  ;;  %v5100_v44 = vadd.f32 %v5098_v16, %v4194_v43  ;;  %v5524_v30 = vadd.f32 %v5098_v16, %v4656_v4 }
 0x922   : > { %v6244_v5 = vsel %vm4642_vm10, 1.0, %v6407_v46  ;;  %vm4860_vm4 = vmand %vm11158_vm13, %vm4632_vm5  ;;  %v4662_v31 = vadd.f32 %v4660_v21, %v11162_v3  ;;  %v11256_v49 = vperm.slane %v4426_v51, 0  ;;  %v4878_v9 = vadd.f32 %v4660_v21, %v11164_v26 }
 0x923   : > { %v11245_v13 = vperm.slane %v4204_v32, 0  ;;  %v11247_v47 = vperm.slane %v4432_v22, 0  ;;  %v4652_v58 = vmul.f32 %v6244_v5, %v4646_v7  ;;  %vm11252_vm7 = vmand %vm4860_vm4, %vm4636_vm8  ;;  %v5102_v28 = vmul.f32 8.0, %v5100_v44 }
 0x924   : > { %vm4864_vm13 = vmand %vm11252_vm7, %vm4168_vm15  ;;  %v5526_v6 = vmul.f32 8.0, %v5524_v30  ;;  %v11263_v45 = vperm.slane %v4662_v31, 0  ;;  %v11274_v11 = vperm.slane %v4878_v9, 0 }
 0x925   : > { %v11265_v37 = vperm.slane %v4652_v58, 0  ;;  %vm4866_vm5 = vmand %vm4864_vm13, %vm4172_vm0  ;;  %vm4238_vm8 = vcmp.eq.f32.partialorder %v11187_v48, %v11245_v13  ;;  %vm4466_vm9 = vcmp.eq.f32.partialorder %v11187_v48, %v11247_v47  ;;  %v5104_v52 = vadd.f32 %v5102_v28, %v11162_v3 }
 0x926   : > { %v6246_v12 = vsel %vm4866_vm5, 1.0, %v6407_v46  ;;  %vm5080_vm15 = vmand %vm11176_vm1, %vm5078_vm11  ;;  %v5314_v42 = vadd.f32 %v5102_v28, %v11164_v26  ;;  %v5528_v61 = vadd.f32 %v5526_v6, %v11162_v3  ;;  %v5738_v43 = vadd.f32 %v5526_v6, %v11164_v26 }
 0x927   : > { %v4876_v57 = vmul.f32 %v6246_v12, %v4870_v41  ;;  %vm5084_vm0 = vmand %vm5080_vm15, %vm5082_vm14  ;;  %v4304_v2 = vsel %vm4238_vm8, %v11233_v23, 0.0  ;;  %v11288_v27 = vperm.slane %v5104_v52, 0  ;;  %vm4696_vm3 = vcmp.eq.f32.partialorder %v11187_v48, %v11263_v45 }
 0x928   : > { %v3927_v0 = vpop.f32.mrf.mxu1  ;;  %v6248_v53 = vsel %vm5084_vm0, 1.0, %v6407_v46  ;;  %vm5302_vm1 = vmand %vm11199_vm6, %vm5078_vm11  ;;  %v11294_v63 = vperm.slane %v5314_v42, 0  ;;  %v11301_v26 = vperm.slane %v5528_v61, 0  ;;  %v11303_v20 = vperm.slane %v5738_v43, 0 }
 0x929   : > { %v4035_v50 = vadd.f32 %v11153_v40, %v3927_v0  ;;  %v11297_v54 = vperm.slane %v4876_v57, 0  ;;  %v5092_v3 = vmul.f32 %v6248_v53, %v5086_v36  ;;  %vm5304_vm12 = vmand %vm5302_vm1, %vm5082_vm14  ;;  %v4532_v40 = vsel %vm4466_vm9, %v11256_v49, 0.0 }
 0x92a   : > { %v6250_v39 = vsel %vm5304_vm12, 1.0, %v6407_v46  ;;  %vm5512_vm6 = vmand %vm11222_vm2, %vm5078_vm11  ;;  %v4596_v34 = vadd.f32 %v4532_v40, %v4304_v2  ;;  %v4762_v7 = vsel %vm4696_vm3, %v11265_v37, 0.0  ;;  %vm4912_vm4 = vcmp.eq.f32.partialorder %v11187_v48, %v11274_v11 }
 0x92b   : > { %v4037_v17 = vmul.f32 0.0625, %v4035_v50  ;;  %v11316_v8 = vperm.slane %v5092_v3, 0  ;;  %v5312_v18 = vmul.f32 %v6250_v39, %v5306_v33  ;;  %vm5514_vm10 = vmand %vm5512_vm6, %vm5082_vm14  ;;  %vm5138_vm13 = vcmp.eq.f32.partialorder %v11187_v48, %v11288_v27 }
 0x92c   : > { %v6252_v4 = vsel %vm5514_vm10, 1.0, %v6407_v46  ;;  %vm5726_vm2 = vmand %vm11252_vm7, %vm5078_vm11  ;;  %v4826_v55 = vadd.f32 %v4762_v7, %v4596_v34  ;;  %v4978_v1 = vsel %vm4912_vm4, %v11297_v54, 0.0  ;;  %vm5348_vm11 = vcmp.eq.f32.partialorder %v11187_v48, %v11294_v63 }
 0x92d   : > { %v4048_v29 = vadd.f32 1.0, %v4037_v17  ;;  %v11330_v19 = vperm.slane %v5312_v18, 0  ;;  %v5522_v59 = vmul.f32 %v6252_v4, %v11230_v38  ;;  %vm5728_vm5 = vmand %vm5726_vm2, %vm5082_vm14  ;;  %v5204_v16 = vsel %vm5138_vm13, %v11316_v8, 0.0 }
 0x92e   : > { %v3972_v35 = vpop.f32.mrf.mxu3  ;;  %v6254_v41 = vsel %vm5728_vm5, 1.0, %v6407_v46  ;;  %v5042_v22 = vadd.f32 %v4978_v1, %v4826_v55  ;;  %vm5562_vm14 = vcmp.eq.f32.partialorder %v11187_v48, %v11301_v26  ;;  %vm5772_vm7 = vcmp.eq.f32.partialorder %v11187_v48, %v11303_v20 }
 0x92f   : > { %v4050_v36 = vmul.f32 4.0, %v4048_v29  ;;  %v4039_v51 = vadd.f32 %v4029_v14, %v3972_v35  ;;  %v11340_v33 = vperm.slane %v5522_v59, 0  ;;  %v5736_v32 = vmul.f32 %v6254_v41, %v11243_v24 }
 0x930   : > { %v4017_v38 = vpop.f32.mrf.mxu1  ;;  %v5414_v44 = vsel %vm5348_vm11, %v11330_v19, 0.0  ;;  %v5268_v10 = vadd.f32 %v5204_v16, %v5042_v22  ;;  %vm4270_vm8 = vcmp.eq.f32.partialorder %v11209_v60, %v11245_v13  ;;  %vm4498_vm9 = vcmp.eq.f32.partialorder %v11209_v60, %v11247_v47 }
 0x931   : > { %v6235_v56 = vadd.f32 -0.5, %v4050_v36  ;;  %v4044_v21 = vadd.f32 %v11139_v15, %v4017_v38  ;;  %v4041_v5 = vmul.f32 0.0625, %v4039_v51  ;;  %v11347_v30 = vperm.slane %v5736_v32, 0 }
 0x932   : > { %v5628_v31 = vsel %vm5562_vm14, %v11340_v33, 0.0  ;;  %v5478_v62 = vadd.f32 %v5414_v44, %v5268_v10  ;;  %v4092_v15 = vadd.s32 112, %v11145_v25  ;;  %v4336_v0 = vsel %vm4270_vm8, %v11233_v23, 0.0 }
 0x933   : > { %v4066_v14 = vfloor.f32 %v6235_v56  ;;  %v4046_v24 = vmul.f32 0.125, %v4044_v21  ;;  %v4054_v58 = vadd.f32 1.0, %v4041_v5  ;;  %v5838_v28 = vsel %vm5772_vm7, %v11347_v30, 0.0 }
 0x934   : > { %v5692_v42 = vadd.f32 %v5628_v31, %v5478_v62  ;;  %v4564_v2 = vsel %vm4498_vm9, %v11256_v49, 0.0  ;;  %vm4728_vm6 = vcmp.eq.f32.partialorder %v11209_v60, %v11263_v45  ;;  %v11367_v17 = vcvt.s32.f32 %v4092_v15 }
 0x935   : > { %v11355_v9 = vsub.f32 %v6235_v56, %v4066_v14  ;;  %v4403_v6 = vadd.f32 1.0, %v4066_v14  ;;  %v4060_v12 = vadd.f32 1.0, %v4046_v24  ;;  %v4056_v52 = vmul.f32 4.0, %v4054_v58 }
 0x936   : > { %vm4155_vm15 = vcmp.ge.f32.partialorder %v4066_v14, 0.0  ;;  %vm4157_vm0 = vcmp.le.f32.partialorder %v4066_v14, 7.0  ;;  %v4201_v57 = vmax.f32 %v4066_v14, 0.0  ;;  %v5902_v53 = vadd.f32 %v5838_v28, %v5692_v42 }
 0x937   : > { %v4062_v61 = vmul.f32 2.0, %v4060_v12  ;;  %v6237_v43 = vadd.f32 -0.5, %v4056_v52  ;;  %vm4405_vm1 = vcmp.ge.f32.partialorder %v4403_v6, 0.0  ;;  %vm4407_vm12 = vcmp.le.f32.partialorder %v4403_v6, 7.0  ;;  %vm11370_vm3 = vmand %vm4155_vm15, %vm4157_vm0 }
 0x938   : > { %v4149_v50 = vsub.f32 1.0, %v11355_v9  ;;  %v11374_v18 = vmin.f32 %v4201_v57, 7.0  ;;  %v4429_v34 = vmax.f32 %v4403_v6, 0.0  ;;  %5938 = vmatpush.msra.mxu2 %v5902_v53  ;;  %v4628_v7 = vadd.f32 %v4564_v2, %v4336_v0  ;;  %vm11381_vm4 = vmand %vm4405_vm1, %vm4407_vm12 }
 0x939   : > { %v6239_v3 = vadd.f32 -0.5, %v4062_v61  ;;  %v4068_v39 = vfloor.f32 %v6237_v43  ;;  %v4794_v4 = vsel %vm4728_vm6, %v11265_v37, 0.0  ;;  %vm4944_vm5 = vcmp.eq.f32.partialorder %v11209_v60, %v11274_v11 }
 0x93a   : > { %vm5170_vm11 = vcmp.eq.f32.partialorder %v11209_v60, %v11288_v27  ;;  %v11405_v16 = vmin.f32 %v4429_v34, 7.0  ;;  %v4858_v22 = vadd.f32 %v4794_v4, %v4628_v7  ;;  %v5010_v44 = vsel %vm4944_vm5, %v11297_v54, 0.0 }
 0x93b   : > { %v11377_v29 = vfloor.f32 %v6239_v3  ;;  %v4074_v59 = vsub.f32 %v6237_v43, %v4068_v39  ;;  %vm4161_vm10 = vcmp.ge.f32.partialorder %v4068_v39, 0.0  ;;  %vm4165_vm2 = vcmp.le.f32.partialorder %v4068_v39, 7.0 }
 0x93c   : > { %vm4163_vm13 = vmand %vm11370_vm3, %vm4161_vm10  ;;  %v4193_v55 = vmax.f32 %v4068_v39, 0.0  ;;  %v11388_v1 = vadd.f32 1.0, %v4068_v39  ;;  %vm5380_vm0 = vcmp.eq.f32.partialorder %v11209_v60, %v11294_v63  ;;  %v5236_v58 = vsel %vm5170_vm11, %v11316_v8, 0.0 }
 0x93d   : > { %v11395_v41 = vsub.f32 %v6239_v3, %v11377_v29  ;;  %vm4169_vm14 = vcmp.ge.f32.partialorder %v11377_v29, 0.0  ;;  %vm4173_vm7 = vcmp.le.f32.partialorder %v11377_v29, 3.0  ;;  %v4187_v36 = vmax.f32 %v11377_v29, 0.0  ;;  %vm11401_vm8 = vmand %vm4163_vm13, %vm4165_vm2 }
 0x93e   : > { %v11408_v32 = vadd.f32 1.0, %v11377_v29  ;;  %v4151_v38 = vsub.f32 1.0, %v4074_v59  ;;  %vm4171_vm9 = vmand %vm11401_vm8, %vm4169_vm14  ;;  %v4195_v5 = vmin.f32 %v4193_v55, 7.0  ;;  %vm4633_vm6 = vcmp.ge.f32.partialorder %v11388_v1, 0.0 }
 0x93f   : > { %v4153_v56 = vsub.f32 1.0, %v11395_v41  ;;  %v4189_v21 = vmin.f32 %v4187_v36, 3.0  ;;  %vm4175_vm15 = vmand %vm4171_vm9, %vm4173_vm7  ;;  %v4645_v15 = vmul.f32 %v4149_v50, %v4074_v59  ;;  %v4655_v28 = vmax.f32 %v11388_v1, 0.0 }
 0x940   : > { %v5095_v10 = vmax.f32 %v11408_v32, 0.0  ;;  %v4177_v14 = vmul.f32 %v4151_v38, %v4149_v50  ;;  %vm4411_vm1 = vmand %vm11381_vm4, %vm4161_vm10  ;;  %v4419_v24 = vmul.f32 %v4151_v38, %v11355_v9  ;;  %v6241_v12 = vsel %vm4175_vm15, 1.0, %v6407_v46 }
 0x941   : > { %v4191_v31 = vmul.f32 8.0, %v4189_v21  ;;  %vm11433_vm12 = vmand %vm4411_vm1, %vm4165_vm2  ;;  %vm4637_vm13 = vcmp.le.f32.partialorder %v11388_v1, 7.0  ;;  %v4869_v52 = vmul.f32 %v4074_v59, %v11355_v9  ;;  %v4647_v61 = vmul.f32 %v4645_v15, %v4153_v56 }
 0x942   : > { %v4179_v6 = vmul.f32 %v4177_v14, %v4153_v56  ;;  %vm4415_vm10 = vmand %vm11433_vm12, %vm4169_vm14  ;;  %v4421_v57 = vmul.f32 %v4419_v24, %v4153_v56  ;;  %v4657_v43 = vmin.f32 %v4655_v28, 7.0  ;;  %vm5079_vm11 = vcmp.ge.f32.partialorder %v11408_v32, 0.0 }
 0x943   : > { %v4197_v42 = vadd.f32 %v4195_v5, %v4191_v31  ;;  %vm4417_vm2 = vmand %vm4415_vm10, %vm4173_vm7  ;;  %v4871_v0 = vmul.f32 %v4869_v52, %v4153_v56  ;;  %vm5083_vm9 = vcmp.le.f32.partialorder %v11408_v32, 3.0  ;;  %v5097_v2 = vmin.f32 %v5095_v10, 3.0 }
 0x944   : > { %vm4635_vm5 = vmand %vm11370_vm3, %vm4633_vm6  ;;  %v4185_v53 = vmul.f32 %v6241_v12, %v4179_v6  ;;  %v4659_v3 = vadd.f32 %v4657_v43, %v4191_v31  ;;  %v5087_v39 = vmul.f32 %v4177_v14, %v11395_v41  ;;  %v6243_v40 = vsel %vm4417_vm2, 1.0, %v6407_v46 }
 0x945   : > { %v4199_v9 = vmul.f32 8.0, %v4197_v42  ;;  %vm11456_vm15 = vmand %vm4635_vm5, %vm4637_vm13  ;;  %v5099_v34 = vmul.f32 8.0, %v5097_v2  ;;  %v5307_v7 = vmul.f32 %v4419_v24, %v11395_v41  ;;  %v5074_v4 = vadd.f32 %v5010_v44, %v4858_v22 }
 0x946   : > { %vm4641_vm3 = vmand %vm11456_vm15, %vm4169_vm14  ;;  %v4427_v55 = vmul.f32 %v6243_v40, %v4421_v57  ;;  %v4661_v36 = vmul.f32 8.0, %v4659_v3  ;;  %v5517_v38 = vmul.f32 %v4645_v15, %v11395_v41  ;;  %v11476_v22 = vperm.slane %v4185_v53, 0 }
 0x947   : > { %v4205_v59 = vadd.f32 %v11374_v18, %v4199_v9  ;;  %vm4643_vm1 = vmand %vm4641_vm3, %vm4173_vm7  ;;  %v5101_v21 = vadd.f32 %v5099_v34, %v4195_v5  ;;  %v5525_v10 = vadd.f32 %v5099_v34, %v4657_v43  ;;  %v5300_v14 = vadd.f32 %v5236_v58, %v5074_v4 }
 0x948   : > { %v6245_v56 = vsel %vm4643_vm1, 1.0, %v6407_v46  ;;  %vm4861_vm10 = vmand %vm11381_vm4, %vm4633_vm6  ;;  %v4433_v44 = vadd.f32 %v11405_v16, %v4199_v9  ;;  %v4663_v31 = vadd.f32 %v4661_v36, %v11374_v18  ;;  %v4879_v35 = vadd.f32 %v4661_v36, %v11405_v16 }
 0x949   : > { %v4653_v24 = vmul.f32 %v6245_v56, %v4647_v61  ;;  %vm11482_vm2 = vmand %vm4861_vm10, %vm4637_vm13  ;;  %v5103_v5 = vmul.f32 8.0, %v5101_v21  ;;  %v11492_v58 = vmul.f32 %v4869_v52, %v11395_v41  ;;  %v5446_v1 = vsel %vm5380_vm0, %v11330_v19, 0.0 }
 0x94a   : > { %vm4865_vm4 = vmand %vm11482_vm2, %vm4169_vm14  ;;  %v11498_v28 = vperm.slane %v4427_v55, 0  ;;  %v5527_v6 = vmul.f32 8.0, %v5525_v10  ;;  %v5510_v12 = vadd.f32 %v5446_v1, %v5300_v14  ;;  %vm5594_vm14 = vcmp.eq.f32.partialorder %v11209_v60, %v11301_v26 }
 0x94b   : > { %vm4867_vm6 = vmand %vm4865_vm4, %vm4173_vm7  ;;  %v11504_v42 = vperm.slane %v4205_v59, 0  ;;  %v5105_v52 = vadd.f32 %v5103_v5, %v11374_v18  ;;  %v5315_v57 = vadd.f32 %v5103_v5, %v11405_v16  ;;  %v11513_v29 = vperm.slane %v4433_v44, 0 }
 0x94c   : > { %v6247_v41 = vsel %vm4867_vm6, 1.0, %v6407_v46  ;;  %vm5081_vm13 = vmand %vm11401_vm8, %vm5079_vm11  ;;  %v11515_v61 = vperm.slane %v4663_v31, 0  ;;  %v11517_v43 = vperm.slane %v4653_v24, 0  ;;  %v5660_v2 = vsel %vm5594_vm14, %v11340_v33, 0.0 }
 0x94d   : > { %vm5085_vm7 = vmand %vm5081_vm13, %vm5083_vm9  ;;  %v4877_v53 = vmul.f32 %v6247_v41, %v4871_v0  ;;  %v11522_v9 = vperm.slane %v4879_v35, 0  ;;  %v5724_v3 = vadd.f32 %v5660_v2, %v5510_v12  ;;  %v11529_v40 = vperm.slane %v5105_v52, 0 }
 0x94e   : > { %v6249_v51 = vsel %vm5085_vm7, 1.0, %v6407_v46  ;;  %vm5303_vm8 = vmand %vm11433_vm12, %vm5079_vm11  ;;  %v11533_v34 = vperm.slane %v5315_v57, 0  ;;  %v5529_v4 = vadd.f32 %v5527_v6, %v11374_v18  ;;  %v5739_v0 = vadd.f32 %v5527_v6, %v11405_v16 }
 0x94f   : > { %vm5305_vm0 = vmand %vm5303_vm8, %vm5083_vm9  ;;  %vm5804_vm12 = vcmp.eq.f32.partialorder %v11209_v60, %v11303_v20  ;;  %vm4236_vm3 = vcmp.eq.f32.partialorder %v11367_v17, %v11245_v13  ;;  %vm4464_vm1 = vcmp.eq.f32.partialorder %v11367_v17, %v11247_v47  ;;  %v5093_v62 = vmul.f32 %v6249_v51, %v5087_v39 }
 0x950   : > { %v6251_v59 = vsel %vm5305_vm0, 1.0, %v6407_v46  ;;  %vm5513_vm5 = vmand %vm11456_vm15, %vm5079_vm11  ;;  %v5870_v16 = vsel %vm5804_vm12, %v11347_v30, 0.0  ;;  %v4302_v55 = vsel %vm4236_vm3, %v11233_v23, 0.0  ;;  %v4530_v56 = vsel %vm4464_vm1, %v11256_v49, 0.0 }
 0x951   : > { %v5313_v18 = vmul.f32 %v6251_v59, %v5307_v7  ;;  %vm5515_vm10 = vmand %vm5513_vm5, %vm5083_vm9  ;;  %v5934_v36 = vadd.f32 %v5870_v16, %v5724_v3  ;;  %vm4694_vm4 = vcmp.eq.f32.partialorder %v11367_v17, %v11263_v45  ;;  %v11560_v39 = vperm.slane %v4877_v53, 0 }
 0x952   : > { %v6253_v50 = vsel %vm5515_vm10, 1.0, %v6407_v46  ;;  %vm5727_vm15 = vmand %vm11482_vm2, %vm5079_vm11  ;;  %v4594_v21 = vadd.f32 %v4530_v56, %v4302_v55  ;;  %v4760_v10 = vsel %vm4694_vm4, %v11265_v37, 0.0  ;;  %v11563_v14 = vperm.slane %v5529_v4, 0 }
 0x953   : > { %v5523_v7 = vmul.f32 %v6253_v50, %v5517_v38  ;;  %vm5729_vm6 = vmand %vm5727_vm15, %vm5083_vm9  ;;  %5958 = vmatpush.msra.mxu3 %v5934_v36  ;;  %vm4910_vm11 = vcmp.eq.f32.partialorder %v11367_v17, %v11274_v11  ;;  %vm5136_vm2 = vcmp.eq.f32.partialorder %v11367_v17, %v11288_v27  ;;  %vm5346_vm14 = vcmp.eq.f32.partialorder %v11367_v17, %v11294_v63 }
 0x954   : > { %v11573_v44 = vperm.slane %v5093_v62, 0  ;;  %v11575_v38 = vperm.slane %v5739_v0, 0  ;;  %v4824_v24 = vadd.f32 %v4760_v10, %v4594_v21  ;;  %v4976_v31 = vsel %vm4910_vm11, %v11297_v54, 0.0 }
 0x955   : > { %v11578_v15 = vperm.slane %v5313_v18, 0  ;;  %v5202_v32 = vsel %vm5136_vm2, %v11316_v8, 0.0  ;;  %vm5560_vm9 = vcmp.eq.f32.partialorder %v11367_v17, %v11301_v26  ;;  %vm5770_vm13 = vcmp.eq.f32.partialorder %v11367_v17, %v11303_v20 }
 0x956   : > { %v11585_v35 = vperm.slane %v5523_v7, 0  ;;  %v11588_v5 = vsel %vm5729_vm6, 1.0, %v6407_v46  ;;  %v5040_v1 = vadd.f32 %v4976_v31, %v4824_v24  ;;  %v5412_v6 = vsel %vm5346_vm14, %v11330_v19, 0.0 }
 0x957   : > { %v4108_v12 = vadd.s32 240, %v11145_v25  ;;  %v4091_v41 = vadd.s32 104, %v11145_v25  ;;  %v4107_v52 = vadd.s32 232, %v11145_v25  ;;  %v4090_v57 = vadd.s32 96, %v11145_v25 }
 0x958   : > { %v5266_v2 = vadd.f32 %v5202_v32, %v5040_v1  ;;  %v5626_v53 = vsel %vm5560_vm9, %v11340_v33, 0.0  ;;  %v5836_v51 = vsel %vm5770_vm13, %v11347_v30, 0.0  ;;  %v4106_v3 = vadd.s32 224, %v11145_v25 }
 0x959   : > { %v11598_v46 = vcvt.s32.f32 %v4108_v12  ;;  %v11600_v4 = vcvt.s32.f32 %v4091_v41  ;;  %v4089_v0 = vadd.s32 88, %v11145_v25  ;;  %v4105_v59 = vadd.s32 216, %v11145_v25 }
 0x95a   : > { %v5476_v62 = vadd.f32 %v5412_v6, %v5266_v2  ;;  %v11604_v18 = vcvt.s32.f32 %v4107_v52  ;;  %v11606_v16 = vcvt.s32.f32 %v4090_v57  ;;  %v11608_v55 = vcvt.s32.f32 %v4106_v3 }
 0x95b   : > { %vm4268_vm7 = vcmp.eq.f32.partialorder %v11598_v46, %v11245_v13  ;;  %vm4496_vm8 = vcmp.eq.f32.partialorder %v11598_v46, %v11247_v47  ;;  %vm4726_vm0 = vcmp.eq.f32.partialorder %v11598_v46, %v11263_v45  ;;  %vm4942_vm5 = vcmp.eq.f32.partialorder %v11598_v46, %v11274_v11 }
 0x95c   : > { %v5690_v50 = vadd.f32 %v5626_v53, %v5476_v62  ;;  %v4334_v36 = vsel %vm4268_vm7, %v11233_v23, 0.0  ;;  %v4562_v56 = vsel %vm4496_vm8, %v11256_v49, 0.0  ;;  %v4792_v7 = vsel %vm4726_vm0, %v11265_v37, 0.0 }
 0x95d   : > { %v4626_v21 = vadd.f32 %v4562_v56, %v4334_v36  ;;  %vm5168_vm12 = vcmp.eq.f32.partialorder %v11598_v46, %v11288_v27  ;;  %vm5378_vm3 = vcmp.eq.f32.partialorder %v11598_v46, %v11294_v63  ;;  %v11625_v10 = vcvt.s32.f32 %v4089_v0 }
 0x95e   : > { %v5900_v24 = vadd.f32 %v5836_v51, %v5690_v50  ;;  %v5008_v31 = vsel %vm4942_vm5, %v11297_v54, 0.0  ;;  %v5234_v32 = vsel %vm5168_vm12, %v11316_v8, 0.0  ;;  %v11629_v1 = vcvt.s32.f32 %v4105_v59 }
 0x95f   : > { %13469 = vst [vmem:[#allocation6_spill] sm:$0xff] %v11625_v10  ;;  %v4856_v6 = vadd.f32 %v4792_v7, %v4626_v21  ;;  %v5444_v12 = vsel %vm5378_vm3, %v11330_v19, 0.0  ;;  %vm5592_vm1 = vcmp.eq.f32.partialorder %v11598_v46, %v11301_v26  ;;  %vm4234_vm10 = vcmp.eq.f32.partialorder %v11600_v4, %v11245_v13 }
 0x960   : > { %13470 = vst [vmem:[#allocation8_spill] sm:$0xff] %v11629_v1  ;;  %5939 = vmatpush.msra.mxu2 %v5900_v24  ;;  %vm5802_vm15 = vcmp.eq.f32.partialorder %v11598_v46, %v11303_v20  ;;  %v4300_v41 = vsel %vm4234_vm10, %v11233_v23, 0.0  ;;  %vm4462_vm4 = vcmp.eq.f32.partialorder %v11600_v4, %v11247_v47  ;;  %vm4692_vm6 = vcmp.eq.f32.partialorder %v11600_v4, %v11263_v45 }
 0x961   : > { %v5072_v52 = vadd.f32 %v5008_v31, %v4856_v6  ;;  %v4528_v57 = vsel %vm4462_vm4, %v11256_v49, 0.0  ;;  %v4758_v2 = vsel %vm4692_vm6, %v11265_v37, 0.0  ;;  %vm4908_vm11 = vcmp.eq.f32.partialorder %v11600_v4, %v11274_v11 }
 0x962   : > { %v5658_v53 = vsel %vm5592_vm1, %v11340_v33, 0.0  ;;  %v4592_v51 = vadd.f32 %v4528_v57, %v4300_v41  ;;  %vm5134_vm2 = vcmp.eq.f32.partialorder %v11600_v4, %v11288_v27  ;;  %vm5344_vm14 = vcmp.eq.f32.partialorder %v11600_v4, %v11294_v63 }
 0x963   : > { %v5298_v3 = vadd.f32 %v5234_v32, %v5072_v52  ;;  %v5868_v0 = vsel %vm5802_vm15, %v11347_v30, 0.0  ;;  %v4974_v59 = vsel %vm4908_vm11, %v11297_v54, 0.0  ;;  %v5200_v62 = vsel %vm5134_vm2, %v11316_v8, 0.0 }
 0x964   : > { %v4822_v50 = vadd.f32 %v4758_v2, %v4592_v51  ;;  %v5410_v36 = vsel %vm5344_vm14, %v11330_v19, 0.0  ;;  %vm5558_vm9 = vcmp.eq.f32.partialorder %v11600_v4, %v11301_v26  ;;  %vm4266_vm13 = vcmp.eq.f32.partialorder %v11604_v18, %v11245_v13 }
 0x965   : > { %v5508_v56 = vadd.f32 %v5444_v12, %v5298_v3  ;;  %vm5768_vm7 = vcmp.eq.f32.partialorder %v11600_v4, %v11303_v20  ;;  %v4332_v7 = vsel %vm4266_vm13, %v11233_v23, 0.0  ;;  %vm4494_vm8 = vcmp.eq.f32.partialorder %v11604_v18, %v11247_v47 }
 0x966   : > { %v5038_v21 = vadd.f32 %v4974_v59, %v4822_v50  ;;  %v4560_v24 = vsel %vm4494_vm8, %v11256_v49, 0.0  ;;  %vm4724_vm0 = vcmp.eq.f32.partialorder %v11604_v18, %v11263_v45  ;;  %vm4940_vm5 = vcmp.eq.f32.partialorder %v11604_v18, %v11274_v11 }
 0x967   : > { %v5722_v31 = vadd.f32 %v5658_v53, %v5508_v56  ;;  %v5624_v32 = vsel %vm5558_vm9, %v11340_v33, 0.0  ;;  %v4624_v6 = vadd.f32 %v4560_v24, %v4332_v7  ;;  %v4790_v12 = vsel %vm4724_vm0, %v11265_v37, 0.0 }
 0x968   : > { %v5264_v41 = vadd.f32 %v5200_v62, %v5038_v21  ;;  %v5006_v52 = vsel %vm4940_vm5, %v11297_v54, 0.0  ;;  %vm5166_vm12 = vcmp.eq.f32.partialorder %v11604_v18, %v11288_v27  ;;  %vm5376_vm3 = vcmp.eq.f32.partialorder %v11604_v18, %v11294_v63 }
 0x969   : > { %v5932_v57 = vadd.f32 %v5868_v0, %v5722_v31  ;;  %v5834_v2 = vsel %vm5768_vm7, %v11347_v30, 0.0  ;;  %v4854_v53 = vadd.f32 %v4790_v12, %v4624_v6  ;;  %vm5590_vm1 = vcmp.eq.f32.partialorder %v11604_v18, %v11301_v26 }
 0x96a   : > { %v5474_v51 = vadd.f32 %v5410_v36, %v5264_v41  ;;  %v5232_v3 = vsel %vm5166_vm12, %v11316_v8, 0.0  ;;  %v5442_v59 = vsel %vm5376_vm3, %v11330_v19, 0.0  ;;  %vm4232_vm10 = vcmp.eq.f32.partialorder %v11606_v16, %v11245_v13 }
 0x96b   : > { %5959 = vmatpush.msra.mxu3 %v5932_v57  ;;  %v5070_v62 = vadd.f32 %v5006_v52, %v4854_v53  ;;  %vm5800_vm15 = vcmp.eq.f32.partialorder %v11604_v18, %v11303_v20  ;;  %v4298_v0 = vsel %vm4232_vm10, %v11233_v23, 0.0  ;;  %vm4460_vm4 = vcmp.eq.f32.partialorder %v11606_v16, %v11247_v47 }
 0x96c   : > { %v5688_v50 = vadd.f32 %v5624_v32, %v5474_v51  ;;  %v4526_v36 = vsel %vm4460_vm4, %v11256_v49, 0.0  ;;  %vm4690_vm6 = vcmp.eq.f32.partialorder %v11606_v16, %v11263_v45  ;;  %vm4906_vm11 = vcmp.eq.f32.partialorder %v11606_v16, %v11274_v11 }
 0x96d   : > { %v5296_v56 = vadd.f32 %v5232_v3, %v5070_v62  ;;  %v5656_v7 = vsel %vm5590_vm1, %v11340_v33, 0.0  ;;  %v4590_v21 = vadd.f32 %v4526_v36, %v4298_v0  ;;  %v4756_v24 = vsel %vm4690_vm6, %v11265_v37, 0.0 }
 0x96e   : > { %v5898_v31 = vadd.f32 %v5834_v2, %v5688_v50  ;;  %v4972_v6 = vsel %vm4906_vm11, %v11297_v54, 0.0  ;;  %vm5132_vm2 = vcmp.eq.f32.partialorder %v11606_v16, %v11288_v27  ;;  %vm5342_vm14 = vcmp.eq.f32.partialorder %v11606_v16, %v11294_v63 }
 0x96f   : > { %v5506_v32 = vadd.f32 %v5442_v59, %v5296_v56  ;;  %v5866_v12 = vsel %vm5800_vm15, %v11347_v30, 0.0  ;;  %v4820_v41 = vadd.f32 %v4756_v24, %v4590_v21  ;;  %vm5556_vm9 = vcmp.eq.f32.partialorder %v11606_v16, %v11301_v26 }
 0x970   : > { %5940 = vmatpush.msra.mxu2 %v5898_v31  ;;  %v5198_v52 = vsel %vm5132_vm2, %v11316_v8, 0.0  ;;  %v5408_v57 = vsel %vm5342_vm14, %v11330_v19, 0.0  ;;  %vm4264_vm13 = vcmp.eq.f32.partialorder %v11608_v55, %v11245_v13  ;;  %vm4492_vm7 = vcmp.eq.f32.partialorder %v11608_v55, %v11247_v47 }
 0x971   : > { %v5720_v2 = vadd.f32 %v5656_v7, %v5506_v32  ;;  %v5036_v53 = vadd.f32 %v4972_v6, %v4820_v41  ;;  %vm5766_vm8 = vcmp.eq.f32.partialorder %v11606_v16, %v11303_v20  ;;  %v4330_v51 = vsel %vm4264_vm13, %v11233_v23, 0.0 }
 0x972   : > { %v4558_v3 = vsel %vm4492_vm7, %v11256_v49, 0.0  ;;  %vm4722_vm0 = vcmp.eq.f32.partialorder %v11608_v55, %v11263_v45  ;;  %vm4938_vm5 = vcmp.eq.f32.partialorder %v11608_v55, %v11274_v11  ;;  %vm5164_vm12 = vcmp.eq.f32.partialorder %v11608_v55, %v11288_v27 }
 0x973   : > { %v5930_v59 = vadd.f32 %v5866_v12, %v5720_v2  ;;  %v5262_v62 = vadd.f32 %v5198_v52, %v5036_v53  ;;  %v4622_v0 = vadd.f32 %v4558_v3, %v4330_v51  ;;  %v4788_v50 = vsel %vm4722_vm0, %v11265_v37, 0.0 }
 0x974   : > { %v5622_v36 = vsel %vm5556_vm9, %v11340_v33, 0.0  ;;  %v5832_v56 = vsel %vm5766_vm8, %v11347_v30, 0.0  ;;  %v5004_v7 = vsel %vm4938_vm5, %v11297_v54, 0.0  ;;  %vm5374_vm3 = vcmp.eq.f32.partialorder %v11608_v55, %v11294_v63 }
 0x975   : > { %5960 = vmatpush.msra.mxu3 %v5930_v59  ;;  %v5472_v21 = vadd.f32 %v5408_v57, %v5262_v62  ;;  %v4852_v24 = vadd.f32 %v4788_v50, %v4622_v0  ;;  %v5230_v31 = vsel %vm5164_vm12, %v11316_v8, 0.0  ;;  %vm5588_vm1 = vcmp.eq.f32.partialorder %v11608_v55, %v11301_v26 }
 0x976   : > { %v5440_v6 = vsel %vm5374_vm3, %v11330_v19, 0.0  ;;  %vm4230_vm10 = vcmp.eq.f32.partialorder %v11625_v10, %v11245_v13  ;;  %vm4458_vm15 = vcmp.eq.f32.partialorder %v11625_v10, %v11247_v47  ;;  %vm4688_vm4 = vcmp.eq.f32.partialorder %v11625_v10, %v11263_v45 }
 0x977   : > { %v5686_v32 = vadd.f32 %v5622_v36, %v5472_v21  ;;  %v5068_v12 = vadd.f32 %v5004_v7, %v4852_v24  ;;  %vm5798_vm6 = vcmp.eq.f32.partialorder %v11608_v55, %v11303_v20  ;;  %v4296_v41 = vsel %vm4230_vm10, %v11233_v23, 0.0 }
 0x978   : > { %v4524_v52 = vsel %vm4458_vm15, %v11256_v49, 0.0  ;;  %v4754_v57 = vsel %vm4688_vm4, %v11265_v37, 0.0  ;;  %vm4904_vm11 = vcmp.eq.f32.partialorder %v11625_v10, %v11274_v11  ;;  %vm5130_vm2 = vcmp.eq.f32.partialorder %v11625_v10, %v11288_v27 }
 0x979   : > { %v5896_v2 = vadd.f32 %v5832_v56, %v5686_v32  ;;  %v5294_v53 = vadd.f32 %v5230_v31, %v5068_v12  ;;  %v5654_v51 = vsel %vm5588_vm1, %v11340_v33, 0.0  ;;  %v4588_v3 = vadd.f32 %v4524_v52, %v4296_v41 }
 0x97a   : > { %v5864_v59 = vsel %vm5798_vm6, %v11347_v30, 0.0  ;;  %v4970_v62 = vsel %vm4904_vm11, %v11297_v54, 0.0  ;;  %v5196_v0 = vsel %vm5130_vm2, %v11316_v8, 0.0  ;;  %vm5340_vm14 = vcmp.eq.f32.partialorder %v11625_v10, %v11294_v63 }
 0x97b   : > { %5941 = vmatpush.msra.mxu2 %v5896_v2  ;;  %v5504_v50 = vadd.f32 %v5440_v6, %v5294_v53  ;;  %v4818_v36 = vadd.f32 %v4754_v57, %v4588_v3  ;;  %vm5554_vm9 = vcmp.eq.f32.partialorder %v11625_v10, %v11301_v26  ;;  %vm5764_vm13 = vcmp.eq.f32.partialorder %v11625_v10, %v11303_v20 }
 0x97c   : > { %v5406_v56 = vsel %vm5340_vm14, %v11330_v19, 0.0  ;;  %vm4262_vm7 = vcmp.eq.f32.partialorder %v11629_v1, %v11245_v13  ;;  %vm4490_vm8 = vcmp.eq.f32.partialorder %v11629_v1, %v11247_v47  ;;  %vm4720_vm0 = vcmp.eq.f32.partialorder %v11629_v1, %v11263_v45 }
 0x97d   : > { %v5718_v7 = vadd.f32 %v5654_v51, %v5504_v50  ;;  %v5034_v21 = vadd.f32 %v4970_v62, %v4818_v36  ;;  %v4328_v24 = vsel %vm4262_vm7, %v11233_v23, 0.0  ;;  %v4556_v31 = vsel %vm4490_vm8, %v11256_v49, 0.0 }
 0x97e   : > { %v4620_v6 = vadd.f32 %v4556_v31, %v4328_v24  ;;  %v4786_v32 = vsel %vm4720_vm0, %v11265_v37, 0.0  ;;  %vm4936_vm5 = vcmp.eq.f32.partialorder %v11629_v1, %v11274_v11  ;;  %vm5162_vm12 = vcmp.eq.f32.partialorder %v11629_v1, %v11288_v27 }
 0x97f   : > { %v5928_v12 = vadd.f32 %v5864_v59, %v5718_v7  ;;  %v5260_v41 = vadd.f32 %v5196_v0, %v5034_v21  ;;  %v5620_v52 = vsel %vm5554_vm9, %v11340_v33, 0.0  ;;  %v5002_v57 = vsel %vm4936_vm5, %v11297_v54, 0.0 }
 0x980   : > { %v4850_v2 = vadd.f32 %v4786_v32, %v4620_v6  ;;  %vm5372_vm3 = vcmp.eq.f32.partialorder %v11629_v1, %v11294_v63  ;;  %vm5586_vm1 = vcmp.eq.f32.partialorder %v11629_v1, %v11301_v26  ;;  %vm5796_vm10 = vcmp.eq.f32.partialorder %v11629_v1, %v11303_v20 }
 0x981   : > { %5961 = vmatpush.msra.mxu3 %v5928_v12  ;;  %v5470_v53 = vadd.f32 %v5406_v56, %v5260_v41  ;;  %v5830_v51 = vsel %vm5764_vm13, %v11347_v30, 0.0  ;;  %v5228_v3 = vsel %vm5162_vm12, %v11316_v8, 0.0  ;;  %v5438_v59 = vsel %vm5372_vm3, %v11330_v19, 0.0 }
 0x982   : > { %v5066_v62 = vadd.f32 %v5002_v57, %v4850_v2  ;;  %v4088_v0 = vadd.s32 80, %v11145_v25  ;;  %v4104_v50 = vadd.s32 208, %v11145_v25  ;;  %v4087_v36 = vadd.s32 72, %v11145_v25 }
 0x983   : > { %v5684_v7 = vadd.f32 %v5620_v52, %v5470_v53  ;;  %v5652_v21 = vsel %vm5586_vm1, %v11340_v33, 0.0  ;;  %v5862_v56 = vsel %vm5796_vm10, %v11347_v30, 0.0  ;;  %v4103_v24 = vadd.s32 200, %v11145_v25 }
 0x984   : > { %v5292_v31 = vadd.f32 %v5228_v3, %v5066_v62  ;;  %v11801_v6 = vcvt.s32.f32 %v4088_v0  ;;  %v4086_v32 = vadd.s32 64, %v11145_v25  ;;  %v4102_v12 = vadd.s32 192, %v11145_v25 }
 0x985   : > { %v5894_v41 = vadd.f32 %v5830_v51, %v5684_v7  ;;  %v11805_v57 = vcvt.s32.f32 %v4104_v50  ;;  %v11807_v2 = vcvt.s32.f32 %v4087_v36  ;;  %v11809_v1 = vcvt.s32.f32 %v4103_v24 }
 0x986   : > { %13471 = vst [vmem:[#allocation10_spill] sm:$0xff] %v11801_v6  ;;  %v5502_v52 = vadd.f32 %v5438_v59, %v5292_v31  ;;  %vm4228_vm15 = vcmp.eq.f32.partialorder %v11801_v6, %v11245_v13  ;;  %vm4456_vm4 = vcmp.eq.f32.partialorder %v11801_v6, %v11247_v47  ;;  %vm4686_vm6 = vcmp.eq.f32.partialorder %v11801_v6, %v11263_v45 }
 0x987   : > { %13472 = vst [vmem:[#allocation12_spill] sm:$0xff] %v11805_v57  ;;  %5942 = vmatpush.msra.mxu2 %v5894_v41  ;;  %v4294_v53 = vsel %vm4228_vm15, %v11233_v23, 0.0  ;;  %v4522_v51 = vsel %vm4456_vm4, %v11256_v49, 0.0  ;;  %v4752_v3 = vsel %vm4686_vm6, %v11265_v37, 0.0  ;;  %vm4902_vm11 = vcmp.eq.f32.partialorder %v11801_v6, %v11274_v11 }
 0x988   : > { %13473 = vst [vmem:[#allocation14_spill] sm:$0xff] %v11809_v1  ;;  %v5716_v59 = vadd.f32 %v5652_v21, %v5502_v52  ;;  %v4586_v62 = vadd.f32 %v4522_v51, %v4294_v53  ;;  %vm5128_vm2 = vcmp.eq.f32.partialorder %v11801_v6, %v11288_v27  ;;  %v11824_v0 = vcvt.s32.f32 %v4086_v32 }
 0x989   : > { %v4968_v50 = vsel %vm4902_vm11, %v11297_v54, 0.0  ;;  %v5194_v36 = vsel %vm5128_vm2, %v11316_v8, 0.0  ;;  %vm5338_vm14 = vcmp.eq.f32.partialorder %v11801_v6, %v11294_v63  ;;  %v11830_v7 = vcvt.s32.f32 %v4102_v12 }
 0x98a   : > { %13474 = vst [vmem:[#allocation16_spill] sm:$0xff] %v11824_v0  ;;  %v5926_v24 = vadd.f32 %v5862_v56, %v5716_v59  ;;  %v4816_v31 = vadd.f32 %v4752_v3, %v4586_v62  ;;  %vm5552_vm9 = vcmp.eq.f32.partialorder %v11801_v6, %v11301_v26  ;;  %vm5762_vm13 = vcmp.eq.f32.partialorder %v11801_v6, %v11303_v20 }
 0x98b   : > { %13475 = vst [vmem:[#allocation18_spill] sm:$0xff] %v11830_v7  ;;  %v5404_v21 = vsel %vm5338_vm14, %v11330_v19, 0.0  ;;  %vm4260_vm7 = vcmp.eq.f32.partialorder %v11805_v57, %v11245_v13  ;;  %vm4488_vm8 = vcmp.eq.f32.partialorder %v11805_v57, %v11247_v47  ;;  %vm4718_vm0 = vcmp.eq.f32.partialorder %v11805_v57, %v11263_v45 }
 0x98c   : > { %5962 = vmatpush.msra.mxu3 %v5926_v24  ;;  %v5032_v56 = vadd.f32 %v4968_v50, %v4816_v31  ;;  %v4326_v32 = vsel %vm4260_vm7, %v11233_v23, 0.0  ;;  %v4554_v12 = vsel %vm4488_vm8, %v11256_v49, 0.0  ;;  %v4784_v41 = vsel %vm4718_vm0, %v11265_v37, 0.0 }
 0x98d   : > { %v4618_v52 = vadd.f32 %v4554_v12, %v4326_v32  ;;  %vm4934_vm5 = vcmp.eq.f32.partialorder %v11805_v57, %v11274_v11  ;;  %vm5160_vm12 = vcmp.eq.f32.partialorder %v11805_v57, %v11288_v27  ;;  %vm5370_vm3 = vcmp.eq.f32.partialorder %v11805_v57, %v11294_v63 }
 0x98e   : > { %v5258_v53 = vadd.f32 %v5194_v36, %v5032_v56  ;;  %v5618_v51 = vsel %vm5552_vm9, %v11340_v33, 0.0  ;;  %v5828_v3 = vsel %vm5762_vm13, %v11347_v30, 0.0  ;;  %v5000_v59 = vsel %vm4934_vm5, %v11297_v54, 0.0 }
 0x98f   : > { %v4848_v62 = vadd.f32 %v4784_v41, %v4618_v52  ;;  %v5226_v50 = vsel %vm5160_vm12, %v11316_v8, 0.0  ;;  %vm5584_vm1 = vcmp.eq.f32.partialorder %v11805_v57, %v11301_v26  ;;  %vm4226_vm10 = vcmp.eq.f32.partialorder %v11807_v2, %v11245_v13 }
 0x990   : > { %v5468_v36 = vadd.f32 %v5404_v21, %v5258_v53  ;;  %v5436_v24 = vsel %vm5370_vm3, %v11330_v19, 0.0  ;;  %vm5794_vm15 = vcmp.eq.f32.partialorder %v11805_v57, %v11303_v20  ;;  %v4292_v31 = vsel %vm4226_vm10, %v11233_v23, 0.0 }
 0x991   : > { %v5064_v56 = vadd.f32 %v5000_v59, %v4848_v62  ;;  %vm4454_vm4 = vcmp.eq.f32.partialorder %v11807_v2, %v11247_v47  ;;  %vm4684_vm6 = vcmp.eq.f32.partialorder %v11807_v2, %v11263_v45  ;;  %vm4900_vm11 = vcmp.eq.f32.partialorder %v11807_v2, %v11274_v11 }
 0x992   : > { %v5682_v32 = vadd.f32 %v5618_v51, %v5468_v36  ;;  %v5650_v21 = vsel %vm5584_vm1, %v11340_v33, 0.0  ;;  %v4520_v12 = vsel %vm4454_vm4, %v11256_v49, 0.0  ;;  %v4750_v41 = vsel %vm4684_vm6, %v11265_v37, 0.0 }
 0x993   : > { %v5290_v52 = vadd.f32 %v5226_v50, %v5064_v56  ;;  %v4584_v53 = vadd.f32 %v4520_v12, %v4292_v31  ;;  %vm5126_vm2 = vcmp.eq.f32.partialorder %v11807_v2, %v11288_v27  ;;  %vm5336_vm14 = vcmp.eq.f32.partialorder %v11807_v2, %v11294_v63 }
 0x994   : > { %v5892_v59 = vadd.f32 %v5828_v3, %v5682_v32  ;;  %v5860_v62 = vsel %vm5794_vm15, %v11347_v30, 0.0  ;;  %v4966_v57 = vsel %vm4900_vm11, %v11297_v54, 0.0  ;;  %v5192_v51 = vsel %vm5126_vm2, %v11316_v8, 0.0 }
 0x995   : > { %v5500_v36 = vadd.f32 %v5436_v24, %v5290_v52  ;;  %v4814_v6 = vadd.f32 %v4750_v41, %v4584_v53  ;;  %v5402_v10 = vsel %vm5336_vm14, %v11330_v19, 0.0  ;;  %vm5550_vm9 = vcmp.eq.f32.partialorder %v11807_v2, %v11301_v26 }
 0x996   : > { %5943 = vmatpush.msra.mxu2 %v5892_v59  ;;  %vm5760_vm13 = vcmp.eq.f32.partialorder %v11807_v2, %v11303_v20  ;;  %vm4258_vm7 = vcmp.eq.f32.partialorder %v11809_v1, %v11245_v13  ;;  %vm4486_vm8 = vcmp.eq.f32.partialorder %v11809_v1, %v11247_v47  ;;  %vm4716_vm0 = vcmp.eq.f32.partialorder %v11809_v1, %v11263_v45 }
 0x997   : > { %v5714_v3 = vadd.f32 %v5650_v21, %v5500_v36  ;;  %v5030_v50 = vadd.f32 %v4966_v57, %v4814_v6  ;;  %v4324_v24 = vsel %vm4258_vm7, %v11233_v23, 0.0  ;;  %v4552_v31 = vsel %vm4486_vm8, %v11256_v49, 0.0 }
 0x998   : > { %v4616_v56 = vadd.f32 %v4552_v31, %v4324_v24  ;;  %v4782_v32 = vsel %vm4716_vm0, %v11265_v37, 0.0  ;;  %vm4932_vm5 = vcmp.eq.f32.partialorder %v11809_v1, %v11274_v11  ;;  %vm5158_vm12 = vcmp.eq.f32.partialorder %v11809_v1, %v11288_v27 }
 0x999   : > { %v5924_v12 = vadd.f32 %v5860_v62, %v5714_v3  ;;  %v5256_v41 = vadd.f32 %v5192_v51, %v5030_v50  ;;  %v5616_v6 = vsel %vm5550_vm9, %v11340_v33, 0.0  ;;  %v4998_v57 = vsel %vm4932_vm5, %v11297_v54, 0.0 }
 0x99a   : > { %v5826_v21 = vsel %vm5760_vm13, %v11347_v30, 0.0  ;;  %v4846_v52 = vadd.f32 %v4782_v32, %v4616_v56  ;;  %v5224_v53 = vsel %vm5158_vm12, %v11316_v8, 0.0  ;;  %vm5368_vm3 = vcmp.eq.f32.partialorder %v11809_v1, %v11294_v63 }
 0x99b   : > { %5963 = vmatpush.msra.mxu3 %v5924_v12  ;;  %v5466_v59 = vadd.f32 %v5402_v10, %v5256_v41  ;;  %v5434_v62 = vsel %vm5368_vm3, %v11330_v19, 0.0  ;;  %vm5582_vm1 = vcmp.eq.f32.partialorder %v11809_v1, %v11301_v26  ;;  %vm5792_vm10 = vcmp.eq.f32.partialorder %v11809_v1, %v11303_v20 }
 0x99c   : > { %v5062_v51 = vadd.f32 %v4998_v57, %v4846_v52  ;;  %vm4224_vm15 = vcmp.eq.f32.partialorder %v11824_v0, %v11245_v13  ;;  %vm4452_vm4 = vcmp.eq.f32.partialorder %v11824_v0, %v11247_v47  ;;  %vm4682_vm6 = vcmp.eq.f32.partialorder %v11824_v0, %v11263_v45 }
 0x99d   : > { %v5680_v36 = vadd.f32 %v5616_v6, %v5466_v59  ;;  %v4290_v10 = vsel %vm4224_vm15, %v11233_v23, 0.0  ;;  %v4518_v3 = vsel %vm4452_vm4, %v11256_v49, 0.0  ;;  %v4748_v50 = vsel %vm4682_vm6, %v11265_v37, 0.0 }
 0x99e   : > { %v5288_v24 = vadd.f32 %v5224_v53, %v5062_v51  ;;  %v4582_v31 = vadd.f32 %v4518_v3, %v4290_v10  ;;  %vm4898_vm11 = vcmp.eq.f32.partialorder %v11824_v0, %v11274_v11  ;;  %vm5124_vm2 = vcmp.eq.f32.partialorder %v11824_v0, %v11288_v27 }
 0x99f   : > { %v5890_v56 = vadd.f32 %v5826_v21, %v5680_v36  ;;  %v5648_v32 = vsel %vm5582_vm1, %v11340_v33, 0.0  ;;  %v4964_v12 = vsel %vm4898_vm11, %v11297_v54, 0.0  ;;  %vm5334_vm14 = vcmp.eq.f32.partialorder %v11824_v0, %v11294_v63 }
 0x9a0   : > { %v5498_v41 = vadd.f32 %v5434_v62, %v5288_v24  ;;  %v5858_v6 = vsel %vm5792_vm10, %v11347_v30, 0.0  ;;  %v4812_v57 = vadd.f32 %v4748_v50, %v4582_v31  ;;  %v5190_v52 = vsel %vm5124_vm2, %v11316_v8, 0.0 }
 0x9a1   : > { %5944 = vmatpush.msra.mxu2 %v5890_v56  ;;  %v5400_v53 = vsel %vm5334_vm14, %v11330_v19, 0.0  ;;  %vm5548_vm9 = vcmp.eq.f32.partialorder %v11824_v0, %v11301_v26  ;;  %vm4256_vm13 = vcmp.eq.f32.partialorder %v11830_v7, %v11245_v13  ;;  %vm4484_vm7 = vcmp.eq.f32.partialorder %v11830_v7, %v11247_v47 }
 0x9a2   : > { %v5712_v21 = vadd.f32 %v5648_v32, %v5498_v41  ;;  %v5028_v59 = vadd.f32 %v4964_v12, %v4812_v57  ;;  %vm5758_vm8 = vcmp.eq.f32.partialorder %v11824_v0, %v11303_v20  ;;  %v4322_v62 = vsel %vm4256_vm13, %v11233_v23, 0.0 }
 0x9a3   : > { %v4550_v51 = vsel %vm4484_vm7, %v11256_v49, 0.0  ;;  %vm4714_vm0 = vcmp.eq.f32.partialorder %v11830_v7, %v11263_v45  ;;  %vm4930_vm5 = vcmp.eq.f32.partialorder %v11830_v7, %v11274_v11  ;;  %vm5156_vm12 = vcmp.eq.f32.partialorder %v11830_v7, %v11288_v27 }
 0x9a4   : > { %v5922_v36 = vadd.f32 %v5858_v6, %v5712_v21  ;;  %v5254_v10 = vadd.f32 %v5190_v52, %v5028_v59  ;;  %v4614_v3 = vadd.f32 %v4550_v51, %v4322_v62  ;;  %v4780_v50 = vsel %vm4714_vm0, %v11265_v37, 0.0 }
 0x9a5   : > { %v5614_v24 = vsel %vm5548_vm9, %v11340_v33, 0.0  ;;  %v4996_v31 = vsel %vm4930_vm5, %v11297_v54, 0.0  ;;  %vm5366_vm3 = vcmp.eq.f32.partialorder %v11830_v7, %v11294_v63  ;;  %vm5580_vm1 = vcmp.eq.f32.partialorder %v11830_v7, %v11301_v26 }
 0x9a6   : > { %5964 = vmatpush.msra.mxu3 %v5922_v36  ;;  %v5464_v56 = vadd.f32 %v5400_v53, %v5254_v10  ;;  %v5824_v32 = vsel %vm5758_vm8, %v11347_v30, 0.0  ;;  %v4844_v12 = vadd.f32 %v4780_v50, %v4614_v3  ;;  %v5222_v41 = vsel %vm5156_vm12, %v11316_v8, 0.0 }
 0x9a7   : > { %vm5790_vm10 = vcmp.eq.f32.partialorder %v11830_v7, %v11303_v20  ;;  %v4085_v6 = vadd.s32 56, %v11145_v25  ;;  %v4101_v57 = vadd.s32 184, %v11145_v25  ;;  %v4084_v52 = vadd.s32 48, %v11145_v25 }
 0x9a8   : > { %v5678_v21 = vadd.f32 %v5614_v24, %v5464_v56  ;;  %v5060_v59 = vadd.f32 %v4996_v31, %v4844_v12  ;;  %v5432_v53 = vsel %vm5366_vm3, %v11330_v19, 0.0  ;;  %v5646_v62 = vsel %vm5580_vm1, %v11340_v33, 0.0 }
 0x9a9   : > { %v5856_v51 = vsel %vm5790_vm10, %v11347_v30, 0.0  ;;  %v11980_v36 = vcvt.s32.f32 %v4085_v6  ;;  %v11982_v10 = vcvt.s32.f32 %v4101_v57  ;;  %v4100_v3 = vadd.s32 176, %v11145_v25 }
 0x9aa   : > { %v5888_v50 = vadd.f32 %v5824_v32, %v5678_v21  ;;  %v5286_v7 = vadd.f32 %v5222_v41, %v5060_v59  ;;  %v11985_v0 = vcvt.s32.f32 %v4084_v52  ;;  %v11988_v1 = vadd.s32 40, %v11145_v25 }
 0x9ab   : > { %13476 = vst [vmem:[#allocation20_spill] sm:$0xff] %v11980_v36  ;;  %vm4222_vm15 = vcmp.eq.f32.partialorder %v11980_v36, %v11245_v13  ;;  %vm4450_vm4 = vcmp.eq.f32.partialorder %v11980_v36, %v11247_v47  ;;  %vm4680_vm6 = vcmp.eq.f32.partialorder %v11980_v36, %v11263_v45  ;;  %vm4896_vm11 = vcmp.eq.f32.partialorder %v11980_v36, %v11274_v11 }
 0x9ac   : > { %13477 = vst [vmem:[#allocation3_spill] sm:$0xff] %v11982_v10  ;;  %5945 = vmatpush.msra.mxu2 %v5888_v50  ;;  %v5496_v24 = vadd.f32 %v5432_v53, %v5286_v7  ;;  %v4288_v31 = vsel %vm4222_vm15, %v11233_v23, 0.0  ;;  %v4516_v56 = vsel %vm4450_vm4, %v11256_v49, 0.0  ;;  %v4746_v32 = vsel %vm4680_vm6, %v11265_v37, 0.0 }
 0x9ad   : > { %13478 = vst [vmem:[#allocation2_spill] sm:$0xff] %v11985_v0  ;;  %v4580_v12 = vadd.f32 %v4516_v56, %v4288_v31  ;;  %vm5122_vm2 = vcmp.eq.f32.partialorder %v11980_v36, %v11288_v27  ;;  %vm5332_vm14 = vcmp.eq.f32.partialorder %v11980_v36, %v11294_v63  ;;  %v12005_v41 = vcvt.s32.f32 %v4100_v3 }
 0x9ae   : > { %v5710_v6 = vadd.f32 %v5646_v62, %v5496_v24  ;;  %v4962_v57 = vsel %vm4896_vm11, %v11297_v54, 0.0  ;;  %v5188_v7 = vsel %vm5122_vm2, %v11316_v8, 0.0  ;;  %v12010_v52 = vadd.s32 168, %v11145_v25 }
 0x9af   : > { %13479 = vst [vmem:[#allocation4_spill] sm:$0xff] %v12005_v41  ;;  %v4810_v21 = vadd.f32 %v4746_v32, %v4580_v12  ;;  %v5398_v59 = vsel %vm5332_vm14, %v11330_v19, 0.0  ;;  %vm5546_vm9 = vcmp.eq.f32.partialorder %v11980_v36, %v11301_v26  ;;  %vm4254_vm13 = vcmp.eq.f32.partialorder %v11982_v10, %v11245_v13 }
 0x9b0   : > { %v5920_v53 = vadd.f32 %v5856_v51, %v5710_v6  ;;  %vm5756_vm7 = vcmp.eq.f32.partialorder %v11980_v36, %v11303_v20  ;;  %v4320_v62 = vsel %vm4254_vm13, %v11233_v23, 0.0  ;;  %vm4482_vm8 = vcmp.eq.f32.partialorder %v11982_v10, %v11247_v47 }
 0x9b1   : > { %v5026_v3 = vadd.f32 %v4962_v57, %v4810_v21  ;;  %v4548_v50 = vsel %vm4482_vm8, %v11256_v49, 0.0  ;;  %vm4712_vm0 = vcmp.eq.f32.partialorder %v11982_v10, %v11263_v45  ;;  %vm4928_vm5 = vcmp.eq.f32.partialorder %v11982_v10, %v11274_v11 }
 0x9b2   : > { %5965 = vmatpush.msra.mxu3 %v5920_v53  ;;  %v5612_v51 = vsel %vm5546_vm9, %v11340_v33, 0.0  ;;  %v4612_v24 = vadd.f32 %v4548_v50, %v4320_v62  ;;  %v4778_v31 = vsel %vm4712_vm0, %v11265_v37, 0.0  ;;  %vm5154_vm12 = vcmp.eq.f32.partialorder %v11982_v10, %v11288_v27 }
 0x9b3   : > { %v5252_v56 = vadd.f32 %v5188_v7, %v5026_v3  ;;  %v5822_v32 = vsel %vm5756_vm7, %v11347_v30, 0.0  ;;  %v4994_v12 = vsel %vm4928_vm5, %v11297_v54, 0.0  ;;  %vm5364_vm3 = vcmp.eq.f32.partialorder %v11982_v10, %v11294_v63 }
 0x9b4   : > { %v4842_v6 = vadd.f32 %v4778_v31, %v4612_v24  ;;  %v5220_v57 = vsel %vm5154_vm12, %v11316_v8, 0.0  ;;  %v5430_v21 = vsel %vm5364_vm3, %v11330_v19, 0.0  ;;  %vm5578_vm1 = vcmp.eq.f32.partialorder %v11982_v10, %v11301_v26 }
 0x9b5   : > { %v5462_v53 = vadd.f32 %v5398_v59, %v5252_v56  ;;  %vm5788_vm10 = vcmp.eq.f32.partialorder %v11982_v10, %v11303_v20  ;;  %vm4220_vm15 = vcmp.eq.f32.partialorder %v11985_v0, %v11245_v13  ;;  %vm4448_vm4 = vcmp.eq.f32.partialorder %v11985_v0, %v11247_v47 }
 0x9b6   : > { %v5058_v7 = vadd.f32 %v4994_v12, %v4842_v6  ;;  %v4286_v62 = vsel %vm4220_vm15, %v11233_v23, 0.0  ;;  %v4514_v3 = vsel %vm4448_vm4, %v11256_v49, 0.0  ;;  %vm4678_vm6 = vcmp.eq.f32.partialorder %v11985_v0, %v11263_v45 }
 0x9b7   : > { %v5676_v50 = vadd.f32 %v5612_v51, %v5462_v53  ;;  %v4578_v24 = vadd.f32 %v4514_v3, %v4286_v62  ;;  %v4744_v59 = vsel %vm4678_vm6, %v11265_v37, 0.0  ;;  %vm4894_vm11 = vcmp.eq.f32.partialorder %v11985_v0, %v11274_v11 }
 0x9b8   : > { %v5284_v31 = vadd.f32 %v5220_v57, %v5058_v7  ;;  %v4960_v56 = vsel %vm4894_vm11, %v11297_v54, 0.0  ;;  %vm5120_vm2 = vcmp.eq.f32.partialorder %v11985_v0, %v11288_v27  ;;  %vm5330_vm14 = vcmp.eq.f32.partialorder %v11985_v0, %v11294_v63 }
 0x9b9   : > { %v5886_v12 = vadd.f32 %v5822_v32, %v5676_v50  ;;  %v5644_v51 = vsel %vm5578_vm1, %v11340_v33, 0.0  ;;  %v5854_v6 = vsel %vm5788_vm10, %v11347_v30, 0.0  ;;  %v4808_v57 = vadd.f32 %v4744_v59, %v4578_v24 }
 0x9ba   : > { %v5494_v53 = vadd.f32 %v5430_v21, %v5284_v31  ;;  %v5186_v7 = vsel %vm5120_vm2, %v11316_v8, 0.0  ;;  %vm5544_vm9 = vcmp.eq.f32.partialorder %v11985_v0, %v11301_v26  ;;  %vm4252_vm13 = vcmp.eq.f32.partialorder %v12005_v41, %v11245_v13 }
 0x9bb   : > { %5946 = vmatpush.msra.mxu2 %v5886_v12  ;;  %v5024_v32 = vadd.f32 %v4960_v56, %v4808_v57  ;;  %v5396_v62 = vsel %vm5330_vm14, %v11330_v19, 0.0  ;;  %vm5754_vm7 = vcmp.eq.f32.partialorder %v11985_v0, %v11303_v20  ;;  %v4318_v3 = vsel %vm4252_vm13, %v11233_v23, 0.0 }
 0x9bc   : > { %v5708_v50 = vadd.f32 %v5644_v51, %v5494_v53  ;;  %vm4480_vm8 = vcmp.eq.f32.partialorder %v12005_v41, %v11247_v47  ;;  %vm4710_vm0 = vcmp.eq.f32.partialorder %v12005_v41, %v11263_v45  ;;  %vm4926_vm5 = vcmp.eq.f32.partialorder %v12005_v41, %v11274_v11 }
 0x9bd   : > { %v5250_v21 = vadd.f32 %v5186_v7, %v5024_v32  ;;  %v5610_v24 = vsel %vm5544_vm9, %v11340_v33, 0.0  ;;  %v4546_v59 = vsel %vm4480_vm8, %v11256_v49, 0.0  ;;  %v4776_v31 = vsel %vm4710_vm0, %v11265_v37, 0.0 }
 0x9be   : > { %v5918_v56 = vadd.f32 %v5854_v6, %v5708_v50  ;;  %v4610_v12 = vadd.f32 %v4546_v59, %v4318_v3  ;;  %vm5152_vm12 = vcmp.eq.f32.partialorder %v12005_v41, %v11288_v27  ;;  %vm5362_vm3 = vcmp.eq.f32.partialorder %v12005_v41, %v11294_v63 }
 0x9bf   : > { %v5460_v51 = vadd.f32 %v5396_v62, %v5250_v21  ;;  %v5820_v57 = vsel %vm5754_vm7, %v11347_v30, 0.0  ;;  %v4992_v53 = vsel %vm4926_vm5, %v11297_v54, 0.0  ;;  %vm5576_vm1 = vcmp.eq.f32.partialorder %v12005_v41, %v11301_v26 }
 0x9c0   : > { %5966 = vmatpush.msra.mxu3 %v5918_v56  ;;  %v4840_v7 = vadd.f32 %v4776_v31, %v4610_v12  ;;  %v5218_v32 = vsel %vm5152_vm12, %v11316_v8, 0.0  ;;  %v5428_v6 = vsel %vm5362_vm3, %v11330_v19, 0.0  ;;  %v12094_v3 = vcvt.s32.f32 %v11988_v1 }
 0x9c1   : > { %v5674_v50 = vadd.f32 %v5610_v24, %v5460_v51  ;;  %v5642_v59 = vsel %vm5576_vm1, %v11340_v33, 0.0  ;;  %vm5786_vm10 = vcmp.eq.f32.partialorder %v12005_v41, %v11303_v20  ;;  %v12100_v62 = vcvt.s32.f32 %v12010_v52 }
 0x9c2   : > { %13480 = vst [vmem:[#allocation5_spill] sm:$0xff] %v12094_v3  ;;  %v5056_v21 = vadd.f32 %v4992_v53, %v4840_v7  ;;  %vm4218_vm15 = vcmp.eq.f32.partialorder %v12094_v3, %v11245_v13  ;;  %vm4446_vm4 = vcmp.eq.f32.partialorder %v12094_v3, %v11247_v47  ;;  %vm4676_vm6 = vcmp.eq.f32.partialorder %v12094_v3, %v11263_v45 }
 0x9c3   : > { %13481 = vst [vmem:[#allocation7_spill] sm:$0xff] %v12100_v62  ;;  %v5884_v1 = vadd.f32 %v5820_v57, %v5674_v50  ;;  %v4284_v24 = vsel %vm4218_vm15, %v11233_v23, 0.0  ;;  %v4512_v31 = vsel %vm4446_vm4, %v11256_v49, 0.0  ;;  %v4742_v56 = vsel %vm4676_vm6, %v11265_v37, 0.0 }
 0x9c4   : > { %v5282_v12 = vadd.f32 %v5218_v32, %v5056_v21  ;;  %v4576_v52 = vadd.f32 %v4512_v31, %v4284_v24  ;;  %vm4892_vm11 = vcmp.eq.f32.partialorder %v12094_v3, %v11274_v11  ;;  %vm5118_vm2 = vcmp.eq.f32.partialorder %v12094_v3, %v11288_v27 }
 0x9c5   : > { %5947 = vmatpush.msra.mxu2 %v5884_v1  ;;  %v5852_v51 = vsel %vm5786_vm10, %v11347_v30, 0.0  ;;  %v4958_v53 = vsel %vm4892_vm11, %v11297_v54, 0.0  ;;  %vm5328_vm14 = vcmp.eq.f32.partialorder %v12094_v3, %v11294_v63  ;;  %v4082_v57 = vadd.s32 32, %v11145_v25 }
 0x9c6   : > { %v5492_v7 = vadd.f32 %v5428_v6, %v5282_v12  ;;  %v4806_v50 = vadd.f32 %v4742_v56, %v4576_v52  ;;  %v5184_v32 = vsel %vm5118_vm2, %v11316_v8, 0.0  ;;  %vm5542_vm9 = vcmp.eq.f32.partialorder %v12094_v3, %v11301_v26 }
 0x9c7   : > { %v5394_v21 = vsel %vm5328_vm14, %v11330_v19, 0.0  ;;  %vm4250_vm13 = vcmp.eq.f32.partialorder %v12100_v62, %v11245_v13  ;;  %vm4478_vm7 = vcmp.eq.f32.partialorder %v12100_v62, %v11247_v47  ;;  %vm4708_vm8 = vcmp.eq.f32.partialorder %v12100_v62, %v11263_v45 }
 0x9c8   : > { %v5706_v1 = vadd.f32 %v5642_v59, %v5492_v7  ;;  %v5022_v24 = vadd.f32 %v4958_v53, %v4806_v50  ;;  %vm5752_vm0 = vcmp.eq.f32.partialorder %v12094_v3, %v11303_v20  ;;  %v4316_v6 = vsel %vm4250_vm13, %v11233_v23, 0.0 }
 0x9c9   : > { %v4544_v31 = vsel %vm4478_vm7, %v11256_v49, 0.0  ;;  %v4774_v56 = vsel %vm4708_vm8, %v11265_v37, 0.0  ;;  %vm4924_vm5 = vcmp.eq.f32.partialorder %v12100_v62, %v11274_v11  ;;  %vm5150_vm12 = vcmp.eq.f32.partialorder %v12100_v62, %v11288_v27 }
 0x9ca   : > { %v5916_v12 = vadd.f32 %v5852_v51, %v5706_v1  ;;  %v5248_v52 = vadd.f32 %v5184_v32, %v5022_v24  ;;  %v5608_v59 = vsel %vm5542_vm9, %v11340_v33, 0.0  ;;  %v4608_v53 = vadd.f32 %v4544_v31, %v4316_v6 }
 0x9cb   : > { %v4990_v7 = vsel %vm4924_vm5, %v11297_v54, 0.0  ;;  %vm5360_vm3 = vcmp.eq.f32.partialorder %v12100_v62, %v11294_v63  ;;  %vm5574_vm1 = vcmp.eq.f32.partialorder %v12100_v62, %v11301_v26  ;;  %vm5784_vm10 = vcmp.eq.f32.partialorder %v12100_v62, %v11303_v20 }
 0x9cc   : > { %5967 = vmatpush.msra.mxu3 %v5916_v12  ;;  %v5458_v50 = vadd.f32 %v5394_v21, %v5248_v52  ;;  %v5818_v51 = vsel %vm5752_vm0, %v11347_v30, 0.0  ;;  %v4838_v32 = vadd.f32 %v4774_v56, %v4608_v53  ;;  %v5216_v1 = vsel %vm5150_vm12, %v11316_v8, 0.0 }
 0x9cd   : > { %v5426_v24 = vsel %vm5360_vm3, %v11330_v19, 0.0  ;;  %v5640_v6 = vsel %vm5574_vm1, %v11340_v33, 0.0  ;;  %v5850_v31 = vsel %vm5784_vm10, %v11347_v30, 0.0  ;;  %v12155_v41 = vcvt.s32.f32 %v4082_v57 }
 0x9ce   : > { %v5672_v0 = vadd.f32 %v5608_v59, %v5458_v50  ;;  %v5054_v62 = vadd.f32 %v4990_v7, %v4838_v32  ;;  %v4098_v21 = vadd.s32 160, %v11145_v25  ;;  %v4081_v12 = vadd.s32 24, %v11145_v25 }
 0x9cf   : > { %13482 = vst [vmem:[#allocation9_spill] sm:$0xff] %v12155_v41  ;;  %vm4216_vm15 = vcmp.eq.f32.partialorder %v12155_v41, %v11245_v13  ;;  %vm4444_vm4 = vcmp.eq.f32.partialorder %v12155_v41, %v11247_v47  ;;  %vm4674_vm6 = vcmp.eq.f32.partialorder %v12155_v41, %v11263_v45  ;;  %vm4890_vm11 = vcmp.eq.f32.partialorder %v12155_v41, %v11274_v11 }
 0x9d0   : > { %v5882_v57 = vadd.f32 %v5818_v51, %v5672_v0  ;;  %v5280_v56 = vadd.f32 %v5216_v1, %v5054_v62  ;;  %v4282_v52 = vsel %vm4216_vm15, %v11233_v23, 0.0  ;;  %v4510_v59 = vsel %vm4444_vm4, %v11256_v49, 0.0 }
 0x9d1   : > { %v4574_v53 = vadd.f32 %v4510_v59, %v4282_v52  ;;  %v4740_v7 = vsel %vm4674_vm6, %v11265_v37, 0.0  ;;  %vm5116_vm2 = vcmp.eq.f32.partialorder %v12155_v41, %v11288_v27  ;;  %v4097_v50 = vadd.s32 152, %v11145_v25 }
 0x9d2   : > { %5948 = vmatpush.msra.mxu2 %v5882_v57  ;;  %v5490_v32 = vadd.f32 %v5426_v24, %v5280_v56  ;;  %v4956_v3 = vsel %vm4890_vm11, %v11297_v54, 0.0  ;;  %vm5326_vm14 = vcmp.eq.f32.partialorder %v12155_v41, %v11294_v63  ;;  %vm5540_vm9 = vcmp.eq.f32.partialorder %v12155_v41, %v11301_v26 }
 0x9d3   : > { %v4804_v0 = vadd.f32 %v4740_v7, %v4574_v53  ;;  %v5182_v62 = vsel %vm5116_vm2, %v11316_v8, 0.0  ;;  %vm5750_vm13 = vcmp.eq.f32.partialorder %v12155_v41, %v11303_v20  ;;  %v4080_v51 = vadd.s32 16, %v11145_v25 }
 0x9d4   : > { %v5704_v1 = vadd.f32 %v5640_v6, %v5490_v32  ;;  %v5392_v57 = vsel %vm5326_vm14, %v11330_v19, 0.0  ;;  %v5606_v24 = vsel %vm5540_vm9, %v11340_v33, 0.0  ;;  %v12184_v56 = vcvt.s32.f32 %v4098_v21 }
 0x9d5   : > { %v5020_v52 = vadd.f32 %v4956_v3, %v4804_v0  ;;  %v5816_v59 = vsel %vm5750_vm13, %v11347_v30, 0.0  ;;  %v12187_v10 = vcvt.s32.f32 %v4081_v12  ;;  %v12189_v53 = vcvt.s32.f32 %v4097_v50 }
 0x9d6   : > { %13483 = vst [vmem:[#allocation11_spill] sm:$0xff] %v12184_v56  ;;  %v5914_v7 = vadd.f32 %v5850_v31, %v5704_v1  ;;  %vm4248_vm7 = vcmp.eq.f32.partialorder %v12184_v56, %v11245_v13  ;;  %vm4476_vm8 = vcmp.eq.f32.partialorder %v12184_v56, %v11247_v47  ;;  %vm4706_vm0 = vcmp.eq.f32.partialorder %v12184_v56, %v11263_v45 }
 0x9d7   : > { %v5246_v6 = vadd.f32 %v5182_v62, %v5020_v52  ;;  %v4314_v21 = vsel %vm4248_vm7, %v11233_v23, 0.0  ;;  %v4542_v3 = vsel %vm4476_vm8, %v11256_v49, 0.0  ;;  %v4772_v12 = vsel %vm4706_vm0, %v11265_v37, 0.0 }
 0x9d8   : > { %5968 = vmatpush.msra.mxu3 %v5914_v7  ;;  %v4606_v50 = vadd.f32 %v4542_v3, %v4314_v21  ;;  %vm4922_vm5 = vcmp.eq.f32.partialorder %v12184_v56, %v11274_v11  ;;  %vm5148_vm12 = vcmp.eq.f32.partialorder %v12184_v56, %v11288_v27  ;;  %vm5358_vm3 = vcmp.eq.f32.partialorder %v12184_v56, %v11294_v63 }
 0x9d9   : > { %v5456_v31 = vadd.f32 %v5392_v57, %v5246_v6  ;;  %v4988_v32 = vsel %vm4922_vm5, %v11297_v54, 0.0  ;;  %v12207_v0 = vcvt.s32.f32 %v4080_v51  ;;  %v12210_v62 = vadd.s32 144, %v11145_v25 }
 0x9da   : > { %v4836_v1 = vadd.f32 %v4772_v12, %v4606_v50  ;;  %v5214_v52 = vsel %vm5148_vm12, %v11316_v8, 0.0  ;;  %vm5572_vm1 = vcmp.eq.f32.partialorder %v12184_v56, %v11301_v26  ;;  %vm4214_vm10 = vcmp.eq.f32.partialorder %v12187_v10, %v11245_v13 }
 0x9db   : > { %13484 = vst [vmem:[#allocation13_spill] sm:$0xff] %v12207_v0  ;;  %v5670_v7 = vadd.f32 %v5606_v24, %v5456_v31  ;;  %v5424_v21 = vsel %vm5358_vm3, %v11330_v19, 0.0  ;;  %vm5782_vm15 = vcmp.eq.f32.partialorder %v12184_v56, %v11303_v20  ;;  %v4280_v51 = vsel %vm4214_vm10, %v11233_v23, 0.0 }
 0x9dc   : > { %v5052_v57 = vadd.f32 %v4988_v32, %v4836_v1  ;;  %vm4442_vm4 = vcmp.eq.f32.partialorder %v12187_v10, %v11247_v47  ;;  %vm4672_vm6 = vcmp.eq.f32.partialorder %v12187_v10, %v11263_v45  ;;  %vm4888_vm11 = vcmp.eq.f32.partialorder %v12187_v10, %v11274_v11 }
 0x9dd   : > { %v5880_v6 = vadd.f32 %v5816_v59, %v5670_v7  ;;  %v5638_v24 = vsel %vm5572_vm1, %v11340_v33, 0.0  ;;  %v4508_v3 = vsel %vm4442_vm4, %v11256_v49, 0.0  ;;  %v4738_v12 = vsel %vm4672_vm6, %v11265_v37, 0.0 }
 0x9de   : > { %v5278_v50 = vadd.f32 %v5214_v52, %v5052_v57  ;;  %v4572_v31 = vadd.f32 %v4508_v3, %v4280_v51  ;;  %vm5114_vm2 = vcmp.eq.f32.partialorder %v12187_v10, %v11288_v27  ;;  %vm5324_vm14 = vcmp.eq.f32.partialorder %v12187_v10, %v11294_v63 }
 0x9df   : > { %5949 = vmatpush.msra.mxu2 %v5880_v6  ;;  %v5848_v32 = vsel %vm5782_vm15, %v11347_v30, 0.0  ;;  %v4954_v1 = vsel %vm4888_vm11, %v11297_v54, 0.0  ;;  %v5180_v59 = vsel %vm5114_vm2, %v11316_v8, 0.0  ;;  %v5390_v7 = vsel %vm5324_vm14, %v11330_v19, 0.0 }
 0x9e0   : > { %v5488_v56 = vadd.f32 %v5424_v21, %v5278_v50  ;;  %v4802_v41 = vadd.f32 %v4738_v12, %v4572_v31  ;;  %vm5538_vm9 = vcmp.eq.f32.partialorder %v12187_v10, %v11301_v26  ;;  %vm5748_vm13 = vcmp.eq.f32.partialorder %v12187_v10, %v11303_v20 }
 0x9e1   : > { %vm4246_vm7 = vcmp.eq.f32.partialorder %v12189_v53, %v11245_v13  ;;  %vm4474_vm8 = vcmp.eq.f32.partialorder %v12189_v53, %v11247_v47  ;;  %vm4704_vm0 = vcmp.eq.f32.partialorder %v12189_v53, %v11263_v45  ;;  %vm4920_vm5 = vcmp.eq.f32.partialorder %v12189_v53, %v11274_v11 }
 0x9e2   : > { %v5702_v52 = vadd.f32 %v5638_v24, %v5488_v56  ;;  %v5018_v21 = vadd.f32 %v4954_v1, %v4802_v41  ;;  %v4312_v51 = vsel %vm4246_vm7, %v11233_v23, 0.0  ;;  %v4540_v57 = vsel %vm4474_vm8, %v11256_v49, 0.0 }
 0x9e3   : > { %v5604_v6 = vsel %vm5538_vm9, %v11340_v33, 0.0  ;;  %v4604_v3 = vadd.f32 %v4540_v57, %v4312_v51  ;;  %v4770_v12 = vsel %vm4704_vm0, %v11265_v37, 0.0  ;;  %vm5146_vm12 = vcmp.eq.f32.partialorder %v12189_v53, %v11288_v27 }
 0x9e4   : > { %v5912_v50 = vadd.f32 %v5848_v32, %v5702_v52  ;;  %v5244_v31 = vadd.f32 %v5180_v59, %v5018_v21  ;;  %v4986_v36 = vsel %vm4920_vm5, %v11297_v54, 0.0  ;;  %vm5356_vm3 = vcmp.eq.f32.partialorder %v12189_v53, %v11294_v63 }
 0x9e5   : > { %v5814_v41 = vsel %vm5748_vm13, %v11347_v30, 0.0  ;;  %v4834_v56 = vadd.f32 %v4770_v12, %v4604_v3  ;;  %v5212_v24 = vsel %vm5146_vm12, %v11316_v8, 0.0  ;;  %v5422_v1 = vsel %vm5356_vm3, %v11330_v19, 0.0 }
 0x9e6   : > { %5969 = vmatpush.msra.mxu3 %v5912_v50  ;;  %v5454_v51 = vadd.f32 %v5390_v7, %v5244_v31  ;;  %vm5570_vm1 = vcmp.eq.f32.partialorder %v12189_v53, %v11301_v26  ;;  %vm5780_vm10 = vcmp.eq.f32.partialorder %v12189_v53, %v11303_v20  ;;  %vm4212_vm15 = vcmp.eq.f32.partialorder %v12207_v0, %v11245_v13 }
 0x9e7   : > { %v5050_v32 = vadd.f32 %v4986_v36, %v4834_v56  ;;  %v4278_v59 = vsel %vm4212_vm15, %v11233_v23, 0.0  ;;  %vm4440_vm4 = vcmp.eq.f32.partialorder %v12207_v0, %v11247_v47  ;;  %vm4670_vm6 = vcmp.eq.f32.partialorder %v12207_v0, %v11263_v45 }
 0x9e8   : > { %v5668_v52 = vadd.f32 %v5604_v6, %v5454_v51  ;;  %v4506_v7 = vsel %vm4440_vm4, %v11256_v49, 0.0  ;;  %v4736_v21 = vsel %vm4670_vm6, %v11265_v37, 0.0  ;;  %vm4886_vm11 = vcmp.eq.f32.partialorder %v12207_v0, %v11274_v11 }
 0x9e9   : > { %v5276_v57 = vadd.f32 %v5212_v24, %v5050_v32  ;;  %v5636_v3 = vsel %vm5570_vm1, %v11340_v33, 0.0  ;;  %v4570_v36 = vadd.f32 %v4506_v7, %v4278_v59  ;;  %vm5112_vm2 = vcmp.eq.f32.partialorder %v12207_v0, %v11288_v27 }
 0x9ea   : > { %v5878_v12 = vadd.f32 %v5814_v41, %v5668_v52  ;;  %v4952_v50 = vsel %vm4886_vm11, %v11297_v54, 0.0  ;;  %vm5322_vm14 = vcmp.eq.f32.partialorder %v12207_v0, %v11294_v63  ;;  %vm5536_vm9 = vcmp.eq.f32.partialorder %v12207_v0, %v11301_v26 }
 0x9eb   : > { %v5486_v6 = vadd.f32 %v5422_v1, %v5276_v57  ;;  %v5846_v31 = vsel %vm5780_vm10, %v11347_v30, 0.0  ;;  %v4800_v56 = vadd.f32 %v4736_v21, %v4570_v36  ;;  %v5178_v24 = vsel %vm5112_vm2, %v11316_v8, 0.0 }
 0x9ec   : > { %5950 = vmatpush.msra.mxu2 %v5878_v12  ;;  %v5388_v41 = vsel %vm5322_vm14, %v11330_v19, 0.0  ;;  %v5602_v51 = vsel %vm5536_vm9, %v11340_v33, 0.0  ;;  %vm5746_vm13 = vcmp.eq.f32.partialorder %v12207_v0, %v11303_v20  ;;  %v12298_v32 = vcvt.s32.f32 %v12210_v62 }
 0x9ed   : > { %v5700_v1 = vadd.f32 %v5636_v3, %v5486_v6  ;;  %v5016_v59 = vadd.f32 %v4952_v50, %v4800_v56  ;;  %v4079_v52 = vadd.s32 8, %v11145_v25  ;;  %v4095_v7 = vadd.s32 136, %v11145_v25 }
 0x9ee   : > { %13485 = vst [vmem:[#allocation15_spill] sm:$0xff] %v12298_v32  ;;  %vm4244_vm7 = vcmp.eq.f32.partialorder %v12298_v32, %v11245_v13  ;;  %vm4472_vm8 = vcmp.eq.f32.partialorder %v12298_v32, %v11247_v47  ;;  %vm4702_vm0 = vcmp.eq.f32.partialorder %v12298_v32, %v11263_v45  ;;  %vm4918_vm5 = vcmp.eq.f32.partialorder %v12298_v32, %v11274_v11 }
 0x9ef   : > { %v5910_v62 = vadd.f32 %v5846_v31, %v5700_v1  ;;  %v5242_v21 = vadd.f32 %v5178_v24, %v5016_v59  ;;  %v4310_v57 = vsel %vm4244_vm7, %v11233_v23, 0.0  ;;  %v4538_v3 = vsel %vm4472_vm8, %v11256_v49, 0.0 }
 0x9f0   : > { %v4602_v36 = vadd.f32 %v4538_v3, %v4310_v57  ;;  %v4768_v12 = vsel %vm4702_vm0, %v11265_v37, 0.0  ;;  %vm5144_vm12 = vcmp.eq.f32.partialorder %v12298_v32, %v11288_v27  ;;  %v12316_v50 = vcvt.s32.f32 %v11145_v25 }
 0x9f1   : > { %5970 = vmatpush.msra.mxu3 %v5910_v62  ;;  %v5452_v6 = vadd.f32 %v5388_v41, %v5242_v21  ;;  %v4984_v56 = vsel %vm4918_vm5, %v11297_v54, 0.0  ;;  %vm5354_vm3 = vcmp.eq.f32.partialorder %v12298_v32, %v11294_v63  ;;  %vm5568_vm1 = vcmp.eq.f32.partialorder %v12298_v32, %v11301_v26 }
 0x9f2   : > { %v12325_v31 = vmul.f32 %v11588_v5, %v11492_v58  ;;  %v5812_v24 = vsel %vm5746_vm13, %v11347_v30, 0.0  ;;  %v4832_v1 = vadd.f32 %v4768_v12, %v4602_v36  ;;  %vm5778_vm10 = vcmp.eq.f32.partialorder %v12298_v32, %v11303_v20 }
 0x9f3   : > { %v5666_v41 = vadd.f32 %v5602_v51, %v5452_v6  ;;  %v5210_v59 = vsel %vm5144_vm12, %v11316_v8, 0.0  ;;  %v5420_v62 = vsel %vm5354_vm3, %v11330_v19, 0.0  ;;  %v12335_v21 = vcvt.s32.f32 %v4079_v52 }
 0x9f4   : > { %v5048_v57 = vadd.f32 %v4984_v56, %v4832_v1  ;;  %v5634_v58 = vsel %vm5568_vm1, %v11340_v33, 0.0  ;;  %v5844_v5 = vsel %vm5778_vm10, %v11347_v30, 0.0  ;;  %v12339_v3 = vcvt.s32.f32 %v4095_v7 }
 0x9f5   : > { %13486 = vst [vmem:[#allocation17_spill] sm:$0xff] %v12335_v21  ;;  %v5876_v0 = vadd.f32 %v5812_v24, %v5666_v41  ;;  %vm4210_vm15 = vcmp.eq.f32.partialorder %v12335_v21, %v11245_v13  ;;  %vm4438_vm4 = vcmp.eq.f32.partialorder %v12335_v21, %v11247_v47  ;;  %vm4668_vm6 = vcmp.eq.f32.partialorder %v12335_v21, %v11263_v45 }
 0x9f6   : > { %13487 = vst [vmem:[#allocation19_spill] sm:$0xff] %v12339_v3  ;;  %vm4208_vm11 = vcmp.eq.f32.partialorder %v12316_v50, %v11245_v13  ;;  %v5274_v51 = vadd.f32 %v5210_v59, %v5048_v57  ;;  %v4276_v52 = vsel %vm4210_vm15, %v11233_v23, 0.0  ;;  %v4504_v36 = vsel %vm4438_vm4, %v11256_v49, 0.0 }
 0x9f7   : > { %v4734_v7 = vsel %vm4668_vm6, %v11265_v37, 0.0  ;;  %5951 = vmatpush.msra.mxu2 %v5876_v0  ;;  %v4568_v12 = vadd.f32 %v4504_v36, %v4276_v52  ;;  %vm4884_vm2 = vcmp.eq.f32.partialorder %v12335_v21, %v11274_v11  ;;  %vm5110_vm14 = vcmp.eq.f32.partialorder %v12335_v21, %v11288_v27 }
 0x9f8   : > { %vm5320_vm9 = vcmp.eq.f32.partialorder %v12335_v21, %v11294_v63  ;;  %v5484_v6 = vadd.f32 %v5420_v62, %v5274_v51  ;;  %v4950_v56 = vsel %vm4884_vm2, %v11297_v54, 0.0  ;;  %vm4436_vm13 = vcmp.eq.f32.partialorder %v12316_v50, %v11247_v47 }
 0x9f9   : > { %vm4666_vm7 = vcmp.eq.f32.partialorder %v12316_v50, %v11263_v45  ;;  %v4798_v0 = vadd.f32 %v4734_v7, %v4568_v12  ;;  %v5176_v24 = vsel %vm5110_vm14, %v11316_v8, 0.0  ;;  %vm5534_vm8 = vcmp.eq.f32.partialorder %v12335_v21, %v11301_v26 }
 0x9fa   : > { %vm4242_vm0 = vcmp.eq.f32.partialorder %v12339_v3, %v11245_v13  ;;  %v5698_v1 = vadd.f32 %v5634_v58, %v5484_v6  ;;  %v5386_v41 = vsel %vm5320_vm9, %v11330_v19, 0.0  ;;  %vm5744_vm5 = vcmp.eq.f32.partialorder %v12335_v21, %v11303_v20 }
 0x9fb   : > { %v4308_v59 = vsel %vm4242_vm0, %v11233_v23, 0.0  ;;  %v5014_v62 = vadd.f32 %v4950_v56, %v4798_v0  ;;  %vm4470_vm12 = vcmp.eq.f32.partialorder %v12339_v3, %v11247_v47  ;;  %vm4700_vm3 = vcmp.eq.f32.partialorder %v12339_v3, %v11263_v45 }
 0x9fc   : > { %vm4916_vm1 = vcmp.eq.f32.partialorder %v12339_v3, %v11274_v11  ;;  %v5908_v57 = vadd.f32 %v5844_v5, %v5698_v1  ;;  %v5600_v58 = vsel %vm5534_vm8, %v11340_v33, 0.0  ;;  %v4536_v51 = vsel %vm4470_vm12, %v11256_v49, 0.0 }
 0x9fd   : > { %v4766_v52 = vsel %vm4700_vm3, %v11265_v37, 0.0  ;;  %v5240_v36 = vadd.f32 %v5176_v24, %v5014_v62  ;;  %v4600_v7 = vadd.f32 %v4536_v51, %v4308_v59  ;;  %vm5142_vm10 = vcmp.eq.f32.partialorder %v12339_v3, %v11288_v27 }
 0x9fe   : > { %vm5352_vm15 = vcmp.eq.f32.partialorder %v12339_v3, %v11294_v63  ;;  %5971 = vmatpush.msra.mxu3 %v5908_v57  ;;  %v5810_v12 = vsel %vm5744_vm5, %v11347_v30, 0.0  ;;  %v4982_v6 = vsel %vm4916_vm1, %v11297_v54, 0.0  ;;  %v5208_v5 = vsel %vm5142_vm10, %v11316_v8, 0.0 }
 0x9ff   : > { %vm5566_vm4 = vcmp.eq.f32.partialorder %v12339_v3, %v11301_v26  ;;  %v5450_v56 = vadd.f32 %v5386_v41, %v5240_v36  ;;  %v4830_v0 = vadd.f32 %v4766_v52, %v4600_v7  ;;  %v5418_v24 = vsel %vm5352_vm15, %v11330_v19, 0.0 }
 0xa00   : > { %vm5776_vm6 = vcmp.eq.f32.partialorder %v12339_v3, %v11303_v20  ;;  %v4274_v1 = vsel %vm4208_vm11, %v11233_v23, 0.0  ;;  %v4502_v59 = vsel %vm4436_vm13, %v11256_v49, 0.0  ;;  %v4732_v41 = vsel %vm4666_vm7, %v11265_v37, 0.0 }
 0xa01   : > { %vm4882_vm2 = vcmp.eq.f32.partialorder %v12316_v50, %v11274_v11  ;;  %v5664_v62 = vadd.f32 %v5600_v58, %v5450_v56  ;;  %v5046_v57 = vadd.f32 %v4982_v6, %v4830_v0  ;;  %v5632_v51 = vsel %vm5566_vm4, %v11340_v33, 0.0 }
 0xa02   : > { %v4566_v52 = vadd.f32 %v4502_v59, %v4274_v1  ;;  %v5842_v36 = vsel %vm5776_vm6, %v11347_v30, 0.0  ;;  %v4948_v7 = vsel %vm4882_vm2, %v11297_v54, 0.0  ;;  %vm5108_vm11 = vcmp.eq.f32.partialorder %v12316_v50, %v11288_v27 }
 0xa03   : > { %vm5318_vm14 = vcmp.eq.f32.partialorder %v12316_v50, %v11294_v63  ;;  %v5874_v3 = vadd.f32 %v5810_v12, %v5664_v62  ;;  %v5272_v21 = vadd.f32 %v5208_v5, %v5046_v57  ;;  %vm5532_vm9 = vcmp.eq.f32.partialorder %v12316_v50, %v11301_v26 }
 0xa04   : > { %v4796_v32 = vadd.f32 %v4732_v41, %v4566_v52  ;;  %v5174_v58 = vsel %vm5108_vm11, %v11316_v8, 0.0  ;;  %v5384_v6 = vsel %vm5318_vm14, %v11330_v19, 0.0  ;;  %vm5742_vm13 = vcmp.eq.f32.partialorder %v12316_v50, %v11303_v20 }
 0xa05   : > { %v4094_v56 = vadd.s32 128, %v11145_v25  ;;  %5952 = vmatpush.msra.mxu2 %v5874_v3  ;;  %v5482_v0 = vadd.f32 %v5418_v24, %v5272_v21  ;;  %vm4239_vm7 = vcmp.eq.f32.partialorder %v11187_v48, %v11504_v42  ;;  %vm4467_vm8 = vcmp.eq.f32.partialorder %v11187_v48, %v11513_v29 }
 0xa06   : > { %v5012_v1 = vadd.f32 %v4948_v7, %v4796_v32  ;;  %v5598_v12 = vsel %vm5532_vm9, %v11340_v33, 0.0  ;;  %v4305_v59 = vsel %vm4239_vm7, %v11476_v22, 0.0  ;;  %v4533_v41 = vsel %vm4467_vm8, %v11498_v28, 0.0 }
 0xa07   : > { %v12426_v5 = vcvt.s32.f32 %v4094_v56  ;;  %v5696_v62 = vadd.f32 %v5632_v51, %v5482_v0  ;;  %v4597_v25 = vadd.f32 %v4533_v41, %v4305_v59  ;;  %vm4697_vm0 = vcmp.eq.f32.partialorder %v11187_v48, %v11515_v61 }
 0xa08   : > { %v5238_v57 = vadd.f32 %v5174_v58, %v5012_v1  ;;  %vm4913_vm6 = vcmp.eq.f32.partialorder %v11187_v48, %v11522_v9  ;;  %vm5139_vm2 = vcmp.eq.f32.partialorder %v11187_v48, %v11529_v40  ;;  %vm5349_vm11 = vcmp.eq.f32.partialorder %v11187_v48, %v11533_v34 }
 0xa09   : > { %vm4240_vm5 = vcmp.eq.f32.partialorder %v12426_v5, %v11245_v13  ;;  %vm4468_vm12 = vcmp.eq.f32.partialorder %v12426_v5, %v11247_v47  ;;  %vm4698_vm3 = vcmp.eq.f32.partialorder %v12426_v5, %v11263_v45  ;;  %vm4914_vm1 = vcmp.eq.f32.partialorder %v12426_v5, %v11274_v11 }
 0xa0a   : > { %v5906_v32 = vadd.f32 %v5842_v36, %v5696_v62  ;;  %v5448_v21 = vadd.f32 %v5384_v6, %v5238_v57  ;;  %v4306_v3 = vsel %vm4240_vm5, %v11233_v23, 0.0  ;;  %v4534_v24 = vsel %vm4468_vm12, %v11256_v49, 0.0 }
 0xa0b   : > { %v5808_v13 = vsel %vm5742_vm13, %v11347_v30, 0.0  ;;  %v4598_v51 = vadd.f32 %v4534_v24, %v4306_v3  ;;  %v4764_v47 = vsel %vm4698_vm3, %v11265_v37, 0.0  ;;  %vm5140_vm10 = vcmp.eq.f32.partialorder %v12426_v5, %v11288_v27 }
 0xa0c   : > { %v12450_v45 = vperm.slane %v12325_v31, 0  ;;  %5972 = vmatpush.msra.mxu3 %v5906_v32  ;;  %v5662_v11 = vadd.f32 %v5598_v12, %v5448_v21  ;;  %v4980_v23 = vsel %vm4914_vm1, %v11297_v54, 0.0  ;;  %vm5350_vm15 = vcmp.eq.f32.partialorder %v12426_v5, %v11294_v63 }
 0xa0d   : > { %v4828_v49 = vadd.f32 %v4764_v47, %v4598_v51  ;;  %v5206_v52 = vsel %vm5140_vm10, %v11316_v8, 0.0  ;;  %vm5564_vm4 = vcmp.eq.f32.partialorder %v12426_v5, %v11301_v26  ;;  %v4763_v37 = vsel %vm4697_vm0, %v11517_v43, 0.0 }
 0xa0e   : > { %v5872_v27 = vadd.f32 %v5808_v13, %v5662_v11  ;;  %v5416_v31 = vsel %vm5350_vm15, %v11330_v19, 0.0  ;;  %v4827_v36 = vadd.f32 %v4763_v37, %v4597_v25  ;;  %v4979_v63 = vsel %vm4913_vm6, %v11560_v39, 0.0 }
 0xa0f   : > { %v5044_v54 = vadd.f32 %v4980_v23, %v4828_v49  ;;  %v5630_v26 = vsel %vm5564_vm4, %v11340_v33, 0.0  ;;  %vm5774_vm14 = vcmp.eq.f32.partialorder %v12426_v5, %v11303_v20  ;;  %v5205_v19 = vsel %vm5139_vm2, %v11573_v44, 0.0 }
 0xa10   : > { %5953 = vmatpush.msra.mxu2 %v5872_v27  ;;  %v5043_v8 = vadd.f32 %v4979_v63, %v4827_v36  ;;  %v5415_v58 = vsel %vm5349_vm11, %v11578_v15, 0.0  ;;  %vm5563_vm9 = vcmp.eq.f32.partialorder %v11187_v48, %v11563_v14  ;;  %vm4271_vm13 = vcmp.eq.f32.partialorder %v11209_v60, %v11504_v42 }
 0xa11   : > { %v5270_v7 = vadd.f32 %v5206_v52, %v5044_v54  ;;  %vm5773_vm7 = vcmp.eq.f32.partialorder %v11187_v48, %v11575_v38  ;;  %v4337_v33 = vsel %vm4271_vm13, %v11476_v22, 0.0  ;;  %vm4499_vm8 = vcmp.eq.f32.partialorder %v11209_v60, %v11513_v29 }
 0xa12   : > { %v5269_v6 = vadd.f32 %v5205_v19, %v5043_v8  ;;  %v4565_v56 = vsel %vm4499_vm8, %v11498_v28, 0.0  ;;  %vm4729_vm0 = vcmp.eq.f32.partialorder %v11209_v60, %v11515_v61  ;;  %vm4945_vm5 = vcmp.eq.f32.partialorder %v11209_v60, %v11522_v9 }
 0xa13   : > { %v5480_v20 = vadd.f32 %v5416_v31, %v5270_v7  ;;  %v5840_v0 = vsel %vm5774_vm14, %v11347_v30, 0.0  ;;  %v4629_v12 = vadd.f32 %v4565_v56, %v4337_v33  ;;  %v5629_v48 = vsel %vm5563_vm9, %v11585_v35, 0.0 }
 0xa14   : > { %v5479_v1 = vadd.f32 %v5415_v58, %v5269_v6  ;;  %v5839_v41 = vsel %vm5773_vm7, %v12450_v45, 0.0  ;;  %v4795_v62 = vsel %vm4729_vm0, %v11517_v43, 0.0  ;;  %v5011_v32 = vsel %vm4945_vm5, %v11560_v39, 0.0 }
 0xa15   : > { %v5694_v59 = vadd.f32 %v5630_v26, %v5480_v20  ;;  %v4859_v25 = vadd.f32 %v4795_v62, %v4629_v12  ;;  %vm5171_vm12 = vcmp.eq.f32.partialorder %v11209_v60, %v11529_v40  ;;  %vm5381_vm3 = vcmp.eq.f32.partialorder %v11209_v60, %v11533_v34 }
 0xa16   : > { %v5693_v57 = vadd.f32 %v5629_v48, %v5479_v1  ;;  %vm5595_vm1 = vcmp.eq.f32.partialorder %v11209_v60, %v11563_v14  ;;  %vm4237_vm10 = vcmp.eq.f32.partialorder %v11367_v17, %v11504_v42  ;;  %vm5805_vm15 = vcmp.eq.f32.partialorder %v11209_v60, %v11575_v38 }
 0xa17   : > { %v5904_v21 = vadd.f32 %v5840_v0, %v5694_v59  ;;  %v5075_v3 = vadd.f32 %v5011_v32, %v4859_v25  ;;  %v4303_v24 = vsel %vm4237_vm10, %v11476_v22, 0.0  ;;  %v5237_v13 = vsel %vm5171_vm12, %v11573_v44, 0.0 }
 0xa18   : > { %v5903_v30 = vadd.f32 %v5839_v41, %v5693_v57  ;;  %vm4465_vm4 = vcmp.eq.f32.partialorder %v11367_v17, %v11513_v29  ;;  %vm4695_vm6 = vcmp.eq.f32.partialorder %v11367_v17, %v11515_v61  ;;  %vm4911_vm2 = vcmp.eq.f32.partialorder %v11367_v17, %v11522_v9 }
 0xa19   : > { %5973 = vmatpush.msra.mxu3 %v5904_v21  ;;  %v5301_v51 = vadd.f32 %v5237_v13, %v5075_v3  ;;  %v5447_v47 = vsel %vm5381_vm3, %v11578_v15, 0.0  ;;  %v5661_v60 = vsel %vm5595_vm1, %v11585_v35, 0.0  ;;  %v4531_v11 = vsel %vm4465_vm4, %v11498_v28, 0.0 }
 0xa1a   : > { %5978 = vmatpush.msrb.mxu0 %v5903_v30  ;;  %v5871_v23 = vsel %vm5805_vm15, %v12450_v45, 0.0  ;;  %v4595_v49 = vadd.f32 %v4531_v11, %v4303_v24  ;;  %v4761_v52 = vsel %vm4695_vm6, %v11517_v43, 0.0  ;;  %vm5137_vm11 = vcmp.eq.f32.partialorder %v11367_v17, %v11529_v40 }
 0xa1b   : > { %v5511_v37 = vadd.f32 %v5447_v47, %v5301_v51  ;;  %v4977_v27 = vsel %vm4911_vm2, %v11560_v39, 0.0  ;;  %vm5347_vm14 = vcmp.eq.f32.partialorder %v11367_v17, %v11533_v34  ;;  %vm5561_vm9 = vcmp.eq.f32.partialorder %v11367_v17, %v11563_v14 }
 0xa1c   : > { %v4825_v31 = vadd.f32 %v4761_v52, %v4595_v49  ;;  %vm5771_vm13 = vcmp.eq.f32.partialorder %v11367_v17, %v11575_v38  ;;  %vm4269_vm7 = vcmp.eq.f32.partialorder %v11598_v46, %v11504_v42  ;;  %vm4497_vm8 = vcmp.eq.f32.partialorder %v11598_v46, %v11513_v29 }
 0xa1d   : > { %v5725_v36 = vadd.f32 %v5661_v60, %v5511_v37  ;;  %v4335_v54 = vsel %vm4269_vm7, %v11476_v22, 0.0  ;;  %v4563_v63 = vsel %vm4497_vm8, %v11498_v28, 0.0  ;;  %vm4727_vm0 = vcmp.eq.f32.partialorder %v11598_v46, %v11515_v61 }
 0xa1e   : > { %v5041_v26 = vadd.f32 %v4977_v27, %v4825_v31  ;;  %v5203_v8 = vsel %vm5137_vm11, %v11573_v44, 0.0  ;;  %v4627_v19 = vadd.f32 %v4563_v63, %v4335_v54  ;;  %vm4943_vm5 = vcmp.eq.f32.partialorder %v11598_v46, %v11522_v9 }
 0xa1f   : > { %v5935_v7 = vadd.f32 %v5871_v23, %v5725_v36  ;;  %v5413_v58 = vsel %vm5347_vm14, %v11578_v15, 0.0  ;;  %v5627_v6 = vsel %vm5561_vm9, %v11585_v35, 0.0  ;;  %v4793_v33 = vsel %vm4727_vm0, %v11517_v43, 0.0 }
 0xa20   : > { %v5267_v20 = vadd.f32 %v5203_v8, %v5041_v26  ;;  %v5837_v56 = vsel %vm5771_vm13, %v12450_v45, 0.0  ;;  %v4857_v0 = vadd.f32 %v4793_v33, %v4627_v19  ;;  %vm5169_vm12 = vcmp.eq.f32.partialorder %v11598_v46, %v11529_v40 }
 0xa21   : > { %5998 = vmatpush.msrb.mxu1 %v5935_v7  ;;  %v5009_v1 = vsel %vm4943_vm5, %v11560_v39, 0.0  ;;  %vm5379_vm3 = vcmp.eq.f32.partialorder %v11598_v46, %v11533_v34  ;;  %vm4235_vm1 = vcmp.eq.f32.partialorder %v11600_v4, %v11504_v42  ;;  %vm4463_vm10 = vcmp.eq.f32.partialorder %v11600_v4, %v11513_v29 }
 0xa22   : > { %v5477_v12 = vadd.f32 %v5413_v58, %v5267_v20  ;;  %v5073_v59 = vadd.f32 %v5009_v1, %v4857_v0  ;;  %vm5593_vm15 = vcmp.eq.f32.partialorder %v11598_v46, %v11563_v14  ;;  %vm5803_vm4 = vcmp.eq.f32.partialorder %v11598_v46, %v11575_v38 }
 0xa23   : > { %v5235_v17 = vsel %vm5169_vm12, %v11573_v44, 0.0  ;;  %v4301_v48 = vsel %vm4235_vm1, %v11476_v22, 0.0  ;;  %v4529_v41 = vsel %vm4463_vm10, %v11498_v28, 0.0  ;;  %vm4693_vm6 = vcmp.eq.f32.partialorder %v11600_v4, %v11515_v61 }
 0xa24   : > { %v5691_v62 = vadd.f32 %v5627_v6, %v5477_v12  ;;  %v5299_v57 = vadd.f32 %v5235_v17, %v5073_v59  ;;  %v4593_v25 = vadd.f32 %v4529_v41, %v4301_v48  ;;  %vm4909_vm2 = vcmp.eq.f32.partialorder %v11600_v4, %v11522_v9 }
 0xa25   : > { %v5445_v32 = vsel %vm5379_vm3, %v11578_v15, 0.0  ;;  %v5659_v21 = vsel %vm5593_vm15, %v11585_v35, 0.0  ;;  %v5869_v46 = vsel %vm5803_vm4, %v12450_v45, 0.0  ;;  %v4759_v30 = vsel %vm4693_vm6, %v11517_v43, 0.0 }
 0xa26   : > { %v5901_v3 = vadd.f32 %v5837_v56, %v5691_v62  ;;  %v5509_v24 = vadd.f32 %v5445_v32, %v5299_v57  ;;  %v4823_v13 = vadd.f32 %v4759_v30, %v4593_v25  ;;  %vm5135_vm11 = vcmp.eq.f32.partialorder %v11600_v4, %v11529_v40 }
 0xa27   : > { %v4975_v51 = vsel %vm4909_vm2, %v11560_v39, 0.0  ;;  %vm5345_vm14 = vcmp.eq.f32.partialorder %v11600_v4, %v11533_v34  ;;  %vm5559_vm9 = vcmp.eq.f32.partialorder %v11600_v4, %v11563_v14  ;;  %vm4267_vm13 = vcmp.eq.f32.partialorder %v11604_v18, %v11504_v42 }
 0xa28   : > { %5979 = vmatpush.msrb.mxu0 %v5901_v3  ;;  %v5723_v47 = vadd.f32 %v5659_v21, %v5509_v24  ;;  %v5039_v60 = vadd.f32 %v4975_v51, %v4823_v13  ;;  %vm5769_vm7 = vcmp.eq.f32.partialorder %v11600_v4, %v11575_v38  ;;  %v4333_v11 = vsel %vm4267_vm13, %v11476_v22, 0.0 }
 0xa29   : > { %v5201_v23 = vsel %vm5135_vm11, %v11573_v44, 0.0  ;;  %vm4495_vm8 = vcmp.eq.f32.partialorder %v11604_v18, %v11513_v29  ;;  %vm4725_vm0 = vcmp.eq.f32.partialorder %v11604_v18, %v11515_v61  ;;  %vm4941_vm5 = vcmp.eq.f32.partialorder %v11604_v18, %v11522_v9 }
 0xa2a   : > { %v5933_v49 = vadd.f32 %v5869_v46, %v5723_v47  ;;  %v5265_v52 = vadd.f32 %v5201_v23, %v5039_v60  ;;  %v5411_v37 = vsel %vm5345_vm14, %v11578_v15, 0.0  ;;  %v4561_v27 = vsel %vm4495_vm8, %v11498_v28, 0.0 }
 0xa2b   : > { %v5625_v4 = vsel %vm5559_vm9, %v11585_v35, 0.0  ;;  %v5835_v31 = vsel %vm5769_vm7, %v12450_v45, 0.0  ;;  %v4625_v36 = vadd.f32 %v4561_v27, %v4333_v11  ;;  %vm5167_vm12 = vcmp.eq.f32.partialorder %v11604_v18, %v11529_v40 }
 0xa2c   : > { %5999 = vmatpush.msrb.mxu1 %v5933_v49  ;;  %v5475_v54 = vadd.f32 %v5411_v37, %v5265_v52  ;;  %v4791_v63 = vsel %vm4725_vm0, %v11517_v43, 0.0  ;;  %v5007_v26 = vsel %vm4941_vm5, %v11560_v39, 0.0  ;;  %vm5377_vm3 = vcmp.eq.f32.partialorder %v11604_v18, %v11533_v34  ;;  %v13488_v49 = vld [vmem:[#allocation6_spill] sm:$0xff] }
 0xa2d   : > { %v4855_v8 = vadd.f32 %v4791_v63, %v4625_v36  ;;  %vm5591_vm1 = vcmp.eq.f32.partialorder %v11604_v18, %v11563_v14  ;;  %vm5801_vm10 = vcmp.eq.f32.partialorder %v11604_v18, %v11575_v38  ;;  %vm4233_vm15 = vcmp.eq.f32.partialorder %v11606_v16, %v11504_v42 }
 0xa2e   : > { %v5689_v19 = vadd.f32 %v5625_v4, %v5475_v54  ;;  %v4299_v7 = vsel %vm4233_vm15, %v11476_v22, 0.0  ;;  %vm4461_vm4 = vcmp.eq.f32.partialorder %v11606_v16, %v11513_v29  ;;  %vm4691_vm6 = vcmp.eq.f32.partialorder %v11606_v16, %v11515_v61 }
 0xa2f   : > { %v5071_v58 = vadd.f32 %v5007_v26, %v4855_v8  ;;  %v5233_v6 = vsel %vm5167_vm12, %v11573_v44, 0.0  ;;  %v4527_v33 = vsel %vm4461_vm4, %v11498_v28, 0.0  ;;  %vm4907_vm2 = vcmp.eq.f32.partialorder %v11606_v16, %v11522_v9 }
 0xa30   : > { %v5899_v20 = vadd.f32 %v5835_v31, %v5689_v19  ;;  %v5443_v56 = vsel %vm5377_vm3, %v11578_v15, 0.0  ;;  %v4591_v0 = vadd.f32 %v4527_v33, %v4299_v7  ;;  %vm5133_vm11 = vcmp.eq.f32.partialorder %v11606_v16, %v11529_v40 }
 0xa31   : > { %v5297_v1 = vadd.f32 %v5233_v6, %v5071_v58  ;;  %v5657_v12 = vsel %vm5591_vm1, %v11585_v35, 0.0  ;;  %v5867_v59 = vsel %vm5801_vm10, %v12450_v45, 0.0  ;;  %v4757_v17 = vsel %vm4691_vm6, %v11517_v43, 0.0  ;;  %v13489_v6 = vld [vmem:[#allocation8_spill] sm:$0xff] }
 0xa32   : > { %5980 = vmatpush.msrb.mxu0 %v5899_v20  ;;  %v4821_v48 = vadd.f32 %v4757_v17, %v4591_v0  ;;  %v4973_v41 = vsel %vm4907_vm2, %v11560_v39, 0.0  ;;  %v5199_v62 = vsel %vm5133_vm11, %v11573_v44, 0.0  ;;  %vm5343_vm14 = vcmp.eq.f32.partialorder %v11606_v16, %v11533_v34 }
 0xa33   : > { %v5507_v57 = vadd.f32 %v5443_v56, %v5297_v1  ;;  %vm5557_vm9 = vcmp.eq.f32.partialorder %v11606_v16, %v11563_v14  ;;  %vm4265_vm13 = vcmp.eq.f32.partialorder %v11608_v55, %v11504_v42  ;;  %vm4493_vm7 = vcmp.eq.f32.partialorder %v11608_v55, %v11513_v29 }
 0xa34   : > { %v5037_v18 = vadd.f32 %v4973_v41, %v4821_v48  ;;  %v4331_v25 = vsel %vm4265_vm13, %v11476_v22, 0.0  ;;  %v4559_v32 = vsel %vm4493_vm7, %v11498_v28, 0.0  ;;  %vm4723_vm8 = vcmp.eq.f32.partialorder %v11608_v55, %v11515_v61 }
 0xa35   : > { %v5721_v21 = vadd.f32 %v5657_v12, %v5507_v57  ;;  %v5409_v46 = vsel %vm5343_vm14, %v11578_v15, 0.0  ;;  %v4623_v30 = vadd.f32 %v4559_v32, %v4331_v25  ;;  %vm4939_vm0 = vcmp.eq.f32.partialorder %v11608_v55, %v11522_v9 }
 0xa36   : > { %v5263_v3 = vadd.f32 %v5199_v62, %v5037_v18  ;;  %v5623_v24 = vsel %vm5557_vm9, %v11585_v35, 0.0  ;;  %v4789_v13 = vsel %vm4723_vm8, %v11517_v43, 0.0  ;;  %vm5165_vm5 = vcmp.eq.f32.partialorder %v11608_v55, %v11529_v40 }
 0xa37   : > { %v5931_v51 = vadd.f32 %v5867_v59, %v5721_v21  ;;  %vm5767_vm12 = vcmp.eq.f32.partialorder %v11606_v16, %v11575_v38  ;;  %v4853_v47 = vadd.f32 %v4789_v13, %v4623_v30  ;;  %v5005_v60 = vsel %vm4939_vm0, %v11560_v39, 0.0  ;;  %v13490_v21 = vld [vmem:[#allocation10_spill] sm:$0xff] }
 0xa38   : > { %v5473_v11 = vadd.f32 %v5409_v46, %v5263_v3  ;;  %v5231_v23 = vsel %vm5165_vm5, %v11573_v44, 0.0  ;;  %vm5375_vm3 = vcmp.eq.f32.partialorder %v11608_v55, %v11533_v34  ;;  %vm4231_vm1 = vcmp.eq.f32.partialorder %v13488_v49, %v11504_v42 }
 0xa39   : > { %6000 = vmatpush.msrb.mxu1 %v5931_v51  ;;  %v5069_v52 = vadd.f32 %v5005_v60, %v4853_v47  ;;  %vm5589_vm10 = vcmp.eq.f32.partialorder %v11608_v55, %v11563_v14  ;;  %vm5799_vm15 = vcmp.eq.f32.partialorder %v11608_v55, %v11575_v38  ;;  %v4297_v37 = vsel %vm4231_vm1, %v11476_v22, 0.0 }
 0xa3a   : > { %v5687_v27 = vadd.f32 %v5623_v24, %v5473_v11  ;;  %vm4459_vm4 = vcmp.eq.f32.partialorder %v13488_v49, %v11513_v29  ;;  %vm4689_vm6 = vcmp.eq.f32.partialorder %v13488_v49, %v11515_v61  ;;  %vm4905_vm2 = vcmp.eq.f32.partialorder %v13488_v49, %v11522_v9 }
 0xa3b   : > { %v5833_v4 = vsel %vm5767_vm12, %v12450_v45, 0.0  ;;  %v5295_v31 = vadd.f32 %v5231_v23, %v5069_v52  ;;  %v5441_v55 = vsel %vm5375_vm3, %v11578_v15, 0.0  ;;  %v4525_v36 = vsel %vm4459_vm4, %v11498_v28, 0.0 }
 0xa3c   : > { %v5897_v54 = vadd.f32 %v5833_v4, %v5687_v27  ;;  %v5655_v63 = vsel %vm5589_vm10, %v11585_v35, 0.0  ;;  %v5865_v26 = vsel %vm5799_vm15, %v12450_v45, 0.0  ;;  %v4589_v8 = vadd.f32 %v4525_v36, %v4297_v37 }
 0xa3d   : > { %v5505_v19 = vadd.f32 %v5441_v55, %v5295_v31  ;;  %v4755_v7 = vsel %vm4689_vm6, %v11517_v43, 0.0  ;;  %v4971_v58 = vsel %vm4905_vm2, %v11560_v39, 0.0  ;;  %vm5131_vm11 = vcmp.eq.f32.partialorder %v13488_v49, %v11529_v40  ;;  %v13491_v55 = vld [vmem:[#allocation12_spill] sm:$0xff] }
 0xa3e   : > { %5981 = vmatpush.msrb.mxu0 %v5897_v54  ;;  %v4819_v16 = vadd.f32 %v4755_v7, %v4589_v8  ;;  %vm5341_vm14 = vcmp.eq.f32.partialorder %v13488_v49, %v11533_v34  ;;  %vm5555_vm9 = vcmp.eq.f32.partialorder %v13488_v49, %v11563_v14  ;;  %vm4263_vm13 = vcmp.eq.f32.partialorder %v13489_v6, %v11504_v42 }
 0xa3f   : > { %v5719_v33 = vadd.f32 %v5655_v63, %v5505_v19  ;;  %vm5765_vm7 = vcmp.eq.f32.partialorder %v13488_v49, %v11575_v38  ;;  %v4329_v20 = vsel %vm4263_vm13, %v11476_v22, 0.0  ;;  %vm4491_vm8 = vcmp.eq.f32.partialorder %v13489_v6, %v11513_v29 }
 0xa40   : > { %v5035_v56 = vadd.f32 %v4971_v58, %v4819_v16  ;;  %v4557_v0 = vsel %vm4491_vm8, %v11498_v28, 0.0  ;;  %vm4721_vm0 = vcmp.eq.f32.partialorder %v13489_v6, %v11515_v61  ;;  %vm4937_vm5 = vcmp.eq.f32.partialorder %v13489_v6, %v11522_v9 }
 0xa41   : > { %v5929_v1 = vadd.f32 %v5865_v26, %v5719_v33  ;;  %v5197_v12 = vsel %vm5131_vm11, %v11573_v44, 0.0  ;;  %v5407_v59 = vsel %vm5341_vm14, %v11578_v15, 0.0  ;;  %v4621_v17 = vadd.f32 %v4557_v0, %v4329_v20 }
 0xa42   : > { %v5261_v48 = vadd.f32 %v5197_v12, %v5035_v56  ;;  %v5621_v41 = vsel %vm5555_vm9, %v11585_v35, 0.0  ;;  %v4787_v62 = vsel %vm4721_vm0, %v11517_v43, 0.0  ;;  %vm5163_vm12 = vcmp.eq.f32.partialorder %v13489_v6, %v11529_v40 }
 0xa43   : > { %6001 = vmatpush.msrb.mxu1 %v5929_v1  ;;  %v5831_v57 = vsel %vm5765_vm7, %v12450_v45, 0.0  ;;  %v4851_v18 = vadd.f32 %v4787_v62, %v4621_v17  ;;  %v5003_v25 = vsel %vm4937_vm5, %v11560_v39, 0.0  ;;  %vm5373_vm3 = vcmp.eq.f32.partialorder %v13489_v6, %v11533_v34 }
 0xa44   : > { %v5471_v32 = vadd.f32 %v5407_v59, %v5261_v48  ;;  %vm5587_vm1 = vcmp.eq.f32.partialorder %v13489_v6, %v11563_v14  ;;  %vm4229_vm10 = vcmp.eq.f32.partialorder %v13490_v21, %v11504_v42  ;;  %vm4457_vm15 = vcmp.eq.f32.partialorder %v13490_v21, %v11513_v29 }
 0xa45   : > { %v5067_v46 = vadd.f32 %v5003_v25, %v4851_v18  ;;  %v5229_v30 = vsel %vm5163_vm12, %v11573_v44, 0.0  ;;  %v4295_v3 = vsel %vm4229_vm10, %v11476_v22, 0.0  ;;  %v4523_v24 = vsel %vm4457_vm15, %v11498_v28, 0.0 }
 0xa46   : > { %v5685_v13 = vadd.f32 %v5621_v41, %v5471_v32  ;;  %v4587_v51 = vadd.f32 %v4523_v24, %v4295_v3  ;;  %vm4687_vm4 = vcmp.eq.f32.partialorder %v13490_v21, %v11515_v61  ;;  %vm4903_vm6 = vcmp.eq.f32.partialorder %v13490_v21, %v11522_v9  ;;  %v13492_v24 = vld [vmem:[#allocation14_spill] sm:$0xff] }
 0xa47   : > { %v5293_v47 = vadd.f32 %v5229_v30, %v5067_v46  ;;  %v5439_v60 = vsel %vm5373_vm3, %v11578_v15, 0.0  ;;  %v4753_v11 = vsel %vm4687_vm4, %v11517_v43, 0.0  ;;  %vm5129_vm2 = vcmp.eq.f32.partialorder %v13490_v21, %v11529_v40 }
 0xa48   : > { %v5895_v23 = vadd.f32 %v5831_v57, %v5685_v13  ;;  %v5653_v49 = vsel %vm5587_vm1, %v11585_v35, 0.0  ;;  %vm5797_vm11 = vcmp.eq.f32.partialorder %v13489_v6, %v11575_v38  ;;  %v4817_v52 = vadd.f32 %v4753_v11, %v4587_v51 }
 0xa49   : > { %v5503_v37 = vadd.f32 %v5439_v60, %v5293_v47  ;;  %v4969_v27 = vsel %vm4903_vm6, %v11560_v39, 0.0  ;;  %v5195_v4 = vsel %vm5129_vm2, %v11573_v44, 0.0  ;;  %vm5339_vm14 = vcmp.eq.f32.partialorder %v13490_v21, %v11533_v34 }
 0xa4a   : > { %5982 = vmatpush.msrb.mxu0 %v5895_v23  ;;  %v5033_v31 = vadd.f32 %v4969_v27, %v4817_v52  ;;  %vm5553_vm9 = vcmp.eq.f32.partialorder %v13490_v21, %v11563_v14  ;;  %vm5763_vm13 = vcmp.eq.f32.partialorder %v13490_v21, %v11575_v38  ;;  %vm4261_vm7 = vcmp.eq.f32.partialorder %v13491_v55, %v11504_v42 }
 0xa4b   : > { %v5717_v36 = vadd.f32 %v5653_v49, %v5503_v37  ;;  %v4327_v54 = vsel %vm4261_vm7, %v11476_v22, 0.0  ;;  %vm4489_vm8 = vcmp.eq.f32.partialorder %v13491_v55, %v11513_v29  ;;  %vm4719_vm0 = vcmp.eq.f32.partialorder %v13491_v55, %v11515_v61 }
 0xa4c   : > { %v5863_v63 = vsel %vm5797_vm11, %v12450_v45, 0.0  ;;  %v5259_v26 = vadd.f32 %v5195_v4, %v5033_v31  ;;  %v4555_v8 = vsel %vm4489_vm8, %v11498_v28, 0.0  ;;  %vm4935_vm5 = vcmp.eq.f32.partialorder %v13491_v55, %v11522_v9 }
 0xa4d   : > { %v5927_v19 = vadd.f32 %v5863_v63, %v5717_v36  ;;  %v5405_v7 = vsel %vm5339_vm14, %v11578_v15, 0.0  ;;  %v4619_v58 = vadd.f32 %v4555_v8, %v4327_v54  ;;  %v5619_v6 = vsel %vm5553_vm9, %v11585_v35, 0.0  ;;  %v13493_v54 = vld [vmem:[#allocation16_spill] sm:$0xff] }
 0xa4e   : > { %v5469_v16 = vadd.f32 %v5405_v7, %v5259_v26  ;;  %v5829_v33 = vsel %vm5763_vm13, %v12450_v45, 0.0  ;;  %v4785_v20 = vsel %vm4719_vm0, %v11517_v43, 0.0  ;;  %v5001_v0 = vsel %vm4935_vm5, %v11560_v39, 0.0 }
 0xa4f   : > { %6002 = vmatpush.msrb.mxu1 %v5927_v19  ;;  %v4849_v56 = vadd.f32 %v4785_v20, %v4619_v58  ;;  %vm5161_vm12 = vcmp.eq.f32.partialorder %v13491_v55, %v11529_v40  ;;  %vm5371_vm3 = vcmp.eq.f32.partialorder %v13491_v55, %v11533_v34  ;;  %vm5585_vm1 = vcmp.eq.f32.partialorder %v13491_v55, %v11563_v14 }
 0xa50   : > { %v5683_v1 = vadd.f32 %v5619_v6, %v5469_v16  ;;  %vm4227_vm10 = vcmp.eq.f32.partialorder %v11807_v2, %v11504_v42  ;;  %vm4455_vm15 = vcmp.eq.f32.partialorder %v11807_v2, %v11513_v29  ;;  %vm4685_vm4 = vcmp.eq.f32.partialorder %v11807_v2, %v11515_v61 }
 0xa51   : > { %v5065_v12 = vadd.f32 %v5001_v0, %v4849_v56  ;;  %v4293_v59 = vsel %vm4227_vm10, %v11476_v22, 0.0  ;;  %v4521_v17 = vsel %vm4455_vm15, %v11498_v28, 0.0  ;;  %v5227_v41 = vsel %vm5161_vm12, %v11573_v44, 0.0 }
 0xa52   : > { %v5893_v48 = vadd.f32 %v5829_v33, %v5683_v1  ;;  %v4585_v62 = vadd.f32 %v4521_v17, %v4293_v59  ;;  %vm4901_vm6 = vcmp.eq.f32.partialorder %v11807_v2, %v11522_v9  ;;  %v5437_v18 = vsel %vm5371_vm3, %v11578_v15, 0.0  ;;  %v13494_v59 = vld [vmem:[#allocation18_spill] sm:$0xff] }
 0xa53   : > { %v5291_v57 = vadd.f32 %v5227_v41, %v5065_v12  ;;  %v4751_v25 = vsel %vm4685_vm4, %v11517_v43, 0.0  ;;  %vm5127_vm2 = vcmp.eq.f32.partialorder %v11807_v2, %v11529_v40  ;;  %v5651_v32 = vsel %vm5585_vm1, %v11585_v35, 0.0 }
 0xa54   : > { %5983 = vmatpush.msrb.mxu0 %v5893_v48  ;;  %vm5795_vm11 = vcmp.eq.f32.partialorder %v13491_v55, %v11575_v38  ;;  %v4815_v21 = vadd.f32 %v4751_v25, %v4585_v62  ;;  %v4967_v46 = vsel %vm4901_vm6, %v11560_v39, 0.0  ;;  %v5193_v3 = vsel %vm5127_vm2, %v11573_v44, 0.0 }
 0xa55   : > { %v5501_v30 = vadd.f32 %v5437_v18, %v5291_v57  ;;  %vm5337_vm14 = vcmp.eq.f32.partialorder %v11807_v2, %v11533_v34  ;;  %vm4259_vm9 = vcmp.eq.f32.partialorder %v13492_v24, %v11504_v42  ;;  %vm5551_vm13 = vcmp.eq.f32.partialorder %v11807_v2, %v11563_v14 }
 0xa56   : > { %v5031_v13 = vadd.f32 %v4967_v46, %v4815_v21  ;;  %v4325_v51 = vsel %vm4259_vm9, %v11476_v22, 0.0  ;;  %vm4487_vm7 = vcmp.eq.f32.partialorder %v13492_v24, %v11513_v29  ;;  %vm5761_vm8 = vcmp.eq.f32.partialorder %v11807_v2, %v11575_v38 }
 0xa57   : > { %v5715_v47 = vadd.f32 %v5651_v32, %v5501_v30  ;;  %v4553_v60 = vsel %vm4487_vm7, %v11498_v28, 0.0  ;;  %vm4717_vm0 = vcmp.eq.f32.partialorder %v13492_v24, %v11515_v61  ;;  %v5861_v11 = vsel %vm5795_vm11, %v12450_v45, 0.0 }
 0xa58   : > { %v5257_v23 = vadd.f32 %v5193_v3, %v5031_v13  ;;  %v4617_v49 = vadd.f32 %v4553_v60, %v4325_v51  ;;  %vm4933_vm5 = vcmp.eq.f32.partialorder %v13492_v24, %v11522_v9  ;;  %v5403_v37 = vsel %vm5337_vm14, %v11578_v15, 0.0  ;;  %v13495_v60 = vld [vmem:[#allocation20_spill] sm:$0xff] }
 0xa59   : > { %v5925_v52 = vadd.f32 %v5861_v11, %v5715_v47  ;;  %v5617_v27 = vsel %vm5551_vm13, %v11585_v35, 0.0  ;;  %v4783_v4 = vsel %vm4717_vm0, %v11517_v43, 0.0  ;;  %v5827_v31 = vsel %vm5761_vm8, %v12450_v45, 0.0 }
 0xa5a   : > { %v5467_v2 = vadd.f32 %v5403_v37, %v5257_v23  ;;  %v4847_v55 = vadd.f32 %v4783_v4, %v4617_v49  ;;  %vm5159_vm12 = vcmp.eq.f32.partialorder %v13492_v24, %v11529_v40  ;;  %v4999_v36 = vsel %vm4933_vm5, %v11560_v39, 0.0 }
 0xa5b   : > { %6003 = vmatpush.msrb.mxu1 %v5925_v52  ;;  %vm5369_vm3 = vcmp.eq.f32.partialorder %v13492_v24, %v11533_v34  ;;  %vm4225_vm1 = vcmp.eq.f32.partialorder %v13493_v54, %v11504_v42  ;;  %vm4453_vm10 = vcmp.eq.f32.partialorder %v13493_v54, %v11513_v29  ;;  %vm5583_vm15 = vcmp.eq.f32.partialorder %v13492_v24, %v11563_v14 }
 0xa5c   : > { %v5681_v63 = vadd.f32 %v5617_v27, %v5467_v2  ;;  %v5063_v26 = vadd.f32 %v4999_v36, %v4847_v55  ;;  %v4291_v8 = vsel %vm4225_vm1, %v11476_v22, 0.0  ;;  %v5225_v19 = vsel %vm5159_vm12, %v11573_v44, 0.0 }
 0xa5d   : > { %v4519_v7 = vsel %vm4453_vm10, %v11498_v28, 0.0  ;;  %vm4683_vm4 = vcmp.eq.f32.partialorder %v13493_v54, %v11515_v61  ;;  %vm4899_vm6 = vcmp.eq.f32.partialorder %v13493_v54, %v11522_v9  ;;  %v5435_v6 = vsel %vm5369_vm3, %v11578_v15, 0.0 }
 0xa5e   : > { %v5891_v58 = vadd.f32 %v5827_v31, %v5681_v63  ;;  %v5289_v16 = vadd.f32 %v5225_v19, %v5063_v26  ;;  %v4583_v33 = vadd.f32 %v4519_v7, %v4291_v8  ;;  %v5649_v20 = vsel %vm5583_vm15, %v11585_v35, 0.0  ;;  %v13496_v7 = vld [vmem:[#allocation3_spill] sm:$0xff] }
 0xa5f   : > { %vm5793_vm2 = vcmp.eq.f32.partialorder %v13492_v24, %v11575_v38  ;;  %v4749_v56 = vsel %vm4683_vm4, %v11517_v43, 0.0  ;;  %vm5125_vm11 = vcmp.eq.f32.partialorder %v13493_v54, %v11529_v40  ;;  %v4965_v12 = vsel %vm4899_vm6, %v11560_v39, 0.0 }
 0xa60   : > { %5984 = vmatpush.msrb.mxu0 %v5891_v58  ;;  %v5499_v0 = vadd.f32 %v5435_v6, %v5289_v16  ;;  %v4813_v1 = vadd.f32 %v4749_v56, %v4583_v33  ;;  %vm5335_vm14 = vcmp.eq.f32.partialorder %v13493_v54, %v11533_v34  ;;  %vm5549_vm9 = vcmp.eq.f32.partialorder %v13493_v54, %v11563_v14 }
 0xa61   : > { %vm5759_vm13 = vcmp.eq.f32.partialorder %v13493_v54, %v11575_v38  ;;  %vm4257_vm7 = vcmp.eq.f32.partialorder %v13494_v59, %v11504_v42  ;;  %vm4485_vm8 = vcmp.eq.f32.partialorder %v13494_v59, %v11513_v29  ;;  %vm4715_vm0 = vcmp.eq.f32.partialorder %v13494_v59, %v11515_v61 }
 0xa62   : > { %v5713_v17 = vadd.f32 %v5649_v20, %v5499_v0  ;;  %v5029_v48 = vadd.f32 %v4965_v12, %v4813_v1  ;;  %v4323_v41 = vsel %vm4257_vm7, %v11476_v22, 0.0  ;;  %v5859_v62 = vsel %vm5793_vm2, %v12450_v45, 0.0 }
 0xa63   : > { %v5191_v57 = vsel %vm5125_vm11, %v11573_v44, 0.0  ;;  %v4551_v18 = vsel %vm4485_vm8, %v11498_v28, 0.0  ;;  %vm4931_vm5 = vcmp.eq.f32.partialorder %v13494_v59, %v11522_v9  ;;  %v5401_v21 = vsel %vm5335_vm14, %v11578_v15, 0.0 }
 0xa64   : > { %v5923_v25 = vadd.f32 %v5859_v62, %v5713_v17  ;;  %v5255_v32 = vadd.f32 %v5191_v57, %v5029_v48  ;;  %v4615_v46 = vadd.f32 %v4551_v18, %v4323_v41  ;;  %v5615_v30 = vsel %vm5549_vm9, %v11585_v35, 0.0  ;;  %v13497_v57 = vld [vmem:[#allocation2_spill] sm:$0xff] }
 0xa65   : > { %v5825_v3 = vsel %vm5759_vm13, %v12450_v45, 0.0  ;;  %v4781_v24 = vsel %vm4715_vm0, %v11517_v43, 0.0  ;;  %vm5157_vm12 = vcmp.eq.f32.partialorder %v13494_v59, %v11529_v40  ;;  %v4997_v47 = vsel %vm4931_vm5, %v11560_v39, 0.0 }
 0xa66   : > { %6004 = vmatpush.msrb.mxu1 %v5923_v25  ;;  %v5465_v13 = vadd.f32 %v5401_v21, %v5255_v32  ;;  %v4845_v51 = vadd.f32 %v4781_v24, %v4615_v46  ;;  %vm5367_vm3 = vcmp.eq.f32.partialorder %v13494_v59, %v11533_v34  ;;  %vm5581_vm1 = vcmp.eq.f32.partialorder %v13494_v59, %v11563_v14 }
 0xa67   : > { %vm4223_vm10 = vcmp.eq.f32.partialorder %v13495_v60, %v11504_v42  ;;  %vm4451_vm15 = vcmp.eq.f32.partialorder %v13495_v60, %v11513_v29  ;;  %vm4681_vm4 = vcmp.eq.f32.partialorder %v13495_v60, %v11515_v61  ;;  %v5223_v37 = vsel %vm5157_vm12, %v11573_v44, 0.0 }
 0xa68   : > { %v5679_v11 = vadd.f32 %v5615_v30, %v5465_v13  ;;  %v5061_v23 = vadd.f32 %v4997_v47, %v4845_v51  ;;  %v4289_v49 = vsel %vm4223_vm10, %v11476_v22, 0.0  ;;  %v4517_v52 = vsel %vm4451_vm15, %v11498_v28, 0.0 }
 0xa69   : > { %v4581_v27 = vadd.f32 %v4517_v52, %v4289_v49  ;;  %vm4897_vm6 = vcmp.eq.f32.partialorder %v13495_v60, %v11522_v9  ;;  %vm5123_vm2 = vcmp.eq.f32.partialorder %v13495_v60, %v11529_v40  ;;  %vm5791_vm11 = vcmp.eq.f32.partialorder %v13494_v59, %v11575_v38  ;;  %v13498_v49 = vld [vmem:[#allocation4_spill] sm:$0xff] }
 0xa6a   : > { %v5889_v4 = vadd.f32 %v5825_v3, %v5679_v11  ;;  %v5287_v2 = vadd.f32 %v5223_v37, %v5061_v23  ;;  %v4747_v31 = vsel %vm4681_vm4, %v11517_v43, 0.0  ;;  %v5433_v55 = vsel %vm5367_vm3, %v11578_v15, 0.0 }
 0xa6b   : > { %v5647_v36 = vsel %vm5581_vm1, %v11585_v35, 0.0  ;;  %v4811_v54 = vadd.f32 %v4747_v31, %v4581_v27  ;;  %v4963_v63 = vsel %vm4897_vm6, %v11560_v39, 0.0  ;;  %v5189_v8 = vsel %vm5123_vm2, %v11573_v44, 0.0 }
 0xa6c   : > { %5985 = vmatpush.msrb.mxu0 %v5889_v4  ;;  %v5497_v26 = vadd.f32 %v5433_v55, %v5287_v2  ;;  %vm5333_vm14 = vcmp.eq.f32.partialorder %v13495_v60, %v11533_v34  ;;  %vm5547_vm9 = vcmp.eq.f32.partialorder %v13495_v60, %v11563_v14  ;;  %vm4255_vm13 = vcmp.eq.f32.partialorder %v13496_v7, %v11504_v42 }
 0xa6d   : > { %v5027_v19 = vadd.f32 %v4963_v63, %v4811_v54  ;;  %vm4483_vm7 = vcmp.eq.f32.partialorder %v13496_v7, %v11513_v29  ;;  %vm4713_vm8 = vcmp.eq.f32.partialorder %v13496_v7, %v11515_v61  ;;  %vm5757_vm0 = vcmp.eq.f32.partialorder %v13495_v60, %v11575_v38 }
 0xa6e   : > { %v5711_v58 = vadd.f32 %v5647_v36, %v5497_v26  ;;  %v4321_v16 = vsel %vm4255_vm13, %v11476_v22, 0.0  ;;  %v4549_v6 = vsel %vm4483_vm7, %v11498_v28, 0.0  ;;  %v5857_v33 = vsel %vm5791_vm11, %v12450_v45, 0.0 }
 0xa6f   : > { %v5253_v20 = vadd.f32 %v5189_v8, %v5027_v19  ;;  %v4613_v56 = vadd.f32 %v4549_v6, %v4321_v16  ;;  %vm4929_vm5 = vcmp.eq.f32.partialorder %v13496_v7, %v11522_v9  ;;  %v5399_v1 = vsel %vm5333_vm14, %v11578_v15, 0.0  ;;  %v13499_v6 = vld [vmem:[#allocation5_spill] sm:$0xff] }
 0xa70   : > { %v5921_v0 = vadd.f32 %v5857_v33, %v5711_v58  ;;  %v5613_v12 = vsel %vm5547_vm9, %v11585_v35, 0.0  ;;  %v4779_v17 = vsel %vm4713_vm8, %v11517_v43, 0.0  ;;  %v5823_v41 = vsel %vm5757_vm0, %v12450_v45, 0.0 }
 0xa71   : > { %v5463_v48 = vadd.f32 %v5399_v1, %v5253_v20  ;;  %v4843_v62 = vadd.f32 %v4779_v17, %v4613_v56  ;;  %vm5155_vm12 = vcmp.eq.f32.partialorder %v13496_v7, %v11529_v40  ;;  %v4995_v59 = vsel %vm4929_vm5, %v11560_v39, 0.0 }
 0xa72   : > { %6005 = vmatpush.msrb.mxu1 %v5921_v0  ;;  %vm5365_vm3 = vcmp.eq.f32.partialorder %v13496_v7, %v11533_v34  ;;  %vm4221_vm1 = vcmp.eq.f32.partialorder %v13497_v57, %v11504_v42  ;;  %vm4449_vm10 = vcmp.eq.f32.partialorder %v13497_v57, %v11513_v29  ;;  %vm5579_vm15 = vcmp.eq.f32.partialorder %v13496_v7, %v11563_v14 }
 0xa73   : > { %v5677_v18 = vadd.f32 %v5613_v12, %v5463_v48  ;;  %v5059_v25 = vadd.f32 %v4995_v59, %v4843_v62  ;;  %v4287_v32 = vsel %vm4221_vm1, %v11476_v22, 0.0  ;;  %v5221_v21 = vsel %vm5155_vm12, %v11573_v44, 0.0 }
 0xa74   : > { %v4515_v46 = vsel %vm4449_vm10, %v11498_v28, 0.0  ;;  %vm4679_vm4 = vcmp.eq.f32.partialorder %v13497_v57, %v11515_v61  ;;  %vm4895_vm6 = vcmp.eq.f32.partialorder %v13497_v57, %v11522_v9  ;;  %v5431_v24 = vsel %vm5365_vm3, %v11578_v15, 0.0 }
 0xa75   : > { %v5887_v30 = vadd.f32 %v5823_v41, %v5677_v18  ;;  %v5285_v3 = vadd.f32 %v5221_v21, %v5059_v25  ;;  %v4579_v13 = vadd.f32 %v4515_v46, %v4287_v32  ;;  %v5645_v51 = vsel %vm5579_vm15, %v11585_v35, 0.0  ;;  %v13500_v46 = vld [vmem:[#allocation7_spill] sm:$0xff] }
 0xa76   : > { %vm5789_vm2 = vcmp.eq.f32.partialorder %v13496_v7, %v11575_v38  ;;  %v4745_v47 = vsel %vm4679_vm4, %v11517_v43, 0.0  ;;  %vm5121_vm11 = vcmp.eq.f32.partialorder %v13497_v57, %v11529_v40  ;;  %v4961_v23 = vsel %vm4895_vm6, %v11560_v39, 0.0 }
 0xa77   : > { %5986 = vmatpush.msrb.mxu0 %v5887_v30  ;;  %v5495_v60 = vadd.f32 %v5431_v24, %v5285_v3  ;;  %v4809_v11 = vadd.f32 %v4745_v47, %v4579_v13  ;;  %vm5331_vm14 = vcmp.eq.f32.partialorder %v13497_v57, %v11533_v34  ;;  %vm5545_vm9 = vcmp.eq.f32.partialorder %v13497_v57, %v11563_v14 }
 0xa78   : > { %vm5755_vm13 = vcmp.eq.f32.partialorder %v13497_v57, %v11575_v38  ;;  %vm4253_vm7 = vcmp.eq.f32.partialorder %v13498_v49, %v11504_v42  ;;  %vm4481_vm8 = vcmp.eq.f32.partialorder %v13498_v49, %v11513_v29  ;;  %vm4711_vm0 = vcmp.eq.f32.partialorder %v13498_v49, %v11515_v61 }
 0xa79   : > { %v5709_v52 = vadd.f32 %v5645_v51, %v5495_v60  ;;  %v5025_v37 = vadd.f32 %v4961_v23, %v4809_v11  ;;  %v4319_v27 = vsel %vm4253_vm7, %v11476_v22, 0.0  ;;  %v5855_v4 = vsel %vm5789_vm2, %v12450_v45, 0.0 }
 0xa7a   : > { %v5187_v2 = vsel %vm5121_vm11, %v11573_v44, 0.0  ;;  %v4547_v31 = vsel %vm4481_vm8, %v11498_v28, 0.0  ;;  %vm4927_vm5 = vcmp.eq.f32.partialorder %v13498_v49, %v11522_v9  ;;  %v5397_v54 = vsel %vm5331_vm14, %v11578_v15, 0.0 }
 0xa7b   : > { %v5919_v55 = vadd.f32 %v5855_v4, %v5709_v52  ;;  %v5251_v36 = vadd.f32 %v5187_v2, %v5025_v37  ;;  %v4611_v63 = vadd.f32 %v4547_v31, %v4319_v27  ;;  %v5611_v26 = vsel %vm5545_vm9, %v11585_v35, 0.0  ;;  %v13501_v2 = vld [vmem:[#allocation9_spill] sm:$0xff] }
 0xa7c   : > { %v5821_v8 = vsel %vm5755_vm13, %v12450_v45, 0.0  ;;  %v4777_v19 = vsel %vm4711_vm0, %v11517_v43, 0.0  ;;  %vm5153_vm12 = vcmp.eq.f32.partialorder %v13498_v49, %v11529_v40  ;;  %v4993_v16 = vsel %vm4927_vm5, %v11560_v39, 0.0 }
 0xa7d   : > { %6006 = vmatpush.msrb.mxu1 %v5919_v55  ;;  %v5461_v7 = vadd.f32 %v5397_v54, %v5251_v36  ;;  %v4841_v58 = vadd.f32 %v4777_v19, %v4611_v63  ;;  %vm5363_vm3 = vcmp.eq.f32.partialorder %v13498_v49, %v11533_v34  ;;  %vm5577_vm1 = vcmp.eq.f32.partialorder %v13498_v49, %v11563_v14 }
 0xa7e   : > { %vm4219_vm10 = vcmp.eq.f32.partialorder %v13499_v6, %v11504_v42  ;;  %vm4447_vm15 = vcmp.eq.f32.partialorder %v13499_v6, %v11513_v29  ;;  %vm4677_vm4 = vcmp.eq.f32.partialorder %v13499_v6, %v11515_v61  ;;  %v5219_v1 = vsel %vm5153_vm12, %v11573_v44, 0.0 }
 0xa7f   : > { %v5675_v33 = vadd.f32 %v5611_v26, %v5461_v7  ;;  %v5057_v20 = vadd.f32 %v4993_v16, %v4841_v58  ;;  %v4285_v56 = vsel %vm4219_vm10, %v11476_v22, 0.0  ;;  %v4513_v0 = vsel %vm4447_vm15, %v11498_v28, 0.0 }
 0xa80   : > { %v4577_v12 = vadd.f32 %v4513_v0, %v4285_v56  ;;  %vm4893_vm6 = vcmp.eq.f32.partialorder %v13499_v6, %v11522_v9  ;;  %vm5119_vm2 = vcmp.eq.f32.partialorder %v13499_v6, %v11529_v40  ;;  %vm5787_vm11 = vcmp.eq.f32.partialorder %v13498_v49, %v11575_v38  ;;  %v13502_v56 = vld [vmem:[#allocation11_spill] sm:$0xff] }
 0xa81   : > { %v5885_v17 = vadd.f32 %v5821_v8, %v5675_v33  ;;  %v5283_v48 = vadd.f32 %v5219_v1, %v5057_v20  ;;  %v4743_v41 = vsel %vm4677_vm4, %v11517_v43, 0.0  ;;  %v5429_v62 = vsel %vm5363_vm3, %v11578_v15, 0.0 }
 0xa82   : > { %v5643_v59 = vsel %vm5577_vm1, %v11585_v35, 0.0  ;;  %v4807_v57 = vadd.f32 %v4743_v41, %v4577_v12  ;;  %v4959_v18 = vsel %vm4893_vm6, %v11560_v39, 0.0  ;;  %v5185_v32 = vsel %vm5119_vm2, %v11573_v44, 0.0 }
 0xa83   : > { %5987 = vmatpush.msrb.mxu0 %v5885_v17  ;;  %v5493_v25 = vadd.f32 %v5429_v62, %v5283_v48  ;;  %vm5329_vm14 = vcmp.eq.f32.partialorder %v13499_v6, %v11533_v34  ;;  %vm5543_vm9 = vcmp.eq.f32.partialorder %v13499_v6, %v11563_v14  ;;  %vm4251_vm13 = vcmp.eq.f32.partialorder %v13500_v46, %v11504_v42 }
 0xa84   : > { %v5023_v21 = vadd.f32 %v4959_v18, %v4807_v57  ;;  %vm4479_vm7 = vcmp.eq.f32.partialorder %v13500_v46, %v11513_v29  ;;  %vm4709_vm8 = vcmp.eq.f32.partialorder %v13500_v46, %v11515_v61  ;;  %vm5753_vm0 = vcmp.eq.f32.partialorder %v13499_v6, %v11575_v38 }
 0xa85   : > { %v5707_v30 = vadd.f32 %v5643_v59, %v5493_v25  ;;  %v4317_v3 = vsel %vm4251_vm13, %v11476_v22, 0.0  ;;  %v4545_v24 = vsel %vm4479_vm7, %v11498_v28, 0.0  ;;  %v5853_v13 = vsel %vm5787_vm11, %v12450_v45, 0.0 }
 0xa86   : > { %v5249_v51 = vadd.f32 %v5185_v32, %v5023_v21  ;;  %v4609_v47 = vadd.f32 %v4545_v24, %v4317_v3  ;;  %vm4925_vm5 = vcmp.eq.f32.partialorder %v13500_v46, %v11522_v9  ;;  %v5395_v11 = vsel %vm5329_vm14, %v11578_v15, 0.0 }
 0xa87   : > { %v5917_v60 = vadd.f32 %v5853_v13, %v5707_v30  ;;  %v5609_v23 = vsel %vm5543_vm9, %v11585_v35, 0.0  ;;  %v4775_v52 = vsel %vm4709_vm8, %v11517_v43, 0.0  ;;  %v5819_v27 = vsel %vm5753_vm0, %v12450_v45, 0.0 }
 0xa88   : > { %v5459_v37 = vadd.f32 %v5395_v11, %v5249_v51  ;;  %v4839_v4 = vadd.f32 %v4775_v52, %v4609_v47  ;;  %vm5151_vm12 = vcmp.eq.f32.partialorder %v13500_v46, %v11529_v40  ;;  %v4991_v49 = vsel %vm4925_vm5, %v11560_v39, 0.0 }
 0xa89   : > { %6007 = vmatpush.msrb.mxu1 %v5917_v60  ;;  %vm5361_vm3 = vcmp.eq.f32.partialorder %v13500_v46, %v11533_v34  ;;  %vm4217_vm1 = vcmp.eq.f32.partialorder %v13501_v2, %v11504_v42  ;;  %vm4445_vm10 = vcmp.eq.f32.partialorder %v13501_v2, %v11513_v29  ;;  %vm5575_vm15 = vcmp.eq.f32.partialorder %v13500_v46, %v11563_v14 }
 0xa8a   : > { %v5673_v31 = vadd.f32 %v5609_v23, %v5459_v37  ;;  %v5055_v55 = vadd.f32 %v4991_v49, %v4839_v4  ;;  %v4283_v36 = vsel %vm4217_vm1, %v11476_v22, 0.0  ;;  %v5217_v54 = vsel %vm5151_vm12, %v11573_v44, 0.0 }
 0xa8b   : > { %v4511_v63 = vsel %vm4445_vm10, %v11498_v28, 0.0  ;;  %vm4675_vm4 = vcmp.eq.f32.partialorder %v13501_v2, %v11515_v61  ;;  %vm4891_vm6 = vcmp.eq.f32.partialorder %v13501_v2, %v11522_v9  ;;  %v5427_v19 = vsel %vm5361_vm3, %v11578_v15, 0.0 }
 0xa8c   : > { %v5883_v26 = vadd.f32 %v5819_v27, %v5673_v31  ;;  %v5281_v8 = vadd.f32 %v5217_v54, %v5055_v55  ;;  %v4575_v7 = vadd.f32 %v4511_v63, %v4283_v36  ;;  %v5641_v58 = vsel %vm5575_vm15, %v11585_v35, 0.0 }
 0xa8d   : > { %vm5785_vm2 = vcmp.eq.f32.partialorder %v13500_v46, %v11575_v38  ;;  %v4741_v16 = vsel %vm4675_vm4, %v11517_v43, 0.0  ;;  %vm5117_vm11 = vcmp.eq.f32.partialorder %v13501_v2, %v11529_v40  ;;  %v4957_v20 = vsel %vm4891_vm6, %v11560_v39, 0.0 }
 0xa8e   : > { %5988 = vmatpush.msrb.mxu0 %v5883_v26  ;;  %v5491_v6 = vadd.f32 %v5427_v19, %v5281_v8  ;;  %v4805_v33 = vadd.f32 %v4741_v16, %v4575_v7  ;;  %vm5327_vm14 = vcmp.eq.f32.partialorder %v13501_v2, %v11533_v34  ;;  %vm5541_vm9 = vcmp.eq.f32.partialorder %v13501_v2, %v11563_v14 }
 0xa8f   : > { %vm5751_vm13 = vcmp.eq.f32.partialorder %v13501_v2, %v11575_v38  ;;  %vm4249_vm7 = vcmp.eq.f32.partialorder %v13502_v56, %v11504_v42  ;;  %vm4477_vm8 = vcmp.eq.f32.partialorder %v13502_v56, %v11513_v29  ;;  %vm4707_vm0 = vcmp.eq.f32.partialorder %v13502_v56, %v11515_v61 }
 0xa90   : > { %v5705_v0 = vadd.f32 %v5641_v58, %v5491_v6  ;;  %v5021_v1 = vadd.f32 %v4957_v20, %v4805_v33  ;;  %v4315_v12 = vsel %vm4249_vm7, %v11476_v22, 0.0  ;;  %v5851_v17 = vsel %vm5785_vm2, %v12450_v45, 0.0 }
 0xa91   : > { %v5183_v48 = vsel %vm5117_vm11, %v11573_v44, 0.0  ;;  %v4543_v41 = vsel %vm4477_vm8, %v11498_v28, 0.0  ;;  %vm4923_vm5 = vcmp.eq.f32.partialorder %v13502_v56, %v11522_v9  ;;  %v5393_v57 = vsel %vm5327_vm14, %v11578_v15, 0.0 }
 0xa92   : > { %v5915_v62 = vadd.f32 %v5851_v17, %v5705_v0  ;;  %v5247_v59 = vadd.f32 %v5183_v48, %v5021_v1  ;;  %v4607_v18 = vadd.f32 %v4543_v41, %v4315_v12  ;;  %v5607_v25 = vsel %vm5541_vm9, %v11585_v35, 0.0  ;;  %v13503_v1 = vld [vmem:[#allocation13_spill] sm:$0xff] }
 0xa93   : > { %v5817_v32 = vsel %vm5751_vm13, %v12450_v45, 0.0  ;;  %v4773_v21 = vsel %vm4707_vm0, %v11517_v43, 0.0  ;;  %vm5149_vm12 = vcmp.eq.f32.partialorder %v13502_v56, %v11529_v40  ;;  %v4989_v3 = vsel %vm4923_vm5, %v11560_v39, 0.0 }
 0xa94   : > { %6008 = vmatpush.msrb.mxu1 %v5915_v62  ;;  %v5457_v46 = vadd.f32 %v5393_v57, %v5247_v59  ;;  %v4837_v30 = vadd.f32 %v4773_v21, %v4607_v18  ;;  %vm5359_vm3 = vcmp.eq.f32.partialorder %v13502_v56, %v11533_v34  ;;  %vm5573_vm1 = vcmp.eq.f32.partialorder %v13502_v56, %v11563_v14 }
 0xa95   : > { %vm4215_vm10 = vcmp.eq.f32.partialorder %v12187_v10, %v11504_v42  ;;  %vm4443_vm15 = vcmp.eq.f32.partialorder %v12187_v10, %v11513_v29  ;;  %vm4673_vm4 = vcmp.eq.f32.partialorder %v12187_v10, %v11515_v61  ;;  %v5215_v60 = vsel %vm5149_vm12, %v11573_v44, 0.0 }
 0xa96   : > { %v5671_v24 = vadd.f32 %v5607_v25, %v5457_v46  ;;  %v5053_v13 = vadd.f32 %v4989_v3, %v4837_v30  ;;  %v4281_v51 = vsel %vm4215_vm10, %v11476_v22, 0.0  ;;  %v4509_v47 = vsel %vm4443_vm15, %v11498_v28, 0.0 }
 0xa97   : > { %v4573_v11 = vadd.f32 %v4509_v47, %v4281_v51  ;;  %vm4889_vm6 = vcmp.eq.f32.partialorder %v12187_v10, %v11522_v9  ;;  %vm5115_vm2 = vcmp.eq.f32.partialorder %v12187_v10, %v11529_v40  ;;  %vm5783_vm11 = vcmp.eq.f32.partialorder %v13502_v56, %v11575_v38 }
 0xa98   : > { %v5881_v23 = vadd.f32 %v5817_v32, %v5671_v24  ;;  %v5279_v52 = vadd.f32 %v5215_v60, %v5053_v13  ;;  %v4739_v37 = vsel %vm4673_vm4, %v11517_v43, 0.0  ;;  %v5425_v27 = vsel %vm5359_vm3, %v11578_v15, 0.0  ;;  %v13504_v24 = vld [vmem:[#allocation15_spill] sm:$0xff] }
 0xa99   : > { %v5639_v4 = vsel %vm5573_vm1, %v11585_v35, 0.0  ;;  %v4803_v49 = vadd.f32 %v4739_v37, %v4573_v11  ;;  %v4955_v2 = vsel %vm4889_vm6, %v11560_v39, 0.0  ;;  %v5181_v55 = vsel %vm5115_vm2, %v11573_v44, 0.0 }
 0xa9a   : > { %5989 = vmatpush.msrb.mxu0 %v5881_v23  ;;  %v5489_v31 = vadd.f32 %v5425_v27, %v5279_v52  ;;  %vm5325_vm14 = vcmp.eq.f32.partialorder %v12187_v10, %v11533_v34  ;;  %vm5539_vm9 = vcmp.eq.f32.partialorder %v12187_v10, %v11563_v14  ;;  %vm4247_vm13 = vcmp.eq.f32.partialorder %v12189_v53, %v11504_v42 }
 0xa9b   : > { %v5019_v36 = vadd.f32 %v4955_v2, %v4803_v49  ;;  %vm4475_vm7 = vcmp.eq.f32.partialorder %v12189_v53, %v11513_v29  ;;  %vm4705_vm8 = vcmp.eq.f32.partialorder %v12189_v53, %v11515_v61  ;;  %vm5749_vm0 = vcmp.eq.f32.partialorder %v12187_v10, %v11575_v38 }
 0xa9c   : > { %v5703_v54 = vadd.f32 %v5639_v4, %v5489_v31  ;;  %v4313_v63 = vsel %vm4247_vm13, %v11476_v22, 0.0  ;;  %v4541_v26 = vsel %vm4475_vm7, %v11498_v28, 0.0  ;;  %v5849_v8 = vsel %vm5783_vm11, %v12450_v45, 0.0 }
 0xa9d   : > { %v5245_v19 = vadd.f32 %v5181_v55, %v5019_v36  ;;  %v4605_v7 = vadd.f32 %v4541_v26, %v4313_v63  ;;  %vm4921_vm5 = vcmp.eq.f32.partialorder %v12189_v53, %v11522_v9  ;;  %v5391_v16 = vsel %vm5325_vm14, %v11578_v15, 0.0 }
 0xa9e   : > { %v5913_v58 = vadd.f32 %v5849_v8, %v5703_v54  ;;  %v5605_v6 = vsel %vm5539_vm9, %v11585_v35, 0.0  ;;  %v4771_v10 = vsel %vm4705_vm8, %v11517_v43, 0.0  ;;  %v5815_v20 = vsel %vm5749_vm0, %v12450_v45, 0.0  ;;  %v13505_v54 = vld [vmem:[#allocation17_spill] sm:$0xff] }
 0xa9f   : > { %v5455_v33 = vadd.f32 %v5391_v16, %v5245_v19  ;;  %v4835_v0 = vadd.f32 %v4771_v10, %v4605_v7  ;;  %vm5147_vm12 = vcmp.eq.f32.partialorder %v12189_v53, %v11529_v40  ;;  %v4987_v56 = vsel %vm4921_vm5, %v11560_v39, 0.0  ;;  %v13230_v16 = vld [vmem:[%s334_s15] sm:$0x3f] }
 0xaa0   : > { %6009 = vmatpush.msrb.mxu1 %v5913_v58  ;;  %vm5357_vm3 = vcmp.eq.f32.partialorder %v12189_v53, %v11533_v34  ;;  %vm4213_vm1 = vcmp.eq.f32.partialorder %v13503_v1, %v11504_v42  ;;  %vm4441_vm10 = vcmp.eq.f32.partialorder %v13503_v1, %v11513_v29  ;;  %vm5571_vm15 = vcmp.eq.f32.partialorder %v12189_v53, %v11563_v14 }
 0xaa1   : > { %v5669_v12 = vadd.f32 %v5605_v6, %v5455_v33  ;;  %v5051_v17 = vadd.f32 %v4987_v56, %v4835_v0  ;;  %v4279_v48 = vsel %vm4213_vm1, %v11476_v22, 0.0  ;;  %v5213_v41 = vsel %vm5147_vm12, %v11573_v44, 0.0  ;;  %v13232_v6 = vld [vmem:[%s334_s15 + $0x8] sm:$0x3f]  ;;  %5954 = vmatmul.f32.vlgmr.msra.gmra.mxu2 %v13230_v16 }
 0xaa2   : > { %v4507_v62 = vsel %vm4441_vm10, %v11498_v28, 0.0  ;;  %vm4671_vm4 = vcmp.eq.f32.partialorder %v13503_v1, %v11515_v61  ;;  %vm4887_vm6 = vcmp.eq.f32.partialorder %v13503_v1, %v11522_v9  ;;  %v5423_v18 = vsel %vm5357_vm3, %v11578_v15, 0.0  ;;  %5974 = vmatmul.f32.vlgmr.msra.gmra.mxu3 %v13232_v6 }
 0xaa3   : > { %v5879_v59 = vadd.f32 %v5815_v20, %v5669_v12  ;;  %v5277_v57 = vadd.f32 %v5213_v41, %v5051_v17  ;;  %v4571_v25 = vadd.f32 %v4507_v62, %v4279_v48  ;;  %v5637_v32 = vsel %vm5571_vm15, %v11585_v35, 0.0  ;;  %v13506_v62 = vld [vmem:[#allocation19_spill] sm:$0xff] }
 0xaa4   : > { %vm5781_vm2 = vcmp.eq.f32.partialorder %v12189_v53, %v11575_v38  ;;  %v4737_v21 = vsel %vm4671_vm4, %v11517_v43, 0.0  ;;  %vm5113_vm11 = vcmp.eq.f32.partialorder %v13503_v1, %v11529_v40  ;;  %v4953_v3 = vsel %vm4887_vm6, %v11560_v39, 0.0 }
 0xaa5   : > { %5990 = vmatpush.msrb.mxu0 %v5879_v59  ;;  %v5487_v46 = vadd.f32 %v5423_v18, %v5277_v57  ;;  %v4801_v30 = vadd.f32 %v4737_v21, %v4571_v25  ;;  %vm5323_vm14 = vcmp.eq.f32.partialorder %v13503_v1, %v11533_v34  ;;  %vm5537_vm9 = vcmp.eq.f32.partialorder %v13503_v1, %v11563_v14 }
 0xaa6   : > { %vm5747_vm13 = vcmp.eq.f32.partialorder %v13503_v1, %v11575_v38  ;;  %vm4245_vm7 = vcmp.eq.f32.partialorder %v13504_v24, %v11504_v42  ;;  %vm4473_vm8 = vcmp.eq.f32.partialorder %v13504_v24, %v11513_v29  ;;  %vm4703_vm0 = vcmp.eq.f32.partialorder %v13504_v24, %v11515_v61 }
 0xaa7   : > { %v5701_v13 = vadd.f32 %v5637_v32, %v5487_v46  ;;  %v5017_v51 = vadd.f32 %v4953_v3, %v4801_v30  ;;  %v4311_v47 = vsel %vm4245_vm7, %v11476_v22, 0.0  ;;  %v5847_v60 = vsel %vm5781_vm2, %v12450_v45, 0.0 }
 0xaa8   : > { %v5179_v11 = vsel %vm5113_vm11, %v11573_v44, 0.0  ;;  %v4539_v23 = vsel %vm4473_vm8, %v11498_v28, 0.0  ;;  %vm4919_vm5 = vcmp.eq.f32.partialorder %v13504_v24, %v11522_v9  ;;  %v5389_v27 = vsel %vm5323_vm14, %v11578_v15, 0.0 }
 0xaa9   : > { %v5911_v52 = vadd.f32 %v5847_v60, %v5701_v13  ;;  %v5243_v37 = vadd.f32 %v5179_v11, %v5017_v51  ;;  %v4603_v4 = vadd.f32 %v4539_v23, %v4311_v47  ;;  %v5603_v53 = vsel %vm5537_vm9, %v11585_v35, 0.0 }
 0xaaa   : > { %v5813_v49 = vsel %vm5747_vm13, %v12450_v45, 0.0  ;;  %v4769_v2 = vsel %vm4703_vm0, %v11517_v43, 0.0  ;;  %vm5145_vm12 = vcmp.eq.f32.partialorder %v13504_v24, %v11529_v40  ;;  %v4985_v36 = vsel %vm4919_vm5, %v11560_v39, 0.0 }
 0xaab   : > { %6010 = vmatpush.msrb.mxu1 %v5911_v52  ;;  %v5453_v31 = vadd.f32 %v5389_v27, %v5243_v37  ;;  %v4833_v55 = vadd.f32 %v4769_v2, %v4603_v4  ;;  %vm5355_vm3 = vcmp.eq.f32.partialorder %v13504_v24, %v11533_v34  ;;  %vm5569_vm1 = vcmp.eq.f32.partialorder %v13504_v24, %v11563_v14 }
 0xaac   : > { %vm4211_vm10 = vcmp.eq.f32.partialorder %v13505_v54, %v11504_v42  ;;  %vm4439_vm15 = vcmp.eq.f32.partialorder %v13505_v54, %v11513_v29  ;;  %vm4669_vm4 = vcmp.eq.f32.partialorder %v13505_v54, %v11515_v61  ;;  %v5211_v7 = vsel %vm5145_vm12, %v11573_v44, 0.0 }
 0xaad   : > { %v5667_v63 = vadd.f32 %v5603_v53, %v5453_v31  ;;  %v5049_v26 = vadd.f32 %v4985_v36, %v4833_v55  ;;  %v4277_v8 = vsel %vm4211_vm10, %v11476_v22, 0.0  ;;  %v4505_v19 = vsel %vm4439_vm15, %v11498_v28, 0.0 }
 0xaae   : > { %v4569_v58 = vadd.f32 %v4505_v19, %v4277_v8  ;;  %vm4885_vm6 = vcmp.eq.f32.partialorder %v13505_v54, %v11522_v9  ;;  %vm5111_vm2 = vcmp.eq.f32.partialorder %v13505_v54, %v11529_v40  ;;  %v4735_v20 = vsel %vm4669_vm4, %v11517_v43, 0.0 }
 0xaaf   : > { %v5877_v10 = vadd.f32 %v5813_v49, %v5667_v63  ;;  %v5275_v33 = vadd.f32 %v5211_v7, %v5049_v26  ;;  %v5421_v0 = vsel %vm5355_vm3, %v11578_v15, 0.0  ;;  %v5635_v56 = vsel %vm5569_vm1, %v11585_v35, 0.0 }
 0xab0   : > { %vm5779_vm11 = vcmp.eq.f32.partialorder %v13504_v24, %v11575_v38  ;;  %v4799_v1 = vadd.f32 %v4735_v20, %v4569_v58  ;;  %v4951_v17 = vsel %vm4885_vm6, %v11560_v39, 0.0  ;;  %v5177_v48 = vsel %vm5111_vm2, %v11573_v44, 0.0 }
 0xab1   : > { %5991 = vmatpush.msrb.mxu0 %v5877_v10  ;;  %v5485_v12 = vadd.f32 %v5421_v0, %v5275_v33  ;;  %vm5321_vm14 = vcmp.eq.f32.partialorder %v13505_v54, %v11533_v34  ;;  %vm4243_vm9 = vcmp.eq.f32.partialorder %v13506_v62, %v11504_v42  ;;  %vm4471_vm13 = vcmp.eq.f32.partialorder %v13506_v62, %v11513_v29 }
 0xab2   : > { %v5015_v41 = vadd.f32 %v4951_v17, %v4799_v1  ;;  %vm4701_vm7 = vcmp.eq.f32.partialorder %v13506_v62, %v11515_v61  ;;  %vm5535_vm8 = vcmp.eq.f32.partialorder %v13505_v54, %v11563_v14  ;;  %v4309_v57 = vsel %vm4243_vm9, %v11476_v22, 0.0 }
 0xab3   : > { %v5699_v59 = vadd.f32 %v5635_v56, %v5485_v12  ;;  %v4537_v18 = vsel %vm4471_vm13, %v11498_v28, 0.0  ;;  %v5845_v25 = vsel %vm5779_vm11, %v12450_v45, 0.0  ;;  %vm4917_vm0 = vcmp.eq.f32.partialorder %v13506_v62, %v11522_v9 }
 0xab4   : > { %v5241_v32 = vadd.f32 %v5177_v48, %v5015_v41  ;;  %v4601_v21 = vadd.f32 %v4537_v18, %v4309_v57  ;;  %v5387_v30 = vsel %vm5321_vm14, %v11578_v15, 0.0  ;;  %vm5745_vm5 = vcmp.eq.f32.partialorder %v13505_v54, %v11575_v38 }
 0xab5   : > { %v5909_v46 = vadd.f32 %v5845_v25, %v5699_v59  ;;  %v4767_v3 = vsel %vm4701_vm7, %v11517_v43, 0.0  ;;  %v5601_v13 = vsel %vm5535_vm8, %v11585_v35, 0.0  ;;  %vm5143_vm12 = vcmp.eq.f32.partialorder %v13506_v62, %v11529_v40 }
 0xab6   : > { %v5451_v24 = vadd.f32 %v5387_v30, %v5241_v32  ;;  %v4831_v51 = vadd.f32 %v4767_v3, %v4601_v21  ;;  %v4983_v47 = vsel %vm4917_vm0, %v11560_v39, 0.0  ;;  %vm5353_vm3 = vcmp.eq.f32.partialorder %v13506_v62, %v11533_v34 }
 0xab7   : > { %6011 = vmatpush.msrb.mxu1 %v5909_v46  ;;  %vm4209_vm1 = vcmp.eq.f32.partialorder %v12316_v50, %v11504_v42  ;;  %vm4437_vm10 = vcmp.eq.f32.partialorder %v12316_v50, %v11513_v29  ;;  %vm5567_vm15 = vcmp.eq.f32.partialorder %v13506_v62, %v11563_v14  ;;  %v5811_v52 = vsel %vm5745_vm5, %v12450_v45, 0.0 }
 0xab8   : > { %v5665_v60 = vadd.f32 %v5601_v13, %v5451_v24  ;;  %v5047_v11 = vadd.f32 %v4983_v47, %v4831_v51  ;;  %v4275_v23 = vsel %vm4209_vm1, %v11476_v22, 0.0  ;;  %v5209_v37 = vsel %vm5143_vm12, %v11573_v44, 0.0 }
 0xab9   : > { %v4503_v27 = vsel %vm4437_vm10, %v11498_v28, 0.0  ;;  %vm4667_vm4 = vcmp.eq.f32.partialorder %v12316_v50, %v11515_v61  ;;  %vm4883_vm6 = vcmp.eq.f32.partialorder %v12316_v50, %v11522_v9  ;;  %v5419_v2 = vsel %vm5353_vm3, %v11578_v15, 0.0 }
 0xaba   : > { %v5875_v4 = vadd.f32 %v5811_v52, %v5665_v60  ;;  %v5273_v53 = vadd.f32 %v5209_v37, %v5047_v11  ;;  %v4567_v49 = vadd.f32 %v4503_v27, %v4275_v23  ;;  %v5633_v31 = vsel %vm5567_vm15, %v11585_v35, 0.0 }
 0xabb   : > { %v4733_v55 = vsel %vm4667_vm4, %v11517_v43, 0.0  ;;  %vm5777_vm2 = vcmp.eq.f32.partialorder %v13506_v62, %v11575_v38  ;;  %vm5109_vm11 = vcmp.eq.f32.partialorder %v12316_v50, %v11529_v40  ;;  %v4949_v63 = vsel %vm4883_vm6, %v11560_v39, 0.0 }
 0xabc   : > { %5992 = vmatpush.msrb.mxu0 %v5875_v4  ;;  %v5483_v36 = vadd.f32 %v5419_v2, %v5273_v53  ;;  %v4797_v54 = vadd.f32 %v4733_v55, %v4567_v49  ;;  %vm5319_vm14 = vcmp.eq.f32.partialorder %v12316_v50, %v11533_v34  ;;  %vm4241_vm9 = vcmp.eq.f32.partialorder %v12426_v5, %v11504_v42 }
 0xabd   : > { %vm4469_vm13 = vcmp.eq.f32.partialorder %v12426_v5, %v11513_v29  ;;  %v4307_v19 = vsel %vm4241_vm9, %v11476_v22, 0.0  ;;  %vm4699_vm7 = vcmp.eq.f32.partialorder %v12426_v5, %v11515_v61  ;;  %v5843_v7 = vsel %vm5777_vm2, %v12450_v45, 0.0 }
 0xabe   : > { %v5697_v26 = vadd.f32 %v5633_v31, %v5483_v36  ;;  %v5013_v8 = vadd.f32 %v4949_v63, %v4797_v54  ;;  %v5175_v58 = vsel %vm5109_vm11, %v11573_v44, 0.0  ;;  %vm5533_vm8 = vcmp.eq.f32.partialorder %v12316_v50, %v11563_v14 }
 0xabf   : > { %v4535_v10 = vsel %vm4469_vm13, %v11498_v28, 0.0  ;;  %vm4915_vm0 = vcmp.eq.f32.partialorder %v12426_v5, %v11522_v9  ;;  %v5385_v22 = vsel %vm5319_vm14, %v11578_v15, 0.0  ;;  %v4765_v29 = vsel %vm4699_vm7, %v11517_v43, 0.0 }
 0xac0   : > { %v5907_v42 = vadd.f32 %v5843_v7, %v5697_v26  ;;  %v5239_v33 = vadd.f32 %v5175_v58, %v5013_v8  ;;  %v4599_v20 = vadd.f32 %v4535_v10, %v4307_v19  ;;  %vm5743_vm5 = vcmp.eq.f32.partialorder %v12316_v50, %v11575_v38 }
 0xac1   : > { %vm5141_vm12 = vcmp.eq.f32.partialorder %v12426_v5, %v11529_v40  ;;  %v5599_v28 = vsel %vm5533_vm8, %v11585_v35, 0.0  ;;  %v4981_v56 = vsel %vm4915_vm0, %v11560_v39, 0.0  ;;  %vm5351_vm3 = vcmp.eq.f32.partialorder %v12426_v5, %v11533_v34 }
 0xac2   : > { %6012 = vmatpush.msrb.mxu1 %v5907_v42  ;;  %v5449_v61 = vadd.f32 %v5385_v22, %v5239_v33  ;;  %v4829_v0 = vadd.f32 %v4765_v29, %v4599_v20  ;;  %v5809_v43 = vsel %vm5743_vm5, %v12450_v45, 0.0  ;;  %v5207_v9 = vsel %vm5141_vm12, %v11573_v44, 0.0 }
 0xac3   : > { %vm5565_vm1 = vcmp.eq.f32.partialorder %v12426_v5, %v11563_v14  ;;  %v5417_v40 = vsel %vm5351_vm3, %v11578_v15, 0.0  ;;  %vm5775_vm10 = vcmp.eq.f32.partialorder %v12426_v5, %v11575_v38 }
 0xac4   : > { %v5663_v1 = vadd.f32 %v5599_v28, %v5449_v61  ;;  %v5045_v12 = vadd.f32 %v4981_v56, %v4829_v0  ;;  %v5631_v34 = vsel %vm5565_vm1, %v11585_v35, 0.0  ;;  %v5841_v44 = vsel %vm5775_vm10, %v12450_v45, 0.0 }
 0xac6   : > { %v5873_v50 = vadd.f32 %v5809_v43, %v5663_v1  ;;  %v5271_v17 = vadd.f32 %v5207_v9, %v5045_v12 }
 0xac8   : > { %5993 = vmatpush.msrb.mxu0 %v5873_v50  ;;  %v5481_v39 = vadd.f32 %v5417_v40, %v5271_v17 }
 0xac9   : > { %5994 = vmatmul.f32.vlgmr.msrb.gmra.mxu0 %v13230_v16 }
 0xaca   : > { %v5695_v48 = vadd.f32 %v5631_v34, %v5481_v39 }
 0xacc   : > { %v5905_v41 = vadd.f32 %v5841_v44, %v5695_v48 }
 0xace   : > { %6013 = vmatpush.msrb.mxu1 %v5905_v41 }
 0xacf   : > { %6014 = vmatmul.f32.vlgmr.msrb.gmra.mxu1 %v13232_v6 }
 0xb24   : > { %v5955_v14 = vpop.f32.mrf.mxu2 }
 0xb25   : > { %v5975_v38 = vpop.f32.mrf.mxu3 }
 0xb26   : > { %v5976_v15 = vadd.f32 %v5975_v38, %v5955_v14 }
 0xb28   : > { %6018 = vst [vmem:[%s353_s30] sm:$0x3f] %v5976_v15 }
 0xb46   : > { %v5995_v35 = vpop.f32.mrf.mxu0 }
 0xb4c   : > { %v6015_v5 = vpop.f32.mrf.mxu1 }
 0xb4d   : > { %v6016_v16 = vadd.f32 %v6015_v5, %v5995_v35 }
 0xb4f   : > { %6019 = vst [vmem:[%s353_s30 + $0x8] sm:$0x3f] %v6016_v16 }
 0xb50 PF: > { %s16_s25 = sadd.s32 1, %s6405_s25   ;;  %s13507_s21 = smov %s6397_s23 }
 0xb51   : > { %p13_p7 = scmp.ge.s32.totalorder %s16_s25, 18   ;;  %s13508_s22 = smov %s6401_s24 }
 0xb52   : > { %s13509_s23 = smov %s13512_s26  ;;  %s13510_s24 = smov %s13516_s27 }
 0xb53   :  { %15 = sbr.rel (!%p13_p7) target bundleno = 3 (0x3), region = 102 }

</bundles_post_ra>
